<compile_context>
chip_gen: v5e
topology: v5e:2x2
jax: 0.10.0
libtpu: 0.0.40
codegen_flags: <defaults>
</compile_context>

<pallas_src>
import functools

import numpy as np
import jax
import jax.numpy as jnp
from jax.experimental import pallas as pl
from jax.experimental.pallas import tpu as pltpu

LANE = 128


def _round_up(x, m):
    return (x + m - 1) // m * m


def _vmem_capacity_bytes():
    try:
        return int(pltpu.get_tpu_info().vmem_capacity_bytes)
    except Exception:
        return 64 * 1024 * 1024          # conservative fallback (v7x per-core)


def _tile_vmem_bytes(th, W, Wp, Cp, cdt_bytes=2):
    """Rough per-grid-step VMEM footprint for a tile of `th` output rows."""
    win = (th + 4) * Wp * Cp * cdt_bytes             # manual-DMA input window
    mid = (th + 2) * Wp * Cp * cdt_bytes             # W-padded intermediate
    out = 2 * th * W * Cp * cdt_bytes                # double-buffered bf16 out
    wts = 2 * 2 * 9 * Cp * Cp * cdt_bytes + 2 * 4 * Cp * 4
    live = ((th + 2) * W * Cp * 4                    # conv1 value accumulator
            + th * W * Cp * 4                        # conv2 value accumulator
            + (th + 2) * W * 3 * Cp * cdt_bytes)     # K-packed LHS
    return win + mid + out + wts + live


def _choose_tile_rows(H, W, Wp, Cp, budget):
    best = 1
    for th in range(1, H + 1):
        if _tile_vmem_bytes(th, W, Wp, Cp) <= budget:
            best = th
    return best


def _residual_block_kernel(x_hbm, w1_ref, w2_ref, s1_ref, b1_ref, s2_ref,
                           b2_ref, out_ref, win_ref, mid_ref, sem,
                           *, H, W, Wp, TH):
    """One (batch, row-tile) grid step.

    x_hbm  : (N, Hp+4, Wp, Cp) bf16 HBM ref (2-row H halo, W pre-padded)
    w*_ref : (3, 3*Cp, Cp)     bf16 K-packed conv weights (dy, dx*Cp+cin, cout)
    s*/b*  : (1, Cp)           f32  folded BatchNorm scale / bias
    out_ref: (TH, W, Cp)       bf16
    win_ref: (TH+4, Wp, Cp)    bf16 VMEM window scratch (manual DMA target)
    mid_ref: (TH+2, Wp, Cp)    bf16 W-padded intermediate activation
    """
    Cp = out_ref.shape[-1]
    n = pl.program_id(0)
    t = pl.program_id(1)

    # ---- DMA the (TH+4)-row halo window for this (batch, row-tile) step ----
    row0 = t * TH
    if TH % 8 == 0:
        row0 = pl.multiple_of(row0, 8)
    cp = pltpu.make_async_copy(x_hbm.at[n, pl.ds(row0, TH + 4)], win_ref, sem)
    cp.start()
    cp.wait()

    def conv3x3(src_ref, wcat_ref, rows_out):
        # K-packed: concat 3 dx-shifted views along channels -> K = 3*Cp.
        acc = None
        for dy in range(3):
            lhs = jnp.concatenate(
                [src_ref[dy:dy + rows_out, dx:dx + W, :] for dx in range(3)],
                axis=-1).reshape(rows_out * W, 3 * Cp)
            p = jnp.dot(lhs, wcat_ref[dy], preferred_element_type=jnp.float32)
            acc = p if acc is None else acc + p
        return acc

    # ---- conv1 over TH+2 rows (1-row halo each side for conv2) + BN1 + ReLU -
    a1 = conv3x3(win_ref, w1_ref, TH + 2)
    y1 = jnp.maximum(a1 * s1_ref[...] + b1_ref[...], 0.0)
    y1 = y1.reshape(TH + 2, W, Cp)

    # conv2 "same" zero-padding in H: zero any y1 row outside global [0, H).
    r = jax.lax.broadcasted_iota(jnp.int32, (TH + 2, 1, 1), 0)
    g = t * TH - 1 + r
    y1 = jnp.where((g >= 0) & (g < H), y1, 0.0)

    # Build the W-padded intermediate and store it in one full unmasked store.
    zl = jnp.zeros((TH + 2, 1, Cp), jnp.float32)
    zr = jnp.zeros((TH + 2, Wp - W - 1, Cp), jnp.float32)
    mid_ref[...] = jnp.concatenate([zl, y1, zr], axis=1).astype(mid_ref.dtype)

    # ---- conv2 + BN2 + residual add + ReLU ----------------------------------
    a2 = conv3x3(mid_ref, w2_ref, TH)
    y2 = a2 * s2_ref[...] + b2_ref[...]
    res = win_ref[2:2 + TH, 1:1 + W, :].astype(jnp.float32).reshape(TH * W, Cp)
    out_ref[...] = jnp.maximum(res + y2, 0.0).reshape(TH, W, Cp).astype(out_ref.dtype)


def residual_block_nhwc(x, w1_hwio, w2_hwio, s1, b1, s2, b2, *,
                        tile_rows=None, compute_dtype=jnp.bfloat16):
    N, H, W, C = x.shape
    Cp = _round_up(C, LANE)                 # lane-dense channel dim
    Wp = _round_up(W + 2, 8)                # 8-sublane-aligned stored width

    cap = _vmem_capacity_bytes()
    budget = max(8 << 20, min(int(cap * 0.45), cap - (20 << 20)))

    if tile_rows is None:
        TH = _choose_tile_rows(H, W, Wp, Cp, budget)
        nT = pl.cdiv(H, TH)
        TH = pl.cdiv(H, nT)                 # rebalance ragged tail
    else:
        TH = int(tile_rows)
        nT = pl.cdiv(H, TH)
    Hp = nT * TH

    # Single host-side pad: 2-row H halo (+ tail pad to Hp), 1-col left W pad
    # plus alignment pad on the right, channel pad to Cp, cast to bf16.
    xc = jnp.pad(x, ((0, 0), (2, 2 + Hp - H), (1, Wp - W - 1),
                     (0, Cp - C))).astype(compute_dtype)

    def pad_w(w):  # (3,3,C,C) HWIO -> K-packed (3, 3*Cp, Cp)
        wp = jnp.pad(w, ((0, 0), (0, 0), (0, Cp - C), (0, Cp - C)))
        return wp.reshape(3, 3 * Cp, Cp).astype(compute_dtype)

    def pad_v(v):
        return jnp.pad(v, (0, Cp - C)).reshape(1, Cp).astype(jnp.float32)

    w1p, w2p = pad_w(w1_hwio), pad_w(w2_hwio)
    s1p, b1p, s2p, b2p = pad_v(s1), pad_v(b1), pad_v(s2), pad_v(b2)

    kernel = functools.partial(_residual_block_kernel, H=H, W=W, Wp=Wp, TH=TH)

    grid_spec = pltpu.PrefetchScalarGridSpec(
        num_scalar_prefetch=0,
        grid=(N, nT),
        in_specs=[
            pl.BlockSpec(memory_space=pl.ANY),                      # padded x (HBM)
            pl.BlockSpec((3, 3 * Cp, Cp), lambda n, t: (0, 0, 0)),  # conv1 w
            pl.BlockSpec((3, 3 * Cp, Cp), lambda n, t: (0, 0, 0)),  # conv2 w
            pl.BlockSpec((1, Cp), lambda n, t: (0, 0)),             # BN1 scale
            pl.BlockSpec((1, Cp), lambda n, t: (0, 0)),             # BN1 bias
            pl.BlockSpec((1, Cp), lambda n, t: (0, 0)),             # BN2 scale
            pl.BlockSpec((1, Cp), lambda n, t: (0, 0)),             # BN2 bias
        ],
        out_specs=pl.BlockSpec((None, TH, W, Cp), lambda n, t: (n, t, 0, 0)),
        scratch_shapes=[
            pltpu.VMEM((TH + 4, Wp, Cp), compute_dtype),   # input window
            pltpu.VMEM((TH + 2, Wp, Cp), compute_dtype),   # intermediate
            pltpu.SemaphoreType.DMA,
        ],
    )

    est = _tile_vmem_bytes(TH, W, Wp, Cp)
    vmem_limit = int(max(16 << 20, min(cap - (8 << 20), max(32 << 20, 2 * est))))

    out_padded = pl.pallas_call(
        kernel,
        out_shape=jax.ShapeDtypeStruct((N, Hp, W, Cp), compute_dtype),
        grid_spec=grid_spec,
        compiler_params=pltpu.CompilerParams(
            dimension_semantics=("parallel", "parallel"),
            vmem_limit_bytes=vmem_limit),
    )(xc, w1p, w2p, s1p, b1p, s2p, b2p)

    return out_padded[:, :H, :, :C]


def residual_block_nchw(x_nchw, params, *, tile_rows=None):
    """Wrapper matching the PyTorch module's NCHW f32 interface."""
    x_nhwc = jnp.transpose(x_nchw, (0, 2, 3, 1))
    y_nhwc = residual_block_nhwc(x_nhwc, *params, tile_rows=tile_rows)
    return jnp.transpose(y_nhwc, (0, 3, 1, 2)).astype(jnp.float32)


def fold_bn(gamma, beta, mean, var, eps=1e-5):
    scale = gamma / jnp.sqrt(var + eps)
    bias = beta - mean * scale
    return scale, bias


def reference_nhwc(x, w1, w2, s1, b1, s2, b2, compute_dtype=jnp.bfloat16):
    """Pure-JAX reference with the same bf16 quantization points as the kernel."""
    q = lambda a: a.astype(compute_dtype).astype(jnp.float32)
    dn = ('NHWC', 'HWIO', 'NHWC')
    pad = ((1, 1), (1, 1))
    xq, w1q, w2q = q(x), q(w1), q(w2)
    y = jax.lax.conv_general_dilated(xq, w1q, (1, 1), pad, dimension_numbers=dn)
    y = jnp.maximum(y * s1 + b1, 0.0)
    y = q(y)
    y = jax.lax.conv_general_dilated(y, w2q, (1, 1), pad, dimension_numbers=dn)
    y = y * s2 + b2
    out = jnp.maximum(xq + y, 0.0)
    return q(out)


if __name__ == "__main__":
    key = jax.random.PRNGKey(0)
    ks = jax.random.split(key, 12)

    N, C, H, W = 2, 8, 16, 16  # NCHW at the module boundary

    x_nchw = jax.random.normal(ks[0], (N, C, H, W), jnp.float32)

    # conv weights, PyTorch layout (Cout, Cin, kh, kw), bias=False
    w1_oihw = 0.1 * jax.random.normal(ks[1], (C, C, 3, 3), jnp.float32)
    w2_oihw = 0.1 * jax.random.normal(ks[2], (C, C, 3, 3), jnp.float32)
    w1_hwio = jnp.transpose(w1_oihw, (2, 3, 1, 0))
    w2_hwio = jnp.transpose(w2_oihw, (2, 3, 1, 0))

    # BatchNorm2d parameters / running stats (eval mode)
    g1 = 1.0 + 0.1 * jax.random.normal(ks[3], (C,), jnp.float32)
    be1 = 0.05 * jax.random.normal(ks[4], (C,), jnp.float32)
    m1 = 0.1 * jax.random.normal(ks[5], (C,), jnp.float32)
    v1 = 0.5 + 0.5 * jnp.abs(jax.random.normal(ks[6], (C,), jnp.float32))

    g2 = 1.0 + 0.1 * jax.random.normal(ks[7], (C,), jnp.float32)
    be2 = 0.05 * jax.random.normal(ks[8], (C,), jnp.float32)
    m2 = 0.1 * jax.random.normal(ks[9], (C,), jnp.float32)
    v2 = 0.5 + 0.5 * jnp.abs(jax.random.normal(ks[10], (C,), jnp.float32))

    s1, b1 = fold_bn(g1, be1, m1, v1)
    s2, b2 = fold_bn(g2, be2, m2, v2)

    params = (w1_hwio, w2_hwio, s1, b1, s2, b2)

    fn = jax.jit(lambda xx: residual_block_nchw(xx, params))
    out = jax.block_until_ready(fn(x_nchw))

    # correctness check against a pure-JAX reference (matched bf16 rounding)
    x_nhwc = jnp.transpose(x_nchw, (0, 2, 3, 1))
    ref = reference_nhwc(x_nhwc, w1_hwio, w2_hwio, s1, b1, s2, b2)
    ref_nchw = jnp.transpose(ref, (0, 3, 1, 2))
    np.testing.assert_allclose(np.asarray(out, dtype=np.float32),
                               np.asarray(ref_nchw, dtype=np.float32),
                               rtol=2e-2, atol=2e-2)

    print("KERNEL_OK")
</pallas_src>

<mosaic_0001>
module attributes {stable_mosaic.version = 11 : i64} {
  func.func @_residual_block_kernel(%arg0: i32, %arg1: i32, %arg2: memref<2x20x24x128xbf16, #tpu.memory_space<any>>, %arg3: memref<3x384x128xbf16, #tpu.memory_space<vmem>>, %arg4: memref<3x384x128xbf16, #tpu.memory_space<vmem>>, %arg5: memref<1x128xf32, #tpu.memory_space<vmem>>, %arg6: memref<1x128xf32, #tpu.memory_space<vmem>>, %arg7: memref<1x128xf32, #tpu.memory_space<vmem>>, %arg8: memref<1x128xf32, #tpu.memory_space<vmem>>, %arg9: memref<1x16x16x128xbf16, #tpu.memory_space<vmem>>, %arg10: memref<20x24x128xbf16, #tpu.memory_space<vmem>>, %arg11: memref<18x24x128xbf16, #tpu.memory_space<vmem>>, %arg12: memref<!tpu.dma_semaphore, #tpu.memory_space<semaphore_mem>>) attributes {dimension_semantics = [#tpu.dimension_semantics<parallel>, #tpu.dimension_semantics<parallel>], iteration_bounds = array<i64: 2, 1>, scalar_prefetch = 0 : i64, scratch_operands = 3 : i64, tpu.core_type = #tpu.core_type<tc>, window_params = [{}, {pipeline_mode = #tpu.pipeline_mode<synchronous>, transform_indices = @transform_1, window_bounds = array<i64: 3, 384, 128>}, {pipeline_mode = #tpu.pipeline_mode<synchronous>, transform_indices = @transform_2, window_bounds = array<i64: 3, 384, 128>}, {pipeline_mode = #tpu.pipeline_mode<synchronous>, transform_indices = @transform_3, window_bounds = array<i64: 1, 128>}, {pipeline_mode = #tpu.pipeline_mode<synchronous>, transform_indices = @transform_4, window_bounds = array<i64: 1, 128>}, {pipeline_mode = #tpu.pipeline_mode<synchronous>, transform_indices = @transform_5, window_bounds = array<i64: 1, 128>}, {pipeline_mode = #tpu.pipeline_mode<synchronous>, transform_indices = @transform_6, window_bounds = array<i64: 1, 128>}, {transform_indices = @transform_7, window_bounds = array<i64: 1, 16, 16, 128>}]} {
    %c16_i32 = arith.constant 16 : i32
    %0 = arith.muli %arg1, %c16_i32 : i32
    %1 = tpu.assume_multiple %0, 8 : i32
    %c0_i32 = arith.constant 0 : i32
    %c0_i32_0 = arith.constant 0 : i32
    %2 = tpu.memref_slice %arg2[%arg0, %1, %c0_i32, %c0_i32_0] : memref<2x20x24x128xbf16, #tpu.memory_space<any>> -> memref<1x20x24x128xbf16, #tpu.memory_space<any>>
    %3 = tpu.memref_squeeze %2 : memref<1x20x24x128xbf16, #tpu.memory_space<any>> -> memref<20x24x128xbf16, #tpu.memory_space<any>>
    tpu.enqueue_dma source(%3 : memref<20x24x128xbf16, #tpu.memory_space<any>>) target(%arg10 : memref<20x24x128xbf16, #tpu.memory_space<vmem>>) target_semaphore(%arg12 : memref<!tpu.dma_semaphore, #tpu.memory_space<semaphore_mem>>)
    %c0_i32_1 = arith.constant 0 : i32
    %c0_i32_2 = arith.constant 0 : i32
    %4 = tpu.memref_slice %arg2[%arg0, %1, %c0_i32_1, %c0_i32_2] : memref<2x20x24x128xbf16, #tpu.memory_space<any>> -> memref<1x20x24x128xbf16, #tpu.memory_space<any>>
    %5 = tpu.memref_squeeze %4 : memref<1x20x24x128xbf16, #tpu.memory_space<any>> -> memref<20x24x128xbf16, #tpu.memory_space<any>>
    tpu.wait_dma2 semaphore(%arg12 : memref<!tpu.dma_semaphore, #tpu.memory_space<semaphore_mem>>) src(%5 : memref<20x24x128xbf16, #tpu.memory_space<any>>) dst(%arg10 : memref<20x24x128xbf16, #tpu.memory_space<vmem>>)
    %c0 = arith.constant 0 : index
    %c0_3 = arith.constant 0 : index
    %c0_4 = arith.constant 0 : index
    %6 = vector.load %arg10[%c0, %c0_3, %c0_4] : memref<20x24x128xbf16, #tpu.memory_space<vmem>>, vector<18x16x128xbf16>
    %c0_5 = arith.constant 0 : index
    %c1 = arith.constant 1 : index
    %c0_6 = arith.constant 0 : index
    %7 = vector.load %arg10[%c0_5, %c1, %c0_6] : memref<20x24x128xbf16, #tpu.memory_space<vmem>>, vector<18x16x128xbf16>
    %c0_7 = arith.constant 0 : index
    %c2 = arith.constant 2 : index
    %c0_8 = arith.constant 0 : index
    %8 = vector.load %arg10[%c0_7, %c2, %c0_8] : memref<20x24x128xbf16, #tpu.memory_space<vmem>>, vector<18x16x128xbf16>
    %9 = tpu.concatenate %6, %7, %8 in 2 : vector<18x16x128xbf16>, vector<18x16x128xbf16>, vector<18x16x128xbf16> -> vector<18x16x384xbf16>
    %10 = vector.shape_cast %9 : vector<18x16x384xbf16> to vector<288x384xbf16>
    %c0_9 = arith.constant 0 : index
    %c0_10 = arith.constant 0 : index
    %c0_11 = arith.constant 0 : index
    %11 = vector.load %arg3[%c0_9, %c0_10, %c0_11] : memref<3x384x128xbf16, #tpu.memory_space<vmem>>, vector<1x384x128xbf16>
    %12 = vector.shape_cast %11 : vector<1x384x128xbf16> to vector<384x128xbf16>
    %cst = arith.constant dense<0.000000e+00> : vector<288x128xf32>
    %13 = tpu.matmul %10, %12, %cst {dimension_numbers = #tpu.dot_dimension_numbers<[1], [0], [0], [1], [0, 0, 1, 1], [], []>} : vector<288x384xbf16>, vector<384x128xbf16>, vector<288x128xf32> -> vector<288x128xf32>
    %c1_12 = arith.constant 1 : index
    %c0_13 = arith.constant 0 : index
    %c0_14 = arith.constant 0 : index
    %14 = vector.load %arg10[%c1_12, %c0_13, %c0_14] : memref<20x24x128xbf16, #tpu.memory_space<vmem>>, vector<18x16x128xbf16>
    %c1_15 = arith.constant 1 : index
    %c1_16 = arith.constant 1 : index
    %c0_17 = arith.constant 0 : index
    %15 = vector.load %arg10[%c1_15, %c1_16, %c0_17] : memref<20x24x128xbf16, #tpu.memory_space<vmem>>, vector<18x16x128xbf16>
    %c1_18 = arith.constant 1 : index
    %c2_19 = arith.constant 2 : index
    %c0_20 = arith.constant 0 : index
    %16 = vector.load %arg10[%c1_18, %c2_19, %c0_20] : memref<20x24x128xbf16, #tpu.memory_space<vmem>>, vector<18x16x128xbf16>
    %17 = tpu.concatenate %14, %15, %16 in 2 : vector<18x16x128xbf16>, vector<18x16x128xbf16>, vector<18x16x128xbf16> -> vector<18x16x384xbf16>
    %18 = vector.shape_cast %17 : vector<18x16x384xbf16> to vector<288x384xbf16>
    %c1_21 = arith.constant 1 : index
    %c0_22 = arith.constant 0 : index
    %c0_23 = arith.constant 0 : index
    %19 = vector.load %arg3[%c1_21, %c0_22, %c0_23] : memref<3x384x128xbf16, #tpu.memory_space<vmem>>, vector<1x384x128xbf16>
    %20 = vector.shape_cast %19 : vector<1x384x128xbf16> to vector<384x128xbf16>
    %cst_24 = arith.constant dense<0.000000e+00> : vector<288x128xf32>
    %21 = tpu.matmul %18, %20, %cst_24 {dimension_numbers = #tpu.dot_dimension_numbers<[1], [0], [0], [1], [0, 0, 1, 1], [], []>} : vector<288x384xbf16>, vector<384x128xbf16>, vector<288x128xf32> -> vector<288x128xf32>
    %22 = arith.addf %13, %21 : vector<288x128xf32>
    %c2_25 = arith.constant 2 : index
    %c0_26 = arith.constant 0 : index
    %c0_27 = arith.constant 0 : index
    %23 = vector.load %arg10[%c2_25, %c0_26, %c0_27] : memref<20x24x128xbf16, #tpu.memory_space<vmem>>, vector<18x16x128xbf16>
    %c2_28 = arith.constant 2 : index
    %c1_29 = arith.constant 1 : index
    %c0_30 = arith.constant 0 : index
    %24 = vector.load %arg10[%c2_28, %c1_29, %c0_30] : memref<20x24x128xbf16, #tpu.memory_space<vmem>>, vector<18x16x128xbf16>
    %c2_31 = arith.constant 2 : index
    %c2_32 = arith.constant 2 : index
    %c0_33 = arith.constant 0 : index
    %25 = vector.load %arg10[%c2_31, %c2_32, %c0_33] : memref<20x24x128xbf16, #tpu.memory_space<vmem>>, vector<18x16x128xbf16>
    %26 = tpu.concatenate %23, %24, %25 in 2 : vector<18x16x128xbf16>, vector<18x16x128xbf16>, vector<18x16x128xbf16> -> vector<18x16x384xbf16>
    %27 = vector.shape_cast %26 : vector<18x16x384xbf16> to vector<288x384xbf16>
    %c2_34 = arith.constant 2 : index
    %c0_35 = arith.constant 0 : index
    %c0_36 = arith.constant 0 : index
    %28 = vector.load %arg3[%c2_34, %c0_35, %c0_36] : memref<3x384x128xbf16, #tpu.memory_space<vmem>>, vector<1x384x128xbf16>
    %29 = vector.shape_cast %28 : vector<1x384x128xbf16> to vector<384x128xbf16>
    %cst_37 = arith.constant dense<0.000000e+00> : vector<288x128xf32>
    %30 = tpu.matmul %27, %29, %cst_37 {dimension_numbers = #tpu.dot_dimension_numbers<[1], [0], [0], [1], [0, 0, 1, 1], [], []>} : vector<288x384xbf16>, vector<384x128xbf16>, vector<288x128xf32> -> vector<288x128xf32>
    %31 = arith.addf %22, %30 : vector<288x128xf32>
    %c0_38 = arith.constant 0 : index
    %c0_39 = arith.constant 0 : index
    %32 = vector.load %arg5[%c0_38, %c0_39] : memref<1x128xf32, #tpu.memory_space<vmem>>, vector<1x128xf32>
    %33 = vector.broadcast %32 : vector<1x128xf32> to vector<288x128xf32>
    %34 = arith.mulf %31, %33 : vector<288x128xf32>
    %c0_40 = arith.constant 0 : index
    %c0_41 = arith.constant 0 : index
    %35 = vector.load %arg6[%c0_40, %c0_41] : memref<1x128xf32, #tpu.memory_space<vmem>>, vector<1x128xf32>
    %36 = vector.broadcast %35 : vector<1x128xf32> to vector<288x128xf32>
    %37 = arith.addf %34, %36 : vector<288x128xf32>
    %cst_42 = arith.constant 0.000000e+00 : f32
    %38 = vector.broadcast %cst_42 : f32 to vector<288x128xf32>
    %39 = arith.maximumf %37, %38 : vector<288x128xf32>
    %40 = vector.shape_cast %39 : vector<288x128xf32> to vector<18x16x128xf32>
    %41 = tpu.iota {dimensions = array<i32: 0>} : vector<18x1x1xi32>
    %c16_i32_43 = arith.constant 16 : i32
    %42 = arith.muli %arg1, %c16_i32_43 : i32
    %c1_i32 = arith.constant 1 : i32
    %43 = arith.subi %42, %c1_i32 : i32
    %44 = vector.broadcast %43 : i32 to vector<18x1x1xi32>
    %45 = arith.addi %44, %41 : vector<18x1x1xi32>
    %c0_i32_44 = arith.constant 0 : i32
    %46 = vector.broadcast %c0_i32_44 : i32 to vector<18x1x1xi32>
    %47 = arith.cmpi sge, %45, %46 : vector<18x1x1xi32>
    %c16_i32_45 = arith.constant 16 : i32
    %48 = vector.broadcast %c16_i32_45 : i32 to vector<18x1x1xi32>
    %49 = arith.cmpi slt, %45, %48 : vector<18x1x1xi32>
    %50 = arith.andi %47, %49 : vector<18x1x1xi1>
    %cst_46 = arith.constant 0.000000e+00 : f32
    %51 = vector.shape_cast %50 : vector<18x1x1xi1> to vector<18x1x1xi1>
    %52 = vector.broadcast %51 : vector<18x1x1xi1> to vector<18x16x128xi1>
    %53 = vector.broadcast %cst_46 : f32 to vector<18x16x128xf32>
    %54 = arith.select %52, %40, %53 : vector<18x16x128xi1>, vector<18x16x128xf32>
    %cst_47 = arith.constant 0.000000e+00 : f32
    %55 = vector.broadcast %cst_47 : f32 to vector<18x1x128xf32>
    %cst_48 = arith.constant 0.000000e+00 : f32
    %56 = vector.broadcast %cst_48 : f32 to vector<18x7x128xf32>
    %57 = tpu.concatenate %55, %54, %56 in 1 : vector<18x1x128xf32>, vector<18x16x128xf32>, vector<18x7x128xf32> -> vector<18x24x128xf32>
    %58 = arith.truncf %57 : vector<18x24x128xf32> to vector<18x24x128xbf16>
    %c0_49 = arith.constant 0 : index
    %c0_50 = arith.constant 0 : index
    %c0_51 = arith.constant 0 : index
    %59 = vector.load %arg11[%c0_49, %c0_50, %c0_51] : memref<18x24x128xbf16, #tpu.memory_space<vmem>>, vector<18x24x128xbf16>
    tpu.vector_store %arg11[%c0_49, %c0_50, %c0_51], %58 {strides = array<i32>} : memref<18x24x128xbf16, #tpu.memory_space<vmem>>, vector<18x24x128xbf16>,
    %c0_52 = arith.constant 0 : index
    %c0_53 = arith.constant 0 : index
    %c0_54 = arith.constant 0 : index
    %60 = vector.load %arg11[%c0_52, %c0_53, %c0_54] : memref<18x24x128xbf16, #tpu.memory_space<vmem>>, vector<16x16x128xbf16>
    %c0_55 = arith.constant 0 : index
    %c1_56 = arith.constant 1 : index
    %c0_57 = arith.constant 0 : index
    %61 = vector.load %arg11[%c0_55, %c1_56, %c0_57] : memref<18x24x128xbf16, #tpu.memory_space<vmem>>, vector<16x16x128xbf16>
    %c0_58 = arith.constant 0 : index
    %c2_59 = arith.constant 2 : index
    %c0_60 = arith.constant 0 : index
    %62 = vector.load %arg11[%c0_58, %c2_59, %c0_60] : memref<18x24x128xbf16, #tpu.memory_space<vmem>>, vector<16x16x128xbf16>
    %63 = tpu.concatenate %60, %61, %62 in 2 : vector<16x16x128xbf16>, vector<16x16x128xbf16>, vector<16x16x128xbf16> -> vector<16x16x384xbf16>
    %64 = vector.shape_cast %63 : vector<16x16x384xbf16> to vector<256x384xbf16>
    %c0_61 = arith.constant 0 : index
    %c0_62 = arith.constant 0 : index
    %c0_63 = arith.constant 0 : index
    %65 = vector.load %arg4[%c0_61, %c0_62, %c0_63] : memref<3x384x128xbf16, #tpu.memory_space<vmem>>, vector<1x384x128xbf16>
    %66 = vector.shape_cast %65 : vector<1x384x128xbf16> to vector<384x128xbf16>
    %cst_64 = arith.constant dense<0.000000e+00> : vector<256x128xf32>
    %67 = tpu.matmul %64, %66, %cst_64 {dimension_numbers = #tpu.dot_dimension_numbers<[1], [0], [0], [1], [0, 0, 1, 1], [], []>} : vector<256x384xbf16>, vector<384x128xbf16>, vector<256x128xf32> -> vector<256x128xf32>
    %c1_65 = arith.constant 1 : index
    %c0_66 = arith.constant 0 : index
    %c0_67 = arith.constant 0 : index
    %68 = vector.load %arg11[%c1_65, %c0_66, %c0_67] : memref<18x24x128xbf16, #tpu.memory_space<vmem>>, vector<16x16x128xbf16>
    %c1_68 = arith.constant 1 : index
    %c1_69 = arith.constant 1 : index
    %c0_70 = arith.constant 0 : index
    %69 = vector.load %arg11[%c1_68, %c1_69, %c0_70] : memref<18x24x128xbf16, #tpu.memory_space<vmem>>, vector<16x16x128xbf16>
    %c1_71 = arith.constant 1 : index
    %c2_72 = arith.constant 2 : index
    %c0_73 = arith.constant 0 : index
    %70 = vector.load %arg11[%c1_71, %c2_72, %c0_73] : memref<18x24x128xbf16, #tpu.memory_space<vmem>>, vector<16x16x128xbf16>
    %71 = tpu.concatenate %68, %69, %70 in 2 : vector<16x16x128xbf16>, vector<16x16x128xbf16>, vector<16x16x128xbf16> -> vector<16x16x384xbf16>
    %72 = vector.shape_cast %71 : vector<16x16x384xbf16> to vector<256x384xbf16>
    %c1_74 = arith.constant 1 : index
    %c0_75 = arith.constant 0 : index
    %c0_76 = arith.constant 0 : index
    %73 = vector.load %arg4[%c1_74, %c0_75, %c0_76] : memref<3x384x128xbf16, #tpu.memory_space<vmem>>, vector<1x384x128xbf16>
    %74 = vector.shape_cast %73 : vector<1x384x128xbf16> to vector<384x128xbf16>
    %cst_77 = arith.constant dense<0.000000e+00> : vector<256x128xf32>
    %75 = tpu.matmul %72, %74, %cst_77 {dimension_numbers = #tpu.dot_dimension_numbers<[1], [0], [0], [1], [0, 0, 1, 1], [], []>} : vector<256x384xbf16>, vector<384x128xbf16>, vector<256x128xf32> -> vector<256x128xf32>
    %76 = arith.addf %67, %75 : vector<256x128xf32>
    %c2_78 = arith.constant 2 : index
    %c0_79 = arith.constant 0 : index
    %c0_80 = arith.constant 0 : index
    %77 = vector.load %arg11[%c2_78, %c0_79, %c0_80] : memref<18x24x128xbf16, #tpu.memory_space<vmem>>, vector<16x16x128xbf16>
    %c2_81 = arith.constant 2 : index
    %c1_82 = arith.constant 1 : index
    %c0_83 = arith.constant 0 : index
    %78 = vector.load %arg11[%c2_81, %c1_82, %c0_83] : memref<18x24x128xbf16, #tpu.memory_space<vmem>>, vector<16x16x128xbf16>
    %c2_84 = arith.constant 2 : index
    %c2_85 = arith.constant 2 : index
    %c0_86 = arith.constant 0 : index
    %79 = vector.load %arg11[%c2_84, %c2_85, %c0_86] : memref<18x24x128xbf16, #tpu.memory_space<vmem>>, vector<16x16x128xbf16>
    %80 = tpu.concatenate %77, %78, %79 in 2 : vector<16x16x128xbf16>, vector<16x16x128xbf16>, vector<16x16x128xbf16> -> vector<16x16x384xbf16>
    %81 = vector.shape_cast %80 : vector<16x16x384xbf16> to vector<256x384xbf16>
    %c2_87 = arith.constant 2 : index
    %c0_88 = arith.constant 0 : index
    %c0_89 = arith.constant 0 : index
    %82 = vector.load %arg4[%c2_87, %c0_88, %c0_89] : memref<3x384x128xbf16, #tpu.memory_space<vmem>>, vector<1x384x128xbf16>
    %83 = vector.shape_cast %82 : vector<1x384x128xbf16> to vector<384x128xbf16>
    %cst_90 = arith.constant dense<0.000000e+00> : vector<256x128xf32>
    %84 = tpu.matmul %81, %83, %cst_90 {dimension_numbers = #tpu.dot_dimension_numbers<[1], [0], [0], [1], [0, 0, 1, 1], [], []>} : vector<256x384xbf16>, vector<384x128xbf16>, vector<256x128xf32> -> vector<256x128xf32>
    %85 = arith.addf %76, %84 : vector<256x128xf32>
    %c0_91 = arith.constant 0 : index
    %c0_92 = arith.constant 0 : index
    %86 = vector.load %arg7[%c0_91, %c0_92] : memref<1x128xf32, #tpu.memory_space<vmem>>, vector<1x128xf32>
    %87 = vector.broadcast %86 : vector<1x128xf32> to vector<256x128xf32>
    %88 = arith.mulf %85, %87 : vector<256x128xf32>
    %c0_93 = arith.constant 0 : index
    %c0_94 = arith.constant 0 : index
    %89 = vector.load %arg8[%c0_93, %c0_94] : memref<1x128xf32, #tpu.memory_space<vmem>>, vector<1x128xf32>
    %90 = vector.broadcast %89 : vector<1x128xf32> to vector<256x128xf32>
    %91 = arith.addf %88, %90 : vector<256x128xf32>
    %c2_95 = arith.constant 2 : index
    %c1_96 = arith.constant 1 : index
    %c0_97 = arith.constant 0 : index
    %92 = vector.load %arg10[%c2_95, %c1_96, %c0_97] : memref<20x24x128xbf16, #tpu.memory_space<vmem>>, vector<16x16x128xbf16>
    %93 = arith.extf %92 : vector<16x16x128xbf16> to vector<16x16x128xf32>
    %94 = vector.shape_cast %93 : vector<16x16x128xf32> to vector<256x128xf32>
    %95 = arith.addf %94, %91 : vector<256x128xf32>
    %cst_98 = arith.constant 0.000000e+00 : f32
    %96 = vector.broadcast %cst_98 : f32 to vector<256x128xf32>
    %97 = arith.maximumf %95, %96 : vector<256x128xf32>
    %98 = vector.shape_cast %97 : vector<256x128xf32> to vector<16x16x128xf32>
    %99 = arith.truncf %98 : vector<16x16x128xf32> to vector<16x16x128xbf16>
    %c0_99 = arith.constant 0 : index
    %c0_100 = arith.constant 0 : index
    %c0_101 = arith.constant 0 : index
    %c0_102 = arith.constant 0 : index
    %100 = vector.load %arg9[%c0_99, %c0_100, %c0_101, %c0_102] : memref<1x16x16x128xbf16, #tpu.memory_space<vmem>>, vector<1x16x16x128xbf16>
    %101 = vector.shape_cast %100 : vector<1x16x16x128xbf16> to vector<16x16x128xbf16>
    %102 = vector.shape_cast %99 : vector<16x16x128xbf16> to vector<1x16x16x128xbf16>
    tpu.vector_store %arg9[%c0_99, %c0_100, %c0_101, %c0_102], %102 {strides = array<i32>} : memref<1x16x16x128xbf16, #tpu.memory_space<vmem>>, vector<1x16x16x128xbf16>,
    return
  }
  func.func @transform_1(%arg0: i32, %arg1: i32) -> (i32, i32, i32) {
    %c0_i32 = arith.constant 0 : i32
    %c0_i32_0 = arith.constant 0 : i32
    %c0_i32_1 = arith.constant 0 : i32
    %c0_i32_2 = arith.constant 0 : i32
    return %c0_i32, %c0_i32_0, %c0_i32_1 : i32, i32, i32
  }
  func.func @transform_2(%arg0: i32, %arg1: i32) -> (i32, i32, i32) {
    %c0_i32 = arith.constant 0 : i32
    %c0_i32_0 = arith.constant 0 : i32
    %c0_i32_1 = arith.constant 0 : i32
    %c0_i32_2 = arith.constant 0 : i32
    return %c0_i32, %c0_i32_0, %c0_i32_1 : i32, i32, i32
  }
  func.func @transform_3(%arg0: i32, %arg1: i32) -> (i32, i32) {
    %c0_i32 = arith.constant 0 : i32
    %c0_i32_0 = arith.constant 0 : i32
    %c0_i32_1 = arith.constant 0 : i32
    return %c0_i32, %c0_i32_0 : i32, i32
  }
  func.func @transform_4(%arg0: i32, %arg1: i32) -> (i32, i32) {
    %c0_i32 = arith.constant 0 : i32
    %c0_i32_0 = arith.constant 0 : i32
    %c0_i32_1 = arith.constant 0 : i32
    return %c0_i32, %c0_i32_0 : i32, i32
  }
  func.func @transform_5(%arg0: i32, %arg1: i32) -> (i32, i32) {
    %c0_i32 = arith.constant 0 : i32
    %c0_i32_0 = arith.constant 0 : i32
    %c0_i32_1 = arith.constant 0 : i32
    return %c0_i32, %c0_i32_0 : i32, i32
  }
  func.func @transform_6(%arg0: i32, %arg1: i32) -> (i32, i32) {
    %c0_i32 = arith.constant 0 : i32
    %c0_i32_0 = arith.constant 0 : i32
    %c0_i32_1 = arith.constant 0 : i32
    return %c0_i32, %c0_i32_0 : i32, i32
  }
  func.func @transform_7(%arg0: i32, %arg1: i32) -> (i32, i32, i32, i32) {
    %c0_i32 = arith.constant 0 : i32
    %c0_i32_0 = arith.constant 0 : i32
    %c0_i32_1 = arith.constant 0 : i32
    return %arg0, %arg1, %c0_i32, %c0_i32_0 : i32, i32, i32, i32
  }
}

</mosaic_0001>

<bundles_post_ra>
// kernel: _lambda_.1
= control target key start
LH: loop header
LB: loop body
LE: loop exit
PB: predicated region body
PF: predicated region fallthrough
CT: control target
= control target key end

     0   :  { %s9691_s24 = smov 0   ;;  %s9693_s25 = smov 0   ;;  %s12216_s0 = inlined_call_operand.vmem [shape: bf16[2,20,24,128], index: 0, kind: input, shape index: {}]   ;;  %s12217_s1 = inlined_call_operand.vmem [shape: bf16[3,384,128], index: 1, kind: input, shape index: {}]   ;;  %s12218_s2 = inlined_call_operand.vmem [shape: bf16[3,384,128], index: 2, kind: input, shape index: {}]   ;;  %s12219_s3 = inlined_call_operand.vmem [shape: f32[1,128], index: 3, kind: input, shape index: {}]   ;;  %s12220_s4 = inlined_call_operand.vmem [shape: f32[1,128], index: 4, kind: input, shape index: {}]   ;;  %s12221_s5 = inlined_call_operand.vmem [shape: f32[1,128], index: 5, kind: input, shape index: {}]   ;;  %s12222_s6 = inlined_call_operand.vmem [shape: f32[1,128], index: 6, kind: input, shape index: {}]   ;;  %s12223_s7 = inlined_call_operand.vmem [shape: bf16[2,16,16,128], index: 7, kind: output, shape index: {}]  }
   0x1   :  { %s9695_s26 = smov 0  }
   0x2 LB: > { %s29_s27 = sadd.s32 1, %s9643_s25  ;;  %p7733_p0 = scmp.ge.s32.totalorder %s9647_s26, 1  ;;  %s9647_s26 = sphi %s9695_s26, %s17_s26   ;;  %s9643_s25 = sphi %s9693_s25, %s12465_s25   ;;  %s9639_s24 = sphi %s9691_s24, %s12464_s24  }
   0x3   : > { %p31_p1 = scmp.ge.s32.totalorder %s29_s27, 2  ;;  %p217_p2 = scmp.lt.s32.totalorder %s9647_s26, 3 }
   0x5   : > { %s12467_s27 = smov (%p31_p1, %s29_s27), 0  ;;  %p218_p3 = pnand %p7733_p0, %p217_p2 }
   0x7   : > { %221 = sbr.rel (%p218_p3) target bundleno = 1865 (0x749), region = 44 }
   0xc   : > { %p248_p4 = scmp.lt.s32.totalorder %s9639_s24, 1  ;;  %s8509_s28 = smul.u32 240, %s9639_s24 }
   0xe   : > { %s12469_s24 = smov (!%p248_p4, %s9639_s24), 1  ;;  %s9712_s8 = scalar_lea.vmem %s12216_s0, %s8509_s28 }
   0xf   : > { %s8508_s9 = sshll.u32 %s12469_s24, 7  ;;  %v274_v0 = vld [vmem:[%s9712_s8] sm:$0xff]  ;;  %v276_v1 = vld [vmem:[%s9712_s8 + $0x8] sm:$0xff]  ;;  %v278_v2 = vld [vmem:[%s9712_s8 + $0x10] sm:$0xff] }
  0x10   : > { %s9720_s12 = scalar_lea.vmem %s12223_s7, %s8508_s9  ;;  %275 = vst [vmem:[#allocation2] sm:$0xff] %v274_v0  ;;  %v280_v3 = vld [vmem:[%s9712_s8 + $0x18] sm:$0xff]  ;;  %v282_v4 = vld [vmem:[%s9712_s8 + $0x20] sm:$0xff]  ;;  %v284_v5 = vld [vmem:[%s9712_s8 + $0x28] sm:$0xff] }
  0x11   : > { %277 = vst [vmem:[#allocation2 + $0x8] sm:$0xff] %v276_v1  ;;  %v286_v6 = vld [vmem:[%s9712_s8 + $0x30] sm:$0xff]  ;;  %v288_v7 = vld [vmem:[%s9712_s8 + $0x38] sm:$0xff]  ;;  %v290_v8 = vld [vmem:[%s9712_s8 + $0x40] sm:$0xff] }
  0x12   : > { %279 = vst [vmem:[#allocation2 + $0x10] sm:$0xff] %v278_v2  ;;  %v292_v9 = vld [vmem:[%s9712_s8 + $0x48] sm:$0xff]  ;;  %v294_v10 = vld [vmem:[%s9712_s8 + $0x50] sm:$0xff]  ;;  %v296_v11 = vld [vmem:[%s9712_s8 + $0x58] sm:$0xff] }
  0x13   : > { %281 = vst [vmem:[#allocation2 + $0x18] sm:$0xff] %v280_v3  ;;  %v298_v12 = vld [vmem:[%s9712_s8 + $0x60] sm:$0xff]  ;;  %v300_v13 = vld [vmem:[%s9712_s8 + $0x68] sm:$0xff]  ;;  %v302_v14 = vld [vmem:[%s9712_s8 + $0x70] sm:$0xff] }
  0x14   : > { %283 = vst [vmem:[#allocation2 + $0x20] sm:$0xff] %v282_v4  ;;  %v304_v15 = vld [vmem:[%s9712_s8 + $0x78] sm:$0xff]  ;;  %v306_v16 = vld [vmem:[%s9712_s8 + $0x80] sm:$0xff]  ;;  %v308_v17 = vld [vmem:[%s9712_s8 + $0x88] sm:$0xff] }
  0x15   : > { %285 = vst [vmem:[#allocation2 + $0x28] sm:$0xff] %v284_v5  ;;  %v310_v18 = vld [vmem:[%s9712_s8 + $0x90] sm:$0xff]  ;;  %v312_v19 = vld [vmem:[%s9712_s8 + $0x98] sm:$0xff]  ;;  %v314_v20 = vld [vmem:[%s9712_s8 + $0xa0] sm:$0xff] }
  0x16   : > { %287 = vst [vmem:[#allocation2 + $0x30] sm:$0xff] %v286_v6  ;;  %v316_v21 = vld [vmem:[%s9712_s8 + $0xa8] sm:$0xff]  ;;  %v318_v22 = vld [vmem:[%s9712_s8 + $0xb0] sm:$0xff]  ;;  %v320_v23 = vld [vmem:[%s9712_s8 + $0xb8] sm:$0xff] }
  0x17   : > { %289 = vst [vmem:[#allocation2 + $0x38] sm:$0xff] %v288_v7  ;;  %v322_v24 = vld [vmem:[%s9712_s8 + $0xc0] sm:$0xff]  ;;  %v324_v25 = vld [vmem:[%s9712_s8 + $0xc8] sm:$0xff]  ;;  %v326_v26 = vld [vmem:[%s9712_s8 + $0xd0] sm:$0xff] }
  0x18   : > { %291 = vst [vmem:[#allocation2 + $0x40] sm:$0xff] %v290_v8  ;;  %v328_v27 = vld [vmem:[%s9712_s8 + $0xd8] sm:$0xff]  ;;  %v330_v28 = vld [vmem:[%s9712_s8 + $0xe0] sm:$0xff]  ;;  %v332_v29 = vld [vmem:[%s9712_s8 + $0xe8] sm:$0xff] }
  0x19   : > { %293 = vst [vmem:[#allocation2 + $0x48] sm:$0xff] %v292_v9 }
  0x1a   : > { %295 = vst [vmem:[#allocation2 + $0x50] sm:$0xff] %v294_v10 }
  0x1b   : > { %297 = vst [vmem:[#allocation2 + $0x58] sm:$0xff] %v296_v11 }
  0x1c   : > { %299 = vst [vmem:[#allocation2 + $0x60] sm:$0xff] %v298_v12 }
  0x1d   : > { %301 = vst [vmem:[#allocation2 + $0x68] sm:$0xff] %v300_v13 }
  0x1e   : > { %303 = vst [vmem:[#allocation2 + $0x70] sm:$0xff] %v302_v14 }
  0x1f   : > { %305 = vst [vmem:[#allocation2 + $0x78] sm:$0xff] %v304_v15 }
  0x20   : > { %307 = vst [vmem:[#allocation2 + $0x80] sm:$0xff] %v306_v16 }
  0x21   : > { %309 = vst [vmem:[#allocation2 + $0x88] sm:$0xff] %v308_v17 }
  0x22   : > { %311 = vst [vmem:[#allocation2 + $0x90] sm:$0xff] %v310_v18 }
  0x23   : > { %313 = vst [vmem:[#allocation2 + $0x98] sm:$0xff] %v312_v19 }
  0x24   : > { %315 = vst [vmem:[#allocation2 + $0xa0] sm:$0xff] %v314_v20 }
  0x25   : > { %317 = vst [vmem:[#allocation2 + $0xa8] sm:$0xff] %v316_v21 }
  0x26   : > { %319 = vst [vmem:[#allocation2 + $0xb0] sm:$0xff] %v318_v22 }
  0x27   : > { %321 = vst [vmem:[#allocation2 + $0xb8] sm:$0xff] %v320_v23 }
  0x28   : > { %323 = vst [vmem:[#allocation2 + $0xc0] sm:$0xff] %v322_v24 }
  0x29   : > { %325 = vst [vmem:[#allocation2 + $0xc8] sm:$0xff] %v324_v25 }
  0x2a   : > { %327 = vst [vmem:[#allocation2 + $0xd0] sm:$0xff] %v326_v26 }
  0x2b   : > { %329 = vst [vmem:[#allocation2 + $0xd8] sm:$0xff] %v328_v27 }
  0x2c   : > { %331 = vst [vmem:[#allocation2 + $0xe0] sm:$0xff] %v330_v28 }
  0x2d   : > { %333 = vst [vmem:[#allocation2 + $0xe8] sm:$0xff] %v332_v29 }
  0x2e   : > { %339 = vsyncadd [#allocation4], 3840 }
  0x2f   : > { %9629 = dma.done.wait [#allocation4], 3840 }
  0x30   : > { %9630 = vsyncadd [#allocation4], 4294963456  ;;  %v8541_v30 = vld [vmem:[%s12217_s1 + $0xf8] sm:$0xff]  ;;  %v8540_v32 = vld [vmem:[%s12217_s1 + $0xf0] sm:$0xff]  ;;  %vm579_vm0 = vsmask.f32 7424 }
  0x31   : > { %v8549_v31 = vld [vmem:[%s12217_s1 + $0x138] sm:$0xff]  ;;  %1777 = vmatpush.bf16.msra.mxu0 %v8541_v30  ;;  %v8548_v33 = vld [vmem:[%s12217_s1 + $0x130] sm:$0xff]  ;;  %v8539_v34 = vld [vmem:[%s12217_s1 + $0xe8] sm:$0xff]  ;;  %vm868_vm1 = vcmask 1046528   ;;  %vm3933_vm2 = vcmask 1040384   ;;  %vm9650_vm4 = vmmov 1  }
  0x32   : > { %1876 = vmatpush.bf16.msra.mxu1 %v8549_v31  ;;  %9353 = vmatpush.bf16.msra.mxu3 %v8549_v31  ;;  %v8547_v35 = vld [vmem:[%s12217_s1 + $0x128] sm:$0xff]  ;;  %v9767_v37 = vld [vmem:[#allocation2 + $0xc] sm:$0xf0]  ;;  %v8557_v38 = vld [vmem:[%s12217_s1 + $0x178] sm:$0xff] }
  0x33   : > { %v990_v36 = vld [vmem:[#allocation2 + $0xc] sm:$0xff]   ;;  %9361 = vmatpush.bf16.msra.mxu2 %v8557_v38  ;;  %v8538_v39 = vld [vmem:[%s12217_s1 + $0xe0] sm:$0xff]  ;;  %v1026_v41 = vld [vmem:[#allocation2 + $0x14] sm:$0x1] }
  0x34   : > { %v8546_v40 = vld [vmem:[%s12217_s1 + $0x120] sm:$0xff]  ;;  %v1037_v42 = vld [vmem:[#allocation2 + $0x98] sm:$0x1]  ;;  %v1188_v45 = vunpack.c.l.b16 %v1026_v41  ;;  %v9784_v47 = vld [vmem:[#allocation2 + $0x90] sm:$0xff]   ;;  %v1227_v51 = vshll.u32 %v990_v36, 16  ;;  %v1225_v56 = vshrl.u32 %v990_v36, 16 }
  0x35   : > { %1778 = vmatpush.bf16.msra.mxu0 %v8540_v32  ;;  %v8537_v43 = vld [vmem:[%s12217_s1 + $0xd8] sm:$0xff]  ;;  %v1199_v46 = vunpack.c.l.b16 %v1037_v42  ;;  %v8536_v48 = vld [vmem:[%s12217_s1 + $0xd0] sm:$0xff]  ;;  %v1359_v53 = vshll.u32 %v9784_v47, 16  ;;  %v8535_v54 = vld [vmem:[%s12217_s1 + $0xc8] sm:$0xff]  ;;  %v1357_v59 = vshrl.u32 %v9784_v47, 16 }
  0x36   : > { %1877 = vmatpush.bf16.msra.mxu1 %v8548_v33  ;;  %9354 = vmatpush.bf16.msra.mxu3 %v8548_v33  ;;  %v8545_v44 = vld [vmem:[%s12217_s1 + $0x118] sm:$0xff]  ;;  %v8544_v49 = vld [vmem:[%s12217_s1 + $0x110] sm:$0xff]  ;;  %v9792_v50 = vpack.c.b16 %v1188_v45, %v1188_v45  ;;  %v8543_v55 = vld [vmem:[%s12217_s1 + $0x108] sm:$0xff]  ;;  %v1229_v57 = vrot.slane %v1227_v51, 1 }
  0x37   : > { %v9794_v52 = vpack.c.b16 %v1199_v46, %v1199_v46  ;;  %v1361_v60 = vrot.slane %v1359_v53, 1  ;;  %v9806_v62 = vld [vmem:[#allocation2 + $0x9c] sm:$0xff]   ;;  %v1038_v7 = vld [vmem:[#allocation2 + $0xa4] sm:$0x1]  ;;  %v8556_v15 = vld [vmem:[%s12217_s1 + $0x170] sm:$0xff] }
  0x38   : > { %v1232_v58 = vshll.u32 %v9792_v50, 16  ;;  %v9808_v63 = vld [vmem:[#allocation2 + $0x9c] sm:$0xf0]  ;;  %v1230_v2 = vor.u32 %v1229_v57, %v1225_v56  ;;  %v9818_v11 = vld [vmem:[#allocation2 + $0x18] sm:$0xff]   ;;  %v1200_v12 = vunpack.c.l.b16 %v1038_v7  ;;  %v1371_v17 = vshll.u32 %v9806_v62, 16  ;;  %9362 = vmatpush.bf16.msra.mxu2 %v8556_v15  ;;  %v994_v24 = vld [vmem:[#allocation2 + $0x24] sm:$0xff]  }
  0x39   : > { %1779 = vmatpush.bf16.msra.mxu0 %v8539_v34  ;;  %v1364_v61 = vshll.u32 %v9794_v52, 16  ;;  %v8534_v0 = vld [vmem:[%s12217_s1 + $0xc0] sm:$0xff]  ;;  %v1362_v4 = vor.u32 %v1361_v60, %v1357_v59  ;;  %v1239_v13 = vshll.u32 %v9818_v11, 16  ;;  %v1237_v18 = vshrl.u32 %v9818_v11, 16  ;;  %v9833_v25 = vld [vmem:[#allocation2 + $0x24] sm:$0xf0]  ;;  %vm9475_vm3 = vmneg %vm3933_vm2 }
  0x3a   : > { %1878 = vmatpush.bf16.msra.mxu1 %v8547_v35  ;;  %9355 = vmatpush.bf16.msra.mxu3 %v8547_v35  ;;  %v8542_v1 = vld [vmem:[%s12217_s1 + $0x100] sm:$0xff]  ;;  %v1234_v3 = vrot.slane %v1232_v58, 1  ;;  %v9826_v16 = vpack.c.b16 %v1200_v12, %v1200_v12  ;;  %v1369_v21 = vshrl.u32 %v9806_v62, 16  ;;  %v1373_v22 = vrot.slane %v1371_v17, 1  ;;  %v1028_v30 = vld [vmem:[#allocation2 + $0x2c] sm:$0x1]  ;;  %vm11085_vm5 = vmpackc.low %vm9650_vm4, %vm9475_vm3 }
  0x3b   : > { %v1366_v5 = vrot.slane %v1364_v61, 1  ;;  %v1027_v6 = vld [vmem:[#allocation2 + $0x20] sm:$0x1]  ;;  %v1241_v19 = vrot.slane %v1239_v13, 1  ;;  %v1039_v31 = vld [vmem:[#allocation2 + $0xb0] sm:$0x1]  ;;  %v1190_v33 = vunpack.c.l.b16 %v1028_v30 }
  0x3c   : > { %v1235_v8 = vsel %vm579_vm0, %v1230_v2, %v1234_v3  ;;  %v1189_v9 = vunpack.c.l.b16 %v1027_v6  ;;  %v1376_v23 = vshll.u32 %v9826_v16, 16  ;;  %v1374_v28 = vor.u32 %v1373_v22, %v1369_v21  ;;  %v9853_v51 = vld [vmem:[#allocation2 + $0xb4] sm:$0xf0]  ;;  %v1040_v58 = vld [vmem:[#allocation2 + $0xbc] sm:$0x1]  ;;  %v9879_v30 = vld [vmem:[#allocation2 + $0xc0] sm:$0xff]  }
  0x3d   : > { %1780 = vmatpush.bf16.msra.mxu0 %v8538_v39  ;;  %v1367_v10 = vsel %vm579_vm0, %v1362_v4, %v1366_v5  ;;  %v9835_v26 = vor.u32 %v1241_v19, %v1237_v18  ;;  %v1201_v35 = vunpack.c.l.b16 %v1039_v31  ;;  %v1251_v39 = vshll.u32 %v994_v24, 16  ;;  %v1029_v57 = vld [vmem:[#allocation2 + $0x38] sm:$0x1]  ;;  %v8555_v4 = vld [vmem:[%s12217_s1 + $0x168] sm:$0xff]  ;;  %v9872_v17 = vld [vmem:[#allocation2 + $0x3c] sm:$0xf0] }
  0x3e   : > { %1879 = vmatpush.bf16.msra.mxu1 %v8546_v40  ;;  %9356 = vmatpush.bf16.msra.mxu3 %v8546_v40  ;;  %v9821_v14 = vpack.c.b16 %v1189_v9, %v1189_v9  ;;  %v1378_v29 = vrot.slane %v1376_v23, 1  ;;  %v1249_v42 = vshrl.u32 %v994_v24, 16  ;;  %v1191_v60 = vunpack.c.l.b16 %v1029_v57  ;;  %v1030_v22 = vld [vmem:[#allocation2 + $0x44] sm:$0x1]  ;;  %v1041_v23 = vld [vmem:[#allocation2 + $0xc8] sm:$0x1] }
  0x3f   : > { %v9845_v40 = vpack.c.b16 %v1201_v35, %v1201_v35  ;;  %9363 = vmatpush.bf16.msra.mxu2 %v8555_v4  ;;  %v8517_v31 = vld [vmem:[%s12217_s1 + $0x38] sm:$0xff] }
  0x40   : > { %v1244_v20 = vshll.u32 %v9821_v14, 16  ;;  %v1379_v34 = vsel %vm579_vm0, %v1374_v28, %v1378_v29  ;;  %v9860_v3 = vpack.c.b16 %v1191_v60, %v1191_v60  ;;  %v1203_v29 = vunpack.c.l.b16 %v1041_v23  ;;  %v9158_v23 = vld [vmem:[#allocation2 + $0x60] sm:$0xf0] }
  0x41   : > { %1781 = vmatpush.bf16.msra.mxu0 %v8537_v43  ;;  %v1253_v43 = vrot.slane %v1251_v39, 1  ;;  %v1407_v39 = vshll.u32 %v9879_v30, 16 }
  0x42   : > { %1880 = vmatpush.bf16.msra.mxu1 %v8545_v44  ;;  %9357 = vmatpush.bf16.msra.mxu3 %v8545_v44  ;;  %v1246_v27 = vrot.slane %v1244_v20, 1  ;;  %v1268_v9 = vshll.u32 %v9860_v3, 16  ;;  %v9890_v35 = vpack.c.b16 %v1203_v29, %v1203_v29 }
  0x43   : > { %v1254_v53 = vor.u32 %v1253_v43, %v1249_v42  ;;  %v8553_v42 = vld [vmem:[%s12217_s1 + $0x158] sm:$0xff] }
  0x44   : > { %v1247_v32 = vsel %vm579_vm0, %v9835_v26, %v1246_v27  ;;  %v1270_v19 = vrot.slane %v1268_v9, 1  ;;  %v1192_v27 = vunpack.c.l.b16 %v1030_v22  ;;  %v8512_v22 = vld [vmem:[%s12217_s1 + $0x10] sm:$0xff] }
  0x45   : > { %1782 = vmatpush.bf16.msra.mxu0 %v8536_v48  ;;  %v1388_v48 = vshll.u32 %v9845_v40, 16 }
  0x46   : > { %1881 = vmatpush.bf16.msra.mxu1 %v8544_v49  ;;  %9358 = vmatpush.bf16.msra.mxu3 %v8544_v49  ;;  %v9851_v49 = vld [vmem:[#allocation2 + $0xb4] sm:$0xff]  }
  0x47   : > { %v1390_v56 = vrot.slane %v1388_v48, 1  ;;  %v1395_v6 = vshll.u32 %v9851_v49, 16  ;;  %v1409_v48 = vrot.slane %v1407_v39, 1 }
  0x49   : > { %1783 = vmatpush.bf16.msra.mxu0 %v8535_v54  ;;  %v1397_v12 = vrot.slane %v1395_v6, 1 }
  0x4a   : > { %1882 = vmatpush.bf16.msra.mxu1 %v8543_v55  ;;  %9359 = vmatpush.bf16.msra.mxu3 %v8543_v55 }
  0x4d   : > { %1784 = vmatpush.bf16.msra.mxu0 %v8534_v0  ;;  %v9857_v0 = vld [vmem:[#allocation2 + $0x30] sm:$0xff]  }
  0x4e   : > { %1883 = vmatpush.bf16.msra.mxu1 %v8542_v1  ;;  %9360 = vmatpush.bf16.msra.mxu3 %v8542_v1  ;;  %v1202_v1 = vunpack.c.l.b16 %v1040_v58  ;;  %v1263_v2 = vshll.u32 %v9857_v0, 16  ;;  %v1261_v7 = vshrl.u32 %v9857_v0, 16 }
  0x50   : > { %1785 = vmatmul.bf16.vlgmr.msra.gmra.mxu0 %v990_v36  ;;  %v9840_v36 = vld [vmem:[#allocation2 + $0xa8] sm:$0xff]   ;;  %v9865_v5 = vpack.c.b16 %v1202_v1, %v1202_v1  ;;  %v8514_v1 = vld [vmem:[%s12217_s1 + $0x20] sm:$0xff] }
  0x51   : > { %1975 = vmatpush.bf16.msrb.mxu0 %v8557_v38  ;;  %1884 = vmatmul.bf16.vlgmr.msra.gmra.mxu1 %v1235_v8  ;;  %v9843_v38 = vpack.c.b16 %v1190_v33, %v1190_v33  ;;  %v1383_v41 = vshll.u32 %v9840_v36, 16  ;;  %v1381_v45 = vshrl.u32 %v9840_v36, 16  ;;  %v1265_v8 = vrot.slane %v1263_v2, 1  ;;  %v1042_v2 = vld [vmem:[#allocation2 + $0xd4] sm:$0x1] }
  0x52   : > { %1939 = vmatmul.bf16.vlgmr.msra.gmra.mxu3 %v1367_v10  ;;  %v1393_v10 = vshrl.u32 %v9851_v49, 16  ;;  %v1400_v13 = vshll.u32 %v9865_v5, 16  ;;  %v1204_v9 = vunpack.c.l.b16 %v1042_v2  ;;  %v8510_v2 = vld [vmem:[%s12217_s1] sm:$0xff] }
  0x53   : > { %v1256_v44 = vshll.u32 %v9843_v38, 16  ;;  %v1385_v46 = vrot.slane %v1383_v41, 1  ;;  %v9874_v18 = vor.u32 %v1265_v8, %v1261_v7  ;;  %2218 = vmatpush.bf16.msrb.mxu3 %v8517_v31  ;;  %v8516_v41 = vld [vmem:[%s12217_s1 + $0x30] sm:$0xff]  ;;  %v9914_v8 = vld [vmem:[#allocation2 + $0x48] sm:$0xff]  }
  0x54   : > { %v1398_v20 = vor.u32 %v1397_v12, %v1393_v10  ;;  %v1402_v21 = vrot.slane %v1400_v13, 1  ;;  %v8552_v10 = vld [vmem:[%s12217_s1 + $0x150] sm:$0xff]  ;;  %v8513_v12 = vld [vmem:[%s12217_s1 + $0x18] sm:$0xff]  ;;  %v1287_v13 = vshll.u32 %v9914_v8, 16  ;;  %v1285_v29 = vshrl.u32 %v9914_v8, 16 }
  0x55   : > { %1976 = vmatpush.bf16.msrb.mxu0 %v8556_v15  ;;  %v1258_v54 = vrot.slane %v1256_v44, 1  ;;  %v1386_v55 = vor.u32 %v1385_v46, %v1381_v45  ;;  %v998_v15 = vld [vmem:[#allocation2 + $0x3c] sm:$0xff]   ;;  %v1405_v46 = vshrl.u32 %v9879_v30, 16 }
  0x56   : > { %v1403_v28 = vsel %vm579_vm0, %v1398_v20, %v1402_v21  ;;  %v1275_v33 = vshll.u32 %v998_v15, 16  ;;  %v1273_v43 = vshrl.u32 %v998_v15, 16  ;;  %v8551_v20 = vld [vmem:[%s12217_s1 + $0x148] sm:$0xff]  ;;  %v9928_v21 = vpack.c.b16 %v1204_v9, %v1204_v9 }
  0x57   : > { %v1259_v59 = vsel %vm579_vm0, %v1254_v53, %v1258_v54  ;;  %v1391_v61 = vsel %vm579_vm0, %v1386_v55, %v1390_v56  ;;  %v1412_v53 = vshll.u32 %v9890_v35, 16  ;;  %2219 = vmatpush.bf16.msrb.mxu3 %v8516_v41  ;;  %v8515_v54 = vld [vmem:[%s12217_s1 + $0x28] sm:$0xff]  ;;  %v9907_v56 = vld [vmem:[#allocation2 + $0xcc] sm:$0xf0] }
  0x58   : > { %v1277_v44 = vrot.slane %v1275_v33, 1  ;;  %v9905_v55 = vld [vmem:[#allocation2 + $0xcc] sm:$0xff]   ;;  %v1289_v33 = vrot.slane %v1287_v13, 1 }
  0x59   : > { %1977 = vmatpush.bf16.msrb.mxu0 %v8555_v4  ;;  %v1414_v60 = vrot.slane %v1412_v53, 1  ;;  %v1417_v39 = vshrl.u32 %v9905_v55, 16 }
  0x5a   : > { %v1278_v57 = vor.u32 %v1277_v44, %v1273_v43  ;;  %v1424_v43 = vshll.u32 %v9928_v21, 16  ;;  %v1002_v44 = vld [vmem:[#allocation2 + $0x54] sm:$0xff]  }
  0x5b   : > { %2220 = vmatpush.bf16.msrb.mxu3 %v8515_v54 }
  0x5f   : > { %2221 = vmatpush.bf16.msrb.mxu3 %v8514_v1 }
  0x60   : > { %1790 = vmatmul.bf16.gmra.mxu0 %v9818_v11 }
  0x61   : > { %1889 = vmatmul.bf16.gmra.mxu1 %v1247_v32  ;;  %v9885_v32 = vpack.c.b16 %v1192_v27, %v1192_v27  ;;  %v9159_v27 = vld [vmem:[#allocation2 + $0x60] sm:$0xe] }
  0x62   : > { %1944 = vmatmul.bf16.gmra.mxu3 %v1379_v34  ;;  %v8554_v34 = vld [vmem:[%s12217_s1 + $0x160] sm:$0xff]  ;;  %v9160_v31 = vor.u32 %v9159_v27, %v9158_v23  ;;  %v1034_v23 = vld [vmem:[#allocation2 + $0x74] sm:$0x1] }
  0x63   : > { %9364 = vmatpush.bf16.msra.mxu2 %v8554_v34  ;;  %1978 = vmatpush.bf16.msrb.mxu0 %v8554_v34  ;;  %v1280_v45 = vshll.u32 %v9885_v32, 16 }
  0x64   : > { %2222 = vmatpush.bf16.msrb.mxu3 %v8513_v12  ;;  %v1533_v53 = vrot.slane %v9160_v31, 1  ;;  %v9958_v12 = vld [vmem:[#allocation2 + $0xd8] sm:$0xff]  }
  0x65   : > { %v1282_v58 = vrot.slane %v1280_v45, 1  ;;  %v9940_v45 = vld [vmem:[#allocation2 + $0x54] sm:$0xf0]  ;;  %v1431_v27 = vshll.u32 %v9958_v12, 16 }
  0x67   : > { %9365 = vmatpush.bf16.msra.mxu2 %v8553_v42  ;;  %1979 = vmatpush.bf16.msrb.mxu0 %v8553_v42  ;;  %v1283_v4 = vsel %vm579_vm0, %v1278_v57, %v1282_v58  ;;  %v9949_v57 = vor.u32 %v1289_v33, %v1285_v29  ;;  %v1196_v29 = vunpack.c.l.b16 %v1034_v23  ;;  %v1297_v33 = vshrl.u32 %v1002_v44, 16 }
  0x68   : > { %2223 = vmatpush.bf16.msrb.mxu3 %v8512_v22  ;;  %v9631_v22 = vld [vmem:[#allocation2 + $0x6c] sm:$0xf0] }
  0x69   : > { %v1214_v31 = vpack.c.b16 %v1196_v29, %v1196_v29 }
  0x6b   : > { %9366 = vmatpush.bf16.msra.mxu2 %v8552_v10  ;;  %1980 = vmatpush.bf16.msrb.mxu0 %v8552_v10 }
  0x6f   : > { %9367 = vmatpush.bf16.msra.mxu2 %v8551_v20  ;;  %1981 = vmatpush.bf16.msrb.mxu0 %v8551_v20  ;;  %v1299_v20 = vshll.u32 %v1002_v44, 16 }
  0x70   : > { %1795 = vmatmul.bf16.gmra.mxu0 %v994_v24  ;;  %v1271_v24 = vsel %vm579_vm0, %v9874_v18, %v1270_v19 }
  0x71   : > { %1894 = vmatmul.bf16.gmra.mxu1 %v1259_v59  ;;  %v1410_v59 = vor.u32 %v1409_v48, %v1405_v46  ;;  %v8550_v46 = vld [vmem:[%s12217_s1 + $0x140] sm:$0xff]  ;;  %v8511_v48 = vld [vmem:[%s12217_s1 + $0x8] sm:$0xff] }
  0x72   : > { %1949 = vmatmul.bf16.gmra.mxu3 %v1391_v61  ;;  %v1031_v61 = vld [vmem:[#allocation2 + $0x50] sm:$0x1] }
  0x73   : > { %v1193_v6 = vunpack.c.l.b16 %v1031_v61  ;;  %v1415_v7 = vsel %vm579_vm0, %v1410_v59, %v1414_v60  ;;  %v1426_v60 = vrot.slane %v1424_v43, 1  ;;  %v1032_v61 = vld [vmem:[#allocation2 + $0x5c] sm:$0x1]  ;;  %9368 = vmatpush.bf16.msra.mxu2 %v8550_v46  ;;  %2224 = vmatpush.bf16.msrb.mxu3 %v8511_v48  ;;  %v1429_v43 = vshrl.u32 %v9958_v12, 16 }
  0x74   : > { %1982 = vmatpush.bf16.msrb.mxu0 %v8550_v46  ;;  %v1433_v46 = vrot.slane %v1431_v27, 1  ;;  %v9161_v27 = vld [vmem:[#allocation2 + $0x78] sm:$0xf0] }
  0x75   : > { %v9923_v19 = vpack.c.b16 %v1193_v6, %v1193_v6 }
  0x77   : > { %v1292_v34 = vshll.u32 %v9923_v19, 16  ;;  %2225 = vmatpush.bf16.msrb.mxu3 %v8510_v2 }
  0x79   : > { %v1294_v58 = vrot.slane %v1292_v34, 1  ;;  %v1301_v34 = vrot.slane %v1299_v20, 1 }
  0x7b   : > { %v1295_v6 = vsel %vm579_vm0, %v9949_v57, %v1294_v58  ;;  %v1302_v58 = vor.u32 %v1301_v34, %v1297_v33 }
  0x80   : > { %1800 = vmatmul.bf16.gmra.mxu0 %v9857_v0 }
  0x81   : > { %1899 = vmatmul.bf16.gmra.mxu1 %v1271_v24  ;;  %v1033_v24 = vld [vmem:[#allocation2 + $0x68] sm:$0x1] }
  0x82   : > { %1954 = vmatmul.bf16.gmra.mxu3 %v1403_v28  ;;  %v1195_v28 = vunpack.c.l.b16 %v1033_v24 }
  0x84   : > { %v9937_v41 = vpack.c.b16 %v1195_v28, %v1195_v28  ;;  %v9632_v28 = vld [vmem:[#allocation2 + $0x6c] sm:$0xe] }
  0x86   : > { %v1534_v54 = vrot.slane %v9937_v41, 1  ;;  %v1316_v20 = vshll.u32 %v9937_v41, 16 }
  0x88   : > { %v1535_v1 = vsel %vm868_vm1, %v1533_v53, %v1534_v54  ;;  %v1537_v53 = vrot.slane %v1214_v31, 1 }
  0x89   : > { %2018 = vmatmul.bf16.vlgmr.msra.gmra.mxu2 %v1535_v1 }
  0x90   : > { %1805 = vmatmul.bf16.gmra.mxu0 %v998_v15  ;;  %v1419_v15 = vshll.u32 %v9905_v55, 16 }
  0x91   : > { %1904 = vmatmul.bf16.gmra.mxu1 %v1283_v4  ;;  %v1043_v4 = vld [vmem:[#allocation2 + $0xe0] sm:$0x1] }
  0x92   : > { %1959 = vmatmul.bf16.gmra.mxu3 %v1415_v7  ;;  %v1421_v42 = vrot.slane %v1419_v15, 1  ;;  %v1194_v7 = vunpack.c.l.b16 %v1032_v61  ;;  %v1205_v10 = vunpack.c.l.b16 %v1043_v4  ;;  %v9963_v15 = vld [vmem:[#allocation2 + $0x6c] sm:$0xff]  }
  0x93   : > { %v1323_v41 = vshll.u32 %v9963_v15, 16 }
  0x94   : > { %v1422_v59 = vor.u32 %v1421_v42, %v1417_v39  ;;  %v9961_v13 = vpack.c.b16 %v1194_v7, %v1194_v7  ;;  %v9965_v24 = vpack.c.b16 %v1205_v10, %v1205_v10  ;;  %v9633_v42 = vor.u32 %v9632_v28, %v9631_v22  ;;  %v1035_v22 = vld [vmem:[#allocation2 + $0x80] sm:$0x1]  ;;  %v9162_v28 = vld [vmem:[#allocation2 + $0x78] sm:$0xe] }
  0x95   : > { %v1197_v23 = vunpack.c.l.b16 %v1035_v22  ;;  %v9163_v33 = vor.u32 %v9162_v28, %v9161_v27 }
  0x96   : > { %v1427_v9 = vsel %vm579_vm0, %v1422_v59, %v1426_v60  ;;  %12246 = vst [vmem:[#allocation7_spill] sm:$0xff] %v9965_v24  ;;  %v1304_v39 = vshll.u32 %v9961_v13, 16  ;;  %v1436_v48 = vshll.u32 %v9965_v24, 16  ;;  %v1536_v54 = vrot.slane %v9633_v42, 1 }
  0x97   : > { %v1434_v60 = vor.u32 %v1433_v46, %v1429_v43  ;;  %v1215_v29 = vpack.c.b16 %v1197_v23, %v1197_v23  ;;  %v1539_v42 = vrot.slane %v9163_v33, 1 }
  0x98   : > { %v1306_v59 = vrot.slane %v1304_v39, 1  ;;  %v1438_v61 = vrot.slane %v1436_v48, 1  ;;  %v1538_v1 = vsel %vm868_vm1, %v1536_v54, %v1537_v53  ;;  %v1318_v39 = vrot.slane %v1316_v20, 1  ;;  %v9984_v48 = vld [vmem:[#allocation2] sm:$0xff]  }
  0x99   : > { %2023 = vmatmul.bf16.gmra.mxu2 %v1538_v1  ;;  %v1321_v53 = vshrl.u32 %v9963_v15, 16  ;;  %v1325_v54 = vrot.slane %v1323_v41, 1  ;;  %v9635_v1 = vld [vmem:[#allocation2 + $0x84] sm:$0xe] }
  0x9a   : > { %v1307_v2 = vsel %vm579_vm0, %v1302_v58, %v1306_v59  ;;  %v1439_v4 = vsel %vm579_vm0, %v1434_v60, %v1438_v61  ;;  %v1328_v58 = vshll.u32 %v1214_v31, 16  ;;  %v9990_v59 = vld [vmem:[#allocation2 + $0x84] sm:$0xff]   ;;  %v1036_v61 = vld [vmem:[#allocation2 + $0x8c] sm:$0x1] }
  0x9b   : > { %v9634_v60 = vld [vmem:[#allocation2 + $0x84] sm:$0xf0]  ;;  %v1326_v20 = vor.u32 %v1325_v54, %v1321_v53 }
  0x9c   : > { %v1330_v22 = vrot.slane %v1328_v58, 1  ;;  %v1340_v58 = vshll.u32 %v1215_v29, 16 }
  0xa0   : > { %1810 = vmatmul.bf16.gmra.mxu0 %v9914_v8 }
  0xa1   : > { %1909 = vmatmul.bf16.gmra.mxu1 %v1295_v6  ;;  %v9974_v6 = vld [vmem:[#allocation2 + $0x60] sm:$0xff]  }
  0xa2   : > { %1964 = vmatmul.bf16.gmra.mxu3 %v1427_v9  ;;  %v1311_v7 = vshll.u32 %v9974_v6, 16  ;;  %v1309_v9 = vshrl.u32 %v9974_v6, 16 }
  0xa4   : > { %v1313_v10 = vrot.slane %v1311_v7, 1  ;;  %v1198_v7 = vunpack.c.l.b16 %v1036_v61  ;;  %v9165_v61 = vld [vmem:[#allocation2 + $0x90] sm:$0xe] }
  0xa6   : > { %v9979_v34 = vor.u32 %v1313_v10, %v1309_v9  ;;  %v1216_v9 = vpack.c.b16 %v1198_v7, %v1198_v7  ;;  %v9636_v10 = vor.u32 %v9635_v1, %v9634_v60  ;;  %v9164_v60 = vld [vmem:[#allocation2 + $0x90] sm:$0xf0] }
  0xa7   : > { %v9166_v1 = vor.u32 %v9165_v61, %v9164_v60  ;;  %v10028_v60 = vld [vmem:[#allocation2 + $0x24] sm:$0xf0] }
  0xa8   : > { %12247 = vst [vmem:[#allocation8_spill] sm:$0xff] %v9979_v34  ;;  %v1319_v46 = vsel %vm579_vm0, %v9979_v34, %v1318_v39  ;;  %v1542_v23 = vrot.slane %v9636_v10, 1  ;;  %v1543_v27 = vrot.slane %v1216_v9, 1  ;;  %v1331_v39 = vsel %vm579_vm0, %v1326_v20, %v1330_v22 }
  0xa9   : > { %v1342_v10 = vrot.slane %v1340_v58, 1  ;;  %v1546_v20 = vrot.slane %v9794_v52, 1  ;;  %v10026_v58 = vld [vmem:[#allocation2 + $0x24] sm:$0xff]  }
  0xaa   : > { %v1544_v28 = vsel %vm868_vm1, %v1542_v23, %v1543_v27 }
  0xb0   : > { %1815 = vmatmul.bf16.gmra.mxu0 %v1002_v44  ;;  %v1540_v44 = vrot.slane %v1215_v29, 1 }
  0xb1   : > { %1914 = vmatmul.bf16.gmra.mxu1 %v1307_v2  ;;  %v9992_v2 = vld [vmem:[#allocation2 + $0xc] sm:$0xff]  }
  0xb2   : > { %1969 = vmatmul.bf16.gmra.mxu3 %v1439_v4  ;;  %v1541_v43 = vsel %vm868_vm1, %v1539_v42, %v1540_v44  ;;  %v9994_v4 = vld [vmem:[#allocation2 + $0xc] sm:$0xf0]  ;;  %v9998_v42 = vld [vmem:[#allocation2 + $0x78] sm:$0xff]  }
  0xb3   : > { %2028 = vmatmul.bf16.gmra.mxu2 %v1541_v43  ;;  %v1335_v44 = vshll.u32 %v9998_v42, 16  ;;  %v1333_v53 = vshrl.u32 %v9998_v42, 16 }
  0xb5   : > { %v1337_v54 = vrot.slane %v1335_v44, 1 }
  0xb7   : > { %v10006_v7 = vor.u32 %v1337_v54, %v1333_v53  ;;  %v1352_v53 = vshll.u32 %v1216_v9, 16  ;;  %v9407_v54 = vld [vmem:[#allocation2 + $0x9c] sm:$0xe] }
  0xb8   : > { %v9408_v61 = vor.u32 %v9407_v54, %v9808_v63 }
  0xb9   : > { %12248 = vst [vmem:[#allocation9_spill] sm:$0xff] %v10006_v7 }
  0xc0   : > { %1820 = vmatmul.bf16.gmra.mxu0 %v9974_v6 }
  0xc1   : > { %1919 = vmatmul.bf16.gmra.mxu1 %v1319_v46 }
  0xc2   : > { %2226 = vmatmul.bf16.vlgmr.msrb.gmra.mxu3 %v9984_v48 }
  0xc3   : > { %2033 = vmatmul.bf16.gmra.mxu2 %v1544_v28 }
  0xcd   : > { %v1786_v33 = vpop.f32.mrf.mxu0 }
  0xce   : > { %v1885_v31 = vpop.f32.mrf.mxu1  ;;  %v1343_v33 = vsel %vm579_vm0, %v10006_v7, %v1342_v10  ;;  %v1548_v10 = vrot.slane %v9408_v61, 1  ;;  %v1552_v61 = vrot.slane %v9845_v40, 1  ;;  %v9410_v40 = vld [vmem:[#allocation2 + $0xb4] sm:$0xe] }
  0xcf   : > { %v1347_v31 = vshll.u32 %v9990_v59, 16 }
  0xd0   : > { %1825 = vmatmul.bf16.gmra.mxu0 %v9963_v15  ;;  %v1545_v15 = vrot.slane %v9166_v1, 1  ;;  %v1354_v1 = vrot.slane %v1352_v53, 1 }
  0xd1   : > { %1924 = vmatmul.bf16.gmra.mxu1 %v1331_v39 }
  0xd2   : > { %2231 = vmatmul.bf16.gmra.mxu3 %v9992_v2  ;;  %v1547_v23 = vsel %vm868_vm1, %v1545_v15, %v1546_v20  ;;  %v1549_v15 = vrot.slane %v9826_v16, 1 }
  0xd3   : > { %2038 = vmatmul.bf16.gmra.mxu2 %v1547_v23 }
  0xd4   : > { %v1550_v23 = vsel %vm868_vm1, %v1548_v10, %v1549_v15 }
  0xd5   : > { %v10003_v43 = vpop.f32.mrf.mxu3  ;;  %v1788_v46 = vpop.f32.mrf.mxu0 }
  0xd6   : > { %v1887_v41 = vpop.f32.mrf.mxu1  ;;  %v1345_v46 = vshrl.u32 %v9990_v59, 16 }
  0xd7   : > { %v1349_v41 = vrot.slane %v1347_v31, 1 }
  0xdd   : > { %v10009_v22 = vpop.f32.mrf.mxu3  ;;  %v1791_v27 = vpop.f32.mrf.mxu0 }
  0xde   : > { %12249 = vst [vmem:[#allocation10_spill] sm:$0xff] %v10009_v22  ;;  %v1890_v28 = vpop.f32.mrf.mxu1 }
  0xdf   : > { %v10014_v29 = vadd.f32 %v1890_v28, %v1791_v27 }
  0xe0   : > { %1830 = vmatmul.bf16.gmra.mxu0 %v9998_v42 }
  0xe1   : > { %1929 = vmatmul.bf16.gmra.mxu1 %v1343_v33 }
  0xe2   : > { %2236 = vmatmul.bf16.gmra.mxu3 %v9818_v11  ;;  %v1350_v11 = vor.u32 %v1349_v41, %v1345_v46  ;;  %v9167_v46 = vld [vmem:[#allocation2 + $0xa8] sm:$0xf0]  ;;  %v9168_v41 = vld [vmem:[#allocation2 + $0xa8] sm:$0xe] }
  0xe3   : > { %2043 = vmatmul.bf16.gmra.mxu2 %v1550_v23  ;;  %v9169_v53 = vor.u32 %v9168_v41, %v9167_v46  ;;  %v10062_v46 = vld [vmem:[#allocation2 + $0x3c] sm:$0xf0]  ;;  %v9411_v41 = vor.u32 %v9410_v40, %v9853_v51 }
  0xe4   : > { %v1355_v9 = vsel %vm579_vm0, %v1350_v11, %v1354_v1  ;;  %v9171_v40 = vld [vmem:[#allocation2 + $0xc0] sm:$0xe] }
  0xe5   : > { %v10019_v52 = vpop.f32.mrf.mxu3  ;;  %v10021_v39 = vpop.f32.mrf.mxu0  ;;  %v1551_v54 = vrot.slane %v9169_v53, 1  ;;  %v1554_v53 = vrot.slane %v9411_v41, 1 }
  0xe6   : > { %v10023_v44 = vpop.f32.mrf.mxu1 }
  0xe7   : > { %v1553_v1 = vsel %vm868_vm1, %v1551_v54, %v1552_v61  ;;  %v1555_v54 = vrot.slane %v9865_v5, 1  ;;  %v9170_v5 = vld [vmem:[#allocation2 + $0xc0] sm:$0xf0] }
  0xe8   : > { %v9172_v41 = vor.u32 %v9171_v40, %v9170_v5 }
  0xed   : > { %v10032_v20 = vpop.f32.mrf.mxu3  ;;  %v1796_v27 = vpop.f32.mrf.mxu0 }
  0xee   : > { %12250 = vst [vmem:[#allocation11_spill] sm:$0xff] %v10032_v20  ;;  %v1895_v28 = vpop.f32.mrf.mxu1 }
  0xef   : > { %v10036_v33 = vadd.f32 %v1895_v28, %v1796_v27 }
  0xf0   : > { %1835 = vmatmul.bf16.gmra.mxu0 %v9990_v59 }
  0xf1   : > { %1934 = vmatmul.bf16.gmra.mxu1 %v1355_v9  ;;  %v10060_v9 = vld [vmem:[#allocation2 + $0x3c] sm:$0xff]  }
  0xf2   : > { %2241 = vmatmul.bf16.gmra.mxu3 %v10026_v58 }
  0xf3   : > { %2048 = vmatmul.bf16.gmra.mxu2 %v1553_v1 }
  0xf5   : > { %v10040_v63 = vpop.f32.mrf.mxu3  ;;  %v10042_v31 = vpop.f32.mrf.mxu0 }
  0xf6   : > { %v10044_v16 = vpop.f32.mrf.mxu1 }
  0xfd   : > { %v10047_v11 = vpop.f32.mrf.mxu3  ;;  %v1801_v59 = vpop.f32.mrf.mxu0 }
  0xfe   : > { %12251 = vst [vmem:[#allocation12_spill] sm:$0xff] %v10047_v11  ;;  %v1900_v10 = vpop.f32.mrf.mxu1 }
  0xff   : > { %v10050_v15 = vadd.f32 %v1900_v10, %v1801_v59 }
 0x100   : > { %1840 = vmatmul.bf16.gmra.mxu0 %v9784_v47  ;;  %v1556_v47 = vsel %vm868_vm1, %v1554_v53, %v1555_v54  ;;  %v1558_v53 = vrot.slane %v9890_v35, 1  ;;  %v9413_v35 = vld [vmem:[#allocation2 + $0xcc] sm:$0xe] }
 0x102   : > { %2246 = vmatmul.bf16.gmra.mxu3 %v9857_v0 }
 0x103   : > { %2053 = vmatmul.bf16.gmra.mxu2 %v1556_v47 }
 0x105   : > { %v10054_v23 = vpop.f32.mrf.mxu3  ;;  %v10056_v27 = vpop.f32.mrf.mxu0 }
 0x106   : > { %v10058_v28 = vpop.f32.mrf.mxu1 }
 0x10c   : > { %v2019_v20 = vpop.f32.mrf.mxu2 }
 0x10d   : > { %v10066_v61 = vpop.f32.mrf.mxu3  ;;  %v1806_v0 = vpop.f32.mrf.mxu0 }
 0x10e   : > { %12252 = vst [vmem:[#allocation13_spill] sm:$0xff] %v10066_v61  ;;  %v1905_v1 = vpop.f32.mrf.mxu1  ;;  %v1557_v61 = vrot.slane %v9172_v41, 1  ;;  %v10093_v41 = vld [vmem:[#allocation2 + $0x54] sm:$0xff]  }
 0x10f   : > { %v10069_v59 = vadd.f32 %v1905_v1, %v1806_v0 }
 0x110   : > { %1845 = vmatmul.bf16.gmra.mxu0 %v9806_v62  ;;  %v1559_v47 = vsel %vm868_vm1, %v1557_v61, %v1558_v53  ;;  %v10095_v61 = vld [vmem:[#allocation2 + $0x54] sm:$0xf0] }
 0x112   : > { %2251 = vmatmul.bf16.gmra.mxu3 %v10060_v9 }
 0x113   : > { %2058 = vmatmul.bf16.gmra.mxu2 %v1559_v47  ;;  %v9414_v47 = vor.u32 %v9413_v35, %v9907_v56 }
 0x114   : > { %v10097_v53 = vpop.f32.mrf.mxu2 }
 0x115   : > { %v10073_v10 = vpop.f32.mrf.mxu3  ;;  %v10075_v11 = vpop.f32.mrf.mxu0  ;;  %12255 = vst [vmem:[#allocation16_spill] sm:$0xff] %v10097_v53 }
 0x116   : > { %v10077_v51 = vpop.f32.mrf.mxu1 }
 0x11c   : > { %v2024_v34 = vpop.f32.mrf.mxu2 }
 0x11d   : > { %v10080_v54 = vpop.f32.mrf.mxu3  ;;  %v1811_v0 = vpop.f32.mrf.mxu0 }
 0x11e   : > { %12253 = vst [vmem:[#allocation14_spill] sm:$0xff] %v10080_v54  ;;  %v1910_v62 = vpop.f32.mrf.mxu1 }
 0x11f   : > { %v10083_v1 = vadd.f32 %v1910_v62, %v1811_v0  ;;  %v1560_v0 = vrot.slane %v9414_v47, 1 }
 0x120   : > { %1850 = vmatmul.bf16.gmra.mxu0 %v9840_v36  ;;  %v1561_v36 = vrot.slane %v9928_v21, 1 }
 0x122   : > { %2256 = vmatmul.bf16.gmra.mxu3 %v9914_v8  ;;  %v1562_v8 = vsel %vm868_vm1, %v1560_v0, %v1561_v36 }
 0x123   : > { %2063 = vmatmul.bf16.gmra.mxu2 %v1562_v8  ;;  %v10122_v8 = vld [vmem:[#allocation2 + $0x6c] sm:$0xff]  }
 0x124   : > { %v10112_v21 = vpop.f32.mrf.mxu2  ;;  %12261 = vst [vmem:[#allocation22_spill] sm:$0xff] %v10122_v8 }
 0x125   : > { %v10087_v22 = vpop.f32.mrf.mxu3  ;;  %v10089_v5 = vpop.f32.mrf.mxu0  ;;  %12258 = vst [vmem:[#allocation19_spill] sm:$0xff] %v10112_v21 }
 0x126   : > { %v10091_v40 = vpop.f32.mrf.mxu1 }
 0x127   : > { %12254 = vst [vmem:[#allocation15_spill] sm:$0xff] %v10091_v40 }
 0x12d   : > { %v10101_v62 = vpop.f32.mrf.mxu3  ;;  %v1816_v54 = vpop.f32.mrf.mxu0 }
 0x12e   : > { %12256 = vst [vmem:[#allocation17_spill] sm:$0xff] %v10101_v62  ;;  %v1915_v7 = vpop.f32.mrf.mxu1 }
 0x12f   : > { %v10104_v24 = vadd.f32 %v1915_v7, %v1816_v54 }
 0x130   : > { %1855 = vmatmul.bf16.gmra.mxu0 %v9851_v49 }
 0x132   : > { %2261 = vmatmul.bf16.gmra.mxu3 %v10093_v41 }
 0x135   : > { %v1970_v53 = vpop.f32.mrf.mxu3  ;;  %v10108_v40 = vpop.f32.mrf.mxu0 }
 0x136   : > { %v10110_v56 = vpop.f32.mrf.mxu1  ;;  %v2029_v7 = vpop.f32.mrf.mxu2 }
 0x137   : > { %12257 = vst [vmem:[#allocation18_spill] sm:$0xff] %v10110_v56  ;;  %v10124_v56 = vld [vmem:[#allocation2 + $0x6c] sm:$0xf0] }
 0x13d   : > { %v1972_v35 = vpop.f32.mrf.mxu3  ;;  %v1821_v47 = vpop.f32.mrf.mxu0 }
 0x13e   : > { %v1920_v0 = vpop.f32.mrf.mxu1  ;;  %v10126_v35 = vpop.f32.mrf.mxu2 }
 0x13f   : > { %v1921_v36 = vadd.f32 %v1920_v0, %v1821_v47  ;;  %12262 = vst [vmem:[#allocation23_spill] sm:$0xff] %v10126_v35 }
 0x140   : > { %1860 = vmatmul.bf16.gmra.mxu0 %v9879_v30  ;;  %v8525_v30 = vld [vmem:[%s12217_s1 + $0x78] sm:$0xff] }
 0x141   : > { %v10114_v62 = vadd.f32 %v2019_v20, %v1921_v36  ;;  %2317 = vmatpush.bf16.msra.mxu0 %v8525_v30 }
 0x142   : > { %2266 = vmatmul.bf16.gmra.mxu3 %v9974_v6 }
 0x145   : > { %v2227_v49 = vpop.f32.mrf.mxu3  ;;  %v10118_v54 = vpop.f32.mrf.mxu0 }
 0x146   : > { %12259 = vst [vmem:[#allocation20_spill] sm:$0xff] %v10118_v54  ;;  %v10120_v53 = vpop.f32.mrf.mxu1  ;;  %v2034_v49 = vpop.f32.mrf.mxu2 }
 0x147   : > { %12260 = vst [vmem:[#allocation21_spill] sm:$0xff] %v10120_v53 }
 0x14d   : > { %v2229_v21 = vpop.f32.mrf.mxu3  ;;  %v1826_v47 = vpop.f32.mrf.mxu0 }
 0x14e   : > { %v1925_v20 = vpop.f32.mrf.mxu1  ;;  %v10146_v54 = vpop.f32.mrf.mxu2 }
 0x14f   : > { %v1926_v0 = vadd.f32 %v1925_v20, %v1826_v47  ;;  %v9416_v20 = vld [vmem:[#allocation2 + $0xc] sm:$0xe]  ;;  %12267 = vst [vmem:[#allocation28_spill] sm:$0xff] %v10146_v54 }
 0x150   : > { %1865 = vmatmul.bf16.gmra.mxu0 %v9905_v55 }
 0x151   : > { %v10128_v36 = vadd.f32 %v2024_v34, %v1926_v0  ;;  %v8524_v0 = vld [vmem:[%s12217_s1 + $0x70] sm:$0xff] }
 0x152   : > { %2271 = vmatmul.bf16.gmra.mxu3 %v10122_v8  ;;  %2318 = vmatpush.bf16.msra.mxu0 %v8524_v0 }
 0x155   : > { %v10135_v6 = vpop.f32.mrf.mxu3  ;;  %v10137_v53 = vpop.f32.mrf.mxu0 }
 0x156   : > { %12263 = vst [vmem:[#allocation24_spill] sm:$0xff] %v10135_v6  ;;  %v10139_v21 = vpop.f32.mrf.mxu1  ;;  %v10161_v6 = vld [vmem:[#allocation2 + $0x84] sm:$0xf0] }
 0x157   : > { %12264 = vst [vmem:[#allocation25_spill] sm:$0xff] %v10137_v53  ;;  %v9417_v53 = vor.u32 %v9416_v20, %v9767_v37 }
 0x158   : > { %12265 = vst [vmem:[#allocation26_spill] sm:$0xff] %v10139_v21 }
 0x159   : > { %12271 = vst [vmem:[#allocation32_spill] sm:$0xff] %v10161_v6  ;;  %v1512_v54 = vrot.slane %v9417_v53, 1  ;;  %v9149_v53 = vld [vmem:[#allocation2 + $0x18] sm:$0xf0] }
 0x15d   : > { %v10141_v35 = vpop.f32.mrf.mxu3  ;;  %v1831_v34 = vpop.f32.mrf.mxu0 }
 0x15e   : > { %12266 = vst [vmem:[#allocation27_spill] sm:$0xff] %v10141_v35  ;;  %v1930_v47 = vpop.f32.mrf.mxu1 }
 0x15f   : > { %v1931_v55 = vadd.f32 %v1930_v47, %v1831_v34  ;;  %v10159_v47 = vld [vmem:[#allocation2 + $0x84] sm:$0xff]  }
 0x160   : > { %1870 = vmatmul.bf16.gmra.mxu0 %v9958_v12 }
 0x161   : > { %v10148_v30 = vadd.f32 %v2029_v7, %v1931_v55  ;;  %v1513_v7 = vrot.slane %v9792_v50, 1  ;;  %v2039_v55 = vpop.f32.mrf.mxu2  ;;  %v9150_v50 = vld [vmem:[#allocation2 + $0x18] sm:$0xe] }
 0x162   : > { %2276 = vmatmul.bf16.gmra.mxu3 %v9998_v42  ;;  %v8523_v42 = vld [vmem:[%s12217_s1 + $0x68] sm:$0xff]  ;;  %v9151_v8 = vor.u32 %v9150_v50, %v9149_v53  ;;  %v10194_v50 = vld [vmem:[#allocation2 + $0x9c] sm:$0xff]  }
 0x163   : > { %v1514_v20 = vsel %vm868_vm1, %v1512_v54, %v1513_v7  ;;  %2319 = vmatpush.bf16.msra.mxu0 %v8523_v42  ;;  %v8522_v54 = vld [vmem:[%s12217_s1 + $0x60] sm:$0xff] }
 0x164   : > { %v1515_v7 = vrot.slane %v9151_v8, 1 }
 0x165   : > { %v10152_v21 = vpop.f32.mrf.mxu3  ;;  %v10155_v35 = vpop.f32.mrf.mxu0 }
 0x166   : > { %12268 = vst [vmem:[#allocation29_spill] sm:$0xff] %v10152_v21  ;;  %v10157_v34 = vpop.f32.mrf.mxu1 }
 0x167   : > { %12269 = vst [vmem:[#allocation30_spill] sm:$0xff] %v10155_v35  ;;  %2320 = vmatpush.bf16.msra.mxu0 %v8522_v54  ;;  %v10196_v54 = vld [vmem:[#allocation2 + $0x9c] sm:$0xf0] }
 0x168   : > { %12270 = vst [vmem:[#allocation31_spill] sm:$0xff] %v10157_v34 }
 0x169   : > { %v10173_v21 = vpop.f32.mrf.mxu2 }
 0x16a   : > { %12273 = vst [vmem:[#allocation34_spill] sm:$0xff] %v10173_v21  ;;  %v9110_v21 = vld [vmem:[#allocation2 + $0x90] sm:$0xff]  }
 0x16d   : > { %v10164_v12 = vpop.f32.mrf.mxu3  ;;  %v1836_v0 = vpop.f32.mrf.mxu0 }
 0x16e   : > { %12272 = vst [vmem:[#allocation33_spill] sm:$0xff] %v10164_v12  ;;  %v1935_v37 = vpop.f32.mrf.mxu1 }
 0x16f   : > { %v1936_v35 = vadd.f32 %v1935_v37, %v1836_v0 }
 0x170   : > { %1983 = vmatmul.bf16.vlgmr.msrb.gmra.mxu0 %v1514_v20 }
 0x171   : > { %v10170_v34 = vadd.f32 %v2034_v49, %v1936_v35  ;;  %v1516_v35 = vrot.slane %v9821_v14, 1  ;;  %v2044_v37 = vpop.f32.mrf.mxu2 }
 0x172   : > { %2281 = vmatmul.bf16.gmra.mxu3 %v10159_v47 }
 0x173   : > { %v1517_v0 = vsel %vm868_vm1, %v1515_v7, %v1516_v35  ;;  %v1519_v35 = vrot.slane %v9843_v38, 1 }
 0x175   : > { %v10175_v12 = vpop.f32.mrf.mxu3  ;;  %v10177_v6 = vpop.f32.mrf.mxu0 }
 0x176   : > { %12274 = vst [vmem:[#allocation35_spill] sm:$0xff] %v10175_v12  ;;  %v9419_v12 = vld [vmem:[#allocation2 + $0x24] sm:$0xe] }
 0x177   : > { %12275 = vst [vmem:[#allocation36_spill] sm:$0xff] %v10177_v6  ;;  %v9420_v14 = vor.u32 %v9419_v12, %v9833_v25 }
 0x179   : > { %v10198_v7 = vpop.f32.mrf.mxu2 }
 0x17a   : > { %12278 = vst [vmem:[#allocation39_spill] sm:$0xff] %v10198_v7  ;;  %v9152_v7 = vld [vmem:[#allocation2 + $0x30] sm:$0xf0] }
 0x17d   : > { %v10183_v49 = vpop.f32.mrf.mxu3  ;;  %v1841_v42 = vpop.f32.mrf.mxu0 }
 0x17e   : > { %v1941_v20 = vadd.f32 %v10003_v43, %v1841_v42  ;;  %v8521_v43 = vld [vmem:[%s12217_s1 + $0x58] sm:$0xff] }
 0x17f   : > { %2321 = vmatpush.bf16.msra.mxu0 %v8521_v43  ;;  %v8520_v43 = vld [vmem:[%s12217_s1 + $0x50] sm:$0xff] }
 0x180   : > { %v10187_v6 = vadd.f32 %v2039_v55, %v1941_v20  ;;  %1988 = vmatmul.bf16.gmra.mxu0 %v1517_v0  ;;  %v1518_v55 = vrot.slane %v9420_v14, 1 }
 0x181   : > { %v2049_v20 = vpop.f32.mrf.mxu2 }
 0x182   : > { %2286 = vmatmul.bf16.gmra.mxu3 %v9110_v21  ;;  %v1520_v0 = vsel %vm868_vm1, %v1518_v55, %v1519_v35 }
 0x183   : > { %2322 = vmatpush.bf16.msra.mxu0 %v8520_v43 }
 0x185   : > { %v10189_v53 = vpop.f32.mrf.mxu3  ;;  %v10191_v8 = vpop.f32.mrf.mxu0 }
 0x186   : > { %12276 = vst [vmem:[#allocation37_spill] sm:$0xff] %v10189_v53 }
 0x187   : > { %12277 = vst [vmem:[#allocation38_spill] sm:$0xff] %v10191_v8  ;;  %v9153_v8 = vld [vmem:[#allocation2 + $0x30] sm:$0xe] }
 0x188   : > { %v9154_v38 = vor.u32 %v9153_v8, %v9152_v7  ;;  %v8533_v7 = vld [vmem:[%s12217_s1 + $0xb8] sm:$0xff] }
 0x189   : > { %2416 = vmatpush.bf16.msrb.mxu1 %v8533_v7 }
 0x18a   : > { %v1521_v55 = vrot.slane %v9154_v38, 1 }
 0x18d   : > { %v10204_v21 = vpop.f32.mrf.mxu3  ;;  %v1846_v42 = vpop.f32.mrf.mxu0 }
 0x18e   : > { %v1946_v25 = vadd.f32 %v10019_v52, %v1846_v42  ;;  %v1522_v52 = vrot.slane %v9860_v3, 1 }
 0x190   : > { %v10208_v12 = vadd.f32 %v2044_v37, %v1946_v25  ;;  %1993 = vmatmul.bf16.gmra.mxu0 %v1520_v0  ;;  %v10219_v37 = vpop.f32.mrf.mxu2  ;;  %v1523_v0 = vsel %vm868_vm1, %v1521_v55, %v1522_v52  ;;  %v10240_v52 = vld [vmem:[#allocation2 + $0xb4] sm:$0xf0] }
 0x191   : > { %12281 = vst [vmem:[#allocation42_spill] sm:$0xff] %v10219_v37 }
 0x192   : > { %2291 = vmatmul.bf16.gmra.mxu3 %v10194_v50 }
 0x195   : > { %v10211_v53 = vpop.f32.mrf.mxu3  ;;  %v10213_v14 = vpop.f32.mrf.mxu0 }
 0x196   : > { %12279 = vst [vmem:[#allocation40_spill] sm:$0xff] %v10211_v53  ;;  %v9111_v53 = vld [vmem:[#allocation2 + $0xa8] sm:$0xff]  }
 0x197   : > { %12280 = vst [vmem:[#allocation41_spill] sm:$0xff] %v10213_v14  ;;  %v9422_v14 = vld [vmem:[#allocation2 + $0x3c] sm:$0xe] }
 0x198   : > { %v2054_v43 = vpop.f32.mrf.mxu2  ;;  %v9423_v55 = vor.u32 %v9422_v14, %v9872_v17  ;;  %v8531_v17 = vld [vmem:[%s12217_s1 + $0xa8] sm:$0xff] }
 0x19d   : > { %v10221_v35 = vpop.f32.mrf.mxu3  ;;  %v1851_v42 = vpop.f32.mrf.mxu0 }
 0x19e   : > { %12282 = vst [vmem:[#allocation43_spill] sm:$0xff] %v10221_v35  ;;  %v1951_v25 = vadd.f32 %v10040_v63, %v1851_v42  ;;  %v8519_v63 = vld [vmem:[%s12217_s1 + $0x48] sm:$0xff]  ;;  %v1524_v42 = vrot.slane %v9423_v55, 1 }
 0x19f   : > { %2323 = vmatpush.bf16.msra.mxu0 %v8519_v63  ;;  %v8530_v63 = vld [vmem:[%s12217_s1 + $0xa0] sm:$0xff] }
 0x1a0   : > { %v10225_v8 = vadd.f32 %v2049_v20, %v1951_v25  ;;  %1998 = vmatmul.bf16.gmra.mxu0 %v1523_v0  ;;  %v10238_v20 = vld [vmem:[#allocation2 + $0xb4] sm:$0xff]   ;;  %v1525_v0 = vrot.slane %v9885_v32, 1  ;;  %v8518_v32 = vld [vmem:[%s12217_s1 + $0x40] sm:$0xff] }
 0x1a1   : > { %12285 = vst [vmem:[#allocation46_spill] sm:$0xff] %v10238_v20 }
 0x1a2   : > { %2296 = vmatmul.bf16.gmra.mxu3 %v9111_v53  ;;  %v8532_v53 = vld [vmem:[%s12217_s1 + $0xb0] sm:$0xff]  ;;  %v1526_v7 = vsel %vm868_vm1, %v1524_v42, %v1525_v0  ;;  %v9156_v42 = vld [vmem:[#allocation2 + $0x48] sm:$0xe] }
 0x1a3   : > { %2417 = vmatpush.bf16.msrb.mxu1 %v8532_v53  ;;  %v10256_v53 = vpop.f32.mrf.mxu2  ;;  %2324 = vmatpush.bf16.msra.mxu0 %v8518_v32  ;;  %v8573_v32 = vld [vmem:[%s12217_s1 + $0x1f8] sm:$0xff] }
 0x1a4   : > { %12287 = vst [vmem:[#allocation48_spill] sm:$0xff] %v10256_v53  ;;  %3402 = vmatpush.bf16.msra.mxu3 %v8573_v32  ;;  %v9112_v32 = vld [vmem:[#allocation2 + $0xc0] sm:$0xff]  }
 0x1a5   : > { %v10230_v3 = vpop.f32.mrf.mxu3  ;;  %v10232_v38 = vpop.f32.mrf.mxu0 }
 0x1a6   : > { %12283 = vst [vmem:[#allocation44_spill] sm:$0xff] %v10230_v3 }
 0x1a7   : > { %12284 = vst [vmem:[#allocation45_spill] sm:$0xff] %v10232_v38  ;;  %2418 = vmatpush.bf16.msrb.mxu1 %v8531_v17  ;;  %v9155_v17 = vld [vmem:[#allocation2 + $0x48] sm:$0xf0] }
 0x1ab   : > { %2419 = vmatpush.bf16.msrb.mxu1 %v8530_v63  ;;  %v381_v63 = vld [vmem:[#allocation2 + $0x8] sm:$0x1]  ;;  %v2059_v53 = vpop.f32.mrf.mxu2 }
 0x1ad   : > { %v10249_v14 = vpop.f32.mrf.mxu3  ;;  %v1856_v25 = vpop.f32.mrf.mxu0 }
 0x1ae   : > { %12286 = vst [vmem:[#allocation47_spill] sm:$0xff] %v10249_v14  ;;  %v1956_v37 = vadd.f32 %v10054_v23, %v1856_v25  ;;  %v8529_v23 = vld [vmem:[%s12217_s1 + $0x98] sm:$0xff]  ;;  %v9157_v25 = vor.u32 %v9156_v42, %v9155_v17  ;;  %v543_v17 = vunpack.c.l.b16 %v381_v63  ;;  %v9425_v14 = vld [vmem:[#allocation2 + $0x54] sm:$0xe] }
 0x1af   : > { %2420 = vmatpush.bf16.msrb.mxu1 %v8529_v23  ;;  %v1528_v23 = vrot.slane %v9923_v19, 1 }
 0x1b0   : > { %v10258_v55 = vadd.f32 %v2054_v43, %v1956_v37  ;;  %2003 = vmatmul.bf16.gmra.mxu0 %v1526_v7  ;;  %v8528_v7 = vld [vmem:[%s12217_s1 + $0x90] sm:$0xff]  ;;  %v1527_v38 = vrot.slane %v9157_v25, 1  ;;  %v9114_v25 = vld [vmem:[#allocation2] sm:$0xe] }
 0x1b2   : > { %2301 = vmatmul.bf16.gmra.mxu3 %v10238_v20  ;;  %v561_v20 = vpack.c.b16 %v543_v17, %v543_v17  ;;  %v382_v17 = vld [vmem:[#allocation2 + $0x14] sm:$0x1] }
 0x1b3   : > { %2421 = vmatpush.bf16.msrb.mxu1 %v8528_v7  ;;  %v1529_v7 = vsel %vm868_vm1, %v1527_v38, %v1528_v23  ;;  %v8581_v38 = vld [vmem:[%s12217_s1 + $0x238] sm:$0xff] }
 0x1b4   : > { %v870_v23 = vrot.slane %v561_v20, 1  ;;  %3501 = vmatpush.bf16.msrb.mxu0 %v8581_v38 }
 0x1b5   : > { %v2262_v0 = vpop.f32.mrf.mxu3  ;;  %v10270_v43 = vpop.f32.mrf.mxu0 }
 0x1b6   : > { %v10268_v37 = vadd.f32 %v2262_v0, %v10114_v62  ;;  %12289 = vst [vmem:[#allocation50_spill] sm:$0xff] %v10270_v43  ;;  %v8527_v62 = vld [vmem:[%s12217_s1 + $0x88] sm:$0xff]  ;;  %v8526_v43 = vld [vmem:[%s12217_s1 + $0x80] sm:$0xff] }
 0x1b7   : > { %2422 = vmatpush.bf16.msrb.mxu1 %v8527_v62 }
 0x1b8   : > { %12288 = vst [vmem:[#allocation49_spill] sm:$0xff] %v10268_v37  ;;  %v9113_v37 = vld [vmem:[#allocation2] sm:$0xf0] }
 0x1b9   : > { %v9115_v3 = vor.u32 %v9114_v25, %v9113_v37  ;;  %v9428_v25 = vld [vmem:[#allocation2 + $0xc] sm:$0xe] }
 0x1bb   : > { %2423 = vmatpush.bf16.msrb.mxu1 %v8526_v43  ;;  %v869_v63 = vrot.slane %v9115_v3, 1  ;;  %v9426_v43 = vor.u32 %v9425_v14, %v9940_v45  ;;  %v1531_v3 = vrot.slane %v9961_v13, 1  ;;  %v9429_v45 = vor.u32 %v9428_v25, %v9994_v4  ;;  %v383_v25 = vld [vmem:[#allocation2 + $0x20] sm:$0x1] }
 0x1bc   : > { %v588_v4 = vshll.u32 %v561_v20, 16 }
 0x1bd   : > { %v10282_v42 = vpop.f32.mrf.mxu3  ;;  %v1861_v0 = vpop.f32.mrf.mxu0  ;;  %v871_v62 = vsel %vm868_vm1, %v869_v63, %v870_v23  ;;  %v872_v13 = vrot.slane %v9429_v45, 1 }
 0x1be   : > { %12290 = vst [vmem:[#allocation51_spill] sm:$0xff] %v10282_v42  ;;  %v1961_v19 = vadd.f32 %v10073_v10, %v1861_v0  ;;  %v10295_v42 = vpop.f32.mrf.mxu2  ;;  %2424 = vmatmul.bf16.vlgmr.msrb.gmra.mxu1 %v871_v62  ;;  %v1530_v0 = vrot.slane %v9426_v43, 1  ;;  %v583_v43 = vshll.u32 %v9984_v48, 16 }
 0x1bf   : > { %12291 = vst [vmem:[#allocation52_spill] sm:$0xff] %v10295_v42 }
 0x1c0   : > { %v10289_v35 = vadd.f32 %v2059_v53, %v1961_v19  ;;  %2008 = vmatmul.bf16.gmra.mxu0 %v1529_v7  ;;  %v544_v7 = vunpack.c.l.b16 %v382_v17  ;;  %v1532_v63 = vsel %vm868_vm1, %v1530_v0, %v1531_v3  ;;  %v581_v3 = vshrl.u32 %v9984_v48, 16  ;;  %v8572_v48 = vld [vmem:[%s12217_s1 + $0x1f0] sm:$0xff] }
 0x1c1   : > { %v585_v42 = vrot.slane %v583_v43, 1  ;;  %3403 = vmatpush.bf16.msra.mxu3 %v8572_v48  ;;  %v384_v48 = vld [vmem:[#allocation2 + $0x2c] sm:$0x1] }
 0x1c2   : > { %2306 = vmatmul.bf16.gmra.mxu3 %v9112_v32  ;;  %v562_v62 = vpack.c.b16 %v544_v7, %v544_v7 }
 0x1c5   : > { %v2267_v10 = vpop.f32.mrf.mxu3  ;;  %v10300_v53 = vpop.f32.mrf.mxu0 }
 0x1c6   : > { %v10298_v37 = vadd.f32 %v2267_v10, %v10128_v36  ;;  %v2064_v38 = vpop.f32.mrf.mxu2  ;;  %v8565_v36 = vld [vmem:[%s12217_s1 + $0x1b8] sm:$0xff]  ;;  %v873_v10 = vrot.slane %v562_v62, 1 }
 0x1c7   : > { %3303 = vmatpush.bf16.msrb.mxu2 %v8565_v36 }
 0x1c8   : > { %v874_v17 = vsel %vm868_vm1, %v872_v13, %v873_v10  ;;  %v9116_v13 = vld [vmem:[#allocation2 + $0x18] sm:$0xf0]  ;;  %v9117_v10 = vld [vmem:[#allocation2 + $0x18] sm:$0xe] }
 0x1c9   : > { %v9118_v43 = vor.u32 %v9117_v10, %v9116_v13 }
 0x1cb   : > { %v875_v20 = vrot.slane %v9118_v43, 1  ;;  %v9431_v43 = vld [vmem:[#allocation2 + $0x24] sm:$0xe] }
 0x1cd   : > { %v10304_v19 = vpop.f32.mrf.mxu3  ;;  %v1866_v32 = vpop.f32.mrf.mxu0 }
 0x1ce   : > { %v1966_v23 = vadd.f32 %v10087_v22, %v1866_v32  ;;  %2429 = vmatmul.bf16.gmra.mxu1 %v874_v17  ;;  %v586_v32 = vor.u32 %v585_v42, %v581_v3  ;;  %v595_v42 = vshll.u32 %v9992_v2, 16 }
 0x1d0   : > { %v10312_v14 = vadd.f32 %v2064_v38, %v1966_v23  ;;  %2013 = vmatmul.bf16.gmra.mxu0 %v1532_v63  ;;  %v590_v38 = vrot.slane %v588_v4, 1  ;;  %v545_v63 = vunpack.c.l.b16 %v383_v25 }
 0x1d2   : > { %v591_v45 = vsel %vm579_vm0, %v586_v32, %v590_v38  ;;  %v593_v32 = vshrl.u32 %v9992_v2, 16  ;;  %v597_v38 = vrot.slane %v595_v42, 1  ;;  %v9432_v42 = vor.u32 %v9431_v43, %v10028_v60 }
 0x1d4   : > { %v598_v13 = vor.u32 %v597_v38, %v593_v32 }
 0x1d5   : > { %v2272_v0 = vpop.f32.mrf.mxu3  ;;  %v10320_v7 = vpop.f32.mrf.mxu0 }
 0x1d6   : > { %v10318_v22 = vadd.f32 %v2272_v0, %v10148_v30  ;;  %v563_v30 = vpack.c.b16 %v545_v63, %v545_v63  ;;  %v8564_v63 = vld [vmem:[%s12217_s1 + $0x1b0] sm:$0xff] }
 0x1d7   : > { %3304 = vmatpush.bf16.msrb.mxu2 %v8564_v63 }
 0x1d8   : > { %v876_v17 = vrot.slane %v563_v30, 1 }
 0x1da   : > { %v877_v0 = vsel %vm868_vm1, %v875_v20, %v876_v17 }
 0x1dd   : > { %v10322_v36 = vpop.f32.mrf.mxu3  ;;  %v1871_v23 = vpop.f32.mrf.mxu0 }
 0x1de   : > { %2434 = vmatmul.bf16.gmra.mxu1 %v877_v0  ;;  %v600_v23 = vshll.u32 %v562_v62, 16  ;;  %v878_v0 = vrot.slane %v9432_v42, 1 }
 0x1e0   : > { %2325 = vmatmul.bf16.vlgmr.msra.gmra.mxu0 %v591_v45  ;;  %v8580_v45 = vld [vmem:[%s12217_s1 + $0x230] sm:$0xff]  ;;  %v602_v10 = vrot.slane %v600_v23, 1  ;;  %v612_v23 = vshll.u32 %v563_v30, 16 }
 0x1e1   : > { %3502 = vmatpush.bf16.msrb.mxu0 %v8580_v45  ;;  %v8563_v45 = vld [vmem:[%s12217_s1 + $0x1a8] sm:$0xff] }
 0x1e2   : > { %v603_v62 = vsel %vm579_vm0, %v598_v13, %v602_v10  ;;  %3305 = vmatpush.bf16.msrb.mxu2 %v8563_v45  ;;  %v614_v13 = vrot.slane %v612_v23, 1 }
 0x1e4   : > { %v615_v43 = vsel %vm579_vm0, %v9835_v26, %v614_v13  ;;  %v1893_v26 = vadd.f32 %v10023_v44, %v10021_v39  ;;  %v9434_v44 = vld [vmem:[#allocation2 + $0x3c] sm:$0xe] }
 0x1e5   : > { %v2277_v3 = vpop.f32.mrf.mxu3  ;;  %v1873_v25 = vpop.f32.mrf.mxu0 }
 0x1e6   : > { %v10331_v4 = vadd.f32 %v2277_v3, %v10170_v34  ;;  %v546_v34 = vunpack.c.l.b16 %v384_v48  ;;  %v385_v48 = vld [vmem:[#allocation2 + $0x38] sm:$0x1] }
 0x1e7   : > { %v547_v60 = vunpack.c.l.b16 %v385_v48  ;;  %v617_v48 = vshrl.u32 %v10026_v58, 16 }
 0x1e8   : > { %v564_v17 = vpack.c.b16 %v546_v34, %v546_v34 }
 0x1e9   : > { %v565_v30 = vpack.c.b16 %v547_v60, %v547_v60 }
 0x1ea   : > { %v879_v3 = vrot.slane %v564_v17, 1  ;;  %v624_v60 = vshll.u32 %v564_v17, 16 }
 0x1ec   : > { %v880_v25 = vsel %vm868_vm1, %v878_v0, %v879_v3  ;;  %v8571_v0 = vld [vmem:[%s12217_s1 + $0x1e8] sm:$0xff] }
 0x1ed   : > { %v10340_v20 = vpop.f32.mrf.mxu3  ;;  %v1984_v2 = vpop.f32.mrf.mxu0  ;;  %3404 = vmatpush.bf16.msra.mxu3 %v8571_v0 }
 0x1ee   : > { %2439 = vmatmul.bf16.gmra.mxu1 %v880_v25  ;;  %v9119_v2 = vld [vmem:[#allocation2 + $0x30] sm:$0xf0]  ;;  %v882_v25 = vrot.slane %v565_v30, 1 }
 0x1f0   : > { %2330 = vmatmul.bf16.gmra.mxu0 %v603_v62  ;;  %v9120_v62 = vld [vmem:[#allocation2 + $0x30] sm:$0xe] }
 0x1f1   : > { %v9121_v42 = vor.u32 %v9120_v62, %v9119_v2  ;;  %v386_v2 = vld [vmem:[#allocation2 + $0x44] sm:$0x1] }
 0x1f2   : > { %v548_v39 = vunpack.c.l.b16 %v386_v2 }
 0x1f3   : > { %v881_v3 = vrot.slane %v9121_v42, 1  ;;  %v626_v42 = vrot.slane %v624_v60, 1 }
 0x1f4   : > { %v566_v17 = vpack.c.b16 %v548_v39, %v548_v39 }
 0x1f5   : > { %v2282_v63 = vpop.f32.mrf.mxu3  ;;  %v1986_v38 = vpop.f32.mrf.mxu0 }
 0x1f6   : > { %v10346_v32 = vadd.f32 %v2282_v63, %v10187_v6  ;;  %v619_v63 = vshll.u32 %v10026_v58, 16  ;;  %v883_v38 = vsel %vm868_vm1, %v881_v3, %v882_v25  ;;  %v9435_v25 = vor.u32 %v9434_v44, %v10062_v46 }
 0x1f7   : > { %v636_v46 = vshll.u32 %v565_v30, 16 }
 0x1f8   : > { %v621_v13 = vrot.slane %v619_v63, 1  ;;  %v8562_v63 = vld [vmem:[%s12217_s1 + $0x1a0] sm:$0xff] }
 0x1f9   : > { %3306 = vmatpush.bf16.msrb.mxu2 %v8562_v63  ;;  %v638_v2 = vrot.slane %v636_v46, 1  ;;  %v643_v63 = vshll.u32 %v10060_v9, 16  ;;  %v8570_v46 = vld [vmem:[%s12217_s1 + $0x1e0] sm:$0xff] }
 0x1fa   : > { %v622_v62 = vor.u32 %v621_v13, %v617_v48  ;;  %3405 = vmatpush.bf16.msra.mxu3 %v8570_v46  ;;  %v10436_v46 = vpop.f32.mrf.mxu1 }
 0x1fb   : > { %v639_v44 = vsel %vm579_vm0, %v9874_v18, %v638_v2  ;;  %v8561_v2 = vld [vmem:[%s12217_s1 + $0x198] sm:$0xff] }
 0x1fc   : > { %v627_v3 = vsel %vm579_vm0, %v622_v62, %v626_v42 }
 0x1fd   : > { %v10351_v10 = vpop.f32.mrf.mxu3  ;;  %v1989_v34 = vpop.f32.mrf.mxu0  ;;  %3307 = vmatpush.bf16.msrb.mxu2 %v8561_v2 }
 0x1fe   : > { %v10356_v6 = vadd.f32 %v1989_v34, %v10014_v29  ;;  %2444 = vmatmul.bf16.gmra.mxu1 %v883_v38  ;;  %v884_v38 = vrot.slane %v9435_v25, 1 }
 0x200   : > { %2335 = vmatmul.bf16.gmra.mxu0 %v615_v43  ;;  %v8579_v43 = vld [vmem:[%s12217_s1 + $0x228] sm:$0xff] }
 0x201   : > { %3503 = vmatpush.bf16.msrb.mxu0 %v8579_v43  ;;  %v387_v43 = vld [vmem:[#allocation2 + $0x50] sm:$0x1] }
 0x202   : > { %v549_v62 = vunpack.c.l.b16 %v387_v43 }
 0x205   : > { %v2287_v29 = vpop.f32.mrf.mxu3  ;;  %v1991_v45 = vpop.f32.mrf.mxu0 }
 0x206   : > { %v10366_v23 = vadd.f32 %v2287_v29, %v10208_v12  ;;  %v10369_v34 = vadd.f32 %v1991_v45, %v1893_v26  ;;  %v885_v26 = vrot.slane %v566_v17, 1  ;;  %v1898_v45 = vadd.f32 %v10044_v16, %v10042_v31 }
 0x207   : > { %v567_v16 = vpack.c.b16 %v549_v62, %v549_v62 }
 0x208   : > { %v886_v29 = vsel %vm868_vm1, %v884_v38, %v885_v26  ;;  %v1903_v26 = vadd.f32 %v10058_v28, %v10056_v27  ;;  %v388_v27 = vld [vmem:[#allocation2 + $0x5c] sm:$0x1] }
 0x209   : > { %v888_v25 = vrot.slane %v567_v16, 1  ;;  %v550_v62 = vunpack.c.l.b16 %v388_v27 }
 0x20d   : > { %v10374_v0 = vpop.f32.mrf.mxu3  ;;  %v1994_v12 = vpop.f32.mrf.mxu0 }
 0x20e   : > { %v10378_v58 = vadd.f32 %v1994_v12, %v10036_v33  ;;  %2449 = vmatmul.bf16.gmra.mxu1 %v886_v29  ;;  %v9122_v12 = vld [vmem:[#allocation2 + $0x48] sm:$0xf0] }
 0x210   : > { %2340 = vmatmul.bf16.gmra.mxu0 %v627_v3  ;;  %v9123_v3 = vld [vmem:[#allocation2 + $0x48] sm:$0xe] }
 0x215   : > { %v2292_v48 = vpop.f32.mrf.mxu3  ;;  %v1996_v13 = vpop.f32.mrf.mxu0 }
 0x216   : > { %v10388_v33 = vadd.f32 %v2292_v48, %v10225_v8  ;;  %v10390_v60 = vadd.f32 %v1996_v13, %v1898_v45  ;;  %v9124_v8 = vor.u32 %v9123_v3, %v9122_v12  ;;  %v645_v48 = vrot.slane %v643_v63, 1  ;;  %v8578_v12 = vld [vmem:[%s12217_s1 + $0x220] sm:$0xff] }
 0x217   : > { %v648_v13 = vshll.u32 %v566_v17, 16  ;;  %3504 = vmatpush.bf16.msrb.mxu0 %v8578_v12 }
 0x218   : > { %v887_v30 = vrot.slane %v9124_v8, 1  ;;  %v568_v8 = vpack.c.b16 %v550_v62, %v550_v62 }
 0x21a   : > { %v889_v38 = vsel %vm868_vm1, %v887_v30, %v888_v25  ;;  %v891_v63 = vrot.slane %v568_v8, 1 }
 0x21d   : > { %v10392_v42 = vpop.f32.mrf.mxu3  ;;  %v1999_v39 = vpop.f32.mrf.mxu0 }
 0x21e   : > { %v10397_v31 = vadd.f32 %v1999_v39, %v10050_v15  ;;  %2454 = vmatmul.bf16.gmra.mxu1 %v889_v38  ;;  %v641_v15 = vshrl.u32 %v10060_v9, 16  ;;  %v9437_v39 = vld [vmem:[#allocation2 + $0x54] sm:$0xe] }
 0x21f   : > { %v9438_v30 = vor.u32 %v9437_v39, %v10095_v61  ;;  %v8560_v61 = vld [vmem:[%s12217_s1 + $0x190] sm:$0xff] }
 0x220   : > { %2345 = vmatmul.bf16.gmra.mxu0 %v639_v44  ;;  %v646_v28 = vor.u32 %v645_v48, %v641_v15  ;;  %3308 = vmatpush.bf16.msrb.mxu2 %v8560_v61  ;;  %v8569_v61 = vld [vmem:[%s12217_s1 + $0x1d8] sm:$0xff] }
 0x221   : > { %v890_v25 = vrot.slane %v9438_v30, 1  ;;  %v667_v30 = vshll.u32 %v10093_v41, 16  ;;  %3406 = vmatpush.bf16.msra.mxu3 %v8569_v61 }
 0x223   : > { %v892_v38 = vsel %vm868_vm1, %v890_v25, %v891_v63  ;;  %v12292_v63 = vld [vmem:[#allocation15_spill] sm:$0xff] }
 0x225   : > { %v2297_v29 = vpop.f32.mrf.mxu3  ;;  %v2001_v45 = vpop.f32.mrf.mxu0 }
 0x226   : > { %v10404_v18 = vadd.f32 %v2297_v29, %v10258_v55  ;;  %v10410_v43 = vadd.f32 %v2001_v45, %v1903_v26  ;;  %v650_v55 = vrot.slane %v648_v13, 1  ;;  %v1908_v26 = vadd.f32 %v10077_v51, %v10075_v11  ;;  %v389_v13 = vld [vmem:[#allocation2 + $0x68] sm:$0x1] }
 0x227   : > { %v551_v27 = vunpack.c.l.b16 %v389_v13 }
 0x228   : > { %v651_v44 = vsel %vm579_vm0, %v646_v28, %v650_v55 }
 0x229   : > { %v569_v62 = vpack.c.b16 %v551_v27, %v551_v27 }
 0x22b   : > { %v894_v12 = vrot.slane %v569_v62, 1 }
 0x22d   : > { %v10415_v9 = vpop.f32.mrf.mxu3  ;;  %v2004_v17 = vpop.f32.mrf.mxu0 }
 0x22e   : > { %v10422_v3 = vadd.f32 %v2004_v17, %v10069_v59  ;;  %2459 = vmatmul.bf16.gmra.mxu1 %v892_v38  ;;  %v660_v59 = vshll.u32 %v567_v16, 16  ;;  %v9126_v16 = vld [vmem:[#allocation2 + $0x60] sm:$0xe]  ;;  %v1913_v38 = vadd.f32 %v12292_v63, %v10089_v5 }
 0x230   : > { %2350 = vmatmul.bf16.gmra.mxu0 %v651_v44  ;;  %v662_v2 = vrot.slane %v660_v59, 1  ;;  %v672_v59 = vshll.u32 %v568_v8, 16 }
 0x232   : > { %v663_v51 = vsel %vm579_vm0, %v9949_v57, %v662_v2  ;;  %v390_v2 = vld [vmem:[#allocation2 + $0x74] sm:$0x1]  ;;  %v674_v5 = vrot.slane %v672_v59, 1 }
 0x235   : > { %v2302_v29 = vpop.f32.mrf.mxu3  ;;  %v2006_v15 = vpop.f32.mrf.mxu0 }
 0x236   : > { %v10429_v45 = vadd.f32 %v2302_v29, %v10289_v35  ;;  %v10431_v48 = vadd.f32 %v2006_v15, %v1908_v26  ;;  %v9125_v35 = vld [vmem:[#allocation2 + $0x60] sm:$0xf0]  ;;  %v665_v29 = vshrl.u32 %v10093_v41, 16  ;;  %v669_v15 = vrot.slane %v667_v30, 1 }
 0x237   : > { %v9127_v39 = vor.u32 %v9126_v16, %v9125_v35  ;;  %v9440_v35 = vld [vmem:[#allocation2 + $0x6c] sm:$0xe] }
 0x239   : > { %v893_v44 = vrot.slane %v9127_v39, 1  ;;  %v9441_v39 = vor.u32 %v9440_v35, %v10124_v56  ;;  %v12294_v56 = vld [vmem:[#allocation18_spill] sm:$0xff] }
 0x23a   : > { %v1918_v63 = vadd.f32 %v12294_v56, %v10108_v40 }
 0x23b   : > { %v2425_v17 = vpop.f32.mrf.mxu1  ;;  %v895_v25 = vsel %vm868_vm1, %v893_v44, %v894_v12  ;;  %v8577_v44 = vld [vmem:[%s12217_s1 + $0x218] sm:$0xff]  ;;  %v896_v12 = vrot.slane %v9441_v39, 1  ;;  %v10485_v39 = vld [vmem:[#allocation2 + $0xcc] sm:$0xff]  }
 0x23c   : > { %3505 = vmatpush.bf16.msrb.mxu0 %v8577_v44  ;;  %v10487_v44 = vld [vmem:[#allocation2 + $0xcc] sm:$0xf0]  ;;  %2311 = vmatmul.bf16.gmra.mxu3 %v10485_v39 }
 0x23d   : > { %v10438_v28 = vpop.f32.mrf.mxu3  ;;  %v2009_v11 = vpop.f32.mrf.mxu0  ;;  %12296 = vst [vmem:[#allocation18_spill] sm:$0xff] %v10487_v44 }
 0x23e   : > { %v10443_v55 = vadd.f32 %v2009_v11, %v10083_v1  ;;  %2464 = vmatmul.bf16.gmra.mxu1 %v895_v25  ;;  %v670_v11 = vor.u32 %v669_v15, %v665_v29  ;;  %v8559_v25 = vld [vmem:[%s12217_s1 + $0x188] sm:$0xff]  ;;  %v391_v29 = vld [vmem:[#allocation2 + $0x80] sm:$0x1] }
 0x23f   : > { %3309 = vmatpush.bf16.msrb.mxu2 %v8559_v25  ;;  %v553_v61 = vunpack.c.l.b16 %v391_v29  ;;  %v9173_v25 = vld [vmem:[#allocation2 + $0xd8] sm:$0xf0] }
 0x240   : > { %2355 = vmatmul.bf16.gmra.mxu0 %v663_v51  ;;  %v552_v51 = vunpack.c.l.b16 %v390_v2  ;;  %v675_v16 = vsel %vm579_vm0, %v670_v11, %v674_v5  ;;  %v9128_v5 = vld [vmem:[#allocation2 + $0x78] sm:$0xf0] }
 0x241   : > { %v10480_v35 = vpack.c.b16 %v553_v61, %v553_v61 }
 0x242   : > { %v570_v8 = vpack.c.b16 %v552_v51, %v552_v51  ;;  %v9129_v51 = vld [vmem:[#allocation2 + $0x78] sm:$0xe] }
 0x243   : > { %v2427_v27 = vpop.f32.mrf.mxu1 }
 0x244   : > { %v897_v30 = vrot.slane %v570_v8, 1  ;;  %v12295_v27 = vld [vmem:[#allocation8_spill] sm:$0xff] }
 0x245   : > { %v2307_v57 = vpop.f32.mrf.mxu3  ;;  %v2011_v1 = vpop.f32.mrf.mxu0 }
 0x246   : > { %v10450_v26 = vadd.f32 %v2307_v57, %v10312_v14  ;;  %v10456_v13 = vadd.f32 %v2011_v1, %v1913_v38  ;;  %v684_v57 = vshll.u32 %v569_v62, 16 }
 0x248   : > { %12293 = vst [vmem:[#allocation15_spill] sm:$0xff] %v10450_v26  ;;  %v686_v59 = vrot.slane %v684_v57, 1  ;;  %v12298_v57 = vld [vmem:[#allocation7_spill] sm:$0xff]  ;;  %v394_v26 = vld [vmem:[#allocation2 + $0xa4] sm:$0x1] }
 0x249   : > { %v1564_v29 = vrot.slane %v12298_v57, 1 }
 0x24a   : > { %v687_v11 = vsel %vm579_vm0, %v12295_v27, %v686_v59  ;;  %v696_v27 = vshll.u32 %v570_v8, 16 }
 0x24b   : > { %v10463_v17 = vpop.f32.mrf.mxu1 }
 0x24d   : > { %v2014_v14 = vpop.f32.mrf.mxu0 }
 0x24e   : > { %v10460_v41 = vadd.f32 %v2014_v14, %v10104_v24  ;;  %v898_v24 = vsel %vm868_vm1, %v896_v12, %v897_v30  ;;  %v9130_v14 = vor.u32 %v9129_v51, %v9128_v5  ;;  %v12297_v12 = vld [vmem:[#allocation22_spill] sm:$0xff]  ;;  %v392_v5 = vld [vmem:[#allocation2 + $0x8c] sm:$0x1] }
 0x24f   : > { %2469 = vmatmul.bf16.gmra.mxu1 %v898_v24  ;;  %v691_v30 = vshll.u32 %v12297_v12, 16  ;;  %v9174_v24 = vld [vmem:[#allocation2 + $0xd8] sm:$0xe]  ;;  %v689_v61 = vshrl.u32 %v12297_v12, 16  ;;  %v698_v12 = vrot.slane %v696_v27, 1  ;;  %v554_v8 = vunpack.c.l.b16 %v392_v5 }
 0x250   : > { %2360 = vmatmul.bf16.gmra.mxu0 %v675_v16  ;;  %v899_v62 = vrot.slane %v9130_v14, 1  ;;  %v900_v16 = vrot.slane %v10480_v35, 1  ;;  %v8558_v14 = vld [vmem:[%s12217_s1 + $0x180] sm:$0xff] }
 0x251   : > { %3310 = vmatpush.bf16.msrb.mxu2 %v8558_v14 }
 0x252   : > { %v901_v56 = vsel %vm868_vm1, %v899_v62, %v900_v16  ;;  %v8568_v62 = vld [vmem:[%s12217_s1 + $0x1d0] sm:$0xff] }
 0x253   : > { %v10476_v15 = vpop.f32.mrf.mxu1  ;;  %3407 = vmatpush.bf16.msra.mxu3 %v8568_v62 }
 0x255   : > { %v2016_v38 = vpop.f32.mrf.mxu0 }
 0x256   : > { %v10474_v1 = vadd.f32 %v2016_v38, %v1918_v63  ;;  %v9175_v63 = vor.u32 %v9174_v24, %v9173_v25  ;;  %v2552_v25 = vld [vmem:[#allocation2 + $0x20] sm:$0x1]  ;;  %v12299_v24 = vld [vmem:[#allocation24_spill] sm:$0xff] }
 0x258   : > { %v1563_v38 = vrot.slane %v9175_v63, 1  ;;  %v8567_v63 = vld [vmem:[%s12217_s1 + $0x1c8] sm:$0xff] }
 0x259   : > { %3408 = vmatpush.bf16.msra.mxu3 %v8567_v63 }
 0x25b   : > { %v10482_v40 = vpop.f32.mrf.mxu1 }
 0x25d   : > { %v2326_v2 = vpop.f32.mrf.mxu0 }
 0x25e   : > { %v693_v2 = vrot.slane %v691_v30, 1  ;;  %v9443_v30 = vld [vmem:[#allocation2 + $0x84] sm:$0xe] }
 0x25f   : > { %2474 = vmatmul.bf16.gmra.mxu1 %v901_v56  ;;  %v2233_v56 = vadd.f32 %v12299_v24, %v10356_v6 }
 0x260   : > { %2365 = vmatmul.bf16.gmra.mxu0 %v687_v11  ;;  %v1565_v11 = vsel %vm868_vm1, %v1563_v38, %v1564_v29  ;;  %v694_v16 = vor.u32 %v693_v2, %v689_v61  ;;  %v8727_v29 = vld [vmem:[#allocation2 + $0x18] sm:$0xff]   ;;  %v10509_v61 = vpack.c.b16 %v554_v8, %v554_v8  ;;  %v12300_v2 = vld [vmem:[#allocation32_spill] sm:$0xff] }
 0x261   : > { %2068 = vmatmul.bf16.gmra.mxu2 %v1565_v11  ;;  %v9444_v27 = vor.u32 %v9443_v30, %v12300_v2  ;;  %v2753_v14 = vshll.u32 %v8727_v29, 16  ;;  %v8576_v8 = vld [vmem:[%s12217_s1 + $0x210] sm:$0xff]  ;;  %v2751_v30 = vshrl.u32 %v8727_v29, 16  ;;  %v708_v2 = vshll.u32 %v10480_v35, 16 }
 0x262   : > { %v699_v57 = vsel %vm579_vm0, %v694_v16, %v698_v12  ;;  %v8566_v16 = vld [vmem:[%s12217_s1 + $0x1c0] sm:$0xff]  ;;  %3506 = vmatpush.bf16.msrb.mxu0 %v8576_v8 }
 0x263   : > { %v10495_v51 = vpop.f32.mrf.mxu1  ;;  %v902_v12 = vrot.slane %v9444_v27, 1  ;;  %v2755_v24 = vrot.slane %v2753_v14, 1  ;;  %3409 = vmatpush.bf16.msra.mxu3 %v8566_v16  ;;  %v393_v14 = vld [vmem:[#allocation2 + $0x98] sm:$0x1]  ;;  %v2518_v8 = vld [vmem:[#allocation2 + $0x24] sm:$0xff]  }
 0x265   : > { %v2328_v59 = vpop.f32.mrf.mxu0  ;;  %v2756_v63 = vor.u32 %v2755_v24, %v2751_v30  ;;  %v10537_v30 = vld [vmem:[#allocation2 + $0x24] sm:$0xf0]  ;;  %v555_v24 = vunpack.c.l.b16 %v393_v14  ;;  %v2765_v14 = vshll.u32 %v2518_v8, 16 }
 0x266   : > { %v2714_v59 = vunpack.c.l.b16 %v2552_v25  ;;  %v903_v25 = vrot.slane %v10509_v61, 1 }
 0x268   : > { %v10512_v5 = vpack.c.b16 %v2714_v59, %v2714_v59 }
 0x26b   : > { %v10517_v62 = vpop.f32.mrf.mxu1 }
 0x26d   : > { %v2331_v38 = vpop.f32.mrf.mxu0 }
 0x26e   : > { %v2332_v11 = vadd.f32 %v2331_v38, %v2233_v56  ;;  %v2758_v56 = vshll.u32 %v10512_v5, 16 }
 0x270   : > { %v10515_v6 = vadd.f32 %v10463_v17, %v2332_v11  ;;  %2370 = vmatmul.bf16.gmra.mxu0 %v699_v57  ;;  %v904_v17 = vsel %vm868_vm1, %v902_v12, %v903_v25  ;;  %v2760_v38 = vrot.slane %v2758_v56, 1  ;;  %v12302_v57 = vld [vmem:[#allocation27_spill] sm:$0xff]  ;;  %v710_v25 = vrot.slane %v708_v2, 1  ;;  %v12304_v56 = vld [vmem:[#allocation29_spill] sm:$0xff] }
 0x271   : > { %2479 = vmatmul.bf16.gmra.mxu1 %v904_v17  ;;  %v2235_v59 = vadd.f32 %v12302_v57, %v10369_v34  ;;  %3311 = vmatmul.bf16.vlgmr.msrb.gmra.mxu2 %v8727_v29  ;;  %v2553_v34 = vld [vmem:[#allocation2 + $0x2c] sm:$0x1]  ;;  %v2238_v35 = vadd.f32 %v12304_v56, %v10378_v58  ;;  %v9131_v57 = vld [vmem:[#allocation2 + $0x90] sm:$0xf0] }
 0x272   : > { %12301 = vst [vmem:[#allocation8_spill] sm:$0xff] %v10515_v6  ;;  %v2761_v27 = vsel %vm579_vm0, %v2756_v63, %v2760_v38  ;;  %v2715_v17 = vunpack.c.l.b16 %v2553_v34  ;;  %v12305_v38 = vld [vmem:[#allocation9_spill] sm:$0xff] }
 0x273   : > { %3410 = vmatmul.bf16.vlgmr.msra.gmra.mxu3 %v2761_v27  ;;  %v10535_v12 = vpop.f32.mrf.mxu1  ;;  %v711_v29 = vsel %vm579_vm0, %v12305_v38, %v710_v25 }
 0x274   : > { %v10548_v27 = vpack.c.b16 %v2715_v17, %v2715_v17  ;;  %v2767_v17 = vrot.slane %v2765_v14, 1 }
 0x275   : > { %v2333_v11 = vpop.f32.mrf.mxu0 }
 0x276   : > { %v2334_v6 = vadd.f32 %v2333_v11, %v2235_v59  ;;  %v9132_v59 = vld [vmem:[#allocation2 + $0x90] sm:$0xe]  ;;  %v10546_v11 = vpack.c.b16 %v555_v24, %v555_v24  ;;  %v715_v24 = vshll.u32 %v10159_v47, 16  ;;  %v2770_v38 = vshll.u32 %v10548_v27, 16 }
 0x277   : > { %v9133_v2 = vor.u32 %v9132_v59, %v9131_v57  ;;  %v12307_v59 = vld [vmem:[#allocation33_spill] sm:$0xff] }
 0x278   : > { %v10533_v16 = vadd.f32 %v10476_v15, %v2334_v6  ;;  %v8621_v6 = vld [vmem:[%s12218_s2 + $0x138] sm:$0xff]  ;;  %v906_v56 = vrot.slane %v10546_v11, 1  ;;  %v2772_v57 = vrot.slane %v2770_v38, 1 }
 0x279   : > { %5573 = vmatpush.bf16.msra.mxu2 %v8621_v6  ;;  %v905_v25 = vrot.slane %v9133_v2, 1  ;;  %v713_v2 = vshrl.u32 %v10159_v47, 16  ;;  %v2554_v38 = vld [vmem:[#allocation2 + $0x38] sm:$0x1]  ;;  %v12308_v47 = vld [vmem:[#allocation35_spill] sm:$0xff] }
 0x27a   : > { %12303 = vst [vmem:[#allocation22_spill] sm:$0xff] %v10533_v16  ;;  %v720_v16 = vshll.u32 %v10509_v61, 16 }
 0x27b   : > { %v10553_v34 = vpop.f32.mrf.mxu1 }
 0x27d   : > { %v2336_v63 = vpop.f32.mrf.mxu0 }
 0x27e   : > { %v2337_v15 = vadd.f32 %v2336_v63, %v2238_v35  ;;  %v8613_v35 = vld [vmem:[%s12218_s2 + $0xf8] sm:$0xff]  ;;  %v2763_v63 = vshrl.u32 %v2518_v8, 16 }
 0x27f   : > { %5484 = vmatpush.bf16.msra.mxu1 %v8613_v35 }
 0x280   : > { %v10551_v58 = vadd.f32 %v10482_v40, %v2337_v15  ;;  %2375 = vmatmul.bf16.gmra.mxu0 %v711_v29  ;;  %v907_v40 = vsel %vm868_vm1, %v905_v25, %v906_v56  ;;  %v2768_v29 = vor.u32 %v2767_v17, %v2763_v63  ;;  %v2240_v15 = vadd.f32 %v12307_v59, %v10390_v60  ;;  %v9446_v17 = vld [vmem:[#allocation2 + $0x9c] sm:$0xe] }
 0x281   : > { %2484 = vmatmul.bf16.gmra.mxu1 %v907_v40  ;;  %3316 = vmatmul.bf16.gmra.mxu2 %v2518_v8  ;;  %v722_v63 = vrot.slane %v720_v16, 1  ;;  %v556_v60 = vunpack.c.l.b16 %v394_v26 }
 0x282   : > { %12306 = vst [vmem:[#allocation7_spill] sm:$0xff] %v10551_v58  ;;  %v717_v58 = vrot.slane %v715_v24, 1  ;;  %v2773_v44 = vsel %vm579_vm0, %v2768_v29, %v2772_v57  ;;  %v2243_v24 = vadd.f32 %v12308_v47, %v10397_v31  ;;  %v9176_v29 = vld [vmem:[#allocation2 + $0x30] sm:$0xff]  }
 0x283   : > { %3415 = vmatmul.bf16.gmra.mxu3 %v2773_v44  ;;  %v10570_v56 = vpop.f32.mrf.mxu1  ;;  %v2716_v44 = vunpack.c.l.b16 %v2554_v38  ;;  %v10575_v57 = vpack.c.b16 %v556_v60, %v556_v60 }
 0x284   : > { %v718_v35 = vor.u32 %v717_v58, %v713_v2  ;;  %v2777_v58 = vshll.u32 %v9176_v29, 16 }
 0x285   : > { %v2338_v6 = vpop.f32.mrf.mxu0  ;;  %v10578_v59 = vpack.c.b16 %v2716_v44, %v2716_v44 }
 0x286   : > { %v2339_v14 = vadd.f32 %v2338_v6, %v2240_v15  ;;  %v723_v40 = vsel %vm579_vm0, %v718_v35, %v722_v63  ;;  %v909_v15 = vrot.slane %v10575_v57, 1  ;;  %v9398_v6 = vld [vmem:[#allocation2 + $0x90] sm:$0xff]   ;;  %v2779_v35 = vrot.slane %v2777_v58, 1 }
 0x287   : > { %v727_v2 = vshll.u32 %v9398_v6, 16  ;;  %v2782_v63 = vshll.u32 %v10578_v59, 16  ;;  %v725_v38 = vshrl.u32 %v9398_v6, 16  ;;  %v10600_v6 = vld [vmem:[#allocation2 + $0x3c] sm:$0xf0] }
 0x288   : > { %v10568_v25 = vadd.f32 %v10495_v51, %v2339_v14  ;;  %v9447_v51 = vor.u32 %v9446_v17, %v10196_v54  ;;  %v2775_v14 = vshrl.u32 %v9176_v29, 16 }
 0x289   : > { %v2784_v17 = vrot.slane %v2782_v63, 1  ;;  %v729_v47 = vrot.slane %v727_v2, 1  ;;  %v2555_v2 = vld [vmem:[#allocation2 + $0x44] sm:$0x1] }
 0x28a   : > { %v908_v31 = vrot.slane %v9447_v51, 1  ;;  %v2780_v60 = vor.u32 %v2779_v35, %v2775_v14  ;;  %v2717_v35 = vunpack.c.l.b16 %v2555_v2 }
 0x28b   : > { %v10583_v16 = vpop.f32.mrf.mxu1 }
 0x28c   : > { %v910_v54 = vsel %vm868_vm1, %v908_v31, %v909_v15  ;;  %v2522_v15 = vld [vmem:[#allocation2 + $0x3c] sm:$0xff]  }
 0x28d   : > { %v2341_v61 = vpop.f32.mrf.mxu0 }
 0x28e   : > { %v2342_v8 = vadd.f32 %v2341_v61, %v2243_v24  ;;  %v732_v61 = vshll.u32 %v10546_v11, 16 }
 0x290   : > { %v10581_v26 = vadd.f32 %v10517_v62, %v2342_v8  ;;  %2380 = vmatmul.bf16.gmra.mxu0 %v723_v40  ;;  %v2245_v62 = vadd.f32 %v10183_v49, %v10410_v43  ;;  %v2785_v40 = vsel %vm579_vm0, %v2780_v60, %v2784_v17  ;;  %v395_v8 = vld [vmem:[#allocation2 + $0xb0] sm:$0x1]  ;;  %v8575_v49 = vld [vmem:[%s12217_s1 + $0x208] sm:$0xff]  ;;  %v730_v43 = vor.u32 %v729_v47, %v725_v38 }
 0x291   : > { %2489 = vmatmul.bf16.gmra.mxu1 %v910_v54  ;;  %3321 = vmatmul.bf16.gmra.mxu2 %v9176_v29  ;;  %v734_v31 = vrot.slane %v732_v61, 1  ;;  %v557_v11 = vunpack.c.l.b16 %v395_v8  ;;  %v12309_v29 = vld [vmem:[#allocation37_spill] sm:$0xff]  ;;  %v9134_v54 = vld [vmem:[#allocation2 + $0xa8] sm:$0xf0]  ;;  %v9135_v60 = vld [vmem:[#allocation2 + $0xa8] sm:$0xe]  ;;  %v10607_v47 = vpack.c.b16 %v2717_v35, %v2717_v35 }
 0x292   : > { %3507 = vmatpush.bf16.msrb.mxu0 %v8575_v49  ;;  %v2248_v14 = vadd.f32 %v12309_v29, %v10422_v3  ;;  %v9136_v38 = vor.u32 %v9135_v60, %v9134_v54  ;;  %v8620_v8 = vld [vmem:[%s12218_s2 + $0x130] sm:$0xff]  ;;  %v739_v49 = vshll.u32 %v10194_v50, 16  ;;  %v744_v54 = vshll.u32 %v10575_v57, 16 }
 0x293   : > { %3420 = vmatmul.bf16.gmra.mxu3 %v2785_v40  ;;  %v10595_v58 = vpop.f32.mrf.mxu1  ;;  %v735_v63 = vsel %vm579_vm0, %v730_v43, %v734_v31  ;;  %v2787_v43 = vshrl.u32 %v2522_v15, 16  ;;  %5574 = vmatpush.bf16.msra.mxu2 %v8620_v8  ;;  %v9449_v57 = vld [vmem:[#allocation2 + $0xb4] sm:$0xe]  ;;  %v2556_v8 = vld [vmem:[#allocation2 + $0x50] sm:$0x1] }
 0x294   : > { %v911_v3 = vrot.slane %v9136_v38, 1  ;;  %v8612_v38 = vld [vmem:[%s12218_s2 + $0xf0] sm:$0xff] }
 0x295   : > { %v2343_v24 = vpop.f32.mrf.mxu0  ;;  %5485 = vmatpush.bf16.msra.mxu1 %v8612_v38 }
 0x296   : > { %v2344_v44 = vadd.f32 %v2343_v24, %v2245_v62  ;;  %v10605_v62 = vpack.c.b16 %v557_v11, %v557_v11  ;;  %v2789_v24 = vshll.u32 %v2522_v15, 16  ;;  %v2794_v11 = vshll.u32 %v10607_v47, 16 }
 0x298   : > { %v10593_v51 = vadd.f32 %v10535_v12, %v2344_v44  ;;  %v912_v44 = vrot.slane %v10605_v62, 1  ;;  %v2791_v31 = vrot.slane %v2789_v24, 1  ;;  %v2796_v29 = vrot.slane %v2794_v11, 1  ;;  %v396_v24 = vld [vmem:[#allocation2 + $0xbc] sm:$0x1] }
 0x29a   : > { %v913_v2 = vsel %vm868_vm1, %v911_v3, %v912_v44  ;;  %v558_v44 = vunpack.c.l.b16 %v396_v24 }
 0x29b   : > { %v10612_v40 = vpop.f32.mrf.mxu1 }
 0x29d   : > { %v2346_v12 = vpop.f32.mrf.mxu0 }
 0x29e   : > { %v2347_v17 = vadd.f32 %v2346_v12, %v2248_v14  ;;  %v2250_v14 = vadd.f32 %v10204_v21, %v10431_v48  ;;  %v737_v12 = vshrl.u32 %v10194_v50, 16  ;;  %v746_v48 = vrot.slane %v744_v54, 1 }
 0x2a0   : > { %v10610_v61 = vadd.f32 %v10553_v34, %v2347_v17  ;;  %2385 = vmatmul.bf16.gmra.mxu0 %v735_v63  ;;  %v2792_v34 = vor.u32 %v2791_v31, %v2787_v43  ;;  %v741_v63 = vrot.slane %v739_v49, 1  ;;  %v12311_v49 = vld [vmem:[#allocation40_spill] sm:$0xff] }
 0x2a1   : > { %2494 = vmatmul.bf16.gmra.mxu1 %v913_v2  ;;  %3326 = vmatmul.bf16.gmra.mxu2 %v2522_v15  ;;  %v2253_v43 = vadd.f32 %v12311_v49, %v10443_v55  ;;  %v9177_v2 = vld [vmem:[#allocation2 + $0x48] sm:$0xff]   ;;  %v2718_v15 = vunpack.c.l.b16 %v2556_v8 }
 0x2a2   : > { %v2797_v60 = vsel %vm579_vm0, %v2792_v34, %v2796_v29  ;;  %v742_v50 = vor.u32 %v741_v63, %v737_v12  ;;  %v10637_v29 = vpack.c.b16 %v558_v44, %v558_v44  ;;  %v2799_v38 = vshrl.u32 %v9177_v2, 16 }
 0x2a3   : > { %3425 = vmatmul.bf16.gmra.mxu3 %v2797_v60  ;;  %v10632_v21 = vpop.f32.mrf.mxu1  ;;  %v9399_v60 = vld [vmem:[#allocation2 + $0xa8] sm:$0xff]  }
 0x2a4   : > { %12310 = vst [vmem:[#allocation24_spill] sm:$0xff] %v10632_v21  ;;  %v747_v11 = vsel %vm579_vm0, %v742_v50, %v746_v48  ;;  %v915_v54 = vrot.slane %v10637_v29, 1  ;;  %v749_v8 = vshrl.u32 %v9399_v60, 16 }
 0x2a5   : > { %v2348_v35 = vpop.f32.mrf.mxu0 }
 0x2a6   : > { %v2349_v17 = vadd.f32 %v2348_v35, %v2250_v14  ;;  %v10640_v14 = vpack.c.b16 %v2718_v15, %v2718_v15  ;;  %v2801_v35 = vshll.u32 %v9177_v2, 16 }
 0x2a8   : > { %v10630_v3 = vadd.f32 %v10570_v56, %v2349_v17  ;;  %v9450_v56 = vor.u32 %v9449_v57, %v10240_v52  ;;  %v751_v17 = vshll.u32 %v9399_v60, 16  ;;  %v2803_v24 = vrot.slane %v2801_v35, 1  ;;  %v8574_v35 = vld [vmem:[%s12217_s1 + $0x200] sm:$0xff]  ;;  %v10661_v60 = vld [vmem:[#allocation2 + $0x54] sm:$0xf0] }
 0x2a9   : > { %v2806_v50 = vshll.u32 %v10640_v14, 16  ;;  %3508 = vmatpush.bf16.msrb.mxu0 %v8574_v35  ;;  %v12316_v35 = vld [vmem:[#allocation46_spill] sm:$0xff] }
 0x2aa   : > { %v914_v55 = vrot.slane %v9450_v56, 1  ;;  %v2804_v48 = vor.u32 %v2803_v24, %v2799_v38  ;;  %v753_v49 = vrot.slane %v751_v17, 1  ;;  %v2557_v17 = vld [vmem:[#allocation2 + $0x5c] sm:$0x1]  ;;  %v12314_v38 = vld [vmem:[#allocation44_spill] sm:$0xff] }
 0x2ab   : > { %v10645_v63 = vpop.f32.mrf.mxu1  ;;  %v2808_v44 = vrot.slane %v2806_v50, 1  ;;  %v2258_v24 = vadd.f32 %v12314_v38, %v10460_v41  ;;  %v2719_v50 = vunpack.c.l.b16 %v2557_v17 }
 0x2ac   : > { %v916_v52 = vsel %vm868_vm1, %v914_v55, %v915_v54  ;;  %v754_v55 = vor.u32 %v753_v49, %v749_v8  ;;  %v2526_v54 = vld [vmem:[#allocation2 + $0x54] sm:$0xff]  }
 0x2ad   : > { %v2351_v31 = vpop.f32.mrf.mxu0  ;;  %v10668_v49 = vpack.c.b16 %v2719_v50, %v2719_v50 }
 0x2ae   : > { %v2352_v34 = vadd.f32 %v2351_v31, %v2253_v43  ;;  %v756_v31 = vshll.u32 %v10605_v62, 16 }
 0x2b0   : > { %v10643_v12 = vadd.f32 %v10583_v16, %v2352_v34  ;;  %2390 = vmatmul.bf16.gmra.mxu0 %v747_v11  ;;  %v12312_v16 = vld [vmem:[#allocation43_spill] sm:$0xff]  ;;  %v2809_v11 = vsel %vm579_vm0, %v2804_v48, %v2808_v44  ;;  %v9137_v48 = vld [vmem:[#allocation2 + $0xc0] sm:$0xf0]  ;;  %v9138_v44 = vld [vmem:[#allocation2 + $0xc0] sm:$0xe] }
 0x2b1   : > { %2499 = vmatmul.bf16.gmra.mxu1 %v916_v52  ;;  %v2255_v57 = vadd.f32 %v12312_v16, %v10456_v13  ;;  %3331 = vmatmul.bf16.gmra.mxu2 %v9177_v2  ;;  %v397_v34 = vld [vmem:[#allocation2 + $0xc8] sm:$0x1]  ;;  %v758_v13 = vrot.slane %v756_v31, 1  ;;  %v9139_v8 = vor.u32 %v9138_v44, %v9137_v48  ;;  %v761_v48 = vshrl.u32 %v12316_v35, 16 }
 0x2b2   : > { %v559_v62 = vunpack.c.l.b16 %v397_v34 }
 0x2b3   : > { %3430 = vmatmul.bf16.gmra.mxu3 %v2809_v11  ;;  %v10656_v56 = vpop.f32.mrf.mxu1  ;;  %v759_v52 = vsel %vm579_vm0, %v754_v55, %v758_v13  ;;  %v917_v41 = vrot.slane %v9139_v8, 1  ;;  %v763_v55 = vshll.u32 %v12316_v35, 16  ;;  %v2811_v13 = vshrl.u32 %v2526_v54, 16 }
 0x2b4   : > { %12313 = vst [vmem:[#allocation32_spill] sm:$0xff] %v10656_v56 }
 0x2b5   : > { %v2353_v43 = vpop.f32.mrf.mxu0  ;;  %v765_v44 = vrot.slane %v763_v55, 1 }
 0x2b6   : > { %v10654_v15 = vadd.f32 %v2353_v43, %v2255_v57  ;;  %v10666_v57 = vpack.c.b16 %v559_v62, %v559_v62  ;;  %v2813_v43 = vshll.u32 %v2526_v54, 16  ;;  %v2818_v62 = vshll.u32 %v10668_v49, 16 }
 0x2b8   : > { %v918_v34 = vrot.slane %v10666_v57, 1  ;;  %v2815_v17 = vrot.slane %v2813_v43, 1  ;;  %v2820_v50 = vrot.slane %v2818_v62, 1  ;;  %v8619_v43 = vld [vmem:[%s12218_s2 + $0x128] sm:$0xff]  ;;  %v9178_v62 = vld [vmem:[#allocation2 + $0x60] sm:$0xff]  }
 0x2b9   : > { %5575 = vmatpush.bf16.msra.mxu2 %v8619_v43 }
 0x2ba   : > { %v919_v38 = vsel %vm868_vm1, %v917_v41, %v918_v34  ;;  %v766_v34 = vor.u32 %v765_v44, %v761_v48  ;;  %v2823_v48 = vshrl.u32 %v9178_v62, 16 }
 0x2bb   : > { %v10673_v11 = vpop.f32.mrf.mxu1 }
 0x2bd   : > { %v2356_v2 = vpop.f32.mrf.mxu0 }
 0x2be   : > { %v2357_v16 = vadd.f32 %v2356_v2, %v2258_v24  ;;  %v2816_v24 = vor.u32 %v2815_v17, %v2811_v13 }
 0x2c0   : > { %v10671_v31 = vadd.f32 %v10612_v40, %v2357_v16  ;;  %2395 = vmatmul.bf16.gmra.mxu0 %v759_v52  ;;  %v12317_v40 = vld [vmem:[#allocation47_spill] sm:$0xff]  ;;  %v768_v16 = vshll.u32 %v10637_v29, 16  ;;  %v2821_v8 = vsel %vm579_vm0, %v2816_v24, %v2820_v50  ;;  %v12321_v24 = vld [vmem:[#allocation21_spill] sm:$0xff] }
 0x2c1   : > { %2504 = vmatmul.bf16.gmra.mxu1 %v919_v38  ;;  %v2260_v2 = vadd.f32 %v12317_v40, %v10474_v1  ;;  %3336 = vmatmul.bf16.gmra.mxu2 %v2526_v54  ;;  %v8611_v1 = vld [vmem:[%s12218_s2 + $0xe8] sm:$0xff]  ;;  %v12320_v38 = vld [vmem:[#allocation20_spill] sm:$0xff]  ;;  %v12322_v54 = vld [vmem:[#allocation49_spill] sm:$0xff] }
 0x2c2   : > { %12315 = vst [vmem:[#allocation27_spill] sm:$0xff] %v10671_v31  ;;  %v770_v35 = vrot.slane %v768_v16, 1  ;;  %5486 = vmatpush.bf16.msra.mxu1 %v8611_v1  ;;  %v2558_v29 = vld [vmem:[#allocation2 + $0x68] sm:$0x1]  ;;  %v1923_v50 = vadd.f32 %v12321_v24, %v12320_v38  ;;  %v9400_v16 = vld [vmem:[#allocation2 + $0xc0] sm:$0xff]  }
 0x2c3   : > { %3435 = vmatmul.bf16.gmra.mxu3 %v2821_v8  ;;  %v10689_v41 = vpop.f32.mrf.mxu1  ;;  %v2720_v55 = vunpack.c.l.b16 %v2558_v29  ;;  %v775_v43 = vshll.u32 %v9400_v16, 16  ;;  %v10712_v31 = vld [vmem:[#allocation2 + $0x6c] sm:$0xf0] }
 0x2c4   : > { %12319 = vst [vmem:[#allocation9_spill] sm:$0xff] %v10689_v41  ;;  %v771_v17 = vsel %vm579_vm0, %v766_v34, %v770_v35  ;;  %v12324_v35 = vld [vmem:[#allocation16_spill] sm:$0xff] }
 0x2c5   : > { %v2358_v52 = vpop.f32.mrf.mxu0  ;;  %v2022_v29 = vadd.f32 %v12324_v35, %v1923_v50  ;;  %v777_v41 = vrot.slane %v775_v43, 1  ;;  %v398_v50 = vld [vmem:[#allocation2 + $0xd4] sm:$0x1]  ;;  %v12327_v35 = vld [vmem:[#allocation25_spill] sm:$0xff] }
 0x2c6   : > { %v10684_v56 = vadd.f32 %v2358_v52, %v2260_v2  ;;  %v10698_v2 = vpack.c.b16 %v2720_v55, %v2720_v55  ;;  %v2825_v52 = vshll.u32 %v9178_v62, 16 }
 0x2c8   : > { %12318 = vst [vmem:[#allocation29_spill] sm:$0xff] %v10684_v56  ;;  %v2830_v44 = vshll.u32 %v10698_v2, 16  ;;  %v2827_v34 = vrot.slane %v2825_v52, 1  ;;  %v2530_v52 = vld [vmem:[#allocation2 + $0x6c] sm:$0xff]  }
 0x2ca   : > { %v2832_v38 = vrot.slane %v2830_v44, 1  ;;  %v2828_v24 = vor.u32 %v2827_v34, %v2823_v48  ;;  %v2559_v44 = vld [vmem:[#allocation2 + $0x74] sm:$0x1] }
 0x2cc   : > { %v10704_v1 = vpop.f32.mrf.mxu1 }
 0x2cd   : > { %v2361_v13 = vpop.f32.mrf.mxu0 }
 0x2ce   : > { %v2362_v40 = vadd.f32 %v2361_v13, %v12322_v54  ;;  %v12325_v13 = vld [vmem:[#allocation51_spill] sm:$0xff]  ;;  %v773_v54 = vshrl.u32 %v9400_v16, 16  ;;  %v2721_v16 = vunpack.c.l.b16 %v2559_v44 }
 0x2cf   : > { %v2265_v55 = vadd.f32 %v12325_v13, %v2022_v29  ;;  %v12328_v29 = vld [vmem:[#allocation26_spill] sm:$0xff] }
 0x2d0   : > { %v10701_v8 = vadd.f32 %v10645_v63, %v2362_v40  ;;  %2400 = vmatmul.bf16.gmra.mxu0 %v771_v17  ;;  %v780_v63 = vshll.u32 %v10666_v57, 16  ;;  %v2833_v17 = vsel %vm579_vm0, %v2828_v24, %v2832_v38  ;;  %v560_v57 = vunpack.c.l.b16 %v398_v50  ;;  %v10722_v24 = vpop.f32.mrf.mxu3 }
 0x2d1   : > { %3341 = vmatmul.bf16.gmra.mxu2 %v9178_v62  ;;  %v10720_v62 = vpack.c.b16 %v2721_v16, %v2721_v16 }
 0x2d2   : > { %12323 = vst [vmem:[#allocation33_spill] sm:$0xff] %v10701_v8  ;;  %v778_v8 = vor.u32 %v777_v41, %v773_v54  ;;  %v782_v56 = vrot.slane %v780_v63, 1  ;;  %v2837_v41 = vshll.u32 %v2530_v52, 16 }
 0x2d3   : > { %3440 = vmatmul.bf16.gmra.mxu3 %v2833_v17  ;;  %v2842_v54 = vshll.u32 %v10720_v62, 16  ;;  %v12330_v17 = vld [vmem:[#allocation19_spill] sm:$0xff] }
 0x2d4   : > { %v10714_v48 = vpop.f32.mrf.mxu1  ;;  %v783_v34 = vsel %vm579_vm0, %v778_v8, %v782_v56  ;;  %v787_v56 = vshll.u32 %v10485_v39, 16  ;;  %v10729_v8 = vpack.c.b16 %v560_v57, %v560_v57  ;;  %v2839_v63 = vrot.slane %v2837_v41, 1  ;;  %v8618_v41 = vld [vmem:[%s12218_s2 + $0x120] sm:$0xff] }
 0x2d5   : > { %v2363_v21 = vpop.f32.mrf.mxu0  ;;  %12326 = vst [vmem:[#allocation35_spill] sm:$0xff] %v10714_v48  ;;  %v2844_v44 = vrot.slane %v2842_v54, 1  ;;  %5576 = vmatpush.bf16.msra.mxu2 %v8618_v41 }
 0x2d6   : > { %v10710_v40 = vadd.f32 %v2363_v21, %v2265_v55  ;;  %v1928_v21 = vadd.f32 %v12328_v29, %v12327_v35  ;;  %v2835_v55 = vshrl.u32 %v2530_v52, 16  ;;  %v792_v29 = vshll.u32 %v10729_v8, 16 }
 0x2d8   : > { %v2027_v50 = vadd.f32 %v12330_v17, %v1928_v21  ;;  %v2840_v16 = vor.u32 %v2839_v63, %v2835_v55  ;;  %v2312_v21 = vpop.f32.mrf.mxu3 }
 0x2da   : > { %v2845_v48 = vsel %vm579_vm0, %v2840_v16, %v2844_v44  ;;  %v12332_v44 = vld [vmem:[#allocation30_spill] sm:$0xff]  ;;  %v12333_v16 = vld [vmem:[#allocation31_spill] sm:$0xff] }
 0x2dd   : > { %v2366_v43 = vpop.f32.mrf.mxu0 }
 0x2de   : > { %v2367_v38 = vadd.f32 %v2366_v43, %v10298_v37  ;;  %v10732_v37 = vpop.f32.mrf.mxu2  ;;  %v2270_v43 = vadd.f32 %v10304_v19, %v2027_v50  ;;  %v794_v19 = vrot.slane %v792_v29, 1  ;;  %v9179_v50 = vld [vmem:[#allocation2 + $0x78] sm:$0xff]  }
 0x2df   : > { %v2847_v41 = vshrl.u32 %v9179_v50, 16 }
 0x2e0   : > { %v10725_v13 = vadd.f32 %v10673_v11, %v2367_v38  ;;  %2405 = vmatmul.bf16.gmra.mxu0 %v783_v34  ;;  %v785_v11 = vshrl.u32 %v10485_v39, 16  ;;  %v789_v34 = vrot.slane %v787_v56, 1  ;;  %v2475_v38 = vpop.f32.mrf.mxu1  ;;  %v2560_v39 = vld [vmem:[#allocation2 + $0x80] sm:$0x1]  ;;  %v2314_v21 = vpop.f32.mrf.mxu3 }
 0x2e1   : > { %3346 = vmatmul.bf16.gmra.mxu2 %v2530_v52  ;;  %v2722_v56 = vunpack.c.l.b16 %v2560_v39  ;;  %v9184_v39 = vld [vmem:[#allocation2 + $0x18] sm:$0xf0]  ;;  %v2534_v21 = vld [vmem:[#allocation2 + $0x84] sm:$0xff]  }
 0x2e2   : > { %12329 = vst [vmem:[#allocation37_spill] sm:$0xff] %v10725_v13  ;;  %v790_v55 = vor.u32 %v789_v34, %v785_v11  ;;  %v2849_v34 = vshll.u32 %v9179_v50, 16 }
 0x2e3   : > { %3445 = vmatmul.bf16.gmra.mxu3 %v2845_v48  ;;  %v8610_v48 = vld [vmem:[%s12218_s2 + $0xe0] sm:$0xff] }
 0x2e4   : > { %v795_v17 = vsel %vm579_vm0, %v790_v55, %v794_v19  ;;  %5487 = vmatpush.bf16.msra.mxu1 %v8610_v48  ;;  %v2851_v19 = vrot.slane %v2849_v34, 1  ;;  %v3039_v48 = vrot.slane %v10512_v5, 1  ;;  %v2861_v5 = vshll.u32 %v2534_v21, 16 }
 0x2e5   : > { %v2368_v35 = vpop.f32.mrf.mxu0 }
 0x2e6   : > { %v10738_v57 = vadd.f32 %v2368_v35, %v2270_v43  ;;  %v2069_v54 = vpop.f32.mrf.mxu2  ;;  %v1933_v43 = vadd.f32 %v12333_v16, %v12332_v44  ;;  %v10750_v35 = vpack.c.b16 %v2722_v56, %v2722_v56  ;;  %v2852_v16 = vor.u32 %v2851_v19, %v2847_v41  ;;  %v2561_v41 = vld [vmem:[#allocation2 + $0x8c] sm:$0x1] }
 0x2e7   : > { %v2723_v19 = vunpack.c.l.b16 %v2561_v41 }
 0x2e8   : > { %12331 = vst [vmem:[#allocation40_spill] sm:$0xff] %v10738_v57  ;;  %v10752_v11 = vpop.f32.mrf.mxu1  ;;  %v2854_v55 = vshll.u32 %v10750_v35, 16 }
 0x2e9   : > { %12334 = vst [vmem:[#allocation43_spill] sm:$0xff] %v10752_v11 }
 0x2ea   : > { %v2856_v56 = vrot.slane %v2854_v55, 1 }
 0x2ed   : > { %v2371_v63 = vpop.f32.mrf.mxu0 }
 0x2ee   : > { %v2372_v52 = vadd.f32 %v2371_v63, %v10318_v22  ;;  %v12335_v22 = vld [vmem:[#allocation23_spill] sm:$0xff]  ;;  %v9185_v63 = vld [vmem:[#allocation2 + $0x18] sm:$0xe]  ;;  %v2071_v44 = vpop.f32.mrf.mxu2 }
 0x2ef   : > { %v2032_v54 = vadd.f32 %v12335_v22, %v1933_v43  ;;  %v9186_v13 = vor.u32 %v9185_v63, %v9184_v39  ;;  %v10764_v22 = vld [vmem:[#allocation2 + $0x84] sm:$0xf0]  ;;  %v12337_v39 = vld [vmem:[#allocation36_spill] sm:$0xff]  ;;  %v2859_v44 = vshrl.u32 %v2534_v21, 16 }
 0x2f0   : > { %v10755_v29 = vadd.f32 %v10704_v1, %v2372_v52  ;;  %2410 = vmatmul.bf16.gmra.mxu0 %v795_v17  ;;  %v2857_v1 = vsel %vm579_vm0, %v2852_v16, %v2856_v56  ;;  %v2480_v34 = vpop.f32.mrf.mxu1 }
 0x2f1   : > { %v2275_v11 = vadd.f32 %v10322_v36, %v2032_v54  ;;  %3351 = vmatmul.bf16.gmra.mxu2 %v9179_v50  ;;  %v3038_v52 = vrot.slane %v9186_v13, 1  ;;  %v9452_v50 = vld [vmem:[#allocation2 + $0x24] sm:$0xe]  ;;  %v10770_v13 = vpack.c.b16 %v2723_v19, %v2723_v19 }
 0x2f3   : > { %3450 = vmatmul.bf16.gmra.mxu3 %v2857_v1  ;;  %v3040_v54 = vsel %vm868_vm1, %v3038_v52, %v3039_v48  ;;  %v2866_v56 = vshll.u32 %v10770_v13, 16  ;;  %v2863_v1 = vrot.slane %v2861_v5, 1 }
 0x2f5   : > { %v2373_v57 = vpop.f32.mrf.mxu0  ;;  %v2868_v48 = vrot.slane %v2866_v56, 1 }
 0x2f6   : > { %v10761_v17 = vadd.f32 %v2373_v57, %v2275_v11  ;;  %v3411_v43 = vpop.f32.mrf.mxu3  ;;  %v3312_v55 = vpop.f32.mrf.mxu2  ;;  %v1938_v57 = vadd.f32 %v10436_v46, %v12337_v39  ;;  %v2864_v46 = vor.u32 %v2863_v1, %v2859_v44 }
 0x2f7   : > { %v12339_v43 = vld [vmem:[#allocation28_spill] sm:$0xff] }
 0x2f8   : > { %12336 = vst [vmem:[#allocation44_spill] sm:$0xff] %v10761_v17  ;;  %v2037_v55 = vadd.f32 %v12339_v43, %v1938_v57  ;;  %v10776_v41 = vpop.f32.mrf.mxu1 }
 0x2f9   : > { %12340 = vst [vmem:[#allocation47_spill] sm:$0xff] %v10776_v41 }
 0x2fd   : > { %v2376_v36 = vpop.f32.mrf.mxu0 }
 0x2fe   : > { %v2377_v11 = vadd.f32 %v2376_v36, %v10331_v4  ;;  %v3413_v16 = vpop.f32.mrf.mxu3  ;;  %v3314_v52 = vpop.f32.mrf.mxu2  ;;  %v2280_v4 = vadd.f32 %v10340_v20, %v2037_v55  ;;  %v9453_v36 = vor.u32 %v9452_v50, %v10537_v30  ;;  %v9180_v30 = vld [vmem:[#allocation2 + $0x90] sm:$0xff]   ;;  %v12342_v50 = vld [vmem:[#allocation38_spill] sm:$0xff] }
 0x2ff   : > { %v2562_v16 = vld [vmem:[#allocation2 + $0x98] sm:$0x1]  ;;  %v12343_v55 = vld [vmem:[#allocation10_spill] sm:$0xff] }
 0x300   : > { %v10772_v63 = vadd.f32 %v2475_v38, %v2377_v11  ;;  %3509 = vmatmul.bf16.vlgmr.msrb.gmra.mxu0 %v3040_v54  ;;  %v2869_v38 = vsel %vm579_vm0, %v2864_v46, %v2868_v48  ;;  %v3041_v39 = vrot.slane %v9453_v36, 1  ;;  %v3042_v11 = vrot.slane %v10548_v27, 1  ;;  %v2485_v43 = vpop.f32.mrf.mxu1  ;;  %v8617_v27 = vld [vmem:[%s12218_s2 + $0x118] sm:$0xff] }
 0x301   : > { %3356 = vmatmul.bf16.gmra.mxu2 %v2534_v21  ;;  %v2724_v44 = vunpack.c.l.b16 %v2562_v16  ;;  %v1943_v52 = vadd.f32 %v12343_v55, %v12342_v50  ;;  %v2873_v46 = vshll.u32 %v9180_v30, 16  ;;  %v2871_v36 = vshrl.u32 %v9180_v30, 16  ;;  %v9188_v16 = vld [vmem:[#allocation2 + $0x30] sm:$0xe] }
 0x302   : > { %12338 = vst [vmem:[#allocation46_spill] sm:$0xff] %v10772_v63  ;;  %v3043_v20 = vsel %vm868_vm1, %v3041_v39, %v3042_v11  ;;  %5577 = vmatpush.bf16.msra.mxu2 %v8617_v27  ;;  %v12345_v11 = vld [vmem:[#allocation34_spill] sm:$0xff] }
 0x303   : > { %3455 = vmatmul.bf16.gmra.mxu3 %v2869_v38  ;;  %v10793_v21 = vpack.c.b16 %v2724_v44, %v2724_v44 }
 0x305   : > { %v2378_v19 = vpop.f32.mrf.mxu0  ;;  %v2878_v38 = vshll.u32 %v10793_v21, 16 }
 0x306   : > { %v10781_v54 = vadd.f32 %v2378_v19, %v2280_v4  ;;  %v3416_v57 = vpop.f32.mrf.mxu3  ;;  %v3317_v5 = vpop.f32.mrf.mxu2  ;;  %v8609_v19 = vld [vmem:[%s12218_s2 + $0xd8] sm:$0xff] }
 0x307   : > { %v10784_v56 = vadd.f32 %v3416_v57, %v3317_v5  ;;  %v2042_v57 = vadd.f32 %v12345_v11, %v1943_v52  ;;  %v9187_v5 = vld [vmem:[#allocation2 + $0x30] sm:$0xf0]  ;;  %5488 = vmatpush.bf16.msra.mxu1 %v8609_v19  ;;  %v3045_v11 = vrot.slane %v10578_v59, 1 }
 0x308   : > { %12341 = vst [vmem:[#allocation20_spill] sm:$0xff] %v10781_v54 }
 0x309   : > { %v2285_v50 = vadd.f32 %v10351_v10, %v2042_v57  ;;  %v2563_v10 = vld [vmem:[#allocation2 + $0xa4] sm:$0x1] }
 0x30a   : > { %v2725_v57 = vunpack.c.l.b16 %v2563_v10 }
 0x30d   : > { %v2381_v1 = vpop.f32.mrf.mxu0 }
 0x30e   : > { %v2382_v48 = vadd.f32 %v2381_v1, %v10346_v32  ;;  %v3418_v39 = vpop.f32.mrf.mxu3  ;;  %v2875_v32 = vrot.slane %v2873_v46, 1  ;;  %v3319_v44 = vpop.f32.mrf.mxu2  ;;  %v2880_v1 = vrot.slane %v2878_v38, 1  ;;  %v2538_v38 = vld [vmem:[#allocation2 + $0x9c] sm:$0xff]  }
 0x30f   : > { %v10808_v46 = vpop.f32.mrf.mxu1  ;;  %v2885_v59 = vshll.u32 %v2538_v38, 16 }
 0x310   : > { %v10795_v4 = vadd.f32 %v2480_v34, %v2382_v48  ;;  %3514 = vmatmul.bf16.gmra.mxu0 %v3043_v20  ;;  %v10802_v34 = vadd.f32 %v3418_v39, %v3319_v44  ;;  %v2876_v20 = vor.u32 %v2875_v32, %v2871_v36  ;;  %v9189_v48 = vor.u32 %v9188_v16, %v9187_v5  ;;  %v10811_v39 = vld [vmem:[#allocation2 + $0x9c] sm:$0xf0]  ;;  %v12348_v44 = vld [vmem:[#allocation41_spill] sm:$0xff] }
 0x311   : > { %12347 = vst [vmem:[#allocation16_spill] sm:$0xff] %v10808_v46  ;;  %3361 = vmatmul.bf16.gmra.mxu2 %v9180_v30  ;;  %v2887_v46 = vrot.slane %v2885_v59, 1  ;;  %v3048_v59 = vrot.slane %v10607_v47, 1 }
 0x312   : > { %12344 = vst [vmem:[#allocation21_spill] sm:$0xff] %v10795_v4  ;;  %v2881_v27 = vsel %vm579_vm0, %v2876_v20, %v2880_v1  ;;  %v3044_v52 = vrot.slane %v9189_v48, 1  ;;  %v12349_v1 = vld [vmem:[#allocation11_spill] sm:$0xff] }
 0x313   : > { %3460 = vmatmul.bf16.gmra.mxu3 %v2881_v27  ;;  %v1948_v20 = vadd.f32 %v12349_v1, %v12348_v44  ;;  %v2883_v27 = vshrl.u32 %v2538_v38, 16 }
 0x314   : > { %v3046_v16 = vsel %vm868_vm1, %v3044_v52, %v3045_v11 }
 0x315   : > { %v2383_v55 = vpop.f32.mrf.mxu0 }
 0x316   : > { %v10806_v41 = vadd.f32 %v2383_v55, %v2285_v50  ;;  %v3421_v19 = vpop.f32.mrf.mxu3  ;;  %v3322_v36 = vpop.f32.mrf.mxu2  ;;  %v9455_v50 = vld [vmem:[#allocation2 + $0x3c] sm:$0xe]  ;;  %v10819_v55 = vpack.c.b16 %v2725_v57, %v2725_v57 }
 0x317   : > { %v10813_v32 = vadd.f32 %v3421_v19, %v3322_v36  ;;  %v2490_v36 = vpop.f32.mrf.mxu1 }
 0x318   : > { %12346 = vst [vmem:[#allocation49_spill] sm:$0xff] %v10806_v41  ;;  %v2890_v19 = vshll.u32 %v10819_v55, 16  ;;  %v12351_v41 = vld [vmem:[#allocation39_spill] sm:$0xff] }
 0x319   : > { %v2047_v52 = vadd.f32 %v12351_v41, %v1948_v20 }
 0x31a   : > { %v2892_v4 = vrot.slane %v2890_v19, 1 }
 0x31b   : > { %v2290_v57 = vadd.f32 %v10374_v0, %v2047_v52  ;;  %v12355_v52 = vld [vmem:[#allocation12_spill] sm:$0xff] }
 0x31d   : > { %v2386_v5 = vpop.f32.mrf.mxu0 }
 0x31e   : > { %v2387_v30 = vadd.f32 %v2386_v5, %v10366_v23  ;;  %v3423_v10 = vpop.f32.mrf.mxu3  ;;  %v3324_v11 = vpop.f32.mrf.mxu2  ;;  %v2888_v23 = vor.u32 %v2887_v46, %v2883_v27  ;;  %v2564_v46 = vld [vmem:[#allocation2 + $0xb0] sm:$0x1] }
 0x31f   : > { %v10825_v44 = vadd.f32 %v3423_v10, %v3324_v11  ;;  %v10833_v19 = vpop.f32.mrf.mxu1  ;;  %v2726_v0 = vunpack.c.l.b16 %v2564_v46  ;;  %v9190_v46 = vld [vmem:[#allocation2 + $0x48] sm:$0xf0] }
 0x320   : > { %v10821_v48 = vadd.f32 %v2485_v43, %v2387_v30  ;;  %3519 = vmatmul.bf16.gmra.mxu0 %v3046_v16  ;;  %v9456_v43 = vor.u32 %v9455_v50, %v10600_v6  ;;  %v2893_v16 = vsel %vm579_vm0, %v2888_v23, %v2892_v4  ;;  %12353 = vst [vmem:[#allocation26_spill] sm:$0xff] %v10833_v19  ;;  %v9181_v50 = vld [vmem:[#allocation2 + $0xa8] sm:$0xff]   ;;  %v12354_v4 = vld [vmem:[#allocation45_spill] sm:$0xff] }
 0x321   : > { %3366 = vmatmul.bf16.gmra.mxu2 %v2538_v38  ;;  %v1953_v11 = vadd.f32 %v12355_v52, %v12354_v4  ;;  %v10841_v23 = vpack.c.b16 %v2726_v0, %v2726_v0  ;;  %v2897_v47 = vshll.u32 %v9181_v50, 16  ;;  %v9191_v4 = vld [vmem:[#allocation2 + $0x48] sm:$0xe] }
 0x322   : > { %12350 = vst [vmem:[#allocation51_spill] sm:$0xff] %v10821_v48  ;;  %v3047_v30 = vrot.slane %v9456_v43, 1  ;;  %v2895_v43 = vshrl.u32 %v9181_v50, 16  ;;  %v9192_v19 = vor.u32 %v9191_v4, %v9190_v46  ;;  %v12359_v4 = vld [vmem:[#allocation50_spill] sm:$0xff]  ;;  %v921_v48 = vrot.slane %v10729_v8, 1 }
 0x323   : > { %3465 = vmatmul.bf16.gmra.mxu3 %v2893_v16  ;;  %v2902_v16 = vshll.u32 %v10841_v23, 16 }
 0x324   : > { %v3049_v6 = vsel %vm868_vm1, %v3047_v30, %v3048_v59  ;;  %v2899_v59 = vrot.slane %v2897_v47, 1  ;;  %v3050_v47 = vrot.slane %v9192_v19, 1  ;;  %v9458_v19 = vld [vmem:[#allocation2 + $0x54] sm:$0xe] }
 0x325   : > { %v2388_v5 = vpop.f32.mrf.mxu0  ;;  %v2904_v0 = vrot.slane %v2902_v16, 1  ;;  %v2542_v16 = vld [vmem:[#allocation2 + $0xb4] sm:$0xff]  }
 0x326   : > { %v10830_v1 = vadd.f32 %v2388_v5, %v2290_v57  ;;  %v3426_v41 = vpop.f32.mrf.mxu3  ;;  %v3327_v20 = vpop.f32.mrf.mxu2  ;;  %v8616_v5 = vld [vmem:[%s12218_s2 + $0x110] sm:$0xff] }
 0x327   : > { %v10835_v10 = vadd.f32 %v3426_v41, %v3327_v20  ;;  %v12357_v41 = vld [vmem:[#allocation42_spill] sm:$0xff]  ;;  %5578 = vmatpush.bf16.msra.mxu2 %v8616_v5  ;;  %v3051_v5 = vrot.slane %v10640_v14, 1 }
 0x328   : > { %12352 = vst [vmem:[#allocation25_spill] sm:$0xff] %v10830_v1  ;;  %v2052_v20 = vadd.f32 %v12357_v41, %v1953_v11  ;;  %v8608_v11 = vld [vmem:[%s12218_s2 + $0xd0] sm:$0xff]  ;;  %v2565_v41 = vld [vmem:[#allocation2 + $0xbc] sm:$0x1] }
 0x329   : > { %5489 = vmatpush.bf16.msra.mxu1 %v8608_v11  ;;  %v2907_v11 = vshrl.u32 %v2542_v16, 16 }
 0x32d   : > { %v2391_v27 = vpop.f32.mrf.mxu0 }
 0x32e   : > { %v2392_v38 = vadd.f32 %v2391_v27, %v10388_v33  ;;  %v3428_v30 = vpop.f32.mrf.mxu3  ;;  %v3329_v33 = vpop.f32.mrf.mxu2 }
 0x32f   : > { %v10850_v27 = vadd.f32 %v3428_v30, %v3329_v33  ;;  %v12360_v33 = vld [vmem:[#allocation13_spill] sm:$0xff] }
 0x330   : > { %v10843_v57 = vadd.f32 %v2490_v36, %v2392_v38  ;;  %3524 = vmatmul.bf16.gmra.mxu0 %v3049_v6  ;;  %v2900_v36 = vor.u32 %v2899_v59, %v2895_v43  ;;  %v2295_v6 = vadd.f32 %v10392_v42, %v2052_v20  ;;  %v2495_v38 = vpop.f32.mrf.mxu1  ;;  %v10860_v42 = vld [vmem:[#allocation2 + $0xb4] sm:$0xf0]  ;;  %v2727_v20 = vunpack.c.l.b16 %v2565_v41 }
 0x331   : > { %3371 = vmatmul.bf16.gmra.mxu2 %v9181_v50 }
 0x332   : > { %12356 = vst [vmem:[#allocation19_spill] sm:$0xff] %v10843_v57  ;;  %v2905_v57 = vsel %vm579_vm0, %v2900_v36, %v2904_v0  ;;  %v1958_v0 = vadd.f32 %v12360_v33, %v12359_v4  ;;  %v10868_v36 = vpack.c.b16 %v2727_v20, %v2727_v20 }
 0x333   : > { %3470 = vmatmul.bf16.gmra.mxu3 %v2905_v57  ;;  %v3052_v57 = vsel %vm868_vm1, %v3050_v47, %v3051_v5  ;;  %v12363_v47 = vld [vmem:[#allocation48_spill] sm:$0xff] }
 0x334   : > { %v2057_v5 = vadd.f32 %v12363_v47, %v1958_v0  ;;  %v3054_v0 = vrot.slane %v10668_v49, 1 }
 0x335   : > { %v2393_v52 = vpop.f32.mrf.mxu0 }
 0x336   : > { %v10854_v1 = vadd.f32 %v2393_v52, %v2295_v6  ;;  %v3431_v43 = vpop.f32.mrf.mxu3  ;;  %v3332_v30 = vpop.f32.mrf.mxu2  ;;  %v2909_v6 = vshll.u32 %v2542_v16, 16  ;;  %v2300_v20 = vadd.f32 %v10415_v9, %v2057_v5 }
 0x337   : > { %v10862_v59 = vadd.f32 %v3431_v43, %v3332_v30  ;;  %v2914_v43 = vshll.u32 %v10868_v36, 16 }
 0x338   : > { %12358 = vst [vmem:[#allocation30_spill] sm:$0xff] %v10854_v1  ;;  %v10870_v14 = vpop.f32.mrf.mxu1  ;;  %v2911_v41 = vrot.slane %v2909_v6, 1 }
 0x339   : > { %12361 = vst [vmem:[#allocation31_spill] sm:$0xff] %v10870_v14  ;;  %v2916_v4 = vrot.slane %v2914_v43, 1  ;;  %v9459_v14 = vor.u32 %v9458_v19, %v10661_v60  ;;  %v9182_v60 = vld [vmem:[#allocation2 + $0xc0] sm:$0xff]  }
 0x33a   : > { %v12365_v19 = vld [vmem:[#allocation14_spill] sm:$0xff]  ;;  %v2919_v49 = vshrl.u32 %v9182_v60, 16 }
 0x33b   : > { %v3053_v6 = vrot.slane %v9459_v14, 1  ;;  %v1963_v5 = vadd.f32 %v12365_v19, %v10300_v53  ;;  %v2921_v14 = vshll.u32 %v9182_v60, 16 }
 0x33d   : > { %v2396_v46 = vpop.f32.mrf.mxu0 }
 0x33e   : > { %v2397_v50 = vadd.f32 %v2396_v46, %v10404_v18  ;;  %v3433_v30 = vpop.f32.mrf.mxu3  ;;  %v3334_v1 = vpop.f32.mrf.mxu2  ;;  %v2912_v18 = vor.u32 %v2911_v41, %v2907_v11  ;;  %v2566_v11 = vld [vmem:[#allocation2 + $0xc8] sm:$0x1]  ;;  %v3055_v41 = vsel %vm868_vm1, %v3053_v6, %v3054_v0  ;;  %v9193_v6 = vld [vmem:[#allocation2 + $0x60] sm:$0xf0]  ;;  %v9194_v0 = vld [vmem:[#allocation2 + $0x60] sm:$0xe] }
 0x33f   : > { %v10876_v33 = vadd.f32 %v3433_v30, %v3334_v1  ;;  %v2728_v30 = vunpack.c.l.b16 %v2566_v11 }
 0x340   : > { %v10872_v52 = vadd.f32 %v2495_v38, %v2397_v50  ;;  %3529 = vmatmul.bf16.gmra.mxu0 %v3052_v57  ;;  %v2917_v38 = vsel %vm579_vm0, %v2912_v18, %v2916_v4  ;;  %v2500_v50 = vpop.f32.mrf.mxu1 }
 0x341   : > { %3376 = vmatmul.bf16.gmra.mxu2 %v2542_v16  ;;  %v10890_v16 = vpack.c.b16 %v2728_v30, %v2728_v30 }
 0x342   : > { %12362 = vst [vmem:[#allocation23_spill] sm:$0xff] %v10872_v52 }
 0x343   : > { %3475 = vmatmul.bf16.gmra.mxu3 %v2917_v38  ;;  %v2926_v38 = vshll.u32 %v10890_v16, 16 }
 0x345   : > { %v2398_v46 = vpop.f32.mrf.mxu0  ;;  %v2928_v30 = vrot.slane %v2926_v38, 1 }
 0x346   : > { %v10881_v57 = vadd.f32 %v2398_v46, %v2300_v20  ;;  %v3436_v47 = vpop.f32.mrf.mxu3  ;;  %v3337_v43 = vpop.f32.mrf.mxu2  ;;  %v2923_v20 = vrot.slane %v2921_v14, 1 }
 0x347   : > { %v10884_v1 = vadd.f32 %v3436_v47, %v3337_v43  ;;  %v12367_v47 = vld [vmem:[#allocation52_spill] sm:$0xff] }
 0x348   : > { %12364 = vst [vmem:[#allocation36_spill] sm:$0xff] %v10881_v57  ;;  %v2062_v43 = vadd.f32 %v12367_v47, %v1963_v5  ;;  %v2924_v57 = vor.u32 %v2923_v20, %v2919_v49  ;;  %v10896_v53 = vpop.f32.mrf.mxu1  ;;  %v8607_v5 = vld [vmem:[%s12218_s2 + $0xc8] sm:$0xff] }
 0x349   : > { %12368 = vst [vmem:[#allocation38_spill] sm:$0xff] %v10896_v53  ;;  %5490 = vmatpush.bf16.msra.mxu1 %v8607_v5 }
 0x34a   : > { %v2929_v19 = vsel %vm579_vm0, %v2924_v57, %v2928_v30  ;;  %v10911_v57 = vld [vmem:[#allocation2 + $0xcc] sm:$0xf0] }
 0x34d   : > { %v2401_v9 = vpop.f32.mrf.mxu0 }
 0x34e   : > { %v2402_v4 = vadd.f32 %v2401_v9, %v10429_v45  ;;  %v3438_v46 = vpop.f32.mrf.mxu3  ;;  %v3339_v11 = vpop.f32.mrf.mxu2 }
 0x34f   : > { %v10898_v45 = vadd.f32 %v3438_v46, %v3339_v11  ;;  %v2546_v46 = vld [vmem:[#allocation2 + $0xcc] sm:$0xff]  }
 0x350   : > { %v10892_v18 = vadd.f32 %v2500_v50, %v2402_v4  ;;  %3534 = vmatmul.bf16.gmra.mxu0 %v3055_v41  ;;  %v2305_v50 = vadd.f32 %v10438_v28, %v2062_v43  ;;  %v9195_v41 = vor.u32 %v9194_v0, %v9193_v6  ;;  %v8615_v4 = vld [vmem:[%s12218_s2 + $0x108] sm:$0xff]  ;;  %v3057_v28 = vrot.slane %v10698_v2, 1  ;;  %v2567_v43 = vld [vmem:[#allocation2 + $0xd4] sm:$0x1]  ;;  %v2505_v11 = vpop.f32.mrf.mxu1 }
 0x351   : > { %3381 = vmatmul.bf16.gmra.mxu2 %v9182_v60  ;;  %v2729_v6 = vunpack.c.l.b16 %v2567_v43  ;;  %v12370_v60 = vld [vmem:[#allocation17_spill] sm:$0xff] }
 0x352   : > { %12366 = vst [vmem:[#allocation28_spill] sm:$0xff] %v10892_v18  ;;  %5579 = vmatpush.bf16.msra.mxu2 %v8615_v4  ;;  %v3056_v49 = vrot.slane %v9195_v41, 1  ;;  %v2933_v4 = vshll.u32 %v2546_v46, 16 }
 0x353   : > { %3480 = vmatmul.bf16.gmra.mxu3 %v2929_v19  ;;  %v9461_v19 = vld [vmem:[#allocation2 + $0x6c] sm:$0xe]  ;;  %v10919_v2 = vpack.c.b16 %v2729_v6, %v2729_v6 }
 0x354   : > { %v3058_v30 = vsel %vm868_vm1, %v3056_v49, %v3057_v28 }
 0x355   : > { %v2403_v9 = vpop.f32.mrf.mxu0  ;;  %v2938_v43 = vshll.u32 %v10919_v2, 16 }
 0x356   : > { %v10908_v14 = vadd.f32 %v2403_v9, %v2305_v50  ;;  %v3441_v20 = vpop.f32.mrf.mxu3  ;;  %v3342_v38 = vpop.f32.mrf.mxu2  ;;  %v1968_v50 = vadd.f32 %v12370_v60, %v10320_v7  ;;  %v12371_v9 = vld [vmem:[#allocation15_spill] sm:$0xff] }
 0x357   : > { %v10913_v47 = vadd.f32 %v3441_v20, %v3342_v38  ;;  %v2931_v20 = vshrl.u32 %v2546_v46, 16  ;;  %v2935_v38 = vrot.slane %v2933_v4, 1  ;;  %v2940_v60 = vrot.slane %v2938_v43, 1 }
 0x358   : > { %12369 = vst [vmem:[#allocation10_spill] sm:$0xff] %v10908_v14  ;;  %v2067_v49 = vadd.f32 %v10732_v37, %v1968_v50  ;;  %v3060_v4 = vrot.slane %v10720_v62, 1  ;;  %v9196_v62 = vld [vmem:[#allocation2 + $0x78] sm:$0xf0]  ;;  %v9467_v14 = vld [vmem:[#allocation2 + $0x84] sm:$0xe] }
 0x359   : > { %v2936_v7 = vor.u32 %v2935_v38, %v2931_v20  ;;  %v2568_v20 = vld [vmem:[#allocation2 + $0xe0] sm:$0x1] }
 0x35a   : > { %v2730_v38 = vunpack.c.l.b16 %v2568_v20 }
 0x35d   : > { %v2406_v0 = vpop.f32.mrf.mxu0 }
 0x35e   : > { %v2407_v41 = vadd.f32 %v2406_v0, %v12371_v9  ;;  %v10923_v53 = vpop.f32.mrf.mxu3  ;;  %v10927_v28 = vpop.f32.mrf.mxu2  ;;  %v2310_v0 = vadd.f32 %v10722_v24, %v2067_v49  ;;  %v9462_v9 = vor.u32 %v9461_v19, %v10712_v31  ;;  %v9183_v49 = vld [vmem:[#allocation2 + $0xd8] sm:$0xff]   ;;  %v10938_v31 = vpack.c.b16 %v2730_v38, %v2730_v38 }
 0x35f   : > { %v2945_v19 = vshll.u32 %v9183_v49, 16  ;;  %v9649_v38 = vmov 0.0  }
 0x360   : > { %v10921_v5 = vadd.f32 %v2505_v11, %v2407_v41  ;;  %3539 = vmatmul.bf16.gmra.mxu0 %v3058_v30  ;;  %v2941_v11 = vsel %vm579_vm0, %v2936_v7, %v2940_v60  ;;  %v3059_v41 = vrot.slane %v9462_v9, 1  ;;  %v2943_v7 = vshrl.u32 %v9183_v49, 16 }
 0x361   : > { %3386 = vmatmul.bf16.gmra.mxu2 %v2546_v46  ;;  %v2947_v60 = vrot.slane %v2945_v19, 1  ;;  %v2950_v46 = vshll.u32 %v10938_v31, 16 }
 0x362   : > { %12372 = vst [vmem:[#allocation34_spill] sm:$0xff] %v10921_v5  ;;  %v3061_v24 = vsel %vm868_vm1, %v3059_v41, %v3060_v4  ;;  %v8629_v41 = vld [vmem:[%s12218_s2 + $0x178] sm:$0xff] }
 0x363   : > { %3485 = vmatmul.bf16.gmra.mxu3 %v2941_v11  ;;  %v2948_v9 = vor.u32 %v2947_v60, %v2943_v7  ;;  %v2952_v11 = vrot.slane %v2950_v46, 1  ;;  %v3063_v7 = vrot.slane %v10750_v35, 1  ;;  %v2550_v46 = vld [vmem:[#allocation2 + $0xe4] sm:$0xff]  }
 0x364   : > { %5662 = vmatpush.bf16.msrb.mxu3 %v8629_v41 }
 0x365   : > { %v2408_v6 = vpop.f32.mrf.mxu0 }
 0x366   : > { %v10932_v30 = vadd.f32 %v2408_v6, %v2310_v0  ;;  %v3446_v5 = vpop.f32.mrf.mxu3  ;;  %v3347_v37 = vpop.f32.mrf.mxu2  ;;  %v9197_v6 = vld [vmem:[#allocation2 + $0x78] sm:$0xe] }
 0x367   : > { %v10935_v50 = vadd.f32 %v3446_v5, %v3347_v37  ;;  %v2953_v37 = vsel %vm579_vm0, %v2948_v9, %v2952_v11  ;;  %v9198_v20 = vor.u32 %v9197_v6, %v9196_v62  ;;  %v10953_v9 = vld [vmem:[#allocation2 + $0xe4] sm:$0xf0]  ;;  %v2569_v62 = vld [vmem:[#allocation2 + $0xec] sm:$0x1] }
 0x368   : > { %12373 = vst [vmem:[#allocation41_spill] sm:$0xff] %v10932_v30  ;;  %v8627_v6 = vld [vmem:[%s12218_s2 + $0x168] sm:$0xff] }
 0x369   : > { %v3062_v19 = vrot.slane %v9198_v20, 1 }
 0x36b   : > { %v3064_v35 = vsel %vm868_vm1, %v3062_v19, %v3063_v7 }
 0x36d   : > { %v2411_v43 = vpop.f32.mrf.mxu0 }
 0x36e   : > { %v10941_v0 = vpop.f32.mrf.mxu3  ;;  %v10943_v5 = vpop.f32.mrf.mxu2  ;;  %v3934_v43 = vrot.slane %v9649_v38, 7  ;;  %v12374_v38 = vld [vmem:[#allocation18_spill] sm:$0xff] }
 0x370   : > { %3544 = vmatmul.bf16.gmra.mxu0 %v3061_v24  ;;  %v8628_v24 = vld [vmem:[%s12218_s2 + $0x170] sm:$0xff] }
 0x371   : > { %3391 = vmatmul.bf16.gmra.mxu2 %v9183_v49  ;;  %5663 = vmatpush.bf16.msrb.mxu3 %v8628_v24  ;;  %v10956_v49 = vsel %vm3933_vm2, %v3934_v43, 0.0  ;;  %v2957_v24 = vshll.u32 %v2550_v46, 16 }
 0x372   : > { %v8895_v20 = vpack.c.bf16 %v10956_v49, %v3934_v43 }
 0x373   : > { %3490 = vmatmul.bf16.gmra.mxu3 %v2953_v37  ;;  %v2731_v37 = vunpack.c.l.b16 %v2569_v62  ;;  %v8626_v62 = vld [vmem:[%s12218_s2 + $0x160] sm:$0xff]  ;;  %v2959_v19 = vrot.slane %v2957_v24, 1  ;;  %v8625_v24 = vld [vmem:[%s12218_s2 + $0x158] sm:$0xff] }
 0x374   : > { %9236 = vst [vmem:[#allocation3 + $0xd0] sm:$0xff] %v8895_v20  }
 0x375   : > { %v2413_v4 = vpop.f32.mrf.mxu0  ;;  %v10964_v18 = vpack.c.b16 %v2731_v37, %v2731_v37  ;;  %5664 = vmatpush.bf16.msrb.mxu3 %v8627_v6  ;;  %v10975_v37 = vsel %vm3933_vm2, 0.0, %v3934_v43 }
 0x376   : > { %v3451_v60 = vpop.f32.mrf.mxu3  ;;  %v3352_v11 = vpop.f32.mrf.mxu2  ;;  %v9464_v4 = vld [vmem:[#allocation2 + $0xcc] sm:$0xe]  ;;  %12375 = vst [vmem:[#allocation11_spill] sm:$0xff] %v10975_v37 }
 0x377   : > { %v9465_v30 = vor.u32 %v9464_v4, %v12374_v38  ;;  %v2962_v7 = vshll.u32 %v10964_v18, 16  ;;  %v10980_v20 = vadd.f32 %v3451_v60, %v3352_v11  ;;  %v3066_v11 = vrot.slane %v10770_v13, 1  ;;  %v11005_v13 = vld [vmem:[%s12219_s3] ss:$0 sm:$0xff] }
 0x379   : > { %v920_v52 = vrot.slane %v9465_v30, 1  ;;  %v2964_v6 = vrot.slane %v2962_v7, 1  ;;  %5665 = vmatpush.bf16.msrb.mxu3 %v8626_v62 }
 0x37b   : > { %v922_v4 = vsel %vm868_vm1, %v920_v52, %v921_v48  ;;  %v9468_v52 = vor.u32 %v9467_v14, %v10764_v22  ;;  %v8606_v22 = vld [vmem:[%s12218_s2 + $0xc0] sm:$0xff] }
 0x37c   : > { %2509 = vmatmul.bf16.gmra.mxu1 %v922_v4 }
 0x37d   : > { %v3510_v41 = vpop.f32.mrf.mxu0  ;;  %5666 = vmatpush.bf16.msrb.mxu3 %v8625_v24  ;;  %v3065_v60 = vrot.slane %v9468_v52, 1  ;;  %5491 = vmatpush.bf16.msra.mxu1 %v8606_v22  ;;  %v9200_v52 = vld [vmem:[#allocation2 + $0x90] sm:$0xe] }
 0x37e   : > { %v2955_v41 = vshrl.u32 %v2550_v46, 16  ;;  %v10971_v54 = vpop.f32.mrf.mxu3  ;;  %v10977_v30 = vpop.f32.mrf.mxu2 }
 0x37f   : > { %v3067_v7 = vsel %vm868_vm1, %v3065_v60, %v3066_v11 }
 0x380   : > { %3549 = vmatmul.bf16.gmra.mxu0 %v3064_v35  ;;  %v2960_v8 = vor.u32 %v2959_v19, %v2955_v41  ;;  %v8765_v35 = vpack.c.bf16 %v3934_v43, %v10975_v37  ;;  %v8614_v41 = vld [vmem:[%s12218_s2 + $0x100] sm:$0xff]  ;;  %v8624_v43 = vld [vmem:[%s12218_s2 + $0x150] sm:$0xff]  ;;  %v8623_v19 = vld [vmem:[%s12218_s2 + $0x148] sm:$0xff] }
 0x381   : > { %5580 = vmatpush.bf16.msra.mxu2 %v8614_v41  ;;  %5667 = vmatpush.bf16.msrb.mxu3 %v8624_v43 }
 0x382   : > { %v2965_v38 = vsel %vm579_vm0, %v2960_v8, %v2964_v6  ;;  %8766 = vst [vmem:[#allocation3] sm:$0xff] %v8765_v35   ;;  %3396 = vmatmul.bf16.gmra.mxu2 %v2550_v46  ;;  %v12376_v8 = vld [vmem:[#allocation8_spill] sm:$0xff]  ;;  %v11011_v35 = vld [vmem:[%s12220_s4] ss:$0 sm:$0xff] }
 0x383   : > { %3495 = vmatmul.bf16.gmra.mxu3 %v2965_v38  ;;  %v8622_v38 = vld [vmem:[%s12218_s2 + $0x140] sm:$0xff] }
 0x385   : > { %v3512_v48 = vpop.f32.mrf.mxu0  ;;  %5668 = vmatpush.bf16.msrb.mxu3 %v8623_v19 }
 0x386   : > { %v3456_v62 = vpop.f32.mrf.mxu3  ;;  %v3357_v14 = vpop.f32.mrf.mxu2  ;;  %v9199_v48 = vld [vmem:[#allocation2 + $0x90] sm:$0xf0] }
 0x387   : > { %v11021_v43 = vadd.f32 %v3456_v62, %v3357_v14  ;;  %v9201_v22 = vor.u32 %v9200_v52, %v9199_v48  ;;  %v9470_v52 = vld [vmem:[#allocation2 + $0x9c] sm:$0xe] }
 0x389   : > { %5669 = vmatpush.bf16.msrb.mxu3 %v8622_v38  ;;  %v3068_v37 = vrot.slane %v9201_v22, 1 }
 0x38d   : > { %v3515_v46 = vpop.f32.mrf.mxu0 }
 0x38e   : > { %v3516_v4 = vadd.f32 %v3515_v46, %v10784_v56  ;;  %v11016_v24 = vpop.f32.mrf.mxu3  ;;  %v11019_v41 = vpop.f32.mrf.mxu2 }
 0x390   : > { %v3602_v6 = vadd.f32 %v3516_v4, %v12376_v8  ;;  %3554 = vmatmul.bf16.gmra.mxu0 %v3067_v7  ;;  %v12377_v4 = vld [vmem:[#allocation22_spill] sm:$0xff] }
 0x392   : > { %v3642_v56 = vmul.f32 %v11005_v13, %v3602_v6  ;;  %v3069_v6 = vrot.slane %v10793_v21, 1  ;;  %v12378_v21 = vld [vmem:[#allocation7_spill] sm:$0xff] }
 0x394   : > { %v3682_v60 = vadd.f32 %v11011_v35, %v3642_v56 }
 0x395   : > { %v3517_v11 = vpop.f32.mrf.mxu0 }
 0x396   : > { %v3718_v19 = vmax.f32 %v3682_v60, 0.0  ;;  %v3518_v46 = vadd.f32 %v3517_v11, %v10802_v34  ;;  %v3461_v63 = vpop.f32.mrf.mxu3  ;;  %v3362_v14 = vpop.f32.mrf.mxu2  ;;  %v3070_v34 = vsel %vm868_vm1, %v3068_v37, %v3069_v6  ;;  %v9471_v6 = vor.u32 %v9470_v52, %v10811_v39  ;;  %v8589_v39 = vld [vmem:[%s12218_s2 + $0x38] sm:$0xff] }
 0x397   : > { %v11041_v37 = vadd.f32 %v3461_v63, %v3362_v14  ;;  %v8597_v63 = vld [vmem:[%s12218_s2 + $0x78] sm:$0xff]  ;;  %5895 = vmatpush.bf16.msrb.mxu1 %v8589_v39 }
 0x398   : > { %v3937_v7 = vrot.slane %v3718_v19, 7  ;;  %v3603_v8 = vadd.f32 %v3518_v46, %v12377_v4  ;;  %5984 = vmatpush.bf16.msrb.mxu2 %v8597_v63 }
 0x39a   : > { %v4043_v17 = vsel %vm3933_vm2, 0.0, %v3937_v7  ;;  %v3643_v62 = vmul.f32 %v11005_v13, %v3603_v8 }
 0x39b   : > { %v8770_v38 = vpack.c.bf16 %v4043_v17, %v10956_v49 }
 0x39c   : > { %v3683_v56 = vadd.f32 %v11011_v35, %v3643_v62 }
 0x39d   : > { %9211 = vst [vmem:[#allocation3 + $0x8] sm:$0xff] %v8770_v38   ;;  %v3520_v48 = vpop.f32.mrf.mxu0 }
 0x39e   : > { %v3719_v60 = vmax.f32 %v3683_v56, 0.0  ;;  %v3521_v11 = vadd.f32 %v3520_v48, %v10813_v32  ;;  %v11034_v46 = vpop.f32.mrf.mxu3  ;;  %v11039_v8 = vpop.f32.mrf.mxu2 }
 0x39f   : > { %12379 = vst [vmem:[#allocation39_spill] sm:$0xff] %v11034_v46 }
 0x3a0   : > { %v3938_v22 = vrot.slane %v3719_v60, 7  ;;  %v3604_v19 = vadd.f32 %v3521_v11, %v12378_v21  ;;  %3559 = vmatmul.bf16.gmra.mxu0 %v3070_v34  ;;  %v3072_v34 = vrot.slane %v10819_v55, 1 }
 0x3a2   : > { %v3939_v4 = vsel %vm3933_vm2, %v3937_v7, %v3938_v22  ;;  %v4061_v17 = vsel %vm3933_vm2, %v3938_v22, 0.0  ;;  %v3644_v49 = vmul.f32 %v11005_v13, %v3604_v19  ;;  %v3071_v7 = vrot.slane %v9471_v6, 1 }
 0x3a3   : > { %v8775_v62 = vpack.c.bf16 %v4061_v17, %v3939_v4 }
 0x3a4   : > { %v3684_v32 = vadd.f32 %v11011_v35, %v3644_v49  ;;  %v9473_v11 = vld [vmem:[#allocation3 + $0xc] sm:$0xe] }
 0x3a5   : > { %9212 = vst [vmem:[#allocation3 + $0x10] sm:$0xff] %v8775_v62   ;;  %v3522_v38 = vpop.f32.mrf.mxu0 }
 0x3a6   : > { %v3523_v56 = vadd.f32 %v3522_v38, %v10825_v44  ;;  %v3720_v60 = vmax.f32 %v3684_v32, 0.0  ;;  %v3466_v22 = vpop.f32.mrf.mxu3  ;;  %v3367_v14 = vpop.f32.mrf.mxu2 }
 0x3a8   : > { %v3605_v48 = vadd.f32 %v3523_v56, %v10568_v25  ;;  %v3073_v25 = vsel %vm868_vm1, %v3071_v7, %v3072_v34  ;;  %v3940_v4 = vrot.slane %v3720_v60, 7 }
 0x3aa   : > { %v3645_v21 = vmul.f32 %v11005_v13, %v3605_v48 }
 0x3ac   : > { %v3685_v44 = vadd.f32 %v11011_v35, %v3645_v21  ;;  %v4763_v52 = vld [vmem:[#allocation3 + $0xc] sm:$0xff]   ;;  %v4795_v19 = vld [vmem:[#allocation3 + $0x14] sm:$0x1]  ;;  %v4044_v21 = vsel %vm3933_vm2, 0.0, %v3940_v4 }
 0x3ad   : > { %v9472_v55 = vld [vmem:[#allocation3 + $0xc] sm:$0xf0]  ;;  %v3525_v17 = vpop.f32.mrf.mxu0  ;;  %v4939_v49 = vunpack.c.l.b16 %v4795_v19  ;;  %5492 = vmatmul.bf16.vlgmr.msra.gmra.mxu1 %v4763_v52  ;;  %v4974_v46 = vshll.u32 %v4763_v52, 16  ;;  %v9202_v19 = vld [vmem:[#allocation2 + $0xa8] sm:$0xf0] }
 0x3ae   : > { %v3721_v62 = vmax.f32 %v3685_v44, 0.0  ;;  %v3526_v6 = vadd.f32 %v3525_v17, %v10835_v10  ;;  %v9474_v38 = vor.u32 %v9473_v11, %v9472_v55  ;;  %v11060_v63 = vpop.f32.mrf.mxu3  ;;  %v4972_v44 = vshrl.u32 %v4763_v52, 16  ;;  %v9203_v11 = vld [vmem:[#allocation2 + $0xa8] sm:$0xe]  ;;  %v11064_v55 = vpop.f32.mrf.mxu2 }
 0x3af   : > { %v4955_v32 = vpack.c.b16 %v4939_v49, %v4939_v49  ;;  %12380 = vst [vmem:[#allocation45_spill] sm:$0xff] %v11060_v63  ;;  %v4976_v17 = vrot.slane %v4974_v46, 1  ;;  %v11069_v49 = vadd.f32 %v3466_v22, %v3367_v14  ;;  %v3075_v22 = vrot.slane %v10841_v23, 1 }
 0x3b0   : > { %v3941_v56 = vrot.slane %v3721_v62, 7  ;;  %v3606_v48 = vadd.f32 %v3526_v6, %v10581_v26  ;;  %3564 = vmatmul.bf16.gmra.mxu0 %v3073_v25  ;;  %v5227_v7 = vrot.slane %v9474_v38, 1  ;;  %12381 = vst [vmem:[#allocation12_spill] sm:$0xff] %v11064_v55 }
 0x3b1   : > { %v5228_v34 = vrot.slane %v4955_v32, 1  ;;  %v4979_v10 = vshll.u32 %v4955_v32, 16  ;;  %v4977_v38 = vor.u32 %v4976_v17, %v4972_v44  ;;  %v9204_v32 = vor.u32 %v9203_v11, %v9202_v19 }
 0x3b2   : > { %v3942_v60 = vsel %vm3933_vm2, %v3940_v4, %v3941_v56  ;;  %v3646_v39 = vmul.f32 %v11005_v13, %v3606_v48 }
 0x3b3   : > { %v11066_v26 = vpack.c.bf16 %v3942_v60, %v4044_v21  ;;  %v5229_v25 = vsel %vm868_vm1, %v5227_v7, %v5228_v34  ;;  %v4981_v52 = vrot.slane %v4979_v10, 1  ;;  %v3074_v46 = vrot.slane %v9204_v32, 1 }
 0x3b4   : > { %v3686_v62 = vadd.f32 %v11011_v35, %v3646_v39  ;;  %5670 = vmatmul.bf16.vlgmr.msrb.gmra.mxu3 %v5229_v25  ;;  %v4062_v34 = vsel %vm3933_vm2, %v3941_v56, 0.0 }
 0x3b5   : > { %9213 = vst [vmem:[#allocation3 + $0x18] sm:$0xff] %v11066_v26   ;;  %v3527_v6 = vpop.f32.mrf.mxu0  ;;  %v4982_v21 = vsel %vm579_vm0, %v4977_v38, %v4981_v52  ;;  %v3076_v25 = vsel %vm868_vm1, %v3074_v46, %v3075_v22 }
 0x3b6   : > { %v3722_v48 = vmax.f32 %v3686_v62, 0.0  ;;  %v3528_v63 = vadd.f32 %v3527_v6, %v10850_v27  ;;  %5581 = vmatmul.bf16.vlgmr.msra.gmra.mxu2 %v4982_v21  ;;  %v3471_v14 = vpop.f32.mrf.mxu3  ;;  %v3372_v10 = vpop.f32.mrf.mxu2  ;;  %v11089_v6 = vpack.c.bf16 %v3942_v60, %v3940_v4  ;;  %v4986_v4 = vshll.u32 %v11066_v26, 16 }
 0x3b7   : > { %v11102_v60 = vadd.f32 %v3471_v14, %v3372_v10  ;;  %v4984_v14 = vshrl.u32 %v11066_v26, 16 }
 0x3b8   : > { %v3943_v55 = vrot.slane %v3722_v48, 7  ;;  %v3607_v7 = vadd.f32 %v3528_v63, %v10593_v51  ;;  %v9480_v51 = vld [vmem:[#allocation2 + $0xb4] sm:$0xe] }
 0x3b9   : > { %v9481_v22 = vor.u32 %v9480_v51, %v10860_v42 }
 0x3ba   : > { %v4045_v39 = vsel %vm3933_vm2, 0.0, %v3943_v55  ;;  %v3647_v44 = vmul.f32 %v11005_v13, %v3607_v7 }
 0x3bb   : > { %v8785_v19 = vpack.c.bf16 %v4045_v39, %v4062_v34 }
 0x3bc   : > { %v3687_v27 = vadd.f32 %v11011_v35, %v3647_v44  ;;  %v9276_v32 = vld [vmem:[#allocation3 + $0x18] sm:$0xf0]  ;;  %v9277_v48 = vld [vmem:[#allocation3 + $0x18] sm:$0xe] }
 0x3bd   : > { %9214 = vst [vmem:[#allocation3 + $0x20] sm:$0xff] %v8785_v19   ;;  %v3530_v11 = vpop.f32.mrf.mxu0  ;;  %9478 = vmatmul.msk.bf16.gmra.mxu1 %vm11085_vm5, %v11089_v6 }
 0x3be   : > { %v3723_v63 = vmax.f32 %v3687_v27, 0.0  ;;  %v3531_v17 = vadd.f32 %v3530_v11, %v10862_v59  ;;  %v11094_v38 = vpop.f32.mrf.mxu3  ;;  %v11099_v21 = vpop.f32.mrf.mxu2  ;;  %v4988_v27 = vrot.slane %v4986_v4, 1 }
 0x3c0   : > { %v3944_v23 = vrot.slane %v3723_v63, 7  ;;  %v3608_v62 = vadd.f32 %v3531_v17, %v10610_v61  ;;  %3569 = vmatmul.bf16.gmra.mxu0 %v3076_v25  ;;  %v3077_v63 = vrot.slane %v9481_v22, 1  ;;  %v3078_v17 = vrot.slane %v10868_v36, 1 }
 0x3c2   : > { %v3945_v59 = vsel %vm3933_vm2, %v3943_v55, %v3944_v23  ;;  %v4063_v61 = vsel %vm3933_vm2, %v3944_v23, 0.0  ;;  %v3648_v52 = vmul.f32 %v11005_v13, %v3608_v62  ;;  %v9278_v55 = vor.u32 %v9277_v48, %v9276_v32 }
 0x3c3   : > { %v8790_v7 = vpack.c.bf16 %v4063_v61, %v3945_v59 }
 0x3c4   : > { %v4796_v46 = vld [vmem:[#allocation3 + $0x20] sm:$0x1]  ;;  %v3688_v44 = vadd.f32 %v11011_v35, %v3648_v52  ;;  %v5230_v10 = vrot.slane %v9278_v55, 1  ;;  %v11117_v52 = vor.u32 %v4988_v27, %v4984_v14 }
 0x3c5   : > { %9215 = vst [vmem:[#allocation3 + $0x28] sm:$0xff] %v8790_v7   ;;  %v3532_v34 = vpop.f32.mrf.mxu0  ;;  %v4940_v39 = vunpack.c.l.b16 %v4796_v46 }
 0x3c6   : > { %v3533_v19 = vadd.f32 %v3532_v34, %v10876_v33  ;;  %v3476_v51 = vpop.f32.mrf.mxu3  ;;  %v3724_v62 = vmax.f32 %v3688_v44, 0.0  ;;  %v8596_v33 = vld [vmem:[%s12218_s2 + $0x70] sm:$0xff]  ;;  %v3377_v61 = vpop.f32.mrf.mxu2  ;;  %v3079_v34 = vsel %vm868_vm1, %v3077_v63, %v3078_v17 }
 0x3c7   : > { %v4956_v11 = vpack.c.b16 %v4940_v39, %v4940_v39  ;;  %5985 = vmatpush.bf16.msrb.mxu2 %v8596_v33 }
 0x3c8   : > { %v3609_v25 = vadd.f32 %v3533_v19, %v10630_v3  ;;  %v8588_v3 = vld [vmem:[%s12218_s2 + $0x30] sm:$0xff]  ;;  %v3946_v39 = vrot.slane %v3724_v62, 7  ;;  %v9206_v62 = vld [vmem:[#allocation2 + $0xc0] sm:$0xe] }
 0x3c9   : > { %v5231_v23 = vrot.slane %v4956_v11, 1  ;;  %v4991_v42 = vshll.u32 %v4956_v11, 16  ;;  %5896 = vmatpush.bf16.msrb.mxu1 %v8588_v3  ;;  %v9483_v19 = vld [vmem:[#allocation3 + $0x24] sm:$0xe] }
 0x3ca   : > { %v3649_v59 = vmul.f32 %v11005_v13, %v3609_v25 }
 0x3cb   : > { %v5232_v36 = vsel %vm868_vm1, %v5230_v10, %v5231_v23  ;;  %v4993_v26 = vrot.slane %v4991_v42, 1  ;;  %v4046_v23 = vsel %vm3933_vm2, 0.0, %v3946_v39  ;;  %v9205_v42 = vld [vmem:[#allocation2 + $0xc0] sm:$0xf0] }
 0x3cc   : > { %v3689_v32 = vadd.f32 %v11011_v35, %v3649_v59  ;;  %5675 = vmatmul.bf16.gmra.mxu3 %v5232_v36  ;;  %v4767_v48 = vld [vmem:[#allocation3 + $0x24] sm:$0xff]   ;;  %v4797_v4 = vld [vmem:[#allocation3 + $0x2c] sm:$0x1] }
 0x3cd   : > { %v9482_v7 = vld [vmem:[#allocation3 + $0x24] sm:$0xf0]  ;;  %v3535_v46 = vpop.f32.mrf.mxu0  ;;  %v4994_v22 = vsel %vm579_vm0, %v11117_v52, %v4993_v26  ;;  %v4941_v27 = vunpack.c.l.b16 %v4797_v4  ;;  %v4998_v14 = vshll.u32 %v4767_v48, 16  ;;  %5502 = vmatmul.bf16.gmra.mxu1 %v4767_v48  ;;  %v9207_v4 = vor.u32 %v9206_v62, %v9205_v42 }
 0x3ce   : > { %v3725_v55 = vmax.f32 %v3689_v32, 0.0  ;;  %v3536_v44 = vadd.f32 %v3535_v46, %v10884_v1  ;;  %5586 = vmatmul.bf16.gmra.mxu2 %v4994_v22  ;;  %v11126_v10 = vpop.f32.mrf.mxu3  ;;  %v11131_v1 = vpop.f32.mrf.mxu2  ;;  %v9484_v3 = vor.u32 %v9483_v19, %v9482_v7  ;;  %v2453_v46 = vadd.f32 %v10595_v58, %v10654_v15 }
 0x3cf   : > { %v4957_v33 = vpack.c.b16 %v4941_v27, %v4941_v27  ;;  %v5000_v32 = vrot.slane %v4998_v14, 1  ;;  %v3080_v19 = vrot.slane %v9207_v4, 1 }
 0x3d0   : > { %v3947_v11 = vrot.slane %v3725_v55, 7  ;;  %v3610_v25 = vadd.f32 %v3536_v44, %v10643_v12  ;;  %3574 = vmatmul.bf16.gmra.mxu0 %v3079_v34  ;;  %v11135_v12 = vadd.f32 %v3476_v51, %v3377_v61  ;;  %v5233_v55 = vrot.slane %v9484_v3, 1 }
 0x3d1   : > { %v5234_v44 = vrot.slane %v4957_v33, 1  ;;  %v5003_v27 = vshll.u32 %v4957_v33, 16 }
 0x3d2   : > { %v3948_v63 = vsel %vm3933_vm2, %v3946_v39, %v3947_v11  ;;  %v3650_v17 = vmul.f32 %v11005_v13, %v3610_v25  ;;  %v4996_v25 = vshrl.u32 %v4767_v48, 16  ;;  %v4064_v14 = vsel %vm3933_vm2, %v3947_v11, 0.0 }
 0x3d3   : > { %v11133_v59 = vpack.c.bf16 %v3948_v63, %v4046_v23  ;;  %v3081_v23 = vrot.slane %v10890_v16, 1  ;;  %v5005_v3 = vrot.slane %v5003_v27, 1 }
 0x3d4   : > { %v3690_v36 = vadd.f32 %v11011_v35, %v3650_v17  ;;  %v5001_v61 = vor.u32 %v5000_v32, %v4996_v25 }
 0x3d5   : > { %9216 = vst [vmem:[#allocation3 + $0x30] sm:$0xff] %v11133_v59   ;;  %v3537_v26 = vpop.f32.mrf.mxu0  ;;  %v3082_v16 = vsel %vm868_vm1, %v3080_v19, %v3081_v23 }
 0x3d6   : > { %v3726_v22 = vmax.f32 %v3690_v36, 0.0  ;;  %v3538_v34 = vadd.f32 %v3537_v26, %v10898_v45  ;;  %v3481_v17 = vpop.f32.mrf.mxu3  ;;  %v3382_v15 = vpop.f32.mrf.mxu2  ;;  %v5235_v45 = vsel %vm868_vm1, %v5233_v55, %v5234_v44  ;;  %v5006_v36 = vsel %vm579_vm0, %v5001_v61, %v5005_v3  ;;  %v9490_v26 = vld [vmem:[#allocation2 + $0xcc] sm:$0xe] }
 0x3d7   : > { %v11155_v55 = vpack.c.bf16 %v3948_v63, %v3946_v39  ;;  %v5010_v39 = vshll.u32 %v11133_v59, 16  ;;  %v11168_v63 = vadd.f32 %v3481_v17, %v3382_v15 }
 0x3d8   : > { %v3949_v7 = vrot.slane %v3726_v22, 7  ;;  %v3611_v51 = vadd.f32 %v3538_v34, %v2453_v46  ;;  %v12384_v46 = vld [vmem:[#allocation27_spill] sm:$0xff]  ;;  %v8637_v34 = vld [vmem:[%s12218_s2 + $0x1b8] sm:$0xff] }
 0x3d9   : > { %6884 = vmatpush.bf16.msra.mxu0 %v8637_v34 }
 0x3da   : > { %v4047_v42 = vsel %vm3933_vm2, 0.0, %v3949_v7  ;;  %v3651_v58 = vmul.f32 %v11005_v13, %v3611_v51 }
 0x3db   : > { %v8800_v62 = vpack.c.bf16 %v4047_v42, %v4064_v14  ;;  %v3444_v14 = vadd.f32 %v10923_v53, %v10927_v28 }
 0x3dc   : > { %v3691_v48 = vadd.f32 %v11011_v35, %v3651_v58  ;;  %5680 = vmatmul.bf16.gmra.mxu3 %v5235_v45  ;;  %v9279_v51 = vld [vmem:[#allocation3 + $0x30] sm:$0xf0]  ;;  %v9280_v61 = vld [vmem:[#allocation3 + $0x30] sm:$0xe]  ;;  %v8636_v58 = vld [vmem:[%s12218_s2 + $0x1b0] sm:$0xff] }
 0x3dd   : > { %9217 = vst [vmem:[#allocation3 + $0x38] sm:$0xff] %v8800_v62   ;;  %v3540_v33 = vpop.f32.mrf.mxu0  ;;  %9488 = vmatmul.msk.bf16.gmra.mxu1 %vm11085_vm5, %v11155_v55  ;;  %v9281_v3 = vor.u32 %v9280_v61, %v9279_v51  ;;  %6885 = vmatpush.bf16.msra.mxu0 %v8636_v58  ;;  %v8634_v58 = vld [vmem:[%s12218_s2 + $0x1a0] sm:$0xff] }
 0x3de   : > { %v3727_v11 = vmax.f32 %v3691_v48, 0.0  ;;  %v3541_v32 = vadd.f32 %v3540_v33, %v10913_v47  ;;  %5591 = vmatmul.bf16.gmra.mxu2 %v5006_v36  ;;  %v11160_v44 = vpop.f32.mrf.mxu3  ;;  %v11165_v19 = vpop.f32.mrf.mxu2  ;;  %v12385_v48 = vld [vmem:[#allocation29_spill] sm:$0xff]  ;;  %v12386_v33 = vld [vmem:[#allocation24_spill] sm:$0xff] }
 0x3df   : > { %v2458_v36 = vadd.f32 %v12386_v33, %v12385_v48 }
 0x3e0   : > { %v3950_v4 = vrot.slane %v3727_v11, 7  ;;  %v3612_v22 = vadd.f32 %v3541_v32, %v12384_v46  ;;  %3579 = vmatmul.bf16.gmra.mxu0 %v3082_v16  ;;  %v5012_v16 = vrot.slane %v5010_v39, 1  ;;  %v5008_v32 = vshrl.u32 %v11133_v59, 16 }
 0x3e2   : > { %v3951_v25 = vsel %vm3933_vm2, %v3949_v7, %v3950_v4  ;;  %v4065_v47 = vsel %vm3933_vm2, %v3950_v4, 0.0  ;;  %v3652_v27 = vmul.f32 %v11005_v13, %v3612_v22  ;;  %v9491_v7 = vor.u32 %v9490_v26, %v10911_v57  ;;  %v8635_v26 = vld [vmem:[%s12218_s2 + $0x1a8] sm:$0xff] }
 0x3e3   : > { %v8805_v23 = vpack.c.bf16 %v4065_v47, %v3951_v25  ;;  %v3084_v57 = vrot.slane %v10919_v2, 1  ;;  %v5236_v4 = vrot.slane %v9281_v3, 1  ;;  %v8587_v2 = vld [vmem:[%s12218_s2 + $0x28] sm:$0xff]  ;;  %6886 = vmatpush.bf16.msra.mxu0 %v8635_v26  ;;  %v11191_v61 = vor.u32 %v5012_v16, %v5008_v32  ;;  %v8633_v26 = vld [vmem:[%s12218_s2 + $0x198] sm:$0xff] }
 0x3e4   : > { %v4798_v42 = vld [vmem:[#allocation3 + $0x38] sm:$0x1]  ;;  %v3692_v17 = vadd.f32 %v11011_v35, %v3652_v27  ;;  %v3083_v11 = vrot.slane %v9491_v7, 1  ;;  %5897 = vmatpush.bf16.msrb.mxu1 %v8587_v2 }
 0x3e5   : > { %9218 = vst [vmem:[#allocation3 + $0x40] sm:$0xff] %v8805_v23   ;;  %v3542_v62 = vpop.f32.mrf.mxu0  ;;  %v4942_v45 = vunpack.c.l.b16 %v4798_v42  ;;  %v8595_v27 = vld [vmem:[%s12218_s2 + $0x68] sm:$0xff] }
 0x3e6   : > { %v3543_v15 = vadd.f32 %v3542_v62, %v3444_v14  ;;  %v3486_v34 = vpop.f32.mrf.mxu3  ;;  %v3728_v25 = vmax.f32 %v3692_v17, 0.0  ;;  %v3387_v51 = vpop.f32.mrf.mxu2  ;;  %5986 = vmatpush.bf16.msrb.mxu2 %v8595_v27  ;;  %v3085_v3 = vsel %vm868_vm1, %v3083_v11, %v3084_v57  ;;  %v9493_v17 = vld [vmem:[#allocation3 + $0x3c] sm:$0xe] }
 0x3e7   : > { %v4958_v53 = vpack.c.b16 %v4942_v45, %v4942_v45  ;;  %6887 = vmatpush.bf16.msra.mxu0 %v8634_v58 }
 0x3e8   : > { %v3613_v28 = vadd.f32 %v3543_v15, %v2458_v36  ;;  %v11201_v48 = vrot.slane %v3728_v25, 7 }
 0x3e9   : > { %v5237_v46 = vrot.slane %v4958_v53, 1  ;;  %v5015_v22 = vshll.u32 %v4958_v53, 16  ;;  %v12387_v53 = vld [vmem:[#allocation33_spill] sm:$0xff] }
 0x3ea   : > { %v3653_v47 = vmul.f32 %v11005_v13, %v3613_v28  ;;  %v4048_v57 = vsel %vm3933_vm2, 0.0, %v11201_v48 }
 0x3eb   : > { %v5238_v59 = vsel %vm868_vm1, %v5236_v4, %v5237_v46  ;;  %v5017_v23 = vrot.slane %v5015_v22, 1  ;;  %v9208_v46 = vld [vmem:[#allocation2 + $0xd8] sm:$0xf0]  ;;  %v9209_v22 = vld [vmem:[#allocation2 + $0xd8] sm:$0xe]  ;;  %6888 = vmatpush.bf16.msra.mxu0 %v8633_v26 }
 0x3ec   : > { %v3693_v39 = vadd.f32 %v11011_v35, %v3653_v47  ;;  %5685 = vmatmul.bf16.gmra.mxu3 %v5238_v59  ;;  %v4771_v14 = vld [vmem:[#allocation3 + $0x3c] sm:$0xff]   ;;  %v4799_v7 = vld [vmem:[#allocation3 + $0x44] sm:$0x1]  ;;  %v11219_v59 = vadd.f32 %v3486_v34, %v3387_v51  ;;  %v11230_v51 = vpop.f32.mrf.mxu1 }
 0x3ed   : > { %v9492_v42 = vld [vmem:[#allocation3 + $0x3c] sm:$0xf0]  ;;  %v3545_v62 = vpop.f32.mrf.mxu0  ;;  %v5018_v45 = vsel %vm579_vm0, %v11191_v61, %v5017_v23  ;;  %v4943_v15 = vunpack.c.l.b16 %v4799_v7  ;;  %v5022_v32 = vshll.u32 %v4771_v14, 16  ;;  %5512 = vmatmul.bf16.gmra.mxu1 %v4771_v14  ;;  %v3449_v23 = vadd.f32 %v10941_v0, %v10943_v5 }
 0x3ee   : > { %v3729_v33 = vmax.f32 %v3693_v39, 0.0  ;;  %v3546_v36 = vadd.f32 %v3545_v62, %v10935_v50  ;;  %5596 = vmatmul.bf16.gmra.mxu2 %v5018_v45  ;;  %v11208_v11 = vpop.f32.mrf.mxu3  ;;  %v11215_v25 = vpop.f32.mrf.mxu2  ;;  %v9494_v2 = vor.u32 %v9493_v17, %v9492_v42  ;;  %v8632_v7 = vld [vmem:[%s12218_s2 + $0x190] sm:$0xff]  ;;  %v9210_v45 = vor.u32 %v9209_v22, %v9208_v46 }
 0x3ef   : > { %v4959_v27 = vpack.c.b16 %v4943_v15, %v4943_v15  ;;  %v5024_v62 = vrot.slane %v5022_v32, 1  ;;  %6889 = vmatpush.bf16.msra.mxu0 %v8632_v7 }
 0x3f0   : > { %v3953_v16 = vrot.slane %v3729_v33, 7  ;;  %v3614_v28 = vadd.f32 %v3546_v36, %v12387_v53  ;;  %3584 = vmatmul.bf16.gmra.mxu0 %v3085_v3  ;;  %v12388_v3 = vld [vmem:[#allocation32_spill] sm:$0xff]  ;;  %v5239_v0 = vrot.slane %v9494_v2, 1  ;;  %v5020_v36 = vshrl.u32 %v4771_v14, 16 }
 0x3f1   : > { %v2463_v33 = vadd.f32 %v12388_v3, %v10710_v40  ;;  %v5240_v5 = vrot.slane %v4959_v27, 1  ;;  %v5027_v17 = vshll.u32 %v4959_v27, 16  ;;  %v3086_v32 = vrot.slane %v9210_v45, 1 }
 0x3f2   : > { %v3954_v50 = vsel %vm3933_vm2, %v11201_v48, %v3953_v16  ;;  %v3654_v4 = vmul.f32 %v11005_v13, %v3614_v28  ;;  %v8631_v28 = vld [vmem:[%s12218_s2 + $0x188] sm:$0xff]  ;;  %v5025_v26 = vor.u32 %v5024_v62, %v5020_v36  ;;  %v9500_v62 = vld [vmem:[#allocation2 + $0xe4] sm:$0xe] }
 0x3f3   : > { %v11217_v47 = vpack.c.bf16 %v3954_v50, %v4048_v57  ;;  %v3087_v57 = vrot.slane %v10938_v31, 1  ;;  %6890 = vmatpush.bf16.msra.mxu0 %v8631_v28  ;;  %v5241_v27 = vsel %vm868_vm1, %v5239_v0, %v5240_v5  ;;  %v8630_v31 = vld [vmem:[%s12218_s2 + $0x180] sm:$0xff]  ;;  %v11249_v5 = vpack.c.bf16 %v3954_v50, %v11201_v48 }
 0x3f4   : > { %v3694_v39 = vadd.f32 %v11011_v35, %v3654_v4  ;;  %v4066_v4 = vsel %vm3933_vm2, %v3953_v16, 0.0 }
 0x3f5   : > { %9219 = vst [vmem:[#allocation3 + $0x48] sm:$0xff] %v11217_v47   ;;  %v3547_v58 = vpop.f32.mrf.mxu0  ;;  %v5034_v48 = vshll.u32 %v11217_v47, 16 }
 0x3f6   : > { %v3730_v42 = vmax.f32 %v3694_v39, 0.0  ;;  %v3548_v34 = vadd.f32 %v3547_v58, %v3449_v23  ;;  %v3491_v40 = vpop.f32.mrf.mxu3  ;;  %v3392_v2 = vpop.f32.mrf.mxu2  ;;  %v5029_v23 = vrot.slane %v5027_v17, 1  ;;  %v3088_v58 = vsel %vm868_vm1, %v3086_v32, %v3087_v57 }
 0x3f7   : > { %6891 = vmatpush.bf16.msra.mxu0 %v8630_v31  ;;  %v11262_v50 = vadd.f32 %v3491_v40, %v3392_v2 }
 0x3f8   : > { %v3955_v15 = vrot.slane %v3730_v42, 7  ;;  %v3615_v53 = vadd.f32 %v3548_v34, %v2463_v33  ;;  %v5030_v16 = vsel %vm579_vm0, %v5025_v26, %v5029_v23  ;;  %v12389_v34 = vld [vmem:[#allocation37_spill] sm:$0xff]  ;;  %v12390_v23 = vld [vmem:[#allocation40_spill] sm:$0xff] }
 0x3f9   : > { %v2510_v33 = vpop.f32.mrf.mxu1 }
 0x3fa   : > { %v4049_v46 = vsel %vm3933_vm2, 0.0, %v3955_v15  ;;  %v3655_v22 = vmul.f32 %v11005_v13, %v3615_v53 }
 0x3fb   : > { %v8815_v14 = vpack.c.bf16 %v4049_v46, %v4066_v4  ;;  %v3454_v4 = vadd.f32 %v10971_v54, %v10977_v30  ;;  %v3090_v54 = vrot.slane %v10964_v18, 1  ;;  %v5032_v30 = vshrl.u32 %v11217_v47, 16 }
 0x3fc   : > { %v3695_v39 = vadd.f32 %v11011_v35, %v3655_v22  ;;  %5690 = vmatmul.bf16.gmra.mxu3 %v5241_v27  ;;  %v9282_v28 = vld [vmem:[#allocation3 + $0x48] sm:$0xf0]  ;;  %v9283_v26 = vld [vmem:[#allocation3 + $0x48] sm:$0xe]  ;;  %v9501_v22 = vor.u32 %v9500_v62, %v10953_v9 }
 0x3fd   : > { %9220 = vst [vmem:[#allocation3 + $0x50] sm:$0xff] %v8815_v14   ;;  %v3550_v7 = vpop.f32.mrf.mxu0  ;;  %9498 = vmatmul.msk.bf16.gmra.mxu1 %vm11085_vm5, %v11249_v5  ;;  %v9284_v27 = vor.u32 %v9283_v26, %v9282_v28 }
 0x3fe   : > { %v3731_v45 = vmax.f32 %v3695_v39, 0.0  ;;  %v3551_v3 = vadd.f32 %v3550_v7, %v10980_v20  ;;  %5601 = vmatmul.bf16.gmra.mxu2 %v5030_v16  ;;  %v11254_v36 = vpop.f32.mrf.mxu3  ;;  %v11259_v32 = vpop.f32.mrf.mxu2  ;;  %v12391_v39 = vld [vmem:[#allocation9_spill] sm:$0xff] }
 0x3ff   : > { %v2468_v31 = vadd.f32 %v12391_v39, %v12390_v23  ;;  %v5242_v9 = vrot.slane %v9284_v27, 1 }
 0x400   : > { %v3956_v42 = vrot.slane %v3731_v45, 7  ;;  %v3616_v0 = vadd.f32 %v3551_v3, %v12389_v34  ;;  %3589 = vmatmul.bf16.gmra.mxu0 %v3088_v58  ;;  %v5036_v58 = vrot.slane %v5034_v48, 1  ;;  %v3089_v3 = vrot.slane %v9501_v22, 1 }
 0x401   : > { %v2512_v40 = vpop.f32.mrf.mxu1 }
 0x402   : > { %v3957_v17 = vsel %vm3933_vm2, %v3955_v15, %v3956_v42  ;;  %v4067_v20 = vsel %vm3933_vm2, %v3956_v42, 0.0  ;;  %v3656_v53 = vmul.f32 %v11005_v13, %v3616_v0 }
 0x403   : > { %v8820_v57 = vpack.c.bf16 %v4067_v20, %v3957_v17  ;;  %v8594_v17 = vld [vmem:[%s12218_s2 + $0x60] sm:$0xff] }
 0x404   : > { %v4800_v46 = vld [vmem:[#allocation3 + $0x50] sm:$0x1]  ;;  %v3696_v7 = vadd.f32 %v11011_v35, %v3656_v53  ;;  %v11279_v53 = vor.u32 %v5036_v58, %v5032_v30  ;;  %5987 = vmatpush.bf16.msrb.mxu2 %v8594_v17  ;;  %v9503_v39 = vld [vmem:[#allocation3 + $0x54] sm:$0xe] }
 0x405   : > { %9221 = vst [vmem:[#allocation3 + $0x58] sm:$0xff] %v8820_v57   ;;  %v3552_v15 = vpop.f32.mrf.mxu0  ;;  %v4944_v14 = vunpack.c.l.b16 %v4800_v46  ;;  %v8586_v20 = vld [vmem:[%s12218_s2 + $0x20] sm:$0xff] }
 0x406   : > { %v3553_v16 = vadd.f32 %v3552_v15, %v3454_v4  ;;  %v3496_v42 = vpop.f32.mrf.mxu3  ;;  %v3732_v34 = vmax.f32 %v3696_v7, 0.0  ;;  %v3397_v28 = vpop.f32.mrf.mxu2  ;;  %v3091_v15 = vsel %vm868_vm1, %v3089_v3, %v3090_v54  ;;  %5898 = vmatpush.bf16.msrb.mxu1 %v8586_v20 }
 0x407   : > { %v4960_v45 = vpack.c.b16 %v4944_v14, %v4944_v14 }
 0x408   : > { %v3617_v2 = vadd.f32 %v3553_v16, %v2468_v31  ;;  %v3958_v14 = vrot.slane %v3732_v34, 7  ;;  %v12392_v34 = vld [vmem:[#allocation44_spill] sm:$0xff] }
 0x409   : > { %v5243_v62 = vrot.slane %v4960_v45, 1  ;;  %v5039_v33 = vshll.u32 %v4960_v45, 16 }
 0x40a   : > { %v3657_v0 = vmul.f32 %v11005_v13, %v3617_v2  ;;  %v4050_v40 = vsel %vm3933_vm2, 0.0, %v3958_v14 }
 0x40b   : > { %v5244_v18 = vsel %vm868_vm1, %v5242_v9, %v5243_v62  ;;  %v5041_v47 = vrot.slane %v5039_v33, 1  ;;  %v3459_v62 = vadd.f32 %v11016_v24, %v11019_v41 }
 0x40c   : > { %v3697_v26 = vadd.f32 %v11011_v35, %v3657_v0  ;;  %5695 = vmatmul.bf16.gmra.mxu3 %v5244_v18  ;;  %v4775_v57 = vld [vmem:[#allocation3 + $0x54] sm:$0xff]   ;;  %v4801_v4 = vld [vmem:[#allocation3 + $0x5c] sm:$0x1] }
 0x40d   : > { %v9502_v48 = vld [vmem:[#allocation3 + $0x54] sm:$0xf0]  ;;  %v3555_v46 = vpop.f32.mrf.mxu0  ;;  %v5042_v22 = vsel %vm579_vm0, %v11279_v53, %v5041_v47  ;;  %v4945_v31 = vunpack.c.l.b16 %v4801_v4  ;;  %v5046_v58 = vshll.u32 %v4775_v57, 16  ;;  %5522 = vmatmul.bf16.gmra.mxu1 %v4775_v57 }
 0x40e   : > { %v3733_v27 = vmax.f32 %v3697_v26, 0.0  ;;  %v3556_v23 = vadd.f32 %v3555_v46, %v11021_v43  ;;  %5606 = vmatmul.bf16.gmra.mxu2 %v5042_v22  ;;  %v3498_v45 = vpop.f32.mrf.mxu3  ;;  %v9504_v43 = vor.u32 %v9503_v39, %v9502_v48  ;;  %v3399_v9 = vpop.f32.mrf.mxu2  ;;  %v12393_v0 = vld [vmem:[#allocation35_spill] sm:$0xff]  ;;  %v5044_v26 = vshrl.u32 %v4775_v57, 16 }
 0x40f   : > { %v4961_v30 = vpack.c.b16 %v4945_v31, %v4945_v31  ;;  %v5048_v42 = vrot.slane %v5046_v58, 1  ;;  %v2473_v17 = vadd.f32 %v12393_v0, %v12392_v34  ;;  %v12395_v34 = vld [vmem:[#allocation39_spill] sm:$0xff] }
 0x410   : > { %v3959_v7 = vrot.slane %v3733_v27, 7  ;;  %v3618_v16 = vadd.f32 %v3556_v23, %v10755_v29  ;;  %3594 = vmatmul.bf16.gmra.mxu0 %v3091_v15  ;;  %v5245_v47 = vrot.slane %v9504_v43, 1 }
 0x411   : > { %v5246_v28 = vrot.slane %v4961_v30, 1  ;;  %v5051_v4 = vshll.u32 %v4961_v30, 16  ;;  %v5049_v22 = vor.u32 %v5048_v42, %v5044_v26 }
 0x412   : > { %v3960_v2 = vsel %vm3933_vm2, %v3958_v14, %v3959_v7  ;;  %v3658_v3 = vmul.f32 %v11005_v13, %v3618_v16  ;;  %v4068_v24 = vsel %vm3933_vm2, %v3959_v7, 0.0 }
 0x413   : > { %v11291_v54 = vpack.c.bf16 %v3960_v2, %v4050_v40  ;;  %v5247_v23 = vsel %vm868_vm1, %v5245_v47, %v5246_v28  ;;  %v5053_v39 = vrot.slane %v5051_v4, 1  ;;  %v12394_v40 = vld [vmem:[#allocation46_spill] sm:$0xff]  ;;  %v11310_v30 = vpack.c.bf16 %v3960_v2, %v3958_v14 }
 0x414   : > { %v3698_v29 = vadd.f32 %v11011_v35, %v3658_v3 }
 0x415   : > { %9222 = vst [vmem:[#allocation3 + $0x60] sm:$0xff] %v11291_v54   ;;  %v3557_v33 = vpop.f32.mrf.mxu0  ;;  %v5054_v57 = vsel %vm579_vm0, %v5049_v22, %v5053_v39  ;;  %v5058_v42 = vshll.u32 %v11291_v54, 16  ;;  %v11326_v22 = vld [vmem:[#allocation3 + $0x24] sm:$0xf0] }
 0x416   : > { %v3734_v20 = vmax.f32 %v3698_v29, 0.0  ;;  %v3558_v18 = vadd.f32 %v3557_v33, %v3459_v62 }
 0x417   : > { %v5060_v4 = vrot.slane %v5058_v42, 1 }
 0x418   : > { %v3961_v48 = vrot.slane %v3734_v20, 7  ;;  %v3619_v46 = vadd.f32 %v3558_v18, %v2473_v17  ;;  %v12396_v20 = vld [vmem:[#allocation20_spill] sm:$0xff]  ;;  %v12397_v18 = vld [vmem:[#allocation43_spill] sm:$0xff] }
 0x419   : > { %v2478_v47 = vadd.f32 %v12397_v18, %v12396_v20 }
 0x41a   : > { %v4051_v41 = vsel %vm3933_vm2, 0.0, %v3961_v48  ;;  %v3659_v15 = vmul.f32 %v11005_v13, %v3619_v46  ;;  %v11324_v46 = vld [vmem:[#allocation3 + $0x24] sm:$0xff]  }
 0x41b   : > { %v8830_v27 = vpack.c.bf16 %v4051_v41, %v4068_v24 }
 0x41c   : > { %v3699_v31 = vadd.f32 %v11011_v35, %v3659_v15  ;;  %5700 = vmatmul.bf16.gmra.mxu3 %v5247_v23  ;;  %v9285_v62 = vld [vmem:[#allocation3 + $0x60] sm:$0xf0]  ;;  %v9286_v29 = vld [vmem:[#allocation3 + $0x60] sm:$0xe] }
 0x41d   : > { %9223 = vst [vmem:[#allocation3 + $0x68] sm:$0xff] %v8830_v27   ;;  %v3560_v16 = vpop.f32.mrf.mxu0  ;;  %9512 = vmatmul.msk.bf16.gmra.mxu1 %vm11085_vm5, %v11310_v30  ;;  %v9287_v17 = vor.u32 %v9286_v29, %v9285_v62 }
 0x41e   : > { %v3735_v58 = vmax.f32 %v3699_v31, 0.0  ;;  %v3561_v45 = vadd.f32 %v3560_v16, %v11041_v37  ;;  %5611 = vmatmul.bf16.gmra.mxu2 %v5054_v57  ;;  %v8593_v31 = vld [vmem:[%s12218_s2 + $0x58] sm:$0xff] }
 0x41f   : > { %v5248_v41 = vrot.slane %v9287_v17, 1  ;;  %v8585_v16 = vld [vmem:[%s12218_s2 + $0x18] sm:$0xff]  ;;  %5988 = vmatpush.bf16.msrb.mxu2 %v8593_v31  ;;  %v11350_v17 = vld [vmem:[%s12219_s3] ss:$0 sm:$0xff] }
 0x420   : > { %v3962_v7 = vrot.slane %v3735_v58, 7  ;;  %v3620_v3 = vadd.f32 %v3561_v45, %v12394_v40  ;;  %9508 = vmatmul.msk.bf16.vlgmr.msra.gmra.mxu0 %vm11085_vm5, %v11089_v6  ;;  %v3464_v6 = vadd.f32 %v12395_v34, %v11039_v8  ;;  %v5056_v8 = vshrl.u32 %v11291_v54, 16  ;;  %5899 = vmatpush.bf16.msrb.mxu1 %v8585_v16 }
 0x422   : > { %v3963_v43 = vsel %vm3933_vm2, %v3961_v48, %v3962_v7  ;;  %v4069_v9 = vsel %vm3933_vm2, %v3962_v7, 0.0  ;;  %v3660_v37 = vmul.f32 %v11005_v13, %v3620_v3  ;;  %v11336_v57 = vor.u32 %v5060_v4, %v5056_v8 }
 0x423   : > { %v8835_v33 = vpack.c.bf16 %v4069_v9, %v3963_v43 }
 0x424   : > { %v4802_v14 = vld [vmem:[#allocation3 + $0x68] sm:$0x1]  ;;  %v3700_v28 = vadd.f32 %v11011_v35, %v3660_v37 }
 0x425   : > { %9224 = vst [vmem:[#allocation3 + $0x70] sm:$0xff] %v8835_v33   ;;  %v3562_v2 = vpop.f32.mrf.mxu0  ;;  %v4946_v0 = vunpack.c.l.b16 %v4802_v14  ;;  %v9514_v33 = vld [vmem:[#allocation3 + $0x6c] sm:$0xe] }
 0x426   : > { %v3563_v26 = vadd.f32 %v3562_v2, %v3464_v6  ;;  %v3736_v23 = vmax.f32 %v3700_v28, 0.0  ;;  %v12399_v28 = vld [vmem:[#allocation12_spill] sm:$0xff] }
 0x427   : > { %v4962_v48 = vpack.c.b16 %v4946_v0, %v4946_v0 }
 0x428   : > { %v3621_v24 = vadd.f32 %v3563_v26, %v2478_v47  ;;  %v3964_v9 = vrot.slane %v3736_v23, 7  ;;  %v12400_v26 = vld [vmem:[#allocation45_spill] sm:$0xff] }
 0x429   : > { %v5249_v15 = vrot.slane %v4962_v48, 1  ;;  %v5063_v27 = vshll.u32 %v4962_v48, 16  ;;  %v3469_v4 = vadd.f32 %v12400_v26, %v12399_v28  ;;  %v11360_v48 = vld [vmem:[%s12220_s4] ss:$0 sm:$0xff] }
 0x42a   : > { %v3661_v39 = vmul.f32 %v11005_v13, %v3621_v24  ;;  %v5493_v29 = vpop.f32.mrf.mxu1  ;;  %v4052_v2 = vsel %vm3933_vm2, 0.0, %v3964_v9 }
 0x42b   : > { %v5250_v58 = vsel %vm868_vm1, %v5248_v41, %v5249_v15  ;;  %v5065_v45 = vrot.slane %v5063_v27, 1  ;;  %v12401_v15 = vld [vmem:[#allocation49_spill] sm:$0xff]  ;;  %v12402_v27 = vld [vmem:[#allocation47_spill] sm:$0xff] }
 0x42c   : > { %v3701_v54 = vadd.f32 %v11011_v35, %v3661_v39  ;;  %5705 = vmatmul.bf16.gmra.mxu3 %v5250_v58  ;;  %v4779_v7 = vld [vmem:[#allocation3 + $0x6c] sm:$0xff]   ;;  %v4803_v3 = vld [vmem:[#allocation3 + $0x74] sm:$0x1]  ;;  %v2483_v23 = vadd.f32 %v12402_v27, %v12401_v15 }
 0x42d   : > { %v9513_v40 = vld [vmem:[#allocation3 + $0x6c] sm:$0xf0]  ;;  %v3565_v13 = vpop.f32.mrf.mxu0  ;;  %v5066_v43 = vsel %vm579_vm0, %v11336_v57, %v5065_v45  ;;  %v4947_v42 = vunpack.c.l.b16 %v4803_v3  ;;  %v12398_v35 = vld [vmem:[#allocation21_spill] sm:$0xff]  ;;  %v5070_v14 = vshll.u32 %v4779_v7, 16  ;;  %5532 = vmatmul.bf16.gmra.mxu1 %v4779_v7 }
 0x42e   : > { %v3737_v37 = vmax.f32 %v3701_v54, 0.0  ;;  %v3566_v62 = vadd.f32 %v3565_v13, %v11069_v49  ;;  %5616 = vmatmul.bf16.gmra.mxu2 %v5066_v43  ;;  %v9515_v47 = vor.u32 %v9514_v33, %v9513_v40  ;;  %v5068_v54 = vshrl.u32 %v4779_v7, 16 }
 0x42f   : > { %v4963_v18 = vpack.c.b16 %v4947_v42, %v4947_v42  ;;  %v5072_v41 = vrot.slane %v5070_v14, 1 }
 0x430   : > { %v3965_v34 = vrot.slane %v3737_v37, 7  ;;  %v3622_v6 = vadd.f32 %v3566_v62, %v12398_v35  ;;  %6897 = vmatmul.bf16.gmra.mxu0 %v11324_v46  ;;  %v5251_v58 = vrot.slane %v9515_v47, 1 }
 0x431   : > { %v5252_v45 = vrot.slane %v4963_v18, 1  ;;  %v5075_v40 = vshll.u32 %v4963_v18, 16  ;;  %v5073_v43 = vor.u32 %v5072_v41, %v5068_v54 }
 0x432   : > { %v3966_v0 = vsel %vm3933_vm2, %v3964_v9, %v3965_v34  ;;  %v3662_v49 = vmul.f32 %v11350_v17, %v3622_v6  ;;  %v5495_v16 = vpop.f32.mrf.mxu1  ;;  %v4070_v37 = vsel %vm3933_vm2, %v3965_v34, 0.0 }
 0x433   : > { %v11353_v20 = vpack.c.bf16 %v3966_v0, %v4052_v2  ;;  %v5253_v14 = vsel %vm868_vm1, %v5251_v58, %v5252_v45  ;;  %v5077_v2 = vrot.slane %v5075_v40, 1 }
 0x434   : > { %v3702_v24 = vadd.f32 %v11360_v48, %v3662_v49 }
 0x435   : > { %9225 = vst [vmem:[#allocation3 + $0x78] sm:$0xff] %v11353_v20   ;;  %v3567_v8 = vpop.f32.mrf.mxu0  ;;  %v5078_v18 = vsel %vm579_vm0, %v5073_v43, %v5077_v2  ;;  %v5082_v58 = vshll.u32 %v11353_v20, 16  ;;  %v12404_v43 = vld [vmem:[#allocation25_spill] sm:$0xff] }
 0x436   : > { %v3738_v39 = vmax.f32 %v3702_v24, 0.0  ;;  %v3568_v31 = vadd.f32 %v3567_v8, %v3469_v4  ;;  %v12403_v8 = vld [vmem:[#allocation51_spill] sm:$0xff] }
 0x437   : > { %v5671_v35 = vpop.f32.mrf.mxu3 }
 0x438   : > { %v3967_v3 = vrot.slane %v3738_v39, 7  ;;  %v3623_v13 = vadd.f32 %v3568_v31, %v2483_v23 }
 0x439   : > { %v5582_v6 = vpop.f32.mrf.mxu2 }
 0x43a   : > { %v4053_v62 = vsel %vm3933_vm2, 0.0, %v3967_v3  ;;  %v3663_v33 = vmul.f32 %v11350_v17, %v3623_v13  ;;  %v5583_v47 = vadd.f32 %v5582_v6, %v5493_v29  ;;  %v11373_v26 = vpop.f32.mrf.mxu1  ;;  %v11381_v29 = vpack.c.bf16 %v3966_v0, %v3964_v9 }
 0x43b   : > { %v8845_v42 = vpack.c.bf16 %v4053_v62, %v4070_v37  ;;  %v12405_v37 = vld [vmem:[#allocation16_spill] sm:$0xff] }
 0x43c   : > { %v3703_v49 = vadd.f32 %v11360_v48, %v3663_v33  ;;  %5710 = vmatmul.bf16.gmra.mxu3 %v5253_v14  ;;  %v11375_v4 = vadd.f32 %v5671_v35, %v5583_v47  ;;  %v9288_v23 = vld [vmem:[#allocation3 + $0x78] sm:$0xf0]  ;;  %v9289_v39 = vld [vmem:[#allocation3 + $0x78] sm:$0xe]  ;;  %v2488_v62 = vadd.f32 %v12405_v37, %v12404_v43  ;;  %v5084_v14 = vrot.slane %v5082_v58, 1 }
 0x43d   : > { %9226 = vst [vmem:[#allocation3 + $0x80] sm:$0xff] %v8845_v42   ;;  %v3570_v7 = vpop.f32.mrf.mxu0  ;;  %9523 = vmatmul.msk.bf16.gmra.mxu1 %vm11085_vm5, %v11381_v29  ;;  %v12407_v43 = vld [vmem:[#allocation19_spill] sm:$0xff] }
 0x43e   : > { %v3739_v28 = vmax.f32 %v3703_v49, 0.0  ;;  %v3571_v34 = vadd.f32 %v3570_v7, %v11102_v60  ;;  %5621 = vmatmul.bf16.gmra.mxu2 %v5078_v18  ;;  %v5080_v49 = vshrl.u32 %v11353_v20, 16 }
 0x43f   : > { %v5673_v54 = vpop.f32.mrf.mxu3 }
 0x440   : > { %v3968_v24 = vrot.slane %v3739_v28, 7  ;;  %v3624_v41 = vadd.f32 %v3571_v34, %v12403_v8  ;;  %9519 = vmatmul.msk.bf16.gmra.mxu0 %vm11085_vm5, %v11155_v55  ;;  %v3474_v55 = vadd.f32 %v11094_v38, %v11099_v21  ;;  %v11399_v38 = vld [vmem:[#allocation3 + $0x3c] sm:$0xff]  }
 0x441   : > { %v5584_v45 = vpop.f32.mrf.mxu2  ;;  %v11401_v21 = vld [vmem:[#allocation3 + $0x3c] sm:$0xf0] }
 0x442   : > { %v3969_v60 = vsel %vm3933_vm2, %v3967_v3, %v3968_v24  ;;  %v4071_v15 = vsel %vm3933_vm2, %v3968_v24, 0.0  ;;  %v3664_v27 = vmul.f32 %v11350_v17, %v3624_v41  ;;  %v5585_v9 = vadd.f32 %v5584_v45, %v5495_v16  ;;  %v11395_v35 = vpop.f32.mrf.mxu1  ;;  %v8592_v24 = vld [vmem:[%s12218_s2 + $0x50] sm:$0xff] }
 0x443   : > { %v8850_v31 = vpack.c.bf16 %v4071_v15, %v3969_v60  ;;  %v9290_v3 = vor.u32 %v9289_v39, %v9288_v23  ;;  %v8584_v8 = vld [vmem:[%s12218_s2 + $0x10] sm:$0xff]  ;;  %v11411_v41 = vor.u32 %v5084_v14, %v5080_v49  ;;  %5989 = vmatpush.bf16.msrb.mxu2 %v8592_v24 }
 0x444   : > { %v4804_v0 = vld [vmem:[#allocation3 + $0x80] sm:$0x1]  ;;  %v3704_v33 = vadd.f32 %v11360_v48, %v3664_v27  ;;  %v11397_v6 = vadd.f32 %v5673_v54, %v5585_v9  ;;  %5900 = vmatpush.bf16.msrb.mxu1 %v8584_v8  ;;  %v9525_v54 = vld [vmem:[#allocation3 + $0x84] sm:$0xe]  ;;  %v12408_v8 = vld [vmem:[#allocation30_spill] sm:$0xff] }
 0x445   : > { %9227 = vst [vmem:[#allocation3 + $0x88] sm:$0xff] %v8850_v31   ;;  %v3572_v40 = vpop.f32.mrf.mxu0  ;;  %v4948_v13 = vunpack.c.l.b16 %v4804_v0  ;;  %v5254_v47 = vrot.slane %v9290_v3, 1 }
 0x446   : > { %v3573_v42 = vadd.f32 %v3572_v40, %v3474_v55  ;;  %v3740_v28 = vmax.f32 %v3704_v33, 0.0  ;;  %12406 = vst [vmem:[#allocation42_spill] sm:$0xff] %v11411_v41 }
 0x447   : > { %v4964_v2 = vpack.c.b16 %v4948_v13, %v4948_v13 }
 0x448   : > { %v3625_v16 = vadd.f32 %v3573_v42, %v2488_v62  ;;  %v3970_v45 = vrot.slane %v3740_v28, 7 }
 0x449   : > { %v5255_v7 = vrot.slane %v4964_v2, 1  ;;  %v5087_v18 = vshll.u32 %v4964_v2, 16 }
 0x44a   : > { %v3665_v34 = vmul.f32 %v11350_v17, %v3625_v16  ;;  %v11418_v0 = vpop.f32.mrf.mxu1  ;;  %v4054_v42 = vsel %vm3933_vm2, 0.0, %v3970_v45 }
 0x44b   : > { %v5256_v60 = vsel %vm868_vm1, %v5254_v47, %v5255_v7  ;;  %v5089_v15 = vrot.slane %v5087_v18, 1  ;;  %v3479_v7 = vadd.f32 %v11126_v10, %v11131_v1 }
 0x44c   : > { %v3705_v20 = vadd.f32 %v11360_v48, %v3665_v34  ;;  %5715 = vmatmul.bf16.gmra.mxu3 %v5256_v60  ;;  %v4783_v27 = vld [vmem:[#allocation3 + $0x84] sm:$0xff]   ;;  %v4805_v39 = vld [vmem:[#allocation3 + $0x8c] sm:$0x1]  ;;  %v12409_v60 = vld [vmem:[#allocation26_spill] sm:$0xff] }
 0x44d   : > { %v9524_v23 = vld [vmem:[#allocation3 + $0x84] sm:$0xf0]  ;;  %v3575_v31 = vpop.f32.mrf.mxu0  ;;  %v5090_v58 = vsel %vm579_vm0, %v11411_v41, %v5089_v15  ;;  %v4949_v13 = vunpack.c.l.b16 %v4805_v39  ;;  %v5094_v62 = vshll.u32 %v4783_v27, 16  ;;  %5542 = vmatmul.bf16.gmra.mxu1 %v4783_v27  ;;  %v2493_v15 = vadd.f32 %v12409_v60, %v12408_v8 }
 0x44e   : > { %v3741_v55 = vmax.f32 %v3705_v20, 0.0  ;;  %v3576_v9 = vadd.f32 %v3575_v31, %v11135_v12  ;;  %5626 = vmatmul.bf16.gmra.mxu2 %v5090_v58  ;;  %v9526_v47 = vor.u32 %v9525_v54, %v9524_v23 }
 0x44f   : > { %v5676_v40 = vpop.f32.mrf.mxu3  ;;  %v4965_v49 = vpack.c.b16 %v4949_v13, %v4949_v13  ;;  %v5096_v24 = vrot.slane %v5094_v62, 1 }
 0x450   : > { %v3971_v3 = vrot.slane %v3741_v55, 7  ;;  %v3626_v37 = vadd.f32 %v3576_v9, %v12407_v43  ;;  %6907 = vmatmul.bf16.gmra.mxu0 %v11399_v38  ;;  %v5257_v23 = vrot.slane %v9526_v47, 1  ;;  %v5092_v55 = vshrl.u32 %v4783_v27, 16 }
 0x451   : > { %v5587_v33 = vpop.f32.mrf.mxu2  ;;  %v5258_v58 = vrot.slane %v4965_v49, 1  ;;  %v5099_v10 = vshll.u32 %v4965_v49, 16 }
 0x452   : > { %v3972_v14 = vsel %vm3933_vm2, %v3970_v45, %v3971_v3  ;;  %v3666_v12 = vmul.f32 %v11350_v17, %v3626_v37  ;;  %v5588_v2 = vadd.f32 %v5587_v33, %v11373_v26  ;;  %v11436_v39 = vpop.f32.mrf.mxu1  ;;  %v4072_v13 = vsel %vm3933_vm2, %v3971_v3, 0.0 }
 0x453   : > { %v11426_v16 = vpack.c.bf16 %v3972_v14, %v4054_v42  ;;  %v5259_v42 = vsel %vm868_vm1, %v5257_v23, %v5258_v58  ;;  %v11454_v60 = vpack.c.bf16 %v3972_v14, %v3970_v45  ;;  %v3484_v45 = vadd.f32 %v11160_v44, %v11165_v19 }
 0x454   : > { %v3706_v18 = vadd.f32 %v11360_v48, %v3666_v12  ;;  %v11431_v28 = vadd.f32 %v5676_v40, %v5588_v2  ;;  %v5097_v40 = vor.u32 %v5096_v24, %v5092_v55  ;;  %v5101_v12 = vrot.slane %v5099_v10, 1  ;;  %v12410_v24 = vld [vmem:[#allocation23_spill] sm:$0xff] }
 0x455   : > { %9228 = vst [vmem:[#allocation3 + $0x90] sm:$0xff] %v11426_v16   ;;  %v3577_v34 = vpop.f32.mrf.mxu0 }
 0x456   : > { %v3742_v20 = vmax.f32 %v3706_v18, 0.0  ;;  %v3578_v26 = vadd.f32 %v3577_v34, %v3479_v7  ;;  %v5102_v47 = vsel %vm579_vm0, %v5097_v40, %v5101_v12  ;;  %v11468_v40 = vld [vmem:[#allocation3 + $0x54] sm:$0xff]  }
 0x457   : > { %v5678_v31 = vpop.f32.mrf.mxu3 }
 0x458   : > { %v3973_v1 = vrot.slane %v3742_v20, 7  ;;  %v3627_v9 = vadd.f32 %v3578_v26, %v2493_v15 }
 0x459   : > { %v5589_v54 = vpop.f32.mrf.mxu2 }
 0x45a   : > { %v4055_v43 = vsel %vm3933_vm2, 0.0, %v3973_v1  ;;  %v3667_v37 = vmul.f32 %v11350_v17, %v3627_v9  ;;  %v5590_v62 = vadd.f32 %v5589_v54, %v11395_v35  ;;  %v11448_v18 = vpop.f32.mrf.mxu1 }
 0x45b   : > { %v8860_v33 = vpack.c.bf16 %v4055_v43, %v4072_v13  ;;  %v11470_v13 = vld [vmem:[#allocation3 + $0x54] sm:$0xf0] }
 0x45c   : > { %v3707_v2 = vadd.f32 %v11360_v48, %v3667_v37  ;;  %5720 = vmatmul.bf16.gmra.mxu3 %v5259_v42  ;;  %v11444_v27 = vadd.f32 %v5678_v31, %v5590_v62  ;;  %v9291_v23 = vld [vmem:[#allocation3 + $0x90] sm:$0xf0]  ;;  %v9292_v58 = vld [vmem:[#allocation3 + $0x90] sm:$0xe]  ;;  %v12412_v43 = vld [vmem:[#allocation31_spill] sm:$0xff] }
 0x45d   : > { %9229 = vst [vmem:[#allocation3 + $0x98] sm:$0xff] %v8860_v33   ;;  %v3580_v49 = vpop.f32.mrf.mxu0  ;;  %9534 = vmatmul.msk.bf16.gmra.mxu1 %vm11085_vm5, %v11454_v60  ;;  %v9293_v54 = vor.u32 %v9292_v58, %v9291_v23 }
 0x45e   : > { %v3743_v3 = vmax.f32 %v3707_v2, 0.0  ;;  %v3581_v7 = vadd.f32 %v3580_v49, %v11168_v63  ;;  %5631 = vmatmul.bf16.gmra.mxu2 %v5102_v47  ;;  %v5104_v49 = vshrl.u32 %v11426_v16, 16 }
 0x45f   : > { %v5681_v35 = vpop.f32.mrf.mxu3 }
 0x460   : > { %v3974_v34 = vrot.slane %v3743_v3, 7  ;;  %v3628_v8 = vadd.f32 %v3581_v7, %v12410_v24  ;;  %9530 = vmatmul.msk.bf16.gmra.mxu0 %vm11085_vm5, %v11249_v5  ;;  %v5106_v5 = vshll.u32 %v11426_v16, 16  ;;  %v5260_v3 = vrot.slane %v9293_v54, 1 }
 0x461   : > { %v5592_v15 = vpop.f32.mrf.mxu2 }
 0x462   : > { %v3975_v63 = vsel %vm3933_vm2, %v3973_v1, %v3974_v34  ;;  %v4073_v20 = vsel %vm3933_vm2, %v3974_v34, 0.0  ;;  %v3668_v26 = vmul.f32 %v11350_v17, %v3628_v8  ;;  %v5593_v31 = vadd.f32 %v5592_v15, %v11418_v0  ;;  %v12411_v0 = vld [vmem:[#allocation36_spill] sm:$0xff]  ;;  %v11475_v42 = vpop.f32.mrf.mxu1  ;;  %v8591_v15 = vld [vmem:[%s12218_s2 + $0x48] sm:$0xff] }
 0x463   : > { %v8865_v55 = vpack.c.bf16 %v4073_v20, %v3975_v63  ;;  %v2498_v37 = vadd.f32 %v12412_v43, %v12411_v0  ;;  %v5108_v44 = vrot.slane %v5106_v5, 1  ;;  %v8583_v63 = vld [vmem:[%s12218_s2 + $0x8] sm:$0xff]  ;;  %5990 = vmatpush.bf16.msrb.mxu2 %v8591_v15 }
 0x464   : > { %v4806_v14 = vld [vmem:[#allocation3 + $0x98] sm:$0x1]  ;;  %v11466_v10 = vadd.f32 %v5681_v35, %v5593_v31  ;;  %v3708_v62 = vadd.f32 %v11360_v48, %v3668_v26  ;;  %5901 = vmatpush.bf16.msrb.mxu1 %v8583_v63  ;;  %v9536_v0 = vld [vmem:[#allocation3 + $0x9c] sm:$0xe] }
 0x465   : > { %9230 = vst [vmem:[#allocation3 + $0xa0] sm:$0xff] %v8865_v55   ;;  %v3582_v9 = vpop.f32.mrf.mxu0  ;;  %v4950_v1 = vunpack.c.l.b16 %v4806_v14  ;;  %v11486_v20 = vor.u32 %v5108_v44, %v5104_v49 }
 0x466   : > { %v3583_v33 = vadd.f32 %v3582_v9, %v3484_v45  ;;  %v3744_v34 = vmax.f32 %v3708_v62, 0.0 }
 0x467   : > { %v5683_v19 = vpop.f32.mrf.mxu3  ;;  %v4966_v12 = vpack.c.b16 %v4950_v1, %v4950_v1  ;;  %12413 = vst [vmem:[#allocation50_spill] sm:$0xff] %v11486_v20 }
 0x468   : > { %v3629_v2 = vadd.f32 %v3583_v33, %v2498_v37  ;;  %v11494_v14 = vrot.slane %v3744_v34, 7  ;;  %v12414_v33 = vld [vmem:[#allocation28_spill] sm:$0xff]  ;;  %v3489_v34 = vadd.f32 %v11208_v11, %v11215_v25 }
 0x469   : > { %v5594_v47 = vpop.f32.mrf.mxu2  ;;  %v5261_v7 = vrot.slane %v4966_v12, 1  ;;  %v5111_v35 = vshll.u32 %v4966_v12, 16 }
 0x46a   : > { %v3669_v24 = vmul.f32 %v11350_v17, %v3629_v2  ;;  %v5595_v8 = vadd.f32 %v5594_v47, %v11436_v39  ;;  %v11497_v54 = vpop.f32.mrf.mxu1  ;;  %v4056_v2 = vsel %vm3933_vm2, 0.0, %v11494_v14 }
 0x46b   : > { %v5262_v16 = vsel %vm868_vm1, %v5260_v3, %v5261_v7  ;;  %v5113_v26 = vrot.slane %v5111_v35, 1 }
 0x46c   : > { %v3709_v31 = vadd.f32 %v11360_v48, %v3669_v24  ;;  %5725 = vmatmul.bf16.gmra.mxu3 %v5262_v16  ;;  %v4787_v23 = vld [vmem:[#allocation3 + $0x9c] sm:$0xff]   ;;  %v4807_v55 = vld [vmem:[#allocation3 + $0xa4] sm:$0x1]  ;;  %v11490_v39 = vadd.f32 %v5683_v19, %v5595_v8  ;;  %v12415_v16 = vld [vmem:[#allocation10_spill] sm:$0xff] }
 0x46d   : > { %v9535_v58 = vld [vmem:[#allocation3 + $0x9c] sm:$0xf0]  ;;  %v3585_v5 = vpop.f32.mrf.mxu0  ;;  %v5114_v45 = vsel %vm579_vm0, %v11486_v20, %v5113_v26  ;;  %v4951_v37 = vunpack.c.l.b16 %v4807_v55  ;;  %v5118_v19 = vshll.u32 %v4787_v23, 16  ;;  %5552 = vmatmul.bf16.gmra.mxu1 %v4787_v23  ;;  %v12416_v26 = vld [vmem:[#allocation38_spill] sm:$0xff]  ;;  %v4221_v20 = vld [vmem:[#allocation3 + $0x2c] sm:$0x1] }
 0x46e   : > { %v3745_v9 = vmax.f32 %v3709_v31, 0.0  ;;  %v3586_v1 = vadd.f32 %v3585_v5, %v11219_v59  ;;  %5636 = vmatmul.bf16.gmra.mxu2 %v5114_v45  ;;  %v9537_v35 = vor.u32 %v9536_v0, %v9535_v58  ;;  %v2503_v31 = vadd.f32 %v12416_v26, %v12415_v16 }
 0x46f   : > { %v5686_v43 = vpop.f32.mrf.mxu3  ;;  %v4967_v7 = vpack.c.b16 %v4951_v37, %v4951_v37  ;;  %v5120_v63 = vrot.slane %v5118_v19, 1 }
 0x470   : > { %v3977_v62 = vrot.slane %v3745_v9, 7  ;;  %v3630_v44 = vadd.f32 %v3586_v1, %v12414_v33  ;;  %6917 = vmatmul.bf16.gmra.mxu0 %v11468_v40  ;;  %v5263_v58 = vrot.slane %v9537_v35, 1  ;;  %v5116_v1 = vshrl.u32 %v4787_v23, 16  ;;  %v8605_v23 = vld [vmem:[%s12218_s2 + $0xb8] sm:$0xff] }
 0x471   : > { %v5597_v12 = vpop.f32.mrf.mxu2  ;;  %v5264_v9 = vrot.slane %v4967_v7, 1  ;;  %v5123_v11 = vshll.u32 %v4967_v7, 16  ;;  %6073 = vmatpush.bf16.msra.mxu3 %v8605_v23 }
 0x472   : > { %v3978_v59 = vsel %vm3933_vm2, %v11494_v14, %v3977_v62  ;;  %v3670_v49 = vmul.f32 %v11350_v17, %v3630_v44  ;;  %v5598_v47 = vadd.f32 %v5597_v12, %v11448_v18  ;;  %v11517_v5 = vpop.f32.mrf.mxu1  ;;  %v5121_v37 = vor.u32 %v5120_v63, %v5116_v1  ;;  %v8590_v63 = vld [vmem:[%s12218_s2 + $0x40] sm:$0xff] }
 0x473   : > { %v11507_v3 = vpack.c.bf16 %v3978_v59, %v4056_v2  ;;  %v4074_v33 = vsel %vm3933_vm2, %v3977_v62, 0.0  ;;  %5991 = vmatpush.bf16.msrb.mxu2 %v8590_v63 }
 0x474   : > { %v3710_v24 = vadd.f32 %v11360_v48, %v3670_v49  ;;  %v11512_v8 = vadd.f32 %v5686_v43, %v5598_v47  ;;  %v5265_v49 = vsel %vm868_vm1, %v5263_v58, %v5264_v9  ;;  %v5125_v47 = vrot.slane %v5123_v11, 1 }
 0x475   : > { %9231 = vst [vmem:[#allocation3 + $0xa8] sm:$0xff] %v11507_v3   ;;  %v3587_v15 = vpop.f32.mrf.mxu0  ;;  %v5128_v63 = vshrl.u32 %v11507_v3, 16 }
 0x476   : > { %v3746_v55 = vmax.f32 %v3710_v24, 0.0  ;;  %v3588_v18 = vadd.f32 %v3587_v15, %v3489_v34  ;;  %v5126_v34 = vsel %vm579_vm0, %v5121_v37, %v5125_v47  ;;  %v12420_v47 = vld [vmem:[#allocation41_spill] sm:$0xff] }
 0x477   : > { %v5688_v45 = vpop.f32.mrf.mxu3 }
 0x478   : > { %v3979_v25 = vrot.slane %v3746_v55, 7  ;;  %v3631_v0 = vadd.f32 %v3588_v18, %v2503_v31  ;;  %v12417_v31 = vld [vmem:[#allocation34_spill] sm:$0xff]  ;;  %v11542_v18 = vpack.c.bf16 %v3978_v59, %v11494_v14 }
 0x479   : > { %v5599_v43 = vpop.f32.mrf.mxu2  ;;  %v8582_v14 = vld [vmem:[%s12218_s2] sm:$0xff] }
 0x47a   : > { %v4057_v44 = vsel %vm3933_vm2, 0.0, %v3979_v25  ;;  %v3671_v19 = vmul.f32 %v11350_v17, %v3631_v0  ;;  %v5600_v12 = vadd.f32 %v5599_v43, %v11475_v42  ;;  %v11532_v15 = vpop.f32.mrf.mxu1  ;;  %v5130_v43 = vshll.u32 %v11507_v3, 16  ;;  %5902 = vmatpush.bf16.msrb.mxu1 %v8582_v14 }
 0x47b   : > { %v8875_v2 = vpack.c.bf16 %v4057_v44, %v4074_v33 }
 0x47c   : > { %v3711_v35 = vadd.f32 %v11360_v48, %v3671_v19  ;;  %5730 = vmatmul.bf16.gmra.mxu3 %v5265_v49  ;;  %v11528_v7 = vadd.f32 %v5688_v45, %v5600_v12  ;;  %v9294_v45 = vld [vmem:[#allocation3 + $0xa8] sm:$0xf0]  ;;  %v9295_v0 = vld [vmem:[#allocation3 + $0xa8] sm:$0xe]  ;;  %v11567_v49 = vld [vmem:[#allocation3 + $0x6c] sm:$0xf0] }
 0x47d   : > { %9232 = vst [vmem:[#allocation3 + $0xb0] sm:$0xff] %v8875_v2   ;;  %v3590_v62 = vpop.f32.mrf.mxu0  ;;  %9545 = vmatmul.msk.bf16.gmra.mxu1 %vm11085_vm5, %v11542_v18  ;;  %v9296_v12 = vor.u32 %v9295_v0, %v9294_v45  ;;  %v11565_v2 = vld [vmem:[#allocation3 + $0x6c] sm:$0xff]  }
 0x47e   : > { %v3747_v24 = vmax.f32 %v3711_v35, 0.0  ;;  %v3591_v42 = vadd.f32 %v3590_v62, %v11262_v50  ;;  %5641 = vmatmul.bf16.gmra.mxu2 %v5126_v34  ;;  %12418 = vst [vmem:[#allocation13_spill] sm:$0xff] %v11565_v2  ;;  %v5132_v62 = vrot.slane %v5130_v43, 1  ;;  %v8601_v43 = vld [vmem:[%s12218_s2 + $0x98] sm:$0xff] }
 0x47f   : > { %v5691_v16 = vpop.f32.mrf.mxu3  ;;  %12419 = vst [vmem:[#allocation48_spill] sm:$0xff] %v11567_v49 }
 0x480   : > { %v3980_v26 = vrot.slane %v3747_v24, 7  ;;  %v3632_v55 = vadd.f32 %v3591_v42, %v12417_v31  ;;  %9541 = vmatmul.msk.bf16.gmra.mxu0 %vm11085_vm5, %v11310_v30  ;;  %v8604_v30 = vld [vmem:[%s12218_s2 + $0xb0] sm:$0xff] }
 0x481   : > { %v5602_v50 = vpop.f32.mrf.mxu2  ;;  %6074 = vmatpush.bf16.msra.mxu3 %v8604_v30 }
 0x482   : > { %v3981_v58 = vsel %vm3933_vm2, %v3979_v25, %v3980_v26  ;;  %v4075_v9 = vsel %vm3933_vm2, %v3980_v26, 0.0  ;;  %v3672_v1 = vmul.f32 %v11350_v17, %v3632_v55  ;;  %v5603_v11 = vadd.f32 %v5602_v50, %v11497_v54  ;;  %v8603_v54 = vld [vmem:[%s12218_s2 + $0xa8] sm:$0xff]  ;;  %v11572_v23 = vpop.f32.mrf.mxu1 }
 0x483   : > { %v8880_v59 = vpack.c.bf16 %v4075_v9, %v3981_v58  ;;  %v3494_v25 = vadd.f32 %v11254_v36, %v11259_v32  ;;  %v2508_v36 = vadd.f32 %v11230_v51, %v12420_v47  ;;  %v5266_v26 = vrot.slane %v9296_v12, 1  ;;  %v8602_v58 = vld [vmem:[%s12218_s2 + $0xa0] sm:$0xff] }
 0x484   : > { %v4808_v37 = vld [vmem:[#allocation3 + $0xb0] sm:$0x1]  ;;  %v11563_v33 = vadd.f32 %v5691_v16, %v5603_v11  ;;  %v3712_v32 = vadd.f32 %v11360_v48, %v3672_v1  ;;  %v11580_v9 = vor.u32 %v5132_v62, %v5128_v63  ;;  %v12422_v63 = vld [vmem:[#allocation11_spill] sm:$0xff] }
 0x485   : > { %9233 = vst [vmem:[#allocation3 + $0xb8] sm:$0xff] %v8880_v59   ;;  %v3592_v44 = vpop.f32.mrf.mxu0  ;;  %v4952_v19 = vunpack.c.l.b16 %v4808_v37  ;;  %6075 = vmatpush.bf16.msra.mxu3 %v8603_v54 }
 0x486   : > { %v3593_v35 = vadd.f32 %v3592_v44, %v3494_v25  ;;  %v3748_v50 = vmax.f32 %v3712_v32, 0.0  ;;  %12421 = vst [vmem:[#allocation14_spill] sm:$0xff] %v11580_v9 }
 0x487   : > { %v5693_v34 = vpop.f32.mrf.mxu3  ;;  %v4968_v24 = vpack.c.b16 %v4952_v19, %v4952_v19 }
 0x488   : > { %v3633_v42 = vadd.f32 %v3593_v35, %v2508_v36  ;;  %v3982_v25 = vrot.slane %v3748_v50, 7 }
 0x489   : > { %v5604_v16 = vpop.f32.mrf.mxu2  ;;  %v5267_v31 = vrot.slane %v4968_v24, 1  ;;  %v5135_v55 = vshll.u32 %v4968_v24, 16  ;;  %6076 = vmatpush.bf16.msra.mxu3 %v8602_v58  ;;  %v8600_v24 = vld [vmem:[%s12218_s2 + $0x90] sm:$0xff] }
 0x48a   : > { %v3673_v45 = vmul.f32 %v11350_v17, %v3633_v42  ;;  %v5605_v51 = vadd.f32 %v5604_v16, %v11517_v5  ;;  %v5523_v54 = vpop.f32.mrf.mxu1  ;;  %v4058_v32 = vsel %vm3933_vm2, 0.0, %v3982_v25 }
 0x48b   : > { %v5268_v1 = vsel %vm868_vm1, %v5266_v26, %v5267_v31  ;;  %v5137_v11 = vrot.slane %v5135_v55, 1 }
 0x48c   : > { %v3713_v3 = vadd.f32 %v11360_v48, %v3673_v45  ;;  %5735 = vmatmul.bf16.gmra.mxu3 %v5268_v1  ;;  %v4791_v0 = vld [vmem:[#allocation3 + $0xb4] sm:$0xff]   ;;  %v4809_v14 = vld [vmem:[#allocation3 + $0xbc] sm:$0x1]  ;;  %v11584_v59 = vadd.f32 %v5693_v34, %v5605_v51 }
 0x48d   : > { %v9546_v30 = vld [vmem:[#allocation3 + $0xb4] sm:$0xf0]  ;;  %v3595_v17 = vpop.f32.mrf.mxu0  ;;  %v5138_v5 = vsel %vm579_vm0, %v11580_v9, %v5137_v11  ;;  %v9547_v48 = vld [vmem:[#allocation3 + $0xb4] sm:$0xe]  ;;  %v4953_v19 = vunpack.c.l.b16 %v4809_v14  ;;  %v5142_v47 = vshll.u32 %v4791_v0, 16  ;;  %5562 = vmatmul.bf16.gmra.mxu1 %v4791_v0  ;;  %6077 = vmatpush.bf16.msra.mxu3 %v8601_v43 }
 0x48e   : > { %v3749_v37 = vmax.f32 %v3713_v3, 0.0  ;;  %5646 = vmatmul.bf16.gmra.mxu2 %v5138_v5  ;;  %v9548_v31 = vor.u32 %v9547_v48, %v9546_v30  ;;  %v8599_v51 = vld [vmem:[%s12218_s2 + $0x88] sm:$0xff]  ;;  %v5140_v3 = vshrl.u32 %v4791_v0, 16  ;;  %v8598_v43 = vld [vmem:[%s12218_s2 + $0x80] sm:$0xff] }
 0x48f   : > { %v5696_v44 = vpop.f32.mrf.mxu3  ;;  %v4969_v26 = vpack.c.b16 %v4953_v19, %v4953_v19  ;;  %v5144_v45 = vrot.slane %v5142_v47, 1 }
 0x490   : > { %v3983_v12 = vrot.slane %v3749_v37, 7  ;;  %6927 = vmatmul.bf16.gmra.mxu0 %v11565_v2  ;;  %v5269_v1 = vrot.slane %v9548_v31, 1 }
 0x491   : > { %v5607_v36 = vpop.f32.mrf.mxu2  ;;  %6078 = vmatpush.bf16.msra.mxu3 %v8600_v24  ;;  %v5270_v11 = vrot.slane %v4969_v26, 1  ;;  %v5147_v14 = vshll.u32 %v4969_v26, 16  ;;  %v5145_v5 = vor.u32 %v5144_v45, %v5140_v3  ;;  %v8645_v26 = vld [vmem:[%s12218_s2 + $0x1f8] sm:$0xff] }
 0x492   : > { %v3984_v35 = vsel %vm3933_vm2, %v3982_v25, %v3983_v12  ;;  %v4076_v62 = vsel %vm3933_vm2, %v3983_v12, 0.0  ;;  %v5608_v34 = vadd.f32 %v5607_v36, %v11532_v15  ;;  %v5525_v15 = vpop.f32.mrf.mxu1  ;;  %6973 = vmatpush.bf16.msra.mxu1 %v8645_v26 }
 0x493   : > { %v8885_v42 = vpack.c.bf16 %v3984_v35, %v4058_v32  ;;  %v8890_v16 = vpack.c.bf16 %v12422_v63, %v4076_v62  ;;  %v5271_v37 = vsel %vm868_vm1, %v5269_v1, %v5270_v11  ;;  %v5149_v48 = vrot.slane %v5147_v14, 1  ;;  %v11629_v1 = vld [vmem:[#allocation3 + $0x84] sm:$0xff]  }
 0x494   : > { %v11600_v55 = vadd.f32 %v5696_v44, %v5608_v34  ;;  %v11619_v32 = vpack.c.bf16 %v3984_v35, %v3982_v25  ;;  %12423 = vst [vmem:[#allocation52_spill] sm:$0xff] %v11629_v1  ;;  %v11631_v11 = vld [vmem:[#allocation3 + $0x84] sm:$0xf0] }
 0x495   : > { %9234 = vst [vmem:[#allocation3 + $0xc0] sm:$0xff] %v8885_v42   ;;  %v3597_v50 = vpop.f32.mrf.mxu0  ;;  %6079 = vmatpush.bf16.msra.mxu3 %v8599_v51  ;;  %v5150_v19 = vsel %vm579_vm0, %v5145_v5, %v5149_v48  ;;  %v5154_v31 = vshll.u32 %v8885_v42, 16 }
 0x496   : > { %9235 = vst [vmem:[#allocation3 + $0xc8] sm:$0xff] %v8890_v16  }
 0x497   : > { %v5698_v58 = vpop.f32.mrf.mxu3  ;;  %v5156_v45 = vrot.slane %v5154_v31, 1  ;;  %12424 = vst [vmem:[#allocation17_spill] sm:$0xff] %v11631_v11 }
 0x499   : > { %v5609_v17 = vpop.f32.mrf.mxu2  ;;  %6080 = vmatpush.bf16.msra.mxu3 %v8598_v43 }
 0x49a   : > { %v5610_v30 = vadd.f32 %v5609_v17, %v11572_v23  ;;  %v5528_v0 = vpop.f32.mrf.mxu1  ;;  %v8653_v23 = vld [vmem:[%s12218_s2 + $0x238] sm:$0xff] }
 0x49b   : > { %7062 = vmatpush.bf16.msra.mxu2 %v8653_v23 }
 0x49c   : > { %5740 = vmatmul.bf16.gmra.mxu3 %v5271_v37  ;;  %v11610_v44 = vadd.f32 %v5698_v58, %v5610_v30  ;;  %v9297_v63 = vld [vmem:[#allocation3 + $0xc0] sm:$0xf0]  ;;  %v9298_v16 = vld [vmem:[#allocation3 + $0xc0] sm:$0xe]  ;;  %v4218_v30 = vld [vmem:[#allocation3 + $0x8] sm:$0x1] }
 0x49d   : > { %v4810_v12 = vld [vmem:[#allocation3 + $0xc8] sm:$0x1]  ;;  %9556 = vmatmul.msk.bf16.gmra.mxu1 %vm11085_vm5, %v11619_v32 }
 0x49e   : > { %5651 = vmatmul.bf16.gmra.mxu2 %v5150_v19  ;;  %v4954_v47 = vunpack.c.l.b16 %v4810_v12  ;;  %v4362_v12 = vunpack.c.l.b16 %v4218_v30 }
 0x49f   : > { %v5701_v36 = vpop.f32.mrf.mxu3 }
 0x4a0   : > { %9552 = vmatmul.msk.bf16.gmra.mxu0 %vm11085_vm5, %v11381_v29  ;;  %v4970_v34 = vpack.c.b16 %v4954_v47, %v4954_v47  ;;  %v9299_v29 = vor.u32 %v9298_v16, %v9297_v63 }
 0x4a1   : > { %v5612_v62 = vpop.f32.mrf.mxu2 }
 0x4a2   : > { %v5613_v24 = vadd.f32 %v5612_v62, %v5523_v54  ;;  %v5159_v25 = vshll.u32 %v4970_v34, 16  ;;  %v5530_v35 = vpop.f32.mrf.mxu1  ;;  %v5273_v58 = vrot.slane %v4970_v34, 1  ;;  %v5152_v54 = vshrl.u32 %v8885_v42, 16  ;;  %v9244_v42 = vld [vmem:[#allocation3] sm:$0xf0] }
 0x4a3   : > { %v5272_v14 = vrot.slane %v9299_v29, 1  ;;  %v9403_v62 = vld [vmem:[#allocation3] sm:$0xff] }
 0x4a4   : > { %v11627_v50 = vadd.f32 %v5701_v36, %v5613_v24  ;;  %v5161_v17 = vrot.slane %v5159_v25, 1  ;;  %v11633_v43 = vor.u32 %v5156_v45, %v5152_v54  ;;  %v9245_v36 = vld [vmem:[#allocation3] sm:$0xe]  ;;  %v4397_v34 = vshll.u32 %v9403_v62, 16 }
 0x4a5   : > { %v5274_v37 = vsel %vm868_vm1, %v5272_v14, %v5273_v58  ;;  %v4378_v24 = vpack.c.b16 %v4362_v12, %v4362_v12  ;;  %v9246_v16 = vor.u32 %v9245_v36, %v9244_v42  ;;  %v4395_v31 = vshrl.u32 %v9403_v62, 16  ;;  %v9561_v58 = vld [vmem:[#allocation3 + $0xc] sm:$0xf0]  ;;  %v9562_v36 = vld [vmem:[#allocation3 + $0xc] sm:$0xe] }
 0x4a6   : > { %12425 = vst [vmem:[#allocation15_spill] sm:$0xff] %v11633_v43  ;;  %v5162_v19 = vsel %vm579_vm0, %v11633_v43, %v5161_v17  ;;  %v4399_v29 = vrot.slane %v4397_v34, 1 }
 0x4a7   : > { %v5703_v51 = vpop.f32.mrf.mxu3  ;;  %v4402_v25 = vshll.u32 %v4378_v24, 16  ;;  %v4651_v14 = vrot.slane %v4378_v24, 1 }
 0x4a8   : > { %v4400_v17 = vor.u32 %v4399_v29, %v4395_v31  ;;  %v9563_v29 = vor.u32 %v9562_v36, %v9561_v58  ;;  %v4220_v58 = vld [vmem:[#allocation3 + $0x20] sm:$0x1] }
 0x4a9   : > { %v5614_v3 = vpop.f32.mrf.mxu2  ;;  %v4404_v30 = vrot.slane %v4402_v25, 1 }
 0x4aa   : > { %v5615_v5 = vadd.f32 %v5614_v3, %v5525_v15  ;;  %v5533_v47 = vpop.f32.mrf.mxu1  ;;  %v4650_v3 = vrot.slane %v9246_v16, 1  ;;  %v8644_v16 = vld [vmem:[%s12218_s2 + $0x1f0] sm:$0xff] }
 0x4ab   : > { %6974 = vmatpush.bf16.msra.mxu1 %v8644_v16  ;;  %v9237_v16 = vld [vmem:[#allocation3 + $0x18] sm:$0xff]  }
 0x4ac   : > { %5745 = vmatmul.bf16.gmra.mxu3 %v5274_v37  ;;  %v11636_v48 = vadd.f32 %v5703_v51, %v5615_v5  ;;  %v4188_v51 = vld [vmem:[#allocation3 + $0xc] sm:$0xff]   ;;  %v4419_v43 = vshrl.u32 %v9237_v16, 16 }
 0x4ad   : > { %5903 = vmatmul.bf16.vlgmr.msrb.gmra.mxu1 %v9403_v62  ;;  %v4409_v24 = vshll.u32 %v4188_v51, 16 }
 0x4ae   : > { %5656 = vmatmul.bf16.gmra.mxu2 %v5162_v19  ;;  %v4652_v19 = vsel %vm868_vm1, %v4650_v3, %v4651_v14 }
 0x4af   : > { %v5706_v23 = vpop.f32.mrf.mxu3 }
 0x4b0   : > { %6937 = vmatmul.bf16.gmra.mxu0 %v11629_v1 }
 0x4b1   : > { %v5617_v15 = vpop.f32.mrf.mxu2 }
 0x4b2   : > { %v5618_v63 = vadd.f32 %v5617_v15, %v5528_v0  ;;  %v5535_v45 = vpop.f32.mrf.mxu1  ;;  %v4219_v0 = vld [vmem:[#allocation3 + $0x14] sm:$0x1]  ;;  %v8652_v15 = vld [vmem:[%s12218_s2 + $0x230] sm:$0xff] }
 0x4b3   : > { %v4363_v34 = vunpack.c.l.b16 %v4219_v0  ;;  %7063 = vmatpush.bf16.msra.mxu2 %v8652_v15 }
 0x4b4   : > { %v11641_v26 = vadd.f32 %v5706_v23, %v5618_v63  ;;  %v4405_v23 = vsel %vm579_vm0, %v4400_v17, %v4404_v30  ;;  %v4653_v17 = vrot.slane %v9563_v29, 1 }
 0x4b5   : > { %v4379_v31 = vpack.c.b16 %v4363_v34, %v4363_v34 }
 0x4b7   : > { %v5708_v54 = vpop.f32.mrf.mxu3  ;;  %v4414_v30 = vshll.u32 %v4379_v31, 16 }
 0x4b9   : > { %v5619_v5 = vpop.f32.mrf.mxu2 }
 0x4ba   : > { %v5620_v37 = vadd.f32 %v5619_v5, %v5530_v35  ;;  %v5538_v42 = vpop.f32.mrf.mxu1  ;;  %v4654_v5 = vrot.slane %v4379_v31, 1 }
 0x4bc   : > { %6081 = vmatmul.bf16.vlgmr.msra.gmra.mxu3 %v4652_v19  ;;  %v11644_v12 = vadd.f32 %v5708_v54, %v5620_v37  ;;  %v4411_v54 = vrot.slane %v4409_v24, 1  ;;  %v11658_v37 = vld [vmem:[#allocation3 + $0x9c] sm:$0xff]   ;;  %v4655_v36 = vsel %vm868_vm1, %v4653_v17, %v4654_v5  ;;  %v4421_v17 = vshll.u32 %v9237_v16, 16 }
 0x4bd   : > { %5908 = vmatmul.bf16.gmra.mxu1 %v4188_v51  ;;  %12426 = vst [vmem:[#allocation18_spill] sm:$0xff] %v11658_v37  ;;  %v11660_v19 = vld [vmem:[#allocation3 + $0x9c] sm:$0xf0] }
 0x4be   : > { %5992 = vmatmul.bf16.vlgmr.msrb.gmra.mxu2 %v4405_v23  ;;  %12427 = vst [vmem:[#allocation8_spill] sm:$0xff] %v11660_v19  ;;  %v11662_v23 = vpop.f32.mrf.mxu0 }
 0x4bf   : > { %v5711_v62 = vpop.f32.mrf.mxu3  ;;  %12428 = vst [vmem:[#allocation22_spill] sm:$0xff] %v11662_v23 }
 0x4c0   : > { %9560 = vmatmul.msk.bf16.gmra.mxu0 %vm11085_vm5, %v11454_v60  ;;  %v4407_v60 = vshrl.u32 %v4188_v51, 16  ;;  %v4364_v51 = vunpack.c.l.b16 %v4220_v58  ;;  %v9568_v58 = vld [vmem:[#allocation3 + $0x24] sm:$0xf0] }
 0x4c1   : > { %v5622_v35 = vpop.f32.mrf.mxu2 }
 0x4c2   : > { %v5623_v63 = vadd.f32 %v5622_v35, %v5533_v47  ;;  %v5540_v3 = vpop.f32.mrf.mxu1  ;;  %v4412_v0 = vor.u32 %v4411_v54, %v4407_v60  ;;  %v4380_v29 = vpack.c.b16 %v4364_v51, %v4364_v51  ;;  %v9247_v54 = vld [vmem:[#allocation3 + $0x18] sm:$0xf0]  ;;  %v9248_v60 = vld [vmem:[#allocation3 + $0x18] sm:$0xe] }
 0x4c4   : > { %v11656_v25 = vadd.f32 %v5711_v62, %v5623_v63  ;;  %v4416_v62 = vrot.slane %v4414_v30, 1  ;;  %v9249_v30 = vor.u32 %v9248_v60, %v9247_v54 }
 0x4c6   : > { %v4417_v35 = vsel %vm579_vm0, %v4412_v0, %v4416_v62  ;;  %v11669_v5 = vpop.f32.mrf.mxu0  ;;  %v4656_v19 = vrot.slane %v9249_v30, 1 }
 0x4c7   : > { %v5713_v14 = vpop.f32.mrf.mxu3  ;;  %12429 = vst [vmem:[#allocation7_spill] sm:$0xff] %v11669_v5 }
 0x4c9   : > { %v5624_v47 = vpop.f32.mrf.mxu2 }
 0x4ca   : > { %v5625_v15 = vadd.f32 %v5624_v47, %v5535_v45  ;;  %v5543_v24 = vpop.f32.mrf.mxu1  ;;  %v4426_v47 = vshll.u32 %v4380_v29, 16 }
 0x4cc   : > { %6086 = vmatmul.bf16.gmra.mxu3 %v4655_v36  ;;  %v11665_v34 = vadd.f32 %v5713_v14, %v5625_v15  ;;  %v4192_v15 = vld [vmem:[#allocation3 + $0x24] sm:$0xff]   ;;  %v4423_v36 = vrot.slane %v4421_v17, 1  ;;  %v4428_v51 = vrot.slane %v4426_v47, 1 }
 0x4cd   : > { %5913 = vmatmul.bf16.gmra.mxu1 %v9237_v16  ;;  %v9569_v17 = vld [vmem:[#allocation3 + $0x24] sm:$0xe]  ;;  %v8651_v16 = vld [vmem:[%s12218_s2 + $0x228] sm:$0xff] }
 0x4ce   : > { %5997 = vmatmul.bf16.gmra.mxu2 %v4417_v35  ;;  %v4657_v35 = vrot.slane %v4380_v29, 1  ;;  %v11677_v54 = vpop.f32.mrf.mxu0  ;;  %v9570_v47 = vor.u32 %v9569_v17, %v9568_v58  ;;  %v4222_v58 = vld [vmem:[#allocation3 + $0x38] sm:$0x1] }
 0x4cf   : > { %v5716_v63 = vpop.f32.mrf.mxu3  ;;  %12430 = vst [vmem:[#allocation27_spill] sm:$0xff] %v11677_v54  ;;  %7064 = vmatpush.bf16.msra.mxu2 %v8651_v16  ;;  %v11692_v16 = vld [vmem:[#allocation3 + $0xb4] sm:$0xf0] }
 0x4d0   : > { %6947 = vmatmul.bf16.gmra.mxu0 %v11658_v37  ;;  %v4658_v37 = vsel %vm868_vm1, %v4656_v19, %v4657_v35  ;;  %v8643_v19 = vld [vmem:[%s12218_s2 + $0x1e8] sm:$0xff]  ;;  %12432 = vst [vmem:[#allocation24_spill] sm:$0xff] %v11692_v16 }
 0x4d1   : > { %v5627_v31 = vpop.f32.mrf.mxu2  ;;  %6975 = vmatpush.bf16.msra.mxu1 %v8643_v19 }
 0x4d2   : > { %v5628_v45 = vadd.f32 %v5627_v31, %v5538_v42  ;;  %v5545_v0 = vpop.f32.mrf.mxu1  ;;  %v4424_v31 = vor.u32 %v4423_v36, %v4419_v43 }
 0x4d4   : > { %v11671_v14 = vadd.f32 %v5716_v63, %v5628_v45  ;;  %v4429_v45 = vsel %vm579_vm0, %v4424_v31, %v4428_v51  ;;  %v4659_v51 = vrot.slane %v9570_v47, 1  ;;  %v9238_v47 = vld [vmem:[#allocation3 + $0x30] sm:$0xff]  }
 0x4d7   : > { %v5718_v62 = vpop.f32.mrf.mxu3 }
 0x4d9   : > { %v5629_v9 = vpop.f32.mrf.mxu2 }
 0x4da   : > { %v5630_v42 = vadd.f32 %v5629_v9, %v5540_v3  ;;  %v5548_v60 = vpop.f32.mrf.mxu1  ;;  %v4365_v9 = vunpack.c.l.b16 %v4221_v20  ;;  %v4433_v3 = vshll.u32 %v4192_v15, 16 }
 0x4dc   : > { %6091 = vmatmul.bf16.gmra.mxu3 %v4658_v37  ;;  %v11674_v63 = vadd.f32 %v5718_v62, %v5630_v42  ;;  %v4381_v30 = vpack.c.b16 %v4365_v9, %v4365_v9  ;;  %v4435_v62 = vrot.slane %v4433_v3, 1 }
 0x4dd   : > { %5918 = vmatmul.bf16.gmra.mxu1 %v4192_v15 }
 0x4de   : > { %6002 = vmatmul.bf16.gmra.mxu2 %v4429_v45  ;;  %v4660_v42 = vrot.slane %v4381_v30, 1  ;;  %v4438_v31 = vshll.u32 %v4381_v30, 16  ;;  %v11690_v45 = vld [vmem:[#allocation3 + $0xb4] sm:$0xff]  }
 0x4df   : > { %v5721_v29 = vpop.f32.mrf.mxu3  ;;  %12431 = vst [vmem:[#allocation29_spill] sm:$0xff] %v11690_v45 }
 0x4e0   : > { %9567 = vmatmul.msk.bf16.gmra.mxu0 %vm11085_vm5, %v11542_v18  ;;  %v4431_v18 = vshrl.u32 %v4192_v15, 16  ;;  %v4661_v17 = vsel %vm868_vm1, %v4659_v51, %v4660_v42  ;;  %v4366_v15 = vunpack.c.l.b16 %v4222_v58  ;;  %v9250_v51 = vld [vmem:[#allocation3 + $0x30] sm:$0xf0]  ;;  %v9251_v42 = vld [vmem:[#allocation3 + $0x30] sm:$0xe]  ;;  %v4196_v58 = vld [vmem:[#allocation3 + $0x3c] sm:$0xff]  }
 0x4e1   : > { %v5632_v43 = vpop.f32.mrf.mxu2 }
 0x4e2   : > { %v5633_v37 = vadd.f32 %v5632_v43, %v5543_v24  ;;  %v5550_v20 = vpop.f32.mrf.mxu1  ;;  %v11694_v24 = vpop.f32.mrf.mxu0  ;;  %v4436_v54 = vor.u32 %v4435_v62, %v4431_v18  ;;  %v4382_v62 = vpack.c.b16 %v4366_v15, %v4366_v15 }
 0x4e3   : > { %12433 = vst [vmem:[#allocation33_spill] sm:$0xff] %v11694_v24  ;;  %v4443_v24 = vshrl.u32 %v9238_v47, 16 }
 0x4e4   : > { %v11688_v36 = vadd.f32 %v5721_v29, %v5633_v37  ;;  %v4440_v29 = vrot.slane %v4438_v31, 1  ;;  %v4445_v31 = vshll.u32 %v9238_v47, 16 }
 0x4e6   : > { %v4441_v37 = vsel %vm579_vm0, %v4436_v54, %v4440_v29  ;;  %v4450_v54 = vshll.u32 %v4382_v62, 16  ;;  %v4447_v29 = vrot.slane %v4445_v31, 1  ;;  %v9576_v31 = vld [vmem:[#allocation3 + $0x3c] sm:$0xe] }
 0x4e7   : > { %v5723_v35 = vpop.f32.mrf.mxu3 }
 0x4e8   : > { %v4452_v15 = vrot.slane %v4450_v54, 1 }
 0x4e9   : > { %v5634_v43 = vpop.f32.mrf.mxu2 }
 0x4ea   : > { %v5635_v9 = vadd.f32 %v5634_v43, %v5545_v0  ;;  %v5553_v19 = vpop.f32.mrf.mxu1  ;;  %v11701_v0 = vpop.f32.mrf.mxu0  ;;  %v9252_v43 = vor.u32 %v9251_v42, %v9250_v51 }
 0x4eb   : > { %12434 = vst [vmem:[#allocation32_spill] sm:$0xff] %v11701_v0  ;;  %v4448_v0 = vor.u32 %v4447_v29, %v4443_v24 }
 0x4ec   : > { %6096 = vmatmul.bf16.gmra.mxu3 %v4661_v17  ;;  %v11697_v3 = vadd.f32 %v5723_v35, %v5635_v9  ;;  %v9575_v17 = vld [vmem:[#allocation3 + $0x3c] sm:$0xf0]  ;;  %v4662_v11 = vrot.slane %v9252_v43, 1 }
 0x4ed   : > { %5923 = vmatmul.bf16.gmra.mxu1 %v9238_v47  ;;  %v4453_v51 = vsel %vm579_vm0, %v4448_v0, %v4452_v15  ;;  %v8650_v47 = vld [vmem:[%s12218_s2 + $0x220] sm:$0xff]  ;;  %v9577_v0 = vor.u32 %v9576_v31, %v9575_v17 }
 0x4ee   : > { %6007 = vmatmul.bf16.gmra.mxu2 %v4441_v37  ;;  %v4224_v17 = vld [vmem:[#allocation3 + $0x50] sm:$0x1] }
 0x4ef   : > { %v5726_v30 = vpop.f32.mrf.mxu3  ;;  %7065 = vmatpush.bf16.msra.mxu2 %v8650_v47 }
 0x4f0   : > { %6957 = vmatmul.bf16.gmra.mxu0 %v11690_v45  ;;  %v4663_v45 = vrot.slane %v4382_v62, 1 }
 0x4f1   : > { %v5637_v16 = vpop.f32.mrf.mxu2 }
 0x4f2   : > { %v5638_v18 = vadd.f32 %v5637_v16, %v5548_v60  ;;  %v5555_v9 = vpop.f32.mrf.mxu1  ;;  %v4664_v60 = vsel %vm868_vm1, %v4662_v11, %v4663_v45  ;;  %v11706_v16 = vpop.f32.mrf.mxu0  ;;  %v8642_v45 = vld [vmem:[%s12218_s2 + $0x1e0] sm:$0xff] }
 0x4f3   : > { %12435 = vst [vmem:[#allocation37_spill] sm:$0xff] %v11706_v16  ;;  %6976 = vmatpush.bf16.msra.mxu1 %v8642_v45  ;;  %v4368_v45 = vunpack.c.l.b16 %v4224_v17  ;;  %v4200_v17 = vld [vmem:[#allocation3 + $0x54] sm:$0xff]  }
 0x4f4   : > { %v11703_v35 = vadd.f32 %v5726_v30, %v5638_v18  ;;  %v4223_v30 = vld [vmem:[#allocation3 + $0x44] sm:$0x1] }
 0x4f7   : > { %v5728_v37 = vpop.f32.mrf.mxu3 }
 0x4f9   : > { %v5639_v5 = vpop.f32.mrf.mxu2 }
 0x4fa   : > { %v5640_v23 = vadd.f32 %v5639_v5, %v5550_v20  ;;  %v5558_v42 = vpop.f32.mrf.mxu1  ;;  %v4367_v5 = vunpack.c.l.b16 %v4223_v30  ;;  %v4457_v20 = vshll.u32 %v4196_v58, 16  ;;  %v11722_v29 = vpop.f32.mrf.mxu0 }
 0x4fb   : > { %12436 = vst [vmem:[#allocation40_spill] sm:$0xff] %v11722_v29 }
 0x4fc   : > { %6101 = vmatmul.bf16.gmra.mxu3 %v4664_v60  ;;  %v11708_v18 = vadd.f32 %v5728_v37, %v5640_v23  ;;  %v4383_v24 = vpack.c.b16 %v4367_v5, %v4367_v5  ;;  %v4459_v54 = vrot.slane %v4457_v20, 1  ;;  %v4455_v60 = vshrl.u32 %v4196_v58, 16 }
 0x4fd   : > { %5928 = vmatmul.bf16.gmra.mxu1 %v4196_v58 }
 0x4fe   : > { %6012 = vmatmul.bf16.gmra.mxu2 %v4453_v51  ;;  %v4666_v15 = vrot.slane %v4383_v24, 1  ;;  %v4462_v30 = vshll.u32 %v4383_v24, 16  ;;  %v11724_v51 = vld [vmem:[#allocation3 + $0xcc] sm:$0xff]  }
 0x4ff   : > { %v5731_v62 = vpop.f32.mrf.mxu3  ;;  %12437 = vst [vmem:[#allocation9_spill] sm:$0xff] %v11724_v51 }
 0x500   : > { %9574 = vmatmul.msk.bf16.gmra.mxu0 %vm11085_vm5, %v11619_v32  ;;  %v4665_v32 = vrot.slane %v9577_v0, 1 }
 0x501   : > { %v5642_v11 = vpop.f32.mrf.mxu2 }
 0x502   : > { %v5643_v23 = vadd.f32 %v5642_v11, %v5553_v19  ;;  %v5560_v37 = vpop.f32.mrf.mxu1  ;;  %v11726_v19 = vld [vmem:[#allocation3 + $0xcc] sm:$0xf0]  ;;  %v4460_v11 = vor.u32 %v4459_v54, %v4455_v60  ;;  %v4667_v31 = vsel %vm868_vm1, %v4665_v32, %v4666_v15  ;;  %v11732_v24 = vpop.f32.mrf.mxu0  ;;  %v9253_v32 = vld [vmem:[#allocation3 + $0x48] sm:$0xf0]  ;;  %v9254_v15 = vld [vmem:[#allocation3 + $0x48] sm:$0xe] }
 0x503   : > { %12438 = vst [vmem:[#allocation44_spill] sm:$0xff] %v11726_v19  ;;  %v9239_v19 = vld [vmem:[#allocation3 + $0x48] sm:$0xff]  }
 0x504   : > { %v11720_v43 = vadd.f32 %v5731_v62, %v5643_v23  ;;  %v4464_v62 = vrot.slane %v4462_v30, 1  ;;  %12439 = vst [vmem:[#allocation35_spill] sm:$0xff] %v11732_v24  ;;  %v4469_v30 = vshll.u32 %v9239_v19, 16  ;;  %v4467_v29 = vshrl.u32 %v9239_v19, 16 }
 0x506   : > { %v4465_v23 = vsel %vm579_vm0, %v4460_v11, %v4464_v62  ;;  %v4471_v62 = vrot.slane %v4469_v30, 1 }
 0x507   : > { %v5733_v56 = vpop.f32.mrf.mxu3 }
 0x509   : > { %v5644_v47 = vpop.f32.mrf.mxu2 }
 0x50a   : > { %v5645_v5 = vadd.f32 %v5644_v47, %v5555_v9  ;;  %v5563_v0 = vpop.f32.mrf.mxu1  ;;  %v4384_v9 = vpack.c.b16 %v4368_v45, %v4368_v45  ;;  %v9255_v47 = vor.u32 %v9254_v15, %v9253_v32  ;;  %v4472_v45 = vor.u32 %v4471_v62, %v4467_v29  ;;  %v9579_v15 = vld [vmem:[#allocation3 + $0x54] sm:$0xe] }
 0x50c   : > { %6106 = vmatmul.bf16.gmra.mxu3 %v4667_v31  ;;  %v11729_v20 = vadd.f32 %v5733_v56, %v5645_v5  ;;  %v4474_v11 = vshll.u32 %v4384_v9, 16  ;;  %v9578_v31 = vld [vmem:[#allocation3 + $0x54] sm:$0xf0]  ;;  %v4669_v24 = vrot.slane %v4384_v9, 1  ;;  %v4668_v16 = vrot.slane %v9255_v47, 1 }
 0x50d   : > { %5933 = vmatmul.bf16.gmra.mxu1 %v9239_v19  ;;  %v8649_v19 = vld [vmem:[%s12218_s2 + $0x218] sm:$0xff] }
 0x50e   : > { %6017 = vmatmul.bf16.gmra.mxu2 %v4465_v23  ;;  %v4476_v1 = vrot.slane %v4474_v11, 1 }
 0x50f   : > { %v5736_v58 = vpop.f32.mrf.mxu3  ;;  %7066 = vmatpush.bf16.msra.mxu2 %v8649_v19 }
 0x510   : > { %6967 = vmatmul.bf16.gmra.mxu0 %v11724_v51 }
 0x511   : > { %v5647_v54 = vpop.f32.mrf.mxu2 }
 0x512   : > { %v5648_v60 = vadd.f32 %v5647_v54, %v5558_v42  ;;  %v5565_v5 = vpop.f32.mrf.mxu1  ;;  %v4670_v42 = vsel %vm868_vm1, %v4668_v16, %v4669_v24  ;;  %v4225_v54 = vld [vmem:[#allocation3 + $0x5c] sm:$0x1] }
 0x513   : > { %v4369_v49 = vunpack.c.l.b16 %v4225_v54 }
 0x514   : > { %v11735_v56 = vadd.f32 %v5736_v58, %v5648_v60  ;;  %v4477_v60 = vsel %vm579_vm0, %v4472_v45, %v4476_v1  ;;  %v4479_v45 = vshrl.u32 %v4200_v17, 16 }
 0x515   : > { %v4385_v29 = vpack.c.b16 %v4369_v49, %v4369_v49 }
 0x517   : > { %v5738_v23 = vpop.f32.mrf.mxu3 }
 0x519   : > { %v5649_v51 = vpop.f32.mrf.mxu2 }
 0x51a   : > { %v5650_v41 = vadd.f32 %v5649_v51, %v5560_v37  ;;  %v5568_v32 = vpop.f32.mrf.mxu1  ;;  %v4481_v37 = vshll.u32 %v4200_v17, 16  ;;  %v9580_v51 = vor.u32 %v9579_v15, %v9578_v31 }
 0x51c   : > { %6111 = vmatmul.bf16.gmra.mxu3 %v4670_v42  ;;  %v11738_v58 = vadd.f32 %v5738_v23, %v5650_v41  ;;  %v8641_v41 = vld [vmem:[%s12218_s2 + $0x1d8] sm:$0xff]  ;;  %v4483_v24 = vrot.slane %v4481_v37, 1  ;;  %v4671_v62 = vrot.slane %v9580_v51, 1  ;;  %v4672_v23 = vrot.slane %v4385_v29, 1 }
 0x51d   : > { %5938 = vmatmul.bf16.gmra.mxu1 %v4200_v17  ;;  %v4486_v42 = vshll.u32 %v4385_v29, 16  ;;  %v9240_v17 = vld [vmem:[#allocation3 + $0x60] sm:$0xff]  }
 0x51e   : > { %6022 = vmatmul.bf16.gmra.mxu2 %v4477_v60  ;;  %6977 = vmatpush.bf16.msra.mxu1 %v8641_v41  ;;  %v4484_v60 = vor.u32 %v4483_v24, %v4479_v45  ;;  %v4673_v49 = vsel %vm868_vm1, %v4671_v62, %v4672_v23  ;;  %v9256_v24 = vld [vmem:[#allocation3 + $0x60] sm:$0xf0]  ;;  %v9257_v45 = vld [vmem:[#allocation3 + $0x60] sm:$0xe]  ;;  %v4493_v62 = vshll.u32 %v9240_v17, 16 }
 0x51f   : > { %v5741_v30 = vpop.f32.mrf.mxu3  ;;  %v4488_v31 = vrot.slane %v4486_v42, 1 }
 0x521   : > { %v5652_v9 = vpop.f32.mrf.mxu2 }
 0x522   : > { %v5653_v16 = vadd.f32 %v5652_v9, %v5563_v0  ;;  %v5570_v47 = vpop.f32.mrf.mxu1  ;;  %v4226_v0 = vld [vmem:[#allocation3 + $0x68] sm:$0x1] }
 0x523   : > { %v4370_v9 = vunpack.c.l.b16 %v4226_v0  ;;  %v4495_v0 = vrot.slane %v4493_v62, 1  ;;  %v9582_v62 = vld [vmem:[#allocation3 + $0x6c] sm:$0xe] }
 0x524   : > { %v11747_v1 = vadd.f32 %v5741_v30, %v5653_v16  ;;  %v4489_v30 = vsel %vm579_vm0, %v4484_v60, %v4488_v31  ;;  %v4204_v60 = vld [vmem:[#allocation3 + $0x6c] sm:$0xff]  }
 0x525   : > { %v4386_v41 = vpack.c.b16 %v4370_v9, %v4370_v9 }
 0x527   : > { %v5743_v11 = vpop.f32.mrf.mxu3  ;;  %v4498_v42 = vshll.u32 %v4386_v41, 16  ;;  %v4675_v31 = vrot.slane %v4386_v41, 1 }
 0x529   : > { %v5654_v54 = vpop.f32.mrf.mxu2  ;;  %v4500_v9 = vrot.slane %v4498_v42, 1 }
 0x52a   : > { %v5655_v19 = vadd.f32 %v5654_v54, %v5565_v5  ;;  %v5904_v37 = vpop.f32.mrf.mxu1 }
 0x52b   : > { %v5905_v16 = vadd.f32 %v5904_v37, %v11375_v4 }
 0x52c   : > { %6116 = vmatmul.bf16.gmra.mxu3 %v4673_v49  ;;  %v11750_v15 = vadd.f32 %v5743_v11, %v5655_v19  ;;  %v9258_v11 = vor.u32 %v9257_v45, %v9256_v24  ;;  %v9581_v19 = vld [vmem:[#allocation3 + $0x6c] sm:$0xf0] }
 0x52d   : > { %5943 = vmatmul.bf16.gmra.mxu1 %v9240_v17 }
 0x52e   : > { %12440 = vst [vmem:[#allocation46_spill] sm:$0xff] %v11750_v15  ;;  %6027 = vmatmul.bf16.gmra.mxu2 %v4489_v30  ;;  %v4491_v30 = vshrl.u32 %v9240_v17, 16  ;;  %v4674_v15 = vrot.slane %v9258_v11, 1  ;;  %v4505_v11 = vshll.u32 %v4204_v60, 16 }
 0x52f   : > { %v5746_v51 = vpop.f32.mrf.mxu3 }
 0x530   : > { %v4676_v2 = vsel %vm868_vm1, %v4674_v15, %v4675_v31  ;;  %v4507_v31 = vrot.slane %v4505_v11, 1 }
 0x531   : > { %v5657_v29 = vpop.f32.mrf.mxu2 }
 0x532   : > { %v5658_v5 = vadd.f32 %v5657_v29, %v5568_v32  ;;  %v5906_v54 = vpop.f32.mrf.mxu1  ;;  %v4496_v29 = vor.u32 %v4495_v0, %v4491_v30 }
 0x533   : > { %v5907_v49 = vadd.f32 %v5906_v54, %v11397_v6  ;;  %v9583_v54 = vor.u32 %v9582_v62, %v9581_v19  ;;  %v4228_v19 = vld [vmem:[#allocation3 + $0x80] sm:$0x1] }
 0x534   : > { %v11754_v23 = vadd.f32 %v5746_v51, %v5658_v5  ;;  %v4227_v51 = vld [vmem:[#allocation3 + $0x74] sm:$0x1]  ;;  %v4501_v24 = vsel %vm579_vm0, %v4496_v29, %v4500_v9  ;;  %v4503_v29 = vshrl.u32 %v4204_v60, 16  ;;  %v4372_v11 = vunpack.c.l.b16 %v4228_v19 }
 0x535   : > { %v4371_v6 = vunpack.c.l.b16 %v4227_v51 }
 0x537   : > { %v5748_v4 = vpop.f32.mrf.mxu3  ;;  %v4387_v42 = vpack.c.b16 %v4371_v6, %v4371_v6 }
 0x539   : > { %v5659_v37 = vpop.f32.mrf.mxu2  ;;  %v4678_v30 = vrot.slane %v4387_v42, 1  ;;  %v4510_v51 = vshll.u32 %v4387_v42, 16 }
 0x53a   : > { %v5660_v32 = vadd.f32 %v5659_v37, %v5570_v47  ;;  %v5909_v45 = vpop.f32.mrf.mxu1  ;;  %v8648_v47 = vld [vmem:[%s12218_s2 + $0x210] sm:$0xff] }
 0x53b   : > { %v5910_v41 = vadd.f32 %v5909_v45, %v11431_v28  ;;  %7067 = vmatpush.bf16.msra.mxu2 %v8648_v47  ;;  %v4512_v6 = vrot.slane %v4510_v51, 1  ;;  %v4208_v51 = vld [vmem:[#allocation3 + $0x84] sm:$0xff]  }
 0x53c   : > { %6121 = vmatmul.bf16.gmra.mxu3 %v4676_v2  ;;  %v11758_v5 = vadd.f32 %v5748_v4, %v5660_v32  ;;  %v8640_v4 = vld [vmem:[%s12218_s2 + $0x1d0] sm:$0xff]  ;;  %v4677_v32 = vrot.slane %v9583_v54, 1  ;;  %v4388_v54 = vpack.c.b16 %v4372_v11, %v4372_v11 }
 0x53d   : > { %5948 = vmatmul.bf16.gmra.mxu1 %v4204_v60  ;;  %v9241_v60 = vld [vmem:[#allocation3 + $0x78] sm:$0xff]  }
 0x53e   : > { %6032 = vmatmul.bf16.gmra.mxu2 %v4501_v24  ;;  %6978 = vmatpush.bf16.msra.mxu1 %v8640_v4  ;;  %v4679_v62 = vsel %vm868_vm1, %v4677_v32, %v4678_v30  ;;  %v9259_v4 = vld [vmem:[#allocation3 + $0x78] sm:$0xf0]  ;;  %v4522_v32 = vshll.u32 %v4388_v54, 16  ;;  %v4681_v19 = vrot.slane %v4388_v54, 1 }
 0x53f   : > { %v6082_v17 = vpop.f32.mrf.mxu3 }
 0x540   : > { %v4524_v11 = vrot.slane %v4522_v32, 1 }
 0x541   : > { %v5993_v15 = vpop.f32.mrf.mxu2 }
 0x542   : > { %v5994_v2 = vadd.f32 %v5993_v15, %v5905_v16  ;;  %v5911_v28 = vpop.f32.mrf.mxu1  ;;  %v4508_v16 = vor.u32 %v4507_v31, %v4503_v29  ;;  %v9260_v31 = vld [vmem:[#allocation3 + $0x78] sm:$0xe] }
 0x543   : > { %v5912_v37 = vadd.f32 %v5911_v28, %v11444_v27  ;;  %v4517_v28 = vshll.u32 %v9241_v60, 16 }
 0x544   : > { %v11765_v0 = vadd.f32 %v6082_v17, %v5994_v2  ;;  %v4513_v47 = vsel %vm579_vm0, %v4508_v16, %v4512_v6 }
 0x545   : > { %v4519_v16 = vrot.slane %v4517_v28, 1 }
 0x547   : > { %v6084_v9 = vpop.f32.mrf.mxu3 }
 0x549   : > { %v5995_v24 = vpop.f32.mrf.mxu2 }
 0x54a   : > { %v5996_v45 = vadd.f32 %v5995_v24, %v5907_v49  ;;  %v5914_v15 = vpop.f32.mrf.mxu1  ;;  %v9584_v24 = vld [vmem:[#allocation3 + $0x84] sm:$0xf0] }
 0x54b   : > { %v5915_v27 = vadd.f32 %v5914_v15, %v11466_v10 }
 0x54c   : > { %v11772_v17 = vadd.f32 %v6084_v9, %v5996_v45  ;;  %6126 = vmatmul.bf16.gmra.mxu3 %v4679_v62  ;;  %v9261_v9 = vor.u32 %v9260_v31, %v9259_v4  ;;  %v4515_v62 = vshrl.u32 %v9241_v60, 16  ;;  %v9585_v31 = vld [vmem:[#allocation3 + $0x84] sm:$0xe] }
 0x54d   : > { %5953 = vmatmul.bf16.gmra.mxu1 %v9241_v60 }
 0x54e   : > { %6037 = vmatmul.bf16.gmra.mxu2 %v4513_v47  ;;  %v4680_v47 = vrot.slane %v9261_v9, 1  ;;  %v4520_v15 = vor.u32 %v4519_v16, %v4515_v62  ;;  %v4529_v9 = vshll.u32 %v4208_v51, 16  ;;  %v9586_v16 = vor.u32 %v9585_v31, %v9584_v24  ;;  %v8639_v62 = vld [vmem:[%s12218_s2 + $0x1c8] sm:$0xff] }
 0x54f   : > { %v6087_v2 = vpop.f32.mrf.mxu3  ;;  %6979 = vmatpush.bf16.msra.mxu1 %v8639_v62  ;;  %v4230_v31 = vld [vmem:[#allocation3 + $0x98] sm:$0x1]  ;;  %v9262_v62 = vld [vmem:[#allocation3 + $0x90] sm:$0xf0] }
 0x550   : > { %v4525_v4 = vsel %vm579_vm0, %v4520_v15, %v4524_v11 }
 0x551   : > { %v5998_v42 = vpop.f32.mrf.mxu2 }
 0x552   : > { %v5999_v49 = vadd.f32 %v5998_v42, %v5910_v41  ;;  %v5916_v29 = vpop.f32.mrf.mxu1  ;;  %v4682_v42 = vsel %vm868_vm1, %v4680_v47, %v4681_v19  ;;  %v4683_v47 = vrot.slane %v9586_v16, 1 }
 0x553   : > { %v5917_v45 = vadd.f32 %v5916_v29, %v11490_v39 }
 0x554   : > { %v11776_v30 = vadd.f32 %v6087_v2, %v5999_v49  ;;  %v4229_v49 = vld [vmem:[#allocation3 + $0x8c] sm:$0x1] }
 0x555   : > { %v4373_v60 = vunpack.c.l.b16 %v4229_v49 }
 0x557   : > { %v6089_v10 = vpop.f32.mrf.mxu3 }
 0x559   : > { %v6000_v6 = vpop.f32.mrf.mxu2 }
 0x55a   : > { %v6001_v41 = vadd.f32 %v6000_v6, %v5912_v37  ;;  %v5919_v28 = vpop.f32.mrf.mxu1  ;;  %v8647_v37 = vld [vmem:[%s12218_s2 + $0x208] sm:$0xff] }
 0x55b   : > { %v5920_v39 = vadd.f32 %v5919_v28, %v11512_v8  ;;  %7068 = vmatpush.bf16.msra.mxu2 %v8647_v37  ;;  %v4531_v8 = vrot.slane %v4529_v9, 1  ;;  %v4374_v9 = vunpack.c.l.b16 %v4230_v31 }
 0x55c   : > { %v11780_v2 = vadd.f32 %v6089_v10, %v6001_v41  ;;  %6131 = vmatmul.bf16.gmra.mxu3 %v4682_v42  ;;  %v4389_v10 = vpack.c.b16 %v4373_v60, %v4373_v60  ;;  %v4527_v42 = vshrl.u32 %v4208_v51, 16 }
 0x55d   : > { %5958 = vmatmul.bf16.gmra.mxu1 %v4208_v51 }
 0x55e   : > { %6042 = vmatmul.bf16.gmra.mxu2 %v4525_v4  ;;  %v4684_v15 = vrot.slane %v4389_v10, 1  ;;  %v4534_v49 = vshll.u32 %v4389_v10, 16  ;;  %v4390_v10 = vpack.c.b16 %v4374_v9, %v4374_v9 }
 0x55f   : > { %v6092_v54 = vpop.f32.mrf.mxu3 }
 0x560   : > { %v4685_v28 = vsel %vm868_vm1, %v4683_v47, %v4684_v15  ;;  %v4546_v15 = vshll.u32 %v4390_v10, 16 }
 0x561   : > { %v6003_v32 = vpop.f32.mrf.mxu2 }
 0x562   : > { %v6004_v29 = vadd.f32 %v6003_v32, %v5915_v27  ;;  %v5921_v6 = vpop.f32.mrf.mxu1  ;;  %v4532_v27 = vor.u32 %v4531_v8, %v4527_v42  ;;  %v9263_v8 = vld [vmem:[#allocation3 + $0x90] sm:$0xe] }
 0x563   : > { %v5922_v11 = vadd.f32 %v5921_v6, %v11528_v7 }
 0x564   : > { %v11787_v19 = vadd.f32 %v6092_v54, %v6004_v29  ;;  %v4536_v54 = vrot.slane %v4534_v49, 1  ;;  %v9242_v29 = vld [vmem:[#allocation3 + $0x90] sm:$0xff]   ;;  %v4212_v49 = vld [vmem:[#allocation3 + $0x9c] sm:$0xff]  }
 0x565   : > { %v4541_v6 = vshll.u32 %v9242_v29, 16  ;;  %v4539_v31 = vshrl.u32 %v9242_v29, 16 }
 0x566   : > { %v4537_v37 = vsel %vm579_vm0, %v4532_v27, %v4536_v54 }
 0x567   : > { %v6094_v41 = vpop.f32.mrf.mxu3  ;;  %v4543_v27 = vrot.slane %v4541_v6, 1 }
 0x569   : > { %v6005_v4 = vpop.f32.mrf.mxu2 }
 0x56a   : > { %v6006_v24 = vadd.f32 %v6005_v4, %v5917_v45  ;;  %v5924_v32 = vpop.f32.mrf.mxu1  ;;  %v9587_v4 = vld [vmem:[#allocation3 + $0x9c] sm:$0xf0] }
 0x56b   : > { %v5925_v7 = vadd.f32 %v5924_v32, %v11563_v33  ;;  %v4687_v33 = vrot.slane %v4390_v10, 1  ;;  %v4553_v10 = vshll.u32 %v4212_v49, 16 }
 0x56c   : > { %v11794_v60 = vadd.f32 %v6094_v41, %v6006_v24  ;;  %6136 = vmatmul.bf16.gmra.mxu3 %v4685_v28  ;;  %v9264_v41 = vor.u32 %v9263_v8, %v9262_v62  ;;  %v9588_v8 = vld [vmem:[#allocation3 + $0x9c] sm:$0xe] }
 0x56d   : > { %5963 = vmatmul.bf16.gmra.mxu1 %v9242_v29 }
 0x56e   : > { %6047 = vmatmul.bf16.gmra.mxu2 %v4537_v37  ;;  %v4686_v54 = vrot.slane %v9264_v41, 1  ;;  %v4548_v37 = vrot.slane %v4546_v15, 1 }
 0x56f   : > { %v6097_v51 = vpop.f32.mrf.mxu3 }
 0x571   : > { %v6008_v16 = vpop.f32.mrf.mxu2 }
 0x572   : > { %v6009_v45 = vadd.f32 %v6008_v16, %v5920_v39  ;;  %v5926_v42 = vpop.f32.mrf.mxu1  ;;  %v4544_v39 = vor.u32 %v4543_v27, %v4539_v31  ;;  %v4688_v16 = vsel %vm868_vm1, %v4686_v54, %v4687_v33  ;;  %v8638_v33 = vld [vmem:[%s12218_s2 + $0x1c0] sm:$0xff]  ;;  %v4555_v31 = vrot.slane %v4553_v10, 1 }
 0x573   : > { %v5927_v24 = vadd.f32 %v5926_v42, %v11584_v59  ;;  %v9589_v42 = vor.u32 %v9588_v8, %v9587_v4  ;;  %6980 = vmatpush.bf16.msra.mxu1 %v8638_v33 }
 0x574   : > { %v11798_v47 = vadd.f32 %v6097_v51, %v6009_v45  ;;  %v4231_v45 = vld [vmem:[#allocation3 + $0xa4] sm:$0x1]  ;;  %v4549_v62 = vsel %vm579_vm0, %v4544_v39, %v4548_v37 }
 0x575   : > { %v4375_v29 = vunpack.c.l.b16 %v4231_v45 }
 0x577   : > { %v6099_v32 = vpop.f32.mrf.mxu3  ;;  %v4391_v27 = vpack.c.b16 %v4375_v29, %v4375_v29 }
 0x579   : > { %v6010_v28 = vpop.f32.mrf.mxu2  ;;  %v4690_v37 = vrot.slane %v4391_v27, 1  ;;  %v4558_v39 = vshll.u32 %v4391_v27, 16 }
 0x57a   : > { %v6011_v9 = vadd.f32 %v6010_v28, %v5922_v11  ;;  %v5929_v6 = vpop.f32.mrf.mxu1  ;;  %v8646_v11 = vld [vmem:[%s12218_s2 + $0x200] sm:$0xff] }
 0x57b   : > { %v5930_v59 = vadd.f32 %v5929_v6, %v11600_v55  ;;  %7069 = vmatpush.bf16.msra.mxu2 %v8646_v11  ;;  %v4689_v55 = vrot.slane %v9589_v42, 1  ;;  %v9266_v42 = vld [vmem:[#allocation3 + $0xa8] sm:$0xe] }
 0x57c   : > { %v11802_v51 = vadd.f32 %v6099_v32, %v6011_v9  ;;  %6141 = vmatmul.bf16.gmra.mxu3 %v4688_v16  ;;  %v4551_v9 = vshrl.u32 %v4212_v49, 16 }
 0x57d   : > { %5968 = vmatmul.bf16.gmra.mxu1 %v4212_v49  ;;  %v4691_v4 = vsel %vm868_vm1, %v4689_v55, %v4690_v37  ;;  %v4216_v55 = vld [vmem:[#allocation3 + $0xb4] sm:$0xff]  }
 0x57e   : > { %6052 = vmatmul.bf16.gmra.mxu2 %v4549_v62  ;;  %v4556_v16 = vor.u32 %v4555_v31, %v4551_v9  ;;  %v4560_v62 = vrot.slane %v4558_v39, 1  ;;  %v9590_v37 = vld [vmem:[#allocation3 + $0xb4] sm:$0xf0] }
 0x580   : > { %v4561_v8 = vsel %vm579_vm0, %v4556_v16, %v4560_v62 }
 0x581   : > { %v6013_v41 = vpop.f32.mrf.mxu2 }
 0x582   : > { %v11809_v15 = vadd.f32 %v6013_v41, %v5925_v7  ;;  %v5931_v28 = vpop.f32.mrf.mxu1  ;;  %v4232_v7 = vld [vmem:[#allocation3 + $0xb0] sm:$0x1] }
 0x583   : > { %v5932_v54 = vadd.f32 %v5931_v28, %v11610_v44  ;;  %v4376_v6 = vunpack.c.l.b16 %v4232_v7  ;;  %v9243_v44 = vld [vmem:[#allocation3 + $0xa8] sm:$0xff]  }
 0x584   : > { %v4565_v27 = vshll.u32 %v9243_v44, 16  ;;  %v4563_v16 = vshrl.u32 %v9243_v44, 16 }
 0x585   : > { %v4392_v10 = vpack.c.b16 %v4376_v6, %v4376_v6  ;;  %v4233_v6 = vld [vmem:[#allocation3 + $0xbc] sm:$0x1] }
 0x586   : > { %v4567_v9 = vrot.slane %v4565_v27, 1  ;;  %v4577_v27 = vshll.u32 %v4216_v55, 16 }
 0x587   : > { %v4570_v31 = vshll.u32 %v4392_v10, 16 }
 0x589   : > { %v6015_v32 = vpop.f32.mrf.mxu2 }
 0x58a   : > { %v11815_v45 = vadd.f32 %v6015_v32, %v5927_v24  ;;  %v5934_v29 = vpop.f32.mrf.mxu1  ;;  %v9265_v24 = vld [vmem:[#allocation3 + $0xa8] sm:$0xf0]  ;;  %v4693_v32 = vrot.slane %v4392_v10, 1  ;;  %v4377_v10 = vunpack.c.l.b16 %v4233_v6 }
 0x58b   : > { %v5935_v11 = vadd.f32 %v5934_v29, %v11627_v50  ;;  %v9267_v33 = vor.u32 %v9266_v42, %v9265_v24  ;;  %v9591_v42 = vld [vmem:[#allocation3 + $0xb4] sm:$0xe] }
 0x58c   : > { %6146 = vmatmul.bf16.gmra.mxu3 %v4691_v4  ;;  %v4572_v4 = vrot.slane %v4570_v31, 1  ;;  %v4393_v31 = vpack.c.b16 %v4377_v10, %v4377_v10 }
 0x58d   : > { %5973 = vmatmul.bf16.gmra.mxu1 %v9243_v44  ;;  %v4692_v7 = vrot.slane %v9267_v33, 1 }
 0x58e   : > { %6057 = vmatmul.bf16.gmra.mxu2 %v4561_v8 }
 0x58f   : > { %v4694_v8 = vsel %vm868_vm1, %v4692_v7, %v4693_v32  ;;  %v4579_v32 = vrot.slane %v4577_v27, 1 }
 0x591   : > { %v6018_v49 = vpop.f32.mrf.mxu2 }
 0x592   : > { %v11820_v41 = vadd.f32 %v6018_v49, %v5930_v59  ;;  %v5936_v28 = vpop.f32.mrf.mxu1  ;;  %v4568_v59 = vor.u32 %v4567_v9, %v4563_v16  ;;  %v6195_v49 = vld [vmem:[#allocation3 + $0x20] sm:$0x1] }
 0x593   : > { %v5937_v39 = vadd.f32 %v5936_v28, %v11636_v48  ;;  %v6339_v44 = vunpack.c.l.b16 %v6195_v49  ;;  %v9592_v28 = vor.u32 %v9591_v42, %v9590_v37 }
 0x594   : > { %v4573_v29 = vsel %vm579_vm0, %v4568_v59, %v4572_v4  ;;  %v4696_v59 = vrot.slane %v4393_v31, 1 }
 0x595   : > { %v6355_v9 = vpack.c.b16 %v6339_v44, %v6339_v44  ;;  %v4695_v4 = vrot.slane %v9592_v28, 1  ;;  %v9307_v28 = vld [vmem:[#allocation3 + $0x18] sm:$0xf0] }
 0x599   : > { %v6020_v50 = vpop.f32.mrf.mxu2 }
 0x59a   : > { %v11823_v62 = vadd.f32 %v6020_v50, %v5932_v54  ;;  %v5939_v24 = vpop.f32.mrf.mxu1  ;;  %v4575_v50 = vshrl.u32 %v4216_v55, 16 }
 0x59b   : > { %v5940_v48 = vadd.f32 %v5939_v24, %v11641_v26  ;;  %v4697_v24 = vsel %vm868_vm1, %v4695_v4, %v4696_v59 }
 0x59c   : > { %6151 = vmatmul.bf16.gmra.mxu3 %v4694_v8  ;;  %v4582_v8 = vshll.u32 %v4393_v31, 16  ;;  %v4580_v6 = vor.u32 %v4579_v32, %v4575_v50  ;;  %v6386_v31 = vshll.u32 %v11324_v46, 16  ;;  %v9308_v32 = vld [vmem:[#allocation3 + $0x18] sm:$0xe] }
 0x59d   : > { %5978 = vmatmul.bf16.gmra.mxu1 %v4216_v55  ;;  %v9309_v59 = vor.u32 %v9308_v32, %v9307_v28 }
 0x59e   : > { %6062 = vmatmul.bf16.gmra.mxu2 %v4573_v29  ;;  %v6379_v29 = vshll.u32 %v6355_v9, 16 }
 0x5a0   : > { %v6381_v10 = vrot.slane %v6379_v29, 1  ;;  %v6628_v29 = vrot.slane %v6355_v9, 1 }
 0x5a1   : > { %v6023_v33 = vpop.f32.mrf.mxu2 }
 0x5a2   : > { %v11828_v54 = vadd.f32 %v6023_v33, %v5935_v11  ;;  %v5941_v16 = vpop.f32.mrf.mxu1  ;;  %v4584_v11 = vrot.slane %v4582_v8, 1  ;;  %v6382_v44 = vsel %vm579_vm0, %v11117_v52, %v6381_v10  ;;  %v6388_v8 = vrot.slane %v6386_v31, 1  ;;  %v6197_v10 = vld [vmem:[#allocation3 + $0x38] sm:$0x1] }
 0x5a3   : > { %v5942_v7 = vadd.f32 %v5941_v16, %v11644_v12  ;;  %v6196_v12 = vld [vmem:[#allocation3 + $0x2c] sm:$0x1]  ;;  %v6384_v52 = vshrl.u32 %v11324_v46, 16 }
 0x5a4   : > { %v4585_v37 = vsel %vm579_vm0, %v4580_v6, %v4584_v11 }
 0x5a9   : > { %v6025_v26 = vpop.f32.mrf.mxu2 }
 0x5aa   : > { %v11831_v49 = vadd.f32 %v6025_v26, %v5937_v39  ;;  %v5944_v42 = vpop.f32.mrf.mxu1  ;;  %v6340_v39 = vunpack.c.l.b16 %v6196_v12 }
 0x5ab   : > { %v5945_v55 = vadd.f32 %v5944_v42, %v11656_v25 }
 0x5ac   : > { %6156 = vmatmul.bf16.gmra.mxu3 %v4697_v24  ;;  %v6356_v50 = vpack.c.b16 %v6340_v39, %v6340_v39  ;;  %v6389_v24 = vor.u32 %v6388_v8, %v6384_v52 }
 0x5ad   : > { %6981 = vmatmul.bf16.vlgmr.msra.gmra.mxu1 %v6382_v44  ;;  %v9594_v44 = vld [vmem:[#allocation3 + $0x24] sm:$0xe] }
 0x5ae   : > { %6067 = vmatmul.bf16.gmra.mxu2 %v4585_v37  ;;  %v6391_v6 = vshll.u32 %v6356_v50, 16  ;;  %v9595_v39 = vor.u32 %v9594_v44, %v11326_v22  ;;  %v6631_v8 = vrot.slane %v6356_v50, 1  ;;  %v6410_v50 = vshll.u32 %v11399_v38, 16 }
 0x5b0   : > { %v6393_v42 = vrot.slane %v6391_v6, 1  ;;  %v6198_v6 = vld [vmem:[#allocation3 + $0x44] sm:$0x1]  ;;  %v6412_v44 = vrot.slane %v6410_v50, 1 }
 0x5b1   : > { %v6028_v27 = vpop.f32.mrf.mxu2 }
 0x5b2   : > { %v11838_v33 = vadd.f32 %v6028_v27, %v5940_v48  ;;  %v5946_v16 = vpop.f32.mrf.mxu1  ;;  %v6627_v48 = vrot.slane %v9309_v59, 1  ;;  %v6341_v27 = vunpack.c.l.b16 %v6197_v10  ;;  %v6630_v59 = vrot.slane %v9595_v39, 1 }
 0x5b3   : > { %v5947_v4 = vadd.f32 %v5946_v16, %v11665_v34  ;;  %v6394_v34 = vsel %vm579_vm0, %v6389_v24, %v6393_v42  ;;  %v6342_v24 = vunpack.c.l.b16 %v6198_v6 }
 0x5b4   : > { %v6629_v11 = vsel %vm868_vm1, %v6627_v48, %v6628_v29  ;;  %v6357_v46 = vpack.c.b16 %v6341_v27, %v6341_v27  ;;  %v6632_v29 = vsel %vm868_vm1, %v6630_v59, %v6631_v8 }
 0x5b6   : > { %v6403_v32 = vshll.u32 %v6357_v46, 16  ;;  %v6634_v27 = vrot.slane %v6357_v46, 1 }
 0x5b9   : > { %v6030_v25 = vpop.f32.mrf.mxu2 }
 0x5ba   : > { %v11842_v26 = vadd.f32 %v6030_v25, %v5942_v7  ;;  %v5949_v37 = vpop.f32.mrf.mxu1 }
 0x5bb   : > { %v5950_v12 = vadd.f32 %v5949_v37, %v11671_v14  ;;  %v6405_v14 = vrot.slane %v6403_v32, 1  ;;  %v6358_v37 = vpack.c.b16 %v6342_v24, %v6342_v24 }
 0x5bd   : > { %6986 = vmatmul.bf16.gmra.mxu1 %v6394_v34  ;;  %v6406_v22 = vsel %vm579_vm0, %v11191_v61, %v6405_v14  ;;  %v6408_v61 = vshrl.u32 %v11399_v38, 16  ;;  %v6415_v39 = vshll.u32 %v6358_v37, 16 }
 0x5be   : > { %7070 = vmatmul.bf16.vlgmr.msra.gmra.mxu2 %v6629_v11  ;;  %v9311_v11 = vld [vmem:[#allocation3 + $0x30] sm:$0xe] }
 0x5bf   : > { %v6417_v8 = vrot.slane %v6415_v39, 1  ;;  %v9314_v39 = vld [vmem:[#allocation3 + $0x48] sm:$0xe] }
 0x5c1   : > { %v6033_v9 = vpop.f32.mrf.mxu2 }
 0x5c2   : > { %v11848_v7 = vadd.f32 %v6033_v9, %v5945_v55  ;;  %v5951_v31 = vpop.f32.mrf.mxu1 }
 0x5c3   : > { %v5952_v28 = vadd.f32 %v5951_v31, %v11674_v63  ;;  %v6413_v31 = vor.u32 %v6412_v44, %v6408_v61 }
 0x5c9   : > { %v6035_v16 = vpop.f32.mrf.mxu2 }
 0x5ca   : > { %v11852_v25 = vadd.f32 %v6035_v16, %v5947_v4  ;;  %v5954_v52 = vpop.f32.mrf.mxu1  ;;  %v9310_v4 = vld [vmem:[#allocation3 + $0x30] sm:$0xf0]  ;;  %v6199_v16 = vld [vmem:[#allocation3 + $0x50] sm:$0x1] }
 0x5cb   : > { %v5955_v55 = vadd.f32 %v5954_v52, %v11688_v36  ;;  %v9312_v34 = vor.u32 %v9311_v11, %v9310_v4  ;;  %v6343_v52 = vunpack.c.l.b16 %v6199_v16  ;;  %v6637_v11 = vrot.slane %v6358_v37, 1 }
 0x5cc   : > { %v6434_v37 = vshll.u32 %v11468_v40, 16 }
 0x5cd   : > { %6991 = vmatmul.bf16.gmra.mxu1 %v6406_v22  ;;  %v6359_v38 = vpack.c.b16 %v6343_v52, %v6343_v52 }
 0x5ce   : > { %7075 = vmatmul.bf16.gmra.mxu2 %v6632_v29  ;;  %v9597_v29 = vld [vmem:[#allocation3 + $0x3c] sm:$0xe] }
 0x5cf   : > { %v9598_v6 = vor.u32 %v9597_v29, %v11401_v21  ;;  %v6427_v24 = vshll.u32 %v6359_v38, 16 }
 0x5d1   : > { %v6038_v48 = vpop.f32.mrf.mxu2  ;;  %v6636_v4 = vrot.slane %v9598_v6, 1  ;;  %v6201_v6 = vld [vmem:[#allocation3 + $0x68] sm:$0x1] }
 0x5d2   : > { %v11858_v63 = vadd.f32 %v6038_v48, %v5950_v12  ;;  %v5956_v10 = vpop.f32.mrf.mxu1  ;;  %v6633_v12 = vrot.slane %v9312_v34, 1 }
 0x5d3   : > { %v5957_v42 = vadd.f32 %v5956_v10, %v11697_v3  ;;  %v6418_v3 = vsel %vm579_vm0, %v6413_v31, %v6417_v8  ;;  %v6638_v34 = vsel %vm868_vm1, %v6636_v4, %v6637_v11  ;;  %v6640_v8 = vrot.slane %v6359_v38, 1  ;;  %v9600_v4 = vld [vmem:[#allocation3 + $0x54] sm:$0xe] }
 0x5d4   : > { %v6635_v32 = vsel %vm868_vm1, %v6633_v12, %v6634_v27  ;;  %v6345_v11 = vunpack.c.l.b16 %v6201_v6 }
 0x5d9   : > { %v6040_v36 = vpop.f32.mrf.mxu2 }
 0x5da   : > { %v11862_v9 = vadd.f32 %v6040_v36, %v5952_v28  ;;  %v5959_v59 = vpop.f32.mrf.mxu1  ;;  %v6200_v36 = vld [vmem:[#allocation3 + $0x5c] sm:$0x1] }
 0x5db   : > { %v5960_v14 = vadd.f32 %v5959_v59, %v11703_v35  ;;  %v6429_v35 = vrot.slane %v6427_v24, 1  ;;  %v6344_v61 = vunpack.c.l.b16 %v6200_v36  ;;  %v6436_v59 = vrot.slane %v6434_v37, 1 }
 0x5dd   : > { %6996 = vmatmul.bf16.gmra.mxu1 %v6418_v3  ;;  %v6430_v21 = vsel %vm579_vm0, %v11279_v53, %v6429_v35  ;;  %v6360_v31 = vpack.c.b16 %v6344_v61, %v6344_v61  ;;  %v6432_v53 = vshrl.u32 %v11468_v40, 16  ;;  %v6361_v40 = vpack.c.b16 %v6345_v11, %v6345_v11 }
 0x5de   : > { %7080 = vmatmul.bf16.gmra.mxu2 %v6635_v32  ;;  %v9601_v35 = vor.u32 %v9600_v4, %v11470_v13 }
 0x5df   : > { %v6439_v29 = vshll.u32 %v6360_v31, 16  ;;  %v6437_v52 = vor.u32 %v6436_v59, %v6432_v53  ;;  %v6451_v36 = vshll.u32 %v6361_v40, 16  ;;  %v6643_v61 = vrot.slane %v6360_v31, 1 }
 0x5e1   : > { %v6043_v46 = vpop.f32.mrf.mxu2  ;;  %v6441_v24 = vrot.slane %v6439_v29, 1 }
 0x5e2   : > { %v11868_v28 = vadd.f32 %v6043_v46, %v5955_v55  ;;  %v5961_v22 = vpop.f32.mrf.mxu1 }
 0x5e3   : > { %v5962_v48 = vadd.f32 %v5961_v22, %v11708_v18 }
 0x5e9   : > { %v6045_v50 = vpop.f32.mrf.mxu2 }
 0x5ea   : > { %v11872_v10 = vadd.f32 %v6045_v50, %v5957_v42  ;;  %v5964_v44 = vpop.f32.mrf.mxu1  ;;  %v9313_v42 = vld [vmem:[#allocation3 + $0x48] sm:$0xf0] }
 0x5eb   : > { %v5965_v55 = vadd.f32 %v5964_v44, %v11720_v43  ;;  %v9315_v16 = vor.u32 %v9314_v39, %v9313_v42 }
 0x5ed   : > { %7001 = vmatmul.bf16.gmra.mxu1 %v6430_v21 }
 0x5ee   : > { %7085 = vmatmul.bf16.gmra.mxu2 %v6638_v34 }
 0x5f1   : > { %v6048_v27 = vpop.f32.mrf.mxu2 }
 0x5f2   : > { %v11878_v18 = vadd.f32 %v6048_v27, %v5960_v14  ;;  %v5966_v12 = vpop.f32.mrf.mxu1  ;;  %v6639_v14 = vrot.slane %v9315_v16, 1  ;;  %v6642_v27 = vrot.slane %v9601_v35, 1 }
 0x5f3   : > { %v5967_v32 = vadd.f32 %v5966_v12, %v11729_v20  ;;  %v6442_v20 = vsel %vm579_vm0, %v6437_v52, %v6441_v24  ;;  %v6202_v12 = vld [vmem:[#allocation3 + $0x74] sm:$0x1] }
 0x5f4   : > { %v6641_v46 = vsel %vm868_vm1, %v6639_v14, %v6640_v8  ;;  %v6644_v42 = vsel %vm868_vm1, %v6642_v27, %v6643_v61  ;;  %v6346_v59 = vunpack.c.l.b16 %v6202_v12  ;;  %v9317_v8 = vld [vmem:[#allocation3 + $0x60] sm:$0xe]  ;;  %v12442_v14 = vld [vmem:[#allocation46_spill] sm:$0xff]  ;;  %v9603_v27 = vld [vmem:[#allocation3 + $0x6c] sm:$0xe] }
 0x5f6   : > { %v6362_v29 = vpack.c.b16 %v6346_v59, %v6346_v59 }
 0x5f9   : > { %v6050_v43 = vpop.f32.mrf.mxu2 }
 0x5fa   : > { %v11882_v3 = vadd.f32 %v6050_v43, %v5962_v48  ;;  %v5969_v22 = vpop.f32.mrf.mxu1  ;;  %v12441_v43 = vld [vmem:[#allocation13_spill] sm:$0xff] }
 0x5fb   : > { %v5970_v50 = vadd.f32 %v5969_v22, %v11735_v56  ;;  %v6453_v56 = vrot.slane %v6451_v36, 1  ;;  %v6458_v31 = vshll.u32 %v12441_v43, 16  ;;  %v6646_v22 = vrot.slane %v6361_v40, 1 }
 0x5fd   : > { %7006 = vmatmul.bf16.gmra.mxu1 %v6442_v20  ;;  %v6454_v13 = vsel %vm579_vm0, %v11336_v57, %v6453_v56  ;;  %v6460_v6 = vrot.slane %v6458_v31, 1  ;;  %v6456_v57 = vshrl.u32 %v12441_v43, 16  ;;  %v6463_v20 = vshll.u32 %v6362_v29, 16 }
 0x5fe   : > { %7090 = vmatmul.bf16.gmra.mxu2 %v6641_v46  ;;  %v6649_v31 = vrot.slane %v6362_v29, 1  ;;  %v9320_v29 = vld [vmem:[#allocation3 + $0x78] sm:$0xe] }
 0x5ff   : > { %v6461_v4 = vor.u32 %v6460_v6, %v6456_v57 }
 0x601   : > { %v6053_v38 = vpop.f32.mrf.mxu2 }
 0x602   : > { %v11888_v48 = vadd.f32 %v6053_v38, %v5965_v55  ;;  %v5971_v34 = vpop.f32.mrf.mxu1  ;;  %v6203_v38 = vld [vmem:[#allocation3 + $0x80] sm:$0x1] }
 0x603   : > { %v5972_v44 = vadd.f32 %v5971_v34, %v11738_v58  ;;  %v6465_v34 = vrot.slane %v6463_v20, 1  ;;  %v6347_v61 = vunpack.c.l.b16 %v6203_v38  ;;  %v9319_v20 = vld [vmem:[#allocation3 + $0x78] sm:$0xf0] }
 0x605   : > { %v6363_v56 = vpack.c.b16 %v6347_v61, %v6347_v61 }
 0x609   : > { %v6055_v21 = vpop.f32.mrf.mxu2 }
 0x60a   : > { %v11892_v37 = vadd.f32 %v6055_v21, %v5967_v32  ;;  %v5974_v39 = vpop.f32.mrf.mxu1  ;;  %v9316_v32 = vld [vmem:[#allocation3 + $0x60] sm:$0xf0]  ;;  %v6466_v21 = vsel %vm579_vm0, %v6461_v4, %v6465_v34  ;;  %v9321_v4 = vor.u32 %v9320_v29, %v9319_v20 }
 0x60b   : > { %v5975_v55 = vadd.f32 %v5974_v39, %v11747_v1  ;;  %v9318_v46 = vor.u32 %v9317_v8, %v9316_v32 }
 0x60c   : > { %v6651_v61 = vrot.slane %v9321_v4, 1  ;;  %v12448_v4 = vld [vmem:[#allocation7_spill] sm:$0xff] }
 0x60d   : > { %7011 = vmatmul.bf16.gmra.mxu1 %v6454_v13 }
 0x60e   : > { %7095 = vmatmul.bf16.gmra.mxu2 %v6644_v42  ;;  %v12443_v42 = vld [vmem:[#allocation48_spill] sm:$0xff] }
 0x60f   : > { %v9604_v39 = vor.u32 %v9603_v27, %v12443_v42  ;;  %v6205_v42 = vld [vmem:[#allocation3 + $0x98] sm:$0x1] }
 0x611   : > { %v6058_v16 = vpop.f32.mrf.mxu2  ;;  %v6648_v43 = vrot.slane %v9604_v39, 1 }
 0x612   : > { %v11898_v58 = vadd.f32 %v6058_v16, %v5970_v50  ;;  %v5976_v53 = vpop.f32.mrf.mxu1  ;;  %v6645_v50 = vrot.slane %v9318_v46, 1  ;;  %v6475_v16 = vshll.u32 %v6363_v56, 16 }
 0x613   : > { %v5977_v52 = vadd.f32 %v5976_v53, %v12442_v14  ;;  %v6650_v8 = vsel %vm868_vm1, %v6648_v43, %v6649_v31  ;;  %v6204_v14 = vld [vmem:[#allocation3 + $0x8c] sm:$0x1]  ;;  %v9606_v31 = vld [vmem:[#allocation3 + $0x84] sm:$0xe] }
 0x614   : > { %v6647_v11 = vsel %vm868_vm1, %v6645_v50, %v6646_v22  ;;  %v12445_v22 = vld [vmem:[#allocation52_spill] sm:$0xff] }
 0x615   : > { %v6482_v57 = vshll.u32 %v12445_v22, 16 }
 0x619   : > { %v6060_v1 = vpop.f32.mrf.mxu2 }
 0x61a   : > { %v11902_v24 = vadd.f32 %v6060_v1, %v5972_v44  ;;  %v5979_v35 = vpop.f32.mrf.mxu1 }
 0x61b   : > { %v5980_v36 = vadd.f32 %v5979_v35, %v11754_v23  ;;  %v6477_v23 = vrot.slane %v6475_v16, 1  ;;  %v6652_v35 = vrot.slane %v6363_v56, 1  ;;  %v12446_v16 = vld [vmem:[#allocation22_spill] sm:$0xff] }
 0x61d   : > { %7016 = vmatmul.bf16.gmra.mxu1 %v6466_v21  ;;  %v6480_v21 = vshrl.u32 %v12445_v22, 16  ;;  %v12447_v22 = vld [vmem:[#allocation17_spill] sm:$0xff] }
 0x61e   : > { %7100 = vmatmul.bf16.gmra.mxu2 %v6647_v11  ;;  %v6484_v11 = vrot.slane %v6482_v57, 1  ;;  %v9607_v57 = vor.u32 %v9606_v31, %v12447_v22  ;;  %v11953_v22 = vpop.f32.mrf.mxu0 }
 0x621   : > { %v6063_v40 = vpop.f32.mrf.mxu2 }
 0x622   : > { %v11908_v44 = vadd.f32 %v6063_v40, %v5975_v55  ;;  %v5981_v12 = vpop.f32.mrf.mxu1  ;;  %v12444_v55 = vld [vmem:[#allocation42_spill] sm:$0xff]  ;;  %v6485_v40 = vor.u32 %v6484_v11, %v6480_v21 }
 0x623   : > { %v5982_v13 = vadd.f32 %v5981_v12, %v11758_v5  ;;  %v6478_v46 = vsel %vm579_vm0, %v12444_v55, %v6477_v23  ;;  %v6348_v5 = vunpack.c.l.b16 %v6204_v14  ;;  %v6349_v23 = vunpack.c.l.b16 %v6205_v42  ;;  %v11930_v55 = vld [vmem:[%s12221_s5] ss:$0 sm:$0xff] }
 0x625   : > { %v6364_v50 = vpack.c.b16 %v6348_v5, %v6348_v5 }
 0x627   : > { %v6487_v27 = vshll.u32 %v6364_v50, 16 }
 0x629   : > { %v6065_v59 = vpop.f32.mrf.mxu2  ;;  %v6489_v12 = vrot.slane %v6487_v27, 1 }
 0x62a   : > { %v11912_v32 = vadd.f32 %v6065_v59, %v5977_v52  ;;  %v6982_v53 = vpop.f32.mrf.mxu1 }
 0x62b   : > { %v6983_v59 = vadd.f32 %v6982_v53, %v12446_v16  ;;  %v6490_v43 = vsel %vm579_vm0, %v6485_v40, %v6489_v12  ;;  %v6654_v40 = vrot.slane %v9607_v57, 1 }
 0x62d   : > { %7021 = vmatmul.bf16.gmra.mxu1 %v6478_v46  ;;  %v7257_v46 = vld [vmem:[#allocation2 + $0x20] sm:$0x1] }
 0x62e   : > { %7105 = vmatmul.bf16.gmra.mxu2 %v6650_v8  ;;  %v8994_v8 = vld [vmem:[#allocation2 + $0x18] sm:$0xff]   ;;  %v7305_v29 = vunpack.c.l.bf16 %v7257_v46 }
 0x62f   : > { %v8995_v5 = vunpack.c.l.bf16 %v8994_v8  ;;  %v8996_v53 = vunpack.c.h.bf16 %v8994_v8 }
 0x630   : > { %v7403_v12 = vrot.slane %v7305_v29, 1 }
 0x631   : > { %v6068_v6 = vpop.f32.mrf.mxu2  ;;  %v7400_v21 = vrot.slane %v8995_v5, 1  ;;  %v7401_v27 = vrot.slane %v8996_v53, 1  ;;  %v12450_v53 = vld [vmem:[#allocation50_spill] sm:$0xff] }
 0x632   : > { %v11917_v1 = vadd.f32 %v6068_v6, %v5980_v36  ;;  %v6984_v52 = vpop.f32.mrf.mxu1  ;;  %v6653_v36 = vsel %vm868_vm1, %v6651_v61, %v6652_v35  ;;  %v11932_v6 = vpack.c.b16 %v6349_v23, %v6349_v23 }
 0x633   : > { %v6985_v11 = vadd.f32 %v6984_v52, %v12448_v4  ;;  %v7404_v8 = vsel %vm868_vm1, %v7401_v27, %v7403_v12  ;;  %v9323_v12 = vld [vmem:[#allocation3 + $0x90] sm:$0xe] }
 0x634   : > { %v6499_v35 = vshll.u32 %v11932_v6, 16 }
 0x639   : > { %v6070_v38 = vpop.f32.mrf.mxu2 }
 0x63a   : > { %v11920_v34 = vadd.f32 %v6070_v38, %v5982_v13  ;;  %v6987_v39 = vpop.f32.mrf.mxu1 }
 0x63d   : > { %7026 = vmatmul.bf16.gmra.mxu1 %v6490_v43  ;;  %v7402_v43 = vsel %vm868_vm1, %v7400_v21, %v7401_v27 }
 0x63e   : > { %7110 = vmatmul.bf16.gmra.mxu2 %v6653_v36  ;;  %v6655_v36 = vrot.slane %v6364_v50, 1 }
 0x640   : > { %v6656_v31 = vsel %vm868_vm1, %v6654_v40, %v6655_v36 }
 0x641   : > { %v7071_v56 = vpop.f32.mrf.mxu2 }
 0x642   : > { %v7072_v13 = vadd.f32 %v7071_v56, %v6983_v59  ;;  %v6989_v20 = vpop.f32.mrf.mxu1  ;;  %v6501_v59 = vrot.slane %v6499_v35, 1  ;;  %v12451_v35 = vld [vmem:[#allocation18_spill] sm:$0xff] }
 0x643   : > { %v6506_v21 = vshll.u32 %v12451_v35, 16 }
 0x644   : > { %v7151_v14 = vadd.f32 %v7072_v13, %v11765_v0  ;;  %v11940_v0 = vld [vmem:[%s12222_s6] ss:$0 sm:$0xff]  ;;  %v6206_v13 = vld [vmem:[#allocation3 + $0xa4] sm:$0x1] }
 0x645   : > { %v6350_v29 = vunpack.c.l.b16 %v6206_v13 }
 0x646   : > { %v7187_v38 = vmul.f32 %v11930_v55, %v7151_v14  ;;  %v12449_v14 = vld [vmem:[#allocation27_spill] sm:$0xff] }
 0x647   : > { %v6988_v50 = vadd.f32 %v6987_v39, %v12449_v14  ;;  %v9322_v39 = vld [vmem:[#allocation3 + $0x90] sm:$0xf0]  ;;  %v12452_v14 = vld [vmem:[#allocation33_spill] sm:$0xff] }
 0x648   : > { %v7223_v16 = vadd.f32 %v11940_v0, %v7187_v38  ;;  %v7258_v38 = vld [vmem:[#allocation2 + $0x24] sm:$0xff]   ;;  %v9324_v13 = vor.u32 %v9323_v12, %v9322_v39 }
 0x649   : > { %v7073_v61 = vpop.f32.mrf.mxu2 }
 0x64a   : > { %v7074_v42 = vadd.f32 %v7073_v61, %v6985_v11  ;;  %v6992_v56 = vpop.f32.mrf.mxu1  ;;  %v7512_v46 = vadd.f32 %v7402_v43, %v7223_v16  ;;  %v11956_v61 = vpop.f32.mrf.mxu3  ;;  %v7306_v16 = vunpack.c.l.bf16 %v7258_v38  ;;  %v6657_v39 = vrot.slane %v9324_v13, 1 }
 0x64c   : > { %v7152_v52 = vadd.f32 %v7074_v42, %v11772_v17  ;;  %v6502_v17 = vsel %vm579_vm0, %v12450_v53, %v6501_v59  ;;  %v7544_v27 = vmax.f32 %v7512_v46, 0.0  ;;  %v7260_v42 = vld [vmem:[#allocation2 + $0x2c] sm:$0x1]  ;;  %v11959_v59 = vpack.c.b16 %v6350_v29, %v6350_v29 }
 0x64d   : > { %7031 = vmatmul.bf16.gmra.mxu1 %v6502_v17  ;;  %v6658_v46 = vrot.slane %v11932_v6, 1  ;;  %v7405_v53 = vrot.slane %v7306_v16, 1 }
 0x64e   : > { %v7188_v23 = vmul.f32 %v11930_v55, %v7152_v52  ;;  %7115 = vmatmul.bf16.gmra.mxu2 %v6656_v31  ;;  %v7307_v52 = vunpack.c.h.bf16 %v7258_v38  ;;  %v6511_v29 = vshll.u32 %v11959_v59, 16 }
 0x650   : > { %v7224_v5 = vadd.f32 %v11940_v0, %v7188_v23  ;;  %v7308_v23 = vunpack.c.l.bf16 %v7260_v42  ;;  %v6513_v42 = vrot.slane %v6511_v29, 1 }
 0x651   : > { %v7076_v57 = vpop.f32.mrf.mxu2 }
 0x652   : > { %v7513_v4 = vadd.f32 %v7404_v8, %v7224_v5  ;;  %v7077_v11 = vadd.f32 %v7076_v57, %v6988_v50  ;;  %v6994_v31 = vpop.f32.mrf.mxu1  ;;  %v6508_v8 = vrot.slane %v6506_v21, 1  ;;  %v6990_v50 = vadd.f32 %v6989_v20, %v12452_v14  ;;  %v9609_v14 = vld [vmem:[#allocation3 + $0x9c] sm:$0xe] }
 0x653   : > { %v6504_v57 = vshrl.u32 %v12451_v35, 16  ;;  %v7408_v38 = vrot.slane %v7308_v23, 1  ;;  %v6207_v35 = vld [vmem:[#allocation3 + $0xb0] sm:$0x1]  ;;  %v12453_v23 = vld [vmem:[#allocation32_spill] sm:$0xff] }
 0x654   : > { %v7545_v40 = vmax.f32 %v7513_v4, 0.0  ;;  %v7153_v36 = vadd.f32 %v7077_v11, %v11776_v30  ;;  %v7406_v30 = vrot.slane %v7307_v52, 1  ;;  %v11967_v11 = vpop.f32.mrf.mxu0  ;;  %v6993_v13 = vadd.f32 %v6992_v56, %v12453_v23 }
 0x655   : > { %v6509_v21 = vor.u32 %v6508_v8, %v6504_v57 }
 0x656   : > { %v9028_v43 = vpack.c.bf16 %v7545_v40, %v7544_v27  ;;  %v7189_v5 = vmul.f32 %v11930_v55, %v7153_v36  ;;  %v11971_v40 = vpop.f32.mrf.mxu3  ;;  %v7407_v6 = vsel %vm868_vm1, %v7405_v53, %v7406_v30  ;;  %v6659_v36 = vsel %vm868_vm1, %v6657_v39, %v6658_v46 }
 0x657   : > { %v7409_v52 = vsel %vm868_vm1, %v7406_v30, %v7408_v38  ;;  %v7263_v30 = vld [vmem:[#allocation2 + $0x38] sm:$0x1] }
 0x658   : > { %9029 = vst [vmem:[%s9720_s12] sm:$0xff] %v9028_v43   ;;  %v7225_v20 = vadd.f32 %v11940_v0, %v7189_v5  ;;  %v6514_v43 = vsel %vm579_vm0, %v6509_v21, %v6513_v42 }
 0x659   : > { %v7078_v17 = vpop.f32.mrf.mxu2 }
 0x65a   : > { %v7079_v4 = vadd.f32 %v7078_v17, %v6990_v50  ;;  %v6997_v16 = vpop.f32.mrf.mxu1  ;;  %v7514_v8 = vadd.f32 %v7407_v6, %v7225_v20  ;;  %v6351_v50 = vunpack.c.l.b16 %v6207_v35  ;;  %v9331_v17 = vld [vmem:[#allocation2 + $0x30] sm:$0xff]   ;;  %v7311_v35 = vunpack.c.l.bf16 %v7263_v30 }
 0x65b   : > { %v8999_v56 = vunpack.c.l.bf16 %v9331_v17  ;;  %v9000_v21 = vunpack.c.h.bf16 %v9331_v17  ;;  %v12454_v20 = vld [vmem:[#allocation8_spill] sm:$0xff] }
 0x65c   : > { %v7154_v27 = vadd.f32 %v7079_v4, %v11780_v2  ;;  %v7546_v57 = vmax.f32 %v7514_v8, 0.0  ;;  %v11981_v38 = vpack.c.b16 %v6351_v50, %v6351_v50  ;;  %v11983_v39 = vpop.f32.mrf.mxu0  ;;  %v6661_v50 = vrot.slane %v11959_v59, 1  ;;  %v6208_v59 = vld [vmem:[#allocation3 + $0xbc] sm:$0x1] }
 0x65d   : > { %7036 = vmatmul.bf16.gmra.mxu1 %v6514_v43  ;;  %v7410_v23 = vrot.slane %v8999_v56, 1 }
 0x65e   : > { %v7190_v12 = vmul.f32 %v11930_v55, %v7154_v27  ;;  %7120 = vmatmul.bf16.gmra.mxu2 %v6659_v36  ;;  %v9610_v27 = vor.u32 %v9609_v14, %v12454_v20  ;;  %v11986_v42 = vpop.f32.mrf.mxu3  ;;  %v7413_v14 = vrot.slane %v7311_v35, 1 }
 0x660   : > { %v7226_v2 = vadd.f32 %v11940_v0, %v7190_v12  ;;  %v12455_v12 = vld [vmem:[#allocation37_spill] sm:$0xff] }
 0x661   : > { %v7081_v5 = vpop.f32.mrf.mxu2 }
 0x662   : > { %v7515_v46 = vadd.f32 %v7409_v52, %v7226_v2  ;;  %v7082_v53 = vadd.f32 %v7081_v5, %v6993_v13  ;;  %v6999_v36 = vpop.f32.mrf.mxu1  ;;  %v6995_v52 = vadd.f32 %v6994_v31, %v12455_v12  ;;  %v7411_v13 = vrot.slane %v9000_v21, 1  ;;  %v12456_v21 = vld [vmem:[#allocation40_spill] sm:$0xff] }
 0x663   : > { %v6660_v2 = vrot.slane %v9610_v27, 1  ;;  %v6998_v20 = vadd.f32 %v6997_v16, %v12456_v21 }
 0x664   : > { %v7547_v29 = vmax.f32 %v7515_v46, 0.0  ;;  %v7155_v4 = vadd.f32 %v7082_v53, %v11787_v19  ;;  %v6523_v19 = vshll.u32 %v11981_v38, 16  ;;  %v7412_v31 = vsel %vm868_vm1, %v7410_v23, %v7411_v13  ;;  %v11998_v30 = vpop.f32.mrf.mxu0  ;;  %v7264_v23 = vld [vmem:[#allocation2 + $0x3c] sm:$0xff]  }
 0x665   : > { %v7414_v56 = vsel %vm868_vm1, %v7411_v13, %v7413_v14  ;;  %v9326_v13 = vld [vmem:[#allocation3 + $0xa8] sm:$0xe] }
 0x666   : > { %v9033_v6 = vpack.c.bf16 %v7547_v29, %v7546_v57  ;;  %v7191_v43 = vmul.f32 %v11930_v55, %v7155_v4  ;;  %v6525_v17 = vrot.slane %v6523_v19, 1  ;;  %v6662_v57 = vsel %vm868_vm1, %v6660_v2, %v6661_v50  ;;  %v12005_v12 = vpop.f32.mrf.mxu3  ;;  %v9325_v2 = vld [vmem:[#allocation3 + $0xa8] sm:$0xf0] }
 0x667   : > { %v12458_v50 = vld [vmem:[#allocation29_spill] sm:$0xff] }
 0x668   : > { %9338 = vst [vmem:[%s9720_s12 + $0x8] sm:$0xff] %v9033_v6   ;;  %v7227_v46 = vadd.f32 %v11940_v0, %v7191_v43 }
 0x669   : > { %v7083_v8 = vpop.f32.mrf.mxu2 }
 0x66a   : > { %v7084_v5 = vadd.f32 %v7083_v8, %v6995_v52  ;;  %v7002_v4 = vpop.f32.mrf.mxu1  ;;  %v7516_v27 = vadd.f32 %v7412_v31, %v7227_v46  ;;  %v6352_v8 = vunpack.c.l.b16 %v6208_v59  ;;  %v7312_v31 = vunpack.c.l.bf16 %v7264_v23 }
 0x66c   : > { %v7156_v53 = vadd.f32 %v7084_v5, %v11794_v60  ;;  %v12457_v60 = vld [vmem:[#allocation14_spill] sm:$0xff]  ;;  %v6530_v5 = vshll.u32 %v12458_v50, 16  ;;  %v7548_v16 = vmax.f32 %v7516_v27, 0.0  ;;  %v12009_v21 = vpack.c.b16 %v6352_v8, %v6352_v8 }
 0x66d   : > { %v6526_v35 = vsel %vm579_vm0, %v12457_v60, %v6525_v17  ;;  %v7313_v17 = vunpack.c.h.bf16 %v7264_v23  ;;  %v7415_v27 = vrot.slane %v7312_v31, 1 }
 0x66e   : > { %v7192_v29 = vmul.f32 %v11930_v55, %v7156_v53  ;;  %7125 = vmatmul.bf16.gmra.mxu2 %v6662_v57  ;;  %7041 = vmatmul.bf16.gmra.mxu1 %v6526_v35  ;;  %v7266_v53 = vld [vmem:[#allocation2 + $0x44] sm:$0x1]  ;;  %v6532_v35 = vrot.slane %v6530_v5, 1  ;;  %v6535_v8 = vshll.u32 %v12009_v21, 16 }
 0x670   : > { %v7228_v6 = vadd.f32 %v11940_v0, %v7192_v29 }
 0x671   : > { %v7086_v52 = vpop.f32.mrf.mxu2 }
 0x672   : > { %v7517_v43 = vadd.f32 %v7414_v56, %v7228_v6  ;;  %v7087_v19 = vadd.f32 %v7086_v52, %v6998_v20  ;;  %v7004_v29 = vpop.f32.mrf.mxu1  ;;  %v7314_v56 = vunpack.c.l.bf16 %v7266_v53  ;;  %v9327_v20 = vor.u32 %v9326_v13, %v9325_v2  ;;  %v12459_v6 = vld [vmem:[#allocation35_spill] sm:$0xff]  ;;  %v12014_v52 = vpop.f32.mrf.mxu0  ;;  %v6209_v53 = vld [vmem:[#allocation3 + $0xc8] sm:$0x1] }
 0x673   : > { %v7000_v59 = vadd.f32 %v6999_v36, %v12459_v6 }
 0x674   : > { %v7549_v14 = vmax.f32 %v7517_v43, 0.0  ;;  %v7157_v46 = vadd.f32 %v7087_v19, %v11798_v47  ;;  %v7416_v43 = vrot.slane %v7313_v17, 1  ;;  %v6664_v19 = vrot.slane %v11981_v38, 1 }
 0x675   : > { %v7418_v2 = vrot.slane %v7314_v56, 1  ;;  %v6663_v36 = vrot.slane %v9327_v20, 1  ;;  %v7003_v56 = vadd.f32 %v7002_v4, %v11953_v22  ;;  %v7269_v4 = vld [vmem:[#allocation2 + $0x50] sm:$0x1] }
 0x676   : > { %v9038_v57 = vpack.c.bf16 %v7549_v14, %v7548_v16  ;;  %v7193_v60 = vmul.f32 %v11930_v55, %v7157_v46  ;;  %v6528_v16 = vshrl.u32 %v12458_v50, 16  ;;  %v12019_v14 = vpop.f32.mrf.mxu3  ;;  %v7417_v31 = vsel %vm868_vm1, %v7415_v27, %v7416_v43 }
 0x677   : > { %v6665_v17 = vsel %vm868_vm1, %v6663_v36, %v6664_v19  ;;  %v6537_v50 = vrot.slane %v6535_v8, 1  ;;  %v7419_v6 = vsel %vm868_vm1, %v7416_v43, %v7418_v2 }
 0x678   : > { %9339 = vst [vmem:[%s9720_s12 + $0x10] sm:$0xff] %v9038_v57   ;;  %v7229_v13 = vadd.f32 %v11940_v0, %v7193_v60  ;;  %v6533_v46 = vor.u32 %v6532_v35, %v6528_v16  ;;  %v9612_v35 = vld [vmem:[#allocation3 + $0xb4] sm:$0xe]  ;;  %v9332_v16 = vld [vmem:[#allocation2 + $0x48] sm:$0xff]  }
 0x679   : > { %v7088_v47 = vpop.f32.mrf.mxu2 }
 0x67a   : > { %v7089_v23 = vadd.f32 %v7088_v47, %v7000_v59  ;;  %v7007_v57 = vpop.f32.mrf.mxu1  ;;  %v6353_v59 = vunpack.c.l.b16 %v6209_v53  ;;  %v7518_v20 = vadd.f32 %v7417_v31, %v7229_v13  ;;  %v6103_v47 = vadd.f32 %v11956_v61, %v11809_v15  ;;  %v12032_v8 = vpop.f32.mrf.mxu0  ;;  %v12460_v53 = vld [vmem:[#allocation24_spill] sm:$0xff] }
 0x67b   : > { %v9613_v31 = vor.u32 %v9612_v35, %v12460_v53  ;;  %v7317_v61 = vunpack.c.l.bf16 %v7269_v4  ;;  %v7008_v4 = vadd.f32 %v7007_v57, %v11983_v39  ;;  %v12461_v53 = vld [vmem:[#allocation15_spill] sm:$0xff] }
 0x67c   : > { %v7158_v5 = vadd.f32 %v7089_v23, %v11802_v51  ;;  %v6538_v51 = vsel %vm579_vm0, %v6533_v46, %v6537_v50  ;;  %v7550_v43 = vmax.f32 %v7518_v20, 0.0  ;;  %v12034_v36 = vpack.c.b16 %v6353_v59, %v6353_v59 }
 0x67d   : > { %v9004_v46 = vunpack.c.h.bf16 %v9332_v16 }
 0x67e   : > { %v7194_v38 = vmul.f32 %v11930_v55, %v7158_v5  ;;  %7130 = vmatmul.bf16.gmra.mxu2 %v6665_v17  ;;  %7046 = vmatmul.bf16.gmra.mxu1 %v6538_v51  ;;  %v12036_v13 = vpop.f32.mrf.mxu3  ;;  %v9003_v5 = vunpack.c.l.bf16 %v9332_v16  ;;  %v6667_v51 = vrot.slane %v12009_v21, 1 }
 0x67f   : > { %v7421_v20 = vrot.slane %v9004_v46, 1 }
 0x680   : > { %v7230_v60 = vadd.f32 %v11940_v0, %v7194_v38  ;;  %v7005_v38 = vadd.f32 %v7004_v29, %v11967_v11 }
 0x681   : > { %v7091_v27 = vpop.f32.mrf.mxu2 }
 0x682   : > { %v7519_v19 = vadd.f32 %v7419_v6, %v7230_v60  ;;  %v7092_v23 = vadd.f32 %v7091_v27, %v7003_v56  ;;  %v7009_v15 = vpop.f32.mrf.mxu1  ;;  %v6547_v6 = vshll.u32 %v12034_v36, 16  ;;  %v7420_v56 = vrot.slane %v9003_v5, 1  ;;  %v12047_v29 = vpop.f32.mrf.mxu0 }
 0x683   : > { %v6666_v60 = vrot.slane %v9613_v31, 1  ;;  %v6105_v27 = vadd.f32 %v11971_v40, %v11815_v45  ;;  %v6210_v40 = vld [vmem:[#allocation3 + $0xd4] sm:$0x1] }
 0x684   : > { %v7551_v2 = vmax.f32 %v7519_v19, 0.0  ;;  %v7159_v22 = vadd.f32 %v7092_v23, %v6103_v47  ;;  %v7423_v47 = vrot.slane %v7317_v61, 1  ;;  %v6549_v11 = vrot.slane %v6547_v6, 1  ;;  %v7270_v6 = vld [vmem:[#allocation2 + $0x54] sm:$0xff]  }
 0x685   : > { %v7422_v16 = vsel %vm868_vm1, %v7420_v56, %v7421_v20  ;;  %v6108_v61 = vadd.f32 %v11986_v42, %v11820_v41  ;;  %v6354_v56 = vunpack.c.l.b16 %v6210_v40 }
 0x686   : > { %v9043_v17 = vpack.c.bf16 %v7551_v2, %v7550_v43  ;;  %v7195_v50 = vmul.f32 %v11930_v55, %v7159_v22  ;;  %v6668_v43 = vsel %vm868_vm1, %v6666_v60, %v6667_v51  ;;  %v12052_v21 = vpop.f32.mrf.mxu3  ;;  %v7424_v45 = vsel %vm868_vm1, %v7421_v20, %v7423_v47  ;;  %v9329_v20 = vld [vmem:[#allocation3 + $0xc0] sm:$0xe]  ;;  %v12462_v60 = vld [vmem:[#allocation9_spill] sm:$0xff] }
 0x687   : > { %v6550_v31 = vsel %vm579_vm0, %v12461_v53, %v6549_v11  ;;  %v6554_v39 = vshll.u32 %v12462_v60, 16  ;;  %v7318_v47 = vunpack.c.l.bf16 %v7270_v6 }
 0x688   : > { %9340 = vst [vmem:[%s9720_s12 + $0x18] sm:$0xff] %v9043_v17   ;;  %v7231_v19 = vadd.f32 %v11940_v0, %v7195_v50 }
 0x689   : > { %v7093_v59 = vpop.f32.mrf.mxu2  ;;  %v6556_v40 = vrot.slane %v6554_v39, 1 }
 0x68a   : > { %v7094_v35 = vadd.f32 %v7093_v59, %v7005_v38  ;;  %v7012_v22 = vpop.f32.mrf.mxu1  ;;  %v7520_v5 = vadd.f32 %v7422_v16, %v7231_v19  ;;  %v9328_v59 = vld [vmem:[#allocation3 + $0xc0] sm:$0xf0]  ;;  %v7319_v19 = vunpack.c.h.bf16 %v7270_v6  ;;  %v12062_v16 = vpack.c.b16 %v6354_v56, %v6354_v56  ;;  %v12064_v41 = vpop.f32.mrf.mxu0 }
 0x68c   : > { %v7160_v23 = vadd.f32 %v7094_v35, %v6105_v27  ;;  %v7552_v57 = vmax.f32 %v7520_v5, 0.0  ;;  %v7272_v35 = vld [vmem:[#allocation2 + $0x5c] sm:$0x1]  ;;  %v7426_v53 = vrot.slane %v7319_v19, 1 }
 0x68d   : > { %v7320_v42 = vunpack.c.l.bf16 %v7272_v35 }
 0x68e   : > { %v7196_v2 = vmul.f32 %v11930_v55, %v7160_v23  ;;  %7135 = vmatmul.bf16.gmra.mxu2 %v6668_v43  ;;  %7051 = vmatmul.bf16.gmra.mxu1 %v6550_v31  ;;  %v9330_v43 = vor.u32 %v9329_v20, %v9328_v59  ;;  %v12070_v5 = vpop.f32.mrf.mxu3 }
 0x690   : > { %v7232_v46 = vadd.f32 %v11940_v0, %v7196_v2  ;;  %v7010_v2 = vadd.f32 %v7009_v15, %v11998_v30  ;;  %v7428_v30 = vrot.slane %v7320_v42, 1  ;;  %v6669_v15 = vrot.slane %v9330_v43, 1 }
 0x691   : > { %v7096_v17 = vpop.f32.mrf.mxu2  ;;  %v6113_v42 = vadd.f32 %v12019_v14, %v11828_v54 }
 0x692   : > { %v7521_v38 = vadd.f32 %v7424_v45, %v7232_v46  ;;  %v7097_v50 = vadd.f32 %v7096_v17, %v7008_v4  ;;  %v7014_v11 = vpop.f32.mrf.mxu1  ;;  %v6559_v4 = vshll.u32 %v12062_v16, 16  ;;  %v7425_v46 = vrot.slane %v7318_v47, 1  ;;  %v12084_v19 = vpop.f32.mrf.mxu0 }
 0x693   : > { %v6670_v17 = vrot.slane %v12034_v36, 1 }
 0x694   : > { %v7553_v51 = vmax.f32 %v7521_v38, 0.0  ;;  %v7161_v27 = vadd.f32 %v7097_v50, %v6108_v61  ;;  %v6110_v61 = vadd.f32 %v12005_v12, %v11823_v62  ;;  %v6552_v50 = vshrl.u32 %v12462_v60, 16 }
 0x695   : > { %v6561_v20 = vrot.slane %v6559_v4, 1  ;;  %v7427_v39 = vsel %vm868_vm1, %v7425_v46, %v7426_v53  ;;  %v7429_v62 = vsel %vm868_vm1, %v7426_v53, %v7428_v30  ;;  %v7013_v12 = vadd.f32 %v7012_v22, %v12014_v52  ;;  %v7275_v46 = vld [vmem:[#allocation2 + $0x68] sm:$0x1] }
 0x696   : > { %v9048_v23 = vpack.c.bf16 %v7553_v51, %v7552_v57  ;;  %v7197_v45 = vmul.f32 %v11930_v55, %v7161_v27  ;;  %v6557_v59 = vor.u32 %v6556_v40, %v6552_v50  ;;  %v6671_v57 = vsel %vm868_vm1, %v6669_v15, %v6670_v17  ;;  %v9615_v27 = vld [vmem:[#allocation3 + $0xcc] sm:$0xe]  ;;  %v12088_v40 = vpop.f32.mrf.mxu3  ;;  %v12463_v17 = vld [vmem:[#allocation44_spill] sm:$0xff] }
 0x697   : > { %v7323_v30 = vunpack.c.l.bf16 %v7275_v46  ;;  %v7015_v15 = vadd.f32 %v7014_v11, %v12032_v8 }
 0x698   : > { %9341 = vst [vmem:[%s9720_s12 + $0x20] sm:$0xff] %v9048_v23   ;;  %v7233_v6 = vadd.f32 %v11940_v0, %v7197_v45  ;;  %v6562_v47 = vsel %vm579_vm0, %v6557_v59, %v6561_v20  ;;  %v9333_v45 = vld [vmem:[#allocation2 + $0x60] sm:$0xff]   ;;  %v6673_v20 = vrot.slane %v12062_v16, 1 }
 0x699   : > { %v7098_v31 = vpop.f32.mrf.mxu2  ;;  %v9007_v53 = vunpack.c.l.bf16 %v9333_v45 }
 0x69a   : > { %v7099_v38 = vadd.f32 %v7098_v31, %v7010_v2  ;;  %v7017_v36 = vpop.f32.mrf.mxu1  ;;  %v7522_v60 = vadd.f32 %v7427_v39, %v7233_v6  ;;  %v9008_v31 = vunpack.c.h.bf16 %v9333_v45  ;;  %v6115_v39 = vadd.f32 %v12036_v13, %v11831_v49 }
 0x69b   : > { %v7430_v14 = vrot.slane %v9007_v53, 1  ;;  %v7018_v49 = vadd.f32 %v7017_v36, %v12047_v29  ;;  %v7278_v53 = vld [vmem:[#allocation2 + $0x74] sm:$0x1] }
 0x69c   : > { %v7162_v56 = vadd.f32 %v7099_v38, %v6110_v61  ;;  %v7554_v4 = vmax.f32 %v7522_v60, 0.0  ;;  %v9616_v61 = vor.u32 %v9615_v27, %v12463_v17  ;;  %v7431_v6 = vrot.slane %v9008_v31, 1 }
 0x69d   : > { %v7433_v27 = vrot.slane %v7323_v30, 1  ;;  %v7326_v30 = vunpack.c.l.bf16 %v7278_v53 }
 0x69e   : > { %v7198_v51 = vmul.f32 %v11930_v55, %v7162_v56  ;;  %7140 = vmatmul.bf16.gmra.mxu2 %v6671_v57  ;;  %7056 = vmatmul.bf16.gmra.mxu1 %v6562_v47  ;;  %v6672_v59 = vrot.slane %v9616_v61, 1  ;;  %v12100_v8 = vpop.f32.mrf.mxu3  ;;  %v7432_v11 = vsel %vm868_vm1, %v7430_v14, %v7431_v6 }
 0x69f   : > { %v7434_v16 = vsel %vm868_vm1, %v7431_v6, %v7433_v27  ;;  %v6120_v6 = vadd.f32 %v12070_v5, %v11842_v26  ;;  %v6123_v5 = vadd.f32 %v12088_v40, %v11848_v7 }
 0x6a0   : > { %v7234_v35 = vadd.f32 %v11940_v0, %v7198_v51  ;;  %v12097_v51 = vpop.f32.mrf.mxu0  ;;  %v6674_v60 = vsel %vm868_vm1, %v6672_v59, %v6673_v20  ;;  %v7438_v59 = vrot.slane %v7326_v30, 1 }
 0x6a1   : > { %v7101_v23 = vpop.f32.mrf.mxu2 }
 0x6a2   : > { %v7523_v43 = vadd.f32 %v7429_v62, %v7234_v35  ;;  %v7102_v2 = vadd.f32 %v7101_v23, %v7013_v12  ;;  %v7019_v50 = vpop.f32.mrf.mxu1 }
 0x6a4   : > { %v7555_v52 = vmax.f32 %v7523_v43, 0.0  ;;  %v7163_v22 = vadd.f32 %v7102_v2, %v6113_v42  ;;  %v6118_v43 = vadd.f32 %v12052_v21, %v11838_v33 }
 0x6a6   : > { %v9053_v38 = vpack.c.bf16 %v7555_v52, %v7554_v4  ;;  %v7199_v54 = vmul.f32 %v11930_v55, %v7163_v22  ;;  %v7276_v4 = vld [vmem:[#allocation2 + $0x6c] sm:$0xff]   ;;  %v6127_v36 = vpop.f32.mrf.mxu3 }
 0x6a7   : > { %v7324_v17 = vunpack.c.l.bf16 %v7276_v4  ;;  %v7325_v61 = vunpack.c.h.bf16 %v7276_v4 }
 0x6a8   : > { %9342 = vst [vmem:[%s9720_s12 + $0x28] sm:$0xff] %v9053_v38   ;;  %v7235_v62 = vadd.f32 %v11940_v0, %v7199_v54  ;;  %v6938_v31 = vpop.f32.mrf.mxu0 }
 0x6a9   : > { %v7103_v56 = vpop.f32.mrf.mxu2  ;;  %v7435_v21 = vrot.slane %v7324_v17, 1  ;;  %v7436_v54 = vrot.slane %v7325_v61, 1  ;;  %v6125_v61 = vadd.f32 %v12100_v8, %v11852_v25  ;;  %v6128_v25 = vadd.f32 %v6127_v36, %v11858_v63 }
 0x6aa   : > { %v7104_v57 = vadd.f32 %v7103_v56, %v7015_v15  ;;  %v7022_v47 = vpop.f32.mrf.mxu1  ;;  %v7524_v13 = vadd.f32 %v7432_v11, %v7235_v62  ;;  %v7020_v15 = vadd.f32 %v7019_v50, %v12064_v41 }
 0x6ab   : > { %v7439_v50 = vsel %vm868_vm1, %v7436_v54, %v7438_v59 }
 0x6ac   : > { %v7164_v12 = vadd.f32 %v7104_v57, %v6115_v39  ;;  %v7556_v52 = vmax.f32 %v7524_v13, 0.0  ;;  %v7437_v57 = vsel %vm868_vm1, %v7435_v21, %v7436_v54  ;;  %v9334_v13 = vld [vmem:[#allocation2 + $0x78] sm:$0xff]  }
 0x6ad   : > { %v9012_v4 = vunpack.c.h.bf16 %v9334_v13 }
 0x6ae   : > { %v7200_v35 = vmul.f32 %v11930_v55, %v7164_v12  ;;  %7145 = vmatmul.bf16.gmra.mxu2 %v6674_v60  ;;  %v7023_v12 = vadd.f32 %v7022_v47, %v12084_v19 }
 0x6af   : > { %v7441_v7 = vrot.slane %v9012_v4, 1 }
 0x6b0   : > { %v7236_v23 = vadd.f32 %v11940_v0, %v7200_v35  ;;  %v6940_v41 = vpop.f32.mrf.mxu0  ;;  %v6129_v35 = vpop.f32.mrf.mxu3 }
 0x6b1   : > { %v7106_v42 = vpop.f32.mrf.mxu2 }
 0x6b2   : > { %v7525_v2 = vadd.f32 %v7434_v16, %v7236_v23  ;;  %v7107_v45 = vadd.f32 %v7106_v42, %v7018_v49  ;;  %v7024_v29 = vpop.f32.mrf.mxu1 }
 0x6b4   : > { %v7557_v22 = vmax.f32 %v7525_v2, 0.0  ;;  %v7165_v46 = vadd.f32 %v7107_v45, %v6118_v43  ;;  %v7281_v2 = vld [vmem:[#allocation2 + $0x80] sm:$0x1]  ;;  %v9011_v45 = vunpack.c.l.bf16 %v9334_v13 }
 0x6b5   : > { %v7329_v47 = vunpack.c.l.bf16 %v7281_v2 }
 0x6b6   : > { %v9058_v38 = vpack.c.bf16 %v7557_v22, %v7556_v52  ;;  %v7201_v33 = vmul.f32 %v11930_v55, %v7165_v46  ;;  %v7025_v22 = vadd.f32 %v7024_v29, %v12097_v51  ;;  %v7440_v17 = vrot.slane %v9011_v45, 1 }
 0x6b8   : > { %9343 = vst [vmem:[%s9720_s12 + $0x30] sm:$0xff] %v9058_v38   ;;  %v7237_v20 = vadd.f32 %v11940_v0, %v7201_v33  ;;  %v6943_v53 = vpop.f32.mrf.mxu0  ;;  %v6132_v30 = vpop.f32.mrf.mxu3  ;;  %v7442_v54 = vsel %vm868_vm1, %v7440_v17, %v7441_v7 }
 0x6b9   : > { %v7108_v14 = vpop.f32.mrf.mxu2 }
 0x6ba   : > { %v7109_v56 = vadd.f32 %v7108_v14, %v7020_v15  ;;  %v7027_v62 = vpop.f32.mrf.mxu1  ;;  %v7526_v11 = vadd.f32 %v7437_v57, %v7237_v20  ;;  %v7443_v15 = vrot.slane %v7329_v47, 1  ;;  %v7282_v57 = vld [vmem:[#allocation2 + $0x84] sm:$0xff]  }
 0x6bc   : > { %v7166_v39 = vadd.f32 %v7109_v56, %v6120_v6  ;;  %v7558_v23 = vmax.f32 %v7526_v11, 0.0  ;;  %v7444_v14 = vsel %vm868_vm1, %v7441_v7, %v7443_v15  ;;  %v7028_v6 = vadd.f32 %v7027_v62, %v6938_v31 }
 0x6be   : > { %v7202_v27 = vmul.f32 %v11930_v55, %v7166_v39 }
 0x6c0   : > { %v7238_v60 = vadd.f32 %v11940_v0, %v7202_v27  ;;  %v6945_v27 = vpop.f32.mrf.mxu0 }
 0x6c1   : > { %v7111_v26 = vpop.f32.mrf.mxu2 }
 0x6c2   : > { %v7527_v16 = vadd.f32 %v7439_v50, %v7238_v60  ;;  %v7112_v49 = vadd.f32 %v7111_v26, %v7023_v12  ;;  %v7029_v19 = vpop.f32.mrf.mxu1  ;;  %v7284_v60 = vld [vmem:[#allocation2 + $0x8c] sm:$0x1]  ;;  %v6134_v26 = vpop.f32.mrf.mxu3 }
 0x6c3   : > { %v7332_v62 = vunpack.c.l.bf16 %v7284_v60  ;;  %v7030_v13 = vadd.f32 %v7029_v19, %v6940_v41 }
 0x6c4   : > { %v7559_v42 = vmax.f32 %v7527_v16, 0.0  ;;  %v7167_v43 = vadd.f32 %v7112_v49, %v6123_v5  ;;  %v7330_v5 = vunpack.c.l.bf16 %v7282_v57  ;;  %v7331_v16 = vunpack.c.h.bf16 %v7282_v57 }
 0x6c5   : > { %v7448_v45 = vrot.slane %v7332_v62, 1 }
 0x6c6   : > { %v9063_v52 = vpack.c.bf16 %v7559_v42, %v7558_v23  ;;  %v7203_v46 = vmul.f32 %v11930_v55, %v7167_v43  ;;  %v7445_v63 = vrot.slane %v7330_v5, 1  ;;  %v7446_v36 = vrot.slane %v7331_v16, 1 }
 0x6c7   : > { %v6130_v43 = vadd.f32 %v6129_v35, %v11862_v9  ;;  %v6133_v9 = vadd.f32 %v6132_v30, %v11868_v28 }
 0x6c8   : > { %9344 = vst [vmem:[%s9720_s12 + $0x38] sm:$0xff] %v9063_v52   ;;  %v7239_v33 = vadd.f32 %v11940_v0, %v7203_v46  ;;  %v6948_v47 = vpop.f32.mrf.mxu0  ;;  %v7449_v19 = vsel %vm868_vm1, %v7446_v36, %v7448_v45 }
 0x6c9   : > { %v7113_v40 = vpop.f32.mrf.mxu2 }
 0x6ca   : > { %v7114_v38 = vadd.f32 %v7113_v40, %v7025_v22  ;;  %v7032_v29 = vpop.f32.mrf.mxu1  ;;  %v7528_v56 = vadd.f32 %v7442_v54, %v7239_v33  ;;  %v7447_v22 = vsel %vm868_vm1, %v7445_v63, %v7446_v36  ;;  %v6137_v41 = vpop.f32.mrf.mxu3  ;;  %v9335_v33 = vld [vmem:[#allocation2 + $0x90] sm:$0xff]  }
 0x6cb   : > { %v7033_v7 = vadd.f32 %v7032_v29, %v6943_v53 }
 0x6cc   : > { %v7168_v21 = vadd.f32 %v7114_v38, %v6125_v61  ;;  %v7560_v50 = vmax.f32 %v7528_v56, 0.0  ;;  %v9016_v56 = vunpack.c.h.bf16 %v9335_v33 }
 0x6ce   : > { %v7204_v51 = vmul.f32 %v11930_v55, %v7168_v21  ;;  %v7451_v28 = vrot.slane %v9016_v56, 1 }
 0x6d0   : > { %v7240_v59 = vadd.f32 %v11940_v0, %v7204_v51 }
 0x6d1   : > { %v7116_v20 = vpop.f32.mrf.mxu2 }
 0x6d2   : > { %v7529_v8 = vadd.f32 %v7444_v14, %v7240_v59  ;;  %v7117_v39 = vadd.f32 %v7116_v20, %v7028_v6  ;;  %v7034_v31 = vpop.f32.mrf.mxu1  ;;  %v7287_v14 = vld [vmem:[#allocation2 + $0x98] sm:$0x1]  ;;  %v9015_v6 = vunpack.c.l.bf16 %v9335_v33 }
 0x6d3   : > { %v7335_v53 = vunpack.c.l.bf16 %v7287_v14  ;;  %v7035_v29 = vadd.f32 %v7034_v31, %v6945_v27 }
 0x6d4   : > { %v7561_v12 = vmax.f32 %v7529_v8, 0.0  ;;  %v7169_v11 = vadd.f32 %v7117_v39, %v6128_v25  ;;  %v6950_v25 = vpop.f32.mrf.mxu0  ;;  %v6139_v39 = vpop.f32.mrf.mxu3  ;;  %v7450_v57 = vrot.slane %v9015_v6, 1 }
 0x6d6   : > { %v9068_v49 = vpack.c.bf16 %v7561_v12, %v7560_v50  ;;  %v7205_v23 = vmul.f32 %v11930_v55, %v7169_v11  ;;  %v6135_v50 = vadd.f32 %v6134_v26, %v11872_v10  ;;  %v7453_v11 = vrot.slane %v7335_v53, 1 }
 0x6d7   : > { %v7452_v16 = vsel %vm868_vm1, %v7450_v57, %v7451_v28  ;;  %v6138_v10 = vadd.f32 %v6137_v41, %v11878_v18  ;;  %v6140_v41 = vadd.f32 %v6139_v39, %v11882_v3  ;;  %v9336_v39 = vld [vmem:[#allocation2 + $0xa8] sm:$0xff]  }
 0x6d8   : > { %9345 = vst [vmem:[%s9720_s12 + $0x40] sm:$0xff] %v9068_v49   ;;  %v7241_v4 = vadd.f32 %v11940_v0, %v7205_v23  ;;  %v7454_v27 = vsel %vm868_vm1, %v7451_v28, %v7453_v11 }
 0x6d9   : > { %v7118_v42 = vpop.f32.mrf.mxu2 }
 0x6da   : > { %v7119_v2 = vadd.f32 %v7118_v42, %v7030_v13  ;;  %v7037_v17 = vpop.f32.mrf.mxu1  ;;  %v7530_v40 = vadd.f32 %v7447_v22, %v7241_v4  ;;  %v7290_v22 = vld [vmem:[#allocation2 + $0xa4] sm:$0x1] }
 0x6db   : > { %v7038_v62 = vadd.f32 %v7037_v17, %v6948_v47  ;;  %v7338_v47 = vunpack.c.l.bf16 %v7290_v22 }
 0x6dc   : > { %v7170_v52 = vadd.f32 %v7119_v2, %v6130_v43  ;;  %v7562_v21 = vmax.f32 %v7530_v40, 0.0  ;;  %v6953_v63 = vpop.f32.mrf.mxu0  ;;  %v7288_v43 = vld [vmem:[#allocation2 + $0x9c] sm:$0xff]   ;;  %v6142_v2 = vpop.f32.mrf.mxu3 }
 0x6dd   : > { %v7458_v33 = vrot.slane %v7338_v47, 1  ;;  %v6143_v3 = vadd.f32 %v6142_v2, %v11888_v48  ;;  %v12165_v48 = vld [vmem:[%s12221_s5] ss:$0 sm:$0xff] }
 0x6de   : > { %v7206_v46 = vmul.f32 %v11930_v55, %v7170_v52 }
 0x6e0   : > { %v7242_v61 = vadd.f32 %v11940_v0, %v7206_v46  ;;  %v7336_v46 = vunpack.c.l.bf16 %v7288_v43 }
 0x6e1   : > { %v7121_v38 = vpop.f32.mrf.mxu2 }
 0x6e2   : > { %v7531_v35 = vadd.f32 %v7449_v19, %v7242_v61  ;;  %v7122_v15 = vadd.f32 %v7121_v38, %v7033_v7  ;;  %v7039_v20 = vpop.f32.mrf.mxu1  ;;  %v7337_v19 = vunpack.c.h.bf16 %v7288_v43  ;;  %v7455_v61 = vrot.slane %v7336_v46, 1 }
 0x6e3   : > { %v7040_v17 = vadd.f32 %v7039_v20, %v6950_v25 }
 0x6e4   : > { %v7563_v54 = vmax.f32 %v7531_v35, 0.0  ;;  %v7171_v51 = vadd.f32 %v7122_v15, %v6133_v9  ;;  %v7456_v38 = vrot.slane %v7337_v19, 1  ;;  %v6955_v15 = vpop.f32.mrf.mxu0 }
 0x6e6   : > { %v9073_v59 = vpack.c.bf16 %v7563_v54, %v7562_v21  ;;  %v7207_v8 = vmul.f32 %v11930_v55, %v7171_v51  ;;  %v6144_v51 = vpop.f32.mrf.mxu3  ;;  %v7457_v14 = vsel %vm868_vm1, %v7455_v61, %v7456_v38  ;;  %v7459_v56 = vsel %vm868_vm1, %v7456_v38, %v7458_v33  ;;  %v7294_v61 = vld [vmem:[#allocation2 + $0xb4] sm:$0xff]  }
 0x6e8   : > { %9346 = vst [vmem:[%s9720_s12 + $0x48] sm:$0xff] %v9073_v59   ;;  %v7243_v60 = vadd.f32 %v11940_v0, %v7207_v8 }
 0x6e9   : > { %v7123_v30 = vpop.f32.mrf.mxu2 }
 0x6ea   : > { %v7124_v12 = vadd.f32 %v7123_v30, %v7035_v29  ;;  %v7532_v13 = vadd.f32 %v7452_v16, %v7243_v60  ;;  %v9020_v60 = vunpack.c.h.bf16 %v9336_v39 }
 0x6eb   : > { %v7042_v31 = vpop.f32.mrf.mxu1 }
 0x6ec   : > { %v7172_v5 = vadd.f32 %v7124_v12, %v6135_v50  ;;  %v7564_v45 = vmax.f32 %v7532_v13, 0.0  ;;  %v7043_v59 = vadd.f32 %v7042_v31, %v6953_v63  ;;  %v7293_v12 = vld [vmem:[#allocation2 + $0xb0] sm:$0x1]  ;;  %v6958_v11 = vpop.f32.mrf.mxu0 }
 0x6ee   : > { %v7208_v49 = vmul.f32 %v11930_v55, %v7172_v5  ;;  %v6147_v16 = vpop.f32.mrf.mxu3 }
 0x6ef   : > { %v6148_v47 = vadd.f32 %v6147_v16, %v11898_v58  ;;  %v9337_v16 = vld [vmem:[#allocation2 + $0xc0] sm:$0xff]  }
 0x6f0   : > { %v7244_v23 = vadd.f32 %v11940_v0, %v7208_v49  ;;  %v7341_v49 = vunpack.c.l.bf16 %v7293_v12 }
 0x6f1   : > { %v7126_v36 = vpop.f32.mrf.mxu2 }
 0x6f2   : > { %v7533_v26 = vadd.f32 %v7454_v27, %v7244_v23  ;;  %v7127_v42 = vadd.f32 %v7126_v36, %v7038_v62  ;;  %v7461_v62 = vrot.slane %v9020_v60, 1  ;;  %v6145_v23 = vadd.f32 %v6144_v51, %v11892_v37 }
 0x6f3   : > { %v7044_v9 = vpop.f32.mrf.mxu1  ;;  %v7463_v36 = vrot.slane %v7341_v49, 1 }
 0x6f4   : > { %v7565_v4 = vmax.f32 %v7533_v26, 0.0  ;;  %v7173_v52 = vadd.f32 %v7127_v42, %v6138_v10  ;;  %v7045_v27 = vadd.f32 %v7044_v9, %v6955_v15  ;;  %v12172_v10 = vld [vmem:[%s12222_s6] ss:$0 sm:$0xff]  ;;  %v7343_v15 = vunpack.c.h.bf16 %v7294_v61 }
 0x6f6   : > { %v9078_v7 = vpack.c.bf16 %v7565_v4, %v7564_v45  ;;  %v7209_v40 = vmul.f32 %v11930_v55, %v7173_v52  ;;  %v6960_v4 = vpop.f32.mrf.mxu0  ;;  %v7464_v52 = vsel %vm868_vm1, %v7461_v62, %v7463_v36  ;;  %v6149_v19 = vpop.f32.mrf.mxu3 }
 0x6f8   : > { %9347 = vst [vmem:[%s9720_s12 + $0x50] sm:$0xff] %v9078_v7   ;;  %v7245_v21 = vadd.f32 %v11940_v0, %v7209_v40 }
 0x6f9   : > { %v7128_v18 = vpop.f32.mrf.mxu2 }
 0x6fa   : > { %v7129_v35 = vadd.f32 %v7128_v18, %v7040_v17  ;;  %v7534_v20 = vadd.f32 %v7457_v14, %v7245_v21 }
 0x6fb   : > { %v7047_v57 = vpop.f32.mrf.mxu1 }
 0x6fc   : > { %v7174_v54 = vadd.f32 %v7129_v35, %v6140_v41  ;;  %v7566_v28 = vmax.f32 %v7534_v20, 0.0  ;;  %v7048_v22 = vadd.f32 %v7047_v57, %v6958_v11  ;;  %v7296_v41 = vld [vmem:[#allocation2 + $0xbc] sm:$0x1]  ;;  %v7342_v35 = vunpack.c.l.bf16 %v7294_v61 }
 0x6fd   : > { %v6150_v20 = vadd.f32 %v6149_v19, %v11902_v24 }
 0x6fe   : > { %v7210_v6 = vmul.f32 %v11930_v55, %v7174_v54  ;;  %v9019_v55 = vunpack.c.l.bf16 %v9336_v39  ;;  %v7344_v54 = vunpack.c.l.bf16 %v7296_v41 }
 0x700   : > { %v7246_v25 = vadd.f32 %v11940_v0, %v7210_v6  ;;  %v7460_v31 = vrot.slane %v9019_v55, 1  ;;  %v6963_v6 = vpop.f32.mrf.mxu0 }
 0x701   : > { %v7131_v53 = vpop.f32.mrf.mxu2 }
 0x702   : > { %v7535_v29 = vadd.f32 %v7459_v56, %v7246_v25  ;;  %v7132_v8 = vadd.f32 %v7131_v53, %v7043_v59  ;;  %v7462_v43 = vsel %vm868_vm1, %v7460_v31, %v7461_v62  ;;  %v7465_v56 = vrot.slane %v7342_v35, 1  ;;  %v6152_v53 = vpop.f32.mrf.mxu3  ;;  %v7299_v62 = vld [vmem:[#allocation2 + $0xc8] sm:$0x1] }
 0x703   : > { %v7049_v2 = vpop.f32.mrf.mxu1  ;;  %v7466_v59 = vrot.slane %v7343_v15, 1  ;;  %v6153_v24 = vadd.f32 %v6152_v53, %v11908_v44 }
 0x704   : > { %v7567_v30 = vmax.f32 %v7535_v29, 0.0  ;;  %v7175_v50 = vadd.f32 %v7132_v8, %v6143_v3  ;;  %v7050_v51 = vadd.f32 %v7049_v2, %v6960_v4  ;;  %v7468_v3 = vrot.slane %v7344_v54, 1 }
 0x705   : > { %v7467_v39 = vsel %vm868_vm1, %v7465_v56, %v7466_v59 }
 0x706   : > { %v9083_v5 = vpack.c.bf16 %v7567_v30, %v7566_v28  ;;  %v7211_v0 = vmul.f32 %v12165_v48, %v7175_v50  ;;  %v7469_v28 = vsel %vm868_vm1, %v7466_v59, %v7468_v3 }
 0x708   : > { %9348 = vst [vmem:[%s9720_s12 + $0x58] sm:$0xff] %v9083_v5   ;;  %v7247_v26 = vadd.f32 %v12172_v10, %v7211_v0  ;;  %v6965_v49 = vpop.f32.mrf.mxu0 }
 0x709   : > { %v7133_v13 = vpop.f32.mrf.mxu2 }
 0x70a   : > { %v7134_v63 = vadd.f32 %v7133_v13, %v7045_v27  ;;  %v7536_v37 = vadd.f32 %v7462_v43, %v7247_v26  ;;  %v6154_v13 = vpop.f32.mrf.mxu3  ;;  %v7347_v26 = vunpack.c.l.bf16 %v7299_v62 }
 0x70b   : > { %v7052_v21 = vpop.f32.mrf.mxu1  ;;  %v6155_v4 = vadd.f32 %v6154_v13, %v11912_v32 }
 0x70c   : > { %v7176_v42 = vadd.f32 %v7134_v63, %v6145_v23  ;;  %v7568_v38 = vmax.f32 %v7536_v37, 0.0  ;;  %v7053_v30 = vadd.f32 %v7052_v21, %v6963_v6  ;;  %v9023_v23 = vunpack.c.l.bf16 %v9337_v16 }
 0x70d   : > { %v9024_v63 = vunpack.c.h.bf16 %v9337_v16  ;;  %v7473_v37 = vrot.slane %v7347_v26, 1 }
 0x70e   : > { %v7212_v45 = vmul.f32 %v12165_v48, %v7176_v42  ;;  %v7470_v2 = vrot.slane %v9023_v23, 1 }
 0x710   : > { %v7248_v46 = vadd.f32 %v12172_v10, %v7212_v45  ;;  %v7471_v45 = vrot.slane %v9024_v63, 1 }
 0x711   : > { %v7136_v7 = vpop.f32.mrf.mxu2 }
 0x712   : > { %v7537_v17 = vadd.f32 %v7464_v52, %v7248_v46  ;;  %v7137_v40 = vadd.f32 %v7136_v7, %v7048_v22  ;;  %v6968_v7 = vpop.f32.mrf.mxu0  ;;  %v7474_v61 = vsel %vm868_vm1, %v7471_v45, %v7473_v37 }
 0x713   : > { %v7054_v11 = vpop.f32.mrf.mxu1 }
 0x714   : > { %v7569_v9 = vmax.f32 %v7537_v17, 0.0  ;;  %v7177_v18 = vadd.f32 %v7137_v40, %v6148_v47  ;;  %v7055_v42 = vadd.f32 %v7054_v11, %v6965_v49  ;;  %v7472_v47 = vsel %vm868_vm1, %v7470_v2, %v7471_v45  ;;  %v6157_v40 = vpop.f32.mrf.mxu3 }
 0x715   : > { %v6158_v32 = vadd.f32 %v6157_v40, %v11917_v1 }
 0x716   : > { %v9088_v33 = vpack.c.bf16 %v7569_v9, %v7568_v38  ;;  %v7213_v14 = vmul.f32 %v12165_v48, %v7177_v18 }
 0x718   : > { %9349 = vst [vmem:[%s9720_s12 + $0x60] sm:$0xff] %v9088_v33   ;;  %v7249_v29 = vadd.f32 %v12172_v10, %v7213_v14  ;;  %v7300_v33 = vld [vmem:[#allocation2 + $0xcc] sm:$0xff]   ;;  %v7302_v14 = vld [vmem:[#allocation2 + $0xd4] sm:$0x1] }
 0x719   : > { %v7138_v58 = vpop.f32.mrf.mxu2  ;;  %v7348_v56 = vunpack.c.l.bf16 %v7300_v33  ;;  %v7349_v59 = vunpack.c.h.bf16 %v7300_v33 }
 0x71a   : > { %v7139_v25 = vadd.f32 %v7138_v58, %v7050_v51  ;;  %v7538_v50 = vadd.f32 %v7467_v39, %v7249_v29 }
 0x71b   : > { %v7057_v22 = vpop.f32.mrf.mxu1  ;;  %v7476_v1 = vrot.slane %v7349_v59, 1 }
 0x71c   : > { %v7178_v8 = vadd.f32 %v7139_v25, %v6150_v20  ;;  %v7570_v27 = vmax.f32 %v7538_v50, 0.0  ;;  %v7058_v38 = vadd.f32 %v7057_v22, %v6968_v7  ;;  %v6970_v20 = vpop.f32.mrf.mxu0  ;;  %v7350_v25 = vunpack.c.l.bf16 %v7302_v14  ;;  %v6159_v29 = vpop.f32.mrf.mxu3 }
 0x71e   : > { %v7214_v57 = vmul.f32 %v12165_v48, %v7178_v8  ;;  %v7475_v8 = vrot.slane %v7348_v56, 1 }
 0x720   : > { %v7250_v12 = vadd.f32 %v12172_v10, %v7214_v57  ;;  %v6160_v57 = vadd.f32 %v6159_v29, %v11920_v34  ;;  %v7477_v11 = vsel %vm868_vm1, %v7475_v8, %v7476_v1 }
 0x721   : > { %v7141_v55 = vpop.f32.mrf.mxu2 }
 0x722   : > { %v7539_v60 = vadd.f32 %v7469_v28, %v7250_v12  ;;  %v7142_v5 = vadd.f32 %v7141_v55, %v7053_v30  ;;  %v7478_v30 = vrot.slane %v7350_v25, 1 }
 0x723   : > { %v7059_v6 = vpop.f32.mrf.mxu1 }
 0x724   : > { %v7571_v0 = vmax.f32 %v7539_v60, 0.0  ;;  %v7179_v31 = vadd.f32 %v7142_v5, %v6153_v24  ;;  %v7060_v53 = vadd.f32 %v7059_v6, %v6970_v20  ;;  %v7479_v24 = vsel %vm868_vm1, %v7476_v1, %v7478_v30 }
 0x726   : > { %v9093_v36 = vpack.c.bf16 %v7571_v0, %v7570_v27  ;;  %v7215_v43 = vmul.f32 %v12165_v48, %v7179_v31 }
 0x728   : > { %9350 = vst [vmem:[%s9720_s12 + $0x68] sm:$0xff] %v9093_v36   ;;  %v7251_v46 = vadd.f32 %v12172_v10, %v7215_v43 }
 0x729   : > { %v7143_v44 = vpop.f32.mrf.mxu2 }
 0x72a   : > { %v7144_v52 = vadd.f32 %v7143_v44, %v7055_v42  ;;  %v7540_v9 = vadd.f32 %v7472_v47, %v7251_v46 }
 0x72c   : > { %v7180_v19 = vadd.f32 %v7144_v52, %v6155_v4  ;;  %v7572_v21 = vmax.f32 %v7540_v9, 0.0 }
 0x72e   : > { %v7216_v17 = vmul.f32 %v12165_v48, %v7180_v19 }
 0x730   : > { %v7252_v18 = vadd.f32 %v12172_v10, %v7216_v17 }
 0x731   : > { %v7146_v41 = vpop.f32.mrf.mxu2 }
 0x732   : > { %v7541_v35 = vadd.f32 %v7474_v61, %v7252_v18  ;;  %v7147_v15 = vadd.f32 %v7146_v41, %v7058_v38 }
 0x734   : > { %v7573_v54 = vmax.f32 %v7541_v35, 0.0  ;;  %v7181_v51 = vadd.f32 %v7147_v15, %v6158_v32 }
 0x736   : > { %v9098_v58 = vpack.c.bf16 %v7573_v54, %v7572_v21  ;;  %v7217_v3 = vmul.f32 %v12165_v48, %v7181_v51 }
 0x738   : > { %9351 = vst [vmem:[%s9720_s12 + $0x70] sm:$0xff] %v9098_v58   ;;  %v7253_v50 = vadd.f32 %v12172_v10, %v7217_v3 }
 0x739   : > { %v7148_v39 = vpop.f32.mrf.mxu2 }
 0x73a   : > { %v7149_v28 = vadd.f32 %v7148_v39, %v7060_v53  ;;  %v7542_v60 = vadd.f32 %v7477_v11, %v7253_v50 }
 0x73c   : > { %v7182_v12 = vadd.f32 %v7149_v28, %v6160_v57  ;;  %v7574_v49 = vmax.f32 %v7542_v60, 0.0 }
 0x73e   : > { %v7218_v55 = vmul.f32 %v12165_v48, %v7182_v12 }
 0x740   : > { %v7254_v5 = vadd.f32 %v12172_v10, %v7218_v55 }
 0x742   : > { %v7543_v16 = vadd.f32 %v7479_v24, %v7254_v5 }
 0x744   : > { %v7575_v27 = vmax.f32 %v7543_v16, 0.0 }
 0x746   : > { %v9103_v0 = vpack.c.bf16 %v7575_v27, %v7574_v49 }
 0x748   : > { %9352 = vst [vmem:[%s9720_s12 + $0x78] sm:$0xff] %v9103_v0  }
 0x749 PF: > { %s17_s26 = sadd.s32 1, %s9647_s26   ;;  %s12464_s24 = smov %s9643_s25 }
 0x74a   : > { %p14_p5 = scmp.ge.s32.totalorder %s17_s26, 4   ;;  %s12465_s25 = smov %s12467_s27 }
 0x74c   :  { %16 = sbr.rel (!%p14_p5) target bundleno = 2 (0x2), region = 103 }
 0x751   :  { %7672 = vsyncmov [#allocation4] }
 0x754   :  { %s7673_s13 = vpop.sfrf %7672 }
 0x755   :  { %p8507_p6 = scmp.ne.s32.totalorder %s7673_s13, 0 }
 0x757   :  { %7677 = shalt.err (%p8507_p6)  }

</bundles_post_ra>
